<compile_context>
chip_gen: v6e
topology: v6e:2x2x1
jax: 0.10.0
libtpu: 0.0.40
codegen_flags: <defaults>
</compile_context>

<pallas_src>
import jax
import jax.numpy as jnp
from jax.experimental import pallas as pl
from jax.experimental.pallas import tpu as pltpu

ND = 10        # input features (Npar)
HIDDEN = 200   # fc1 output width (multiple of 8 -> legal sublane extent, no pad)
OUT = 1        # fc2 output width


def _round_up(x, m):
    return (x + m - 1) // m * m


def _choose_tile(n, max_tile=2048):
    """Pick (tile_b, n_pad): tile_b a multiple of 128 and <= max_tile, n_pad a
    multiple of tile_b, minimizing padded rows (ties -> largest tile).  For
    N=5000 this gives 4 steps of 1280 (zero waste beyond the 128 pad, even step
    count for the two v7x TensorCores); for N=1000 a single 1024-row step."""
    n128 = _round_up(max(n, 1), 128)
    units = n128 // 128
    max_units = max(1, min(max_tile // 128, units))
    best = None  # ((pad_rows, -tile_units), tile_units, steps)
    for t in range(max_units, 0, -1):
        steps = -(-units // t)
        pad = steps * t * 128 - n
        cand = (pad, -t)
        if best is None or cand < best[0]:
            best = (cand, t, steps)
    tile_units, steps = best[1], best[2]
    return tile_units * 128, tile_units * 128 * steps


def uq_net_std_kernel(xT_ref, w1t_ref, b1_ref, w2_ref, b2_ref, o_ref):
    # xT_ref:  (ND, TB)       x tile, pre-transposed (K on sublanes)
    # w1t_ref: (HIDDEN, ND)   fc1 weight, transposed
    # b1_ref:  (HIDDEN, 1)    fc1 bias (column)
    # w2_ref:  (HIDDEN, 1)    fc2 weight (column)
    # b2_ref:  (1, 1)         fc2 bias (= 25.0)
    # o_ref:   (1, TB)        lane-dense output slab
    #
    # fc1 computed transposed: h^T = W1^T . x^T  -- a plain NN matmul on the MXU.
    pre = jnp.dot(
        w1t_ref[...], xT_ref[...],
        preferred_element_type=jnp.float32,
        precision=jax.lax.Precision.HIGHEST,
    ) + b1_ref[...]                                   # (HIDDEN, TB), lane-bcast bias
    hT = jnp.tanh(pre)                                # EUP; binding unit

    # fc2 off the MXU: VPU multiply + cross-sublane reduce -> already lane-dense.
    y = jnp.sum(hT * w2_ref[...], axis=0, keepdims=True) + b2_ref[...]   # (1, TB)
    o_ref[...] = jnp.sqrt(jnp.square(y) + jnp.float32(0.1))


def prepare_params(w1, b1, w2, b2):
    """One-time parameter layout prep (hoisted out of the forward path).
    w1: (ND, HIDDEN), b1: (1, HIDDEN), w2: (HIDDEN, 1), b2: (1, 1)."""
    w1t = jnp.asarray(w1, jnp.float32).T.reshape(HIDDEN, ND)
    b1c = jnp.asarray(b1, jnp.float32).reshape(HIDDEN, 1)
    w2c = jnp.asarray(w2, jnp.float32).reshape(HIDDEN, 1)
    b2c = jnp.asarray(b2, jnp.float32).reshape(1, 1)
    return w1t, b1c, w2c, b2c


def uq_net_std_forward(x, params, *, max_tile=2048):
    """x: (N, ND) float32, params from prepare_params().  Returns (N, OUT)."""
    w1t, b1c, w2c, b2c = params
    n = x.shape[0]
    assert x.shape[1] == ND

    tile_b, n_pad = _choose_tile(n, max_tile)
    xp = jnp.pad(x, ((0, n_pad - n), (0, 0))) if n_pad != n else x
    xT = xp.T                                           # (ND, n_pad); wrapper plumbing

    grid = (n_pad // tile_b,)
    out = pl.pallas_call(
        uq_net_std_kernel,
        out_shape=jax.ShapeDtypeStruct((1, n_pad), jnp.float32),
        grid_spec=pltpu.PrefetchScalarGridSpec(
            num_scalar_prefetch=0,
            grid=grid,
            in_specs=[
                pl.BlockSpec((ND, tile_b), lambda i: (0, i)),      # x^T tile
                pl.BlockSpec((HIDDEN, ND), lambda i: (0, 0)),      # W1^T (resident)
                pl.BlockSpec((HIDDEN, 1), lambda i: (0, 0)),       # b1
                pl.BlockSpec((HIDDEN, 1), lambda i: (0, 0)),       # w2
                pl.BlockSpec((1, 1), lambda i: (0, 0)),            # b2
            ],
            out_specs=pl.BlockSpec((1, tile_b), lambda i: (0, i)),  # lane-dense
        ),
        compiler_params=pltpu.CompilerParams(
            dimension_semantics=("parallel",),       # shard steps across v7x TCs
            vmem_limit_bytes=32 * 1024 * 1024,       # safe on v5e default / v7x 64MiB
        ),
    )(xT, w1t, b1c, w2c, b2c)

    # Layout plumbing only: (1, N_pad) -> (N, 1).
    return out.reshape(n_pad, 1)[:n]


def init_params(key):
    """nn.Linear-style init (U(-1/sqrt(fan_in), 1/sqrt(fan_in))), with fc2.bias
    overridden to 25.0 as in UQ_Net_std.__init__.  Weights stored as (in, out)."""
    k1, k2, k3, _ = jax.random.split(key, 4)
    bound1 = 1.0 / jnp.sqrt(jnp.float32(ND))
    bound2 = 1.0 / jnp.sqrt(jnp.float32(HIDDEN))
    w1 = jax.random.uniform(k1, (ND, HIDDEN), jnp.float32, -bound1, bound1)
    b1 = jax.random.uniform(k2, (1, HIDDEN), jnp.float32, -bound1, bound1)
    w2 = jax.random.uniform(k3, (HIDDEN, OUT), jnp.float32, -bound2, bound2)
    b2 = jnp.full((1, OUT), 25.0, dtype=jnp.float32)
    return w1, b1, w2, b2


def reference_forward(x, w1, b1, w2, b2):
    h = jnp.tanh(jnp.dot(x, w1, precision=jax.lax.Precision.HIGHEST) + b1)
    y = jnp.dot(h, w2, precision=jax.lax.Precision.HIGHEST) + b2
    return jnp.sqrt(jnp.square(y) + 0.1)


if __name__ == "__main__":
    key = jax.random.PRNGKey(0)
    kp, kx1, kx2 = jax.random.split(key, 3)
    w1, b1, w2, b2 = init_params(kp)
    params = prepare_params(w1, b1, w2, b2)   # hoisted: done once, reused below

    # Case 1: Nvalid-sized batch (1000) -> single 1024-row tile (ragged pad 1000->1024).
    x1 = jax.random.normal(kx1, (1000, ND), dtype=jnp.float32)
    out1 = jax.block_until_ready(uq_net_std_forward(x1, params))
    ref1 = reference_forward(x1, w1, b1, w2, b2)
    assert out1.shape == (1000, OUT)
    assert jnp.allclose(out1, ref1, atol=1e-3, rtol=1e-3), "mismatch vs reference (batch=1000)"

    # Case 2: Ntrain-sized batch (5000) -> 4 steps of 1280 rows (even grid, ~2% pad).
    x2 = jax.random.normal(kx2, (5000, ND), dtype=jnp.float32)
    out2 = jax.block_until_ready(uq_net_std_forward(x2, params))
    ref2 = reference_forward(x2, w1, b1, w2, b2)
    assert out2.shape == (5000, OUT)
    assert jnp.allclose(out2, ref2, atol=1e-3, rtol=1e-3), "mismatch vs reference (batch=5000)"

    print("KERNEL_OK")
</pallas_src>

<mosaic_0001>
module attributes {stable_mosaic.version = 11 : i64} {
  func.func @uq_net_std_kernel(%arg0: i32, %arg1: memref<10x1024xf32, #tpu.memory_space<vmem>>, %arg2: memref<200x10xf32, #tpu.memory_space<vmem>>, %arg3: memref<200x1xf32, #tpu.memory_space<vmem>>, %arg4: memref<200x1xf32, #tpu.memory_space<vmem>>, %arg5: memref<1x1xf32, #tpu.memory_space<vmem>>, %arg6: memref<1x1024xf32, #tpu.memory_space<vmem>>) attributes {dimension_semantics = [#tpu.dimension_semantics<parallel>], iteration_bounds = array<i64: 1>, scalar_prefetch = 0 : i64, scratch_operands = 0 : i64, tpu.core_type = #tpu.core_type<tc>, window_params = [{transform_indices = @transform_0, window_bounds = array<i64: 10, 1024>}, {pipeline_mode = #tpu.pipeline_mode<synchronous>, transform_indices = @transform_1, window_bounds = array<i64: 200, 10>}, {pipeline_mode = #tpu.pipeline_mode<synchronous>, transform_indices = @transform_2, window_bounds = array<i64: 200, 1>}, {pipeline_mode = #tpu.pipeline_mode<synchronous>, transform_indices = @transform_3, window_bounds = array<i64: 200, 1>}, {pipeline_mode = #tpu.pipeline_mode<synchronous>, transform_indices = @transform_4, window_bounds = array<i64: 1, 1>}, {transform_indices = @transform_5, window_bounds = array<i64: 1, 1024>}]} {
    %c0 = arith.constant 0 : index
    %c0_0 = arith.constant 0 : index
    %0 = vector.load %arg2[%c0, %c0_0] : memref<200x10xf32, #tpu.memory_space<vmem>>, vector<200x10xf32>
    %c0_1 = arith.constant 0 : index
    %c0_2 = arith.constant 0 : index
    %1 = vector.load %arg1[%c0_1, %c0_2] : memref<10x1024xf32, #tpu.memory_space<vmem>>, vector<10x1024xf32>
    %cst = arith.constant dense<0.000000e+00> : vector<200x1024xf32>
    %2 = tpu.matmul %0, %1, %cst {dimension_numbers = #tpu.dot_dimension_numbers<[1], [0], [0], [1], [0, 0, 1, 1], [], []>, precision = #tpu.contract_precision<fp32>} : vector<200x10xf32>, vector<10x1024xf32>, vector<200x1024xf32> -> vector<200x1024xf32>
    %c0_3 = arith.constant 0 : index
    %c0_4 = arith.constant 0 : index
    %3 = vector.load %arg3[%c0_3, %c0_4] : memref<200x1xf32, #tpu.memory_space<vmem>>, vector<200x1xf32>
    %4 = vector.broadcast %3 : vector<200x1xf32> to vector<200x1024xf32>
    %5 = arith.addf %2, %4 : vector<200x1024xf32>
    %6 = math.tanh %5 : vector<200x1024xf32>
    %c0_5 = arith.constant 0 : index
    %c0_6 = arith.constant 0 : index
    %7 = vector.load %arg4[%c0_5, %c0_6] : memref<200x1xf32, #tpu.memory_space<vmem>>, vector<200x1xf32>
    %8 = vector.broadcast %7 : vector<200x1xf32> to vector<200x1024xf32>
    %9 = arith.mulf %6, %8 : vector<200x1024xf32>
    %cst_7 = arith.constant dense<0.000000e+00> : vector<1024xf32>
    %10 = vector.multi_reduction <add>, %9, %cst_7 [0] : vector<200x1024xf32> to vector<1024xf32>
    %11 = vector.shape_cast %10 : vector<1024xf32> to vector<1x1024xf32>
    %c0_8 = arith.constant 0 : index
    %c0_9 = arith.constant 0 : index
    %12 = vector.load %arg5[%c0_8, %c0_9] : memref<1x1xf32, #tpu.memory_space<vmem>>, vector<1x1xf32>
    %13 = vector.broadcast %12 : vector<1x1xf32> to vector<1x1024xf32>
    %14 = arith.addf %11, %13 : vector<1x1024xf32>
    %15 = arith.mulf %14, %14 : vector<1x1024xf32>
    %cst_10 = arith.constant 1.000000e-01 : f32
    %16 = vector.broadcast %cst_10 : f32 to vector<1x1024xf32>
    %17 = arith.addf %15, %16 : vector<1x1024xf32>
    %18 = math.sqrt %17 : vector<1x1024xf32>
    %c0_11 = arith.constant 0 : index
    %c0_12 = arith.constant 0 : index
    %19 = vector.load %arg6[%c0_11, %c0_12] : memref<1x1024xf32, #tpu.memory_space<vmem>>, vector<1x1024xf32>
    tpu.vector_store %arg6[%c0_11, %c0_12], %18 {strides = array<i32>} : memref<1x1024xf32, #tpu.memory_space<vmem>>, vector<1x1024xf32>,
    return
  }
  func.func @transform_0(%arg0: i32) -> (i32, i32) {
    %c0_i32 = arith.constant 0 : i32
    %c0_i32_0 = arith.constant 0 : i32
    return %c0_i32, %arg0 : i32, i32
  }
  func.func @transform_1(%arg0: i32) -> (i32, i32) {
    %c0_i32 = arith.constant 0 : i32
    %c0_i32_0 = arith.constant 0 : i32
    %c0_i32_1 = arith.constant 0 : i32
    return %c0_i32, %c0_i32_0 : i32, i32
  }
  func.func @transform_2(%arg0: i32) -> (i32, i32) {
    %c0_i32 = arith.constant 0 : i32
    %c0_i32_0 = arith.constant 0 : i32
    %c0_i32_1 = arith.constant 0 : i32
    return %c0_i32, %c0_i32_0 : i32, i32
  }
  func.func @transform_3(%arg0: i32) -> (i32, i32) {
    %c0_i32 = arith.constant 0 : i32
    %c0_i32_0 = arith.constant 0 : i32
    %c0_i32_1 = arith.constant 0 : i32
    return %c0_i32, %c0_i32_0 : i32, i32
  }
  func.func @transform_4(%arg0: i32) -> (i32, i32) {
    %c0_i32 = arith.constant 0 : i32
    %c0_i32_0 = arith.constant 0 : i32
    %c0_i32_1 = arith.constant 0 : i32
    return %c0_i32, %c0_i32_0 : i32, i32
  }
  func.func @transform_5(%arg0: i32) -> (i32, i32) {
    %c0_i32 = arith.constant 0 : i32
    %c0_i32_0 = arith.constant 0 : i32
    return %c0_i32, %arg0 : i32, i32
  }
}

</mosaic_0001>

<bundles_post_ra>
// kernel: tpu_custom_call.1
= control target key start
LH: loop header
LB: loop body
LE: loop exit
PB: predicated region body
PF: predicated region fallthrough
CT: control target
= control target key end

     0   :  { %s12263_s0 = inlined_call_operand.vmem [shape: f32[10,1024], index: 0, kind: input, shape index: {}]   ;;  %s12264_s1 = inlined_call_operand.vmem [shape: f32[200,10], index: 1, kind: input, shape index: {}]   ;;  %s12265_s2 = inlined_call_operand.vmem [shape: f32[200,1], index: 2, kind: input, shape index: {}]   ;;  %s12266_s3 = inlined_call_operand.vmem [shape: f32[200,1], index: 3, kind: input, shape index: {}]   ;;  %s12267_s4 = inlined_call_operand.<no memory space> [shape: f32[1,1], index: 4, kind: input, shape index: {}]   ;;  %s12268_s5 = inlined_call_operand.hbm [shape: f32[1,1024], index: 5, kind: output, shape index: {}]  }
   0x1   :  { %v10_v0 = vstv %s12267_s4 }
   0x2   :  { %11 = vst [vmem:[#allocation2] sm:$0x1] %v10_v0 }
   0x3   :  { %v57_v1 = vld [vmem:[%s12263_s0 + $0x48] sm:$0x3]  ;;  %vm290_vm0 = vcmask 1041408   ;;  %v56_v2 = vld [vmem:[%s12263_s0 + $0x40] sm:$0x3]  ;;  %v12278_v12 = vmov 0.0  }
   0x4   :  { %v49_v3 = vld [vmem:[%s12263_s0 + $0x8] sm:$0xff]  ;;  %v295_v4 = vsel %vm290_vm0, %v57_v1, 0  ;;  %v292_v5 = vsel %vm290_vm0, %v56_v2, 0  ;;  %v48_v7 = vld [vmem:[%s12263_s0] sm:$0xff]  ;;  %383 = vmatprep.mubr.f32.mxu0 %v12278_v12  ;;  %vm214_vm1 = vcmask 80896   ;;  %743 = vmatprep.mubr.f32.mxu1 %v12278_v12  ;;  %v25_v14 = vld [vmem:[%s12264_s1 + $0x10] sm:$0xff] }
   0x5   :  { %v8428_v6 = vand.u32 4294901760, %v49_v3  ;;  %v23_v8 = vld [vmem:[%s12264_s1] sm:$0xff]  ;;  %v8436_v9 = vand.u32 4294901760, %v295_v4  ;;  %v8438_v10 = vand.u32 4294901760, %v292_v5  ;;  %v8440_v11 = vand.u32 4294901760, %v48_v7  ;;  %v24_v13 = vld [vmem:[%s12264_s1 + $0x8] sm:$0xff] }
   0x6   :  { %v216_v15 = vsel %vm214_vm1, %v23_v8, 0  ;;  %v219_v17 = vsel %vm214_vm1, %v24_v13, 0  ;;  %v222_v18 = vsel %vm214_vm1, %v25_v14, 0  ;;  %v26_v19 = vld [vmem:[%s12264_s1 + $0x18] sm:$0xff]  ;;  %v27_v40 = vld [vmem:[%s12264_s1 + $0x20] sm:$0xff]  ;;  %v28_v44 = vld [vmem:[%s12264_s1 + $0x28] sm:$0xff] }
   0x7   :  { %v8452_v16 = vsub.f32 %v49_v3, %v8428_v6  ;;  %344 = vmatprep.subr.mxu0 %v8436_v9  ;;  %v8460_v20 = vand.u32 4294901760, %v216_v15  ;;  %v8463_v21 = vsub.f32 %v295_v4, %v8436_v9  ;;  %v8466_v22 = vsub.f32 %v292_v5, %v8438_v10  ;;  %v29_v55 = vld [vmem:[%s12264_s1 + $0x30] sm:$0xff]  ;;  %v30_v62 = vld [vmem:[%s12264_s1 + $0x38] sm:$0xff] }
   0x8   :  { %v8469_v23 = vsub.f32 %v48_v7, %v8440_v11  ;;  %346 = vmatpush1.msra.mxu0 %v8438_v10  ;;  %v8473_v25 = vand.u32 4294901760, %v219_v17  ;;  %v8475_v26 = vand.u32 4294901760, %v222_v18  ;;  %v225_v27 = vsel %vm214_vm1, %v26_v19, 0 }
   0x9   :  { %12757 = vst [vmem:[#allocation6_spill] sm:$0xff] %v8460_v20  ;;  %v12270_v24 = vand.u32 4294901760, %v8452_v16  ;;  %348 = vmatprep.subr.mxu0 %v8428_v6  ;;  %v8480_v28 = vsub.f32 %v216_v15, %v8460_v20  ;;  %v689_v29 = vand.u32 4294901760, %v8463_v21  ;;  %v12271_v30 = vand.u32 4294901760, %v8466_v22 }
   0xa   :  { %12758 = vst [vmem:[#allocation7_spill] sm:$0xff] %v8473_v25  ;;  %12759 = vst [vmem:[#allocation8_spill] sm:$0xff] %v8475_v26  ;;  %v12269_v31 = vand.u32 4294901760, %v8469_v23  ;;  %350 = vmatpush1.msra.mxu0 %v8440_v11  ;;  %v8490_v33 = vsub.f32 %v219_v17, %v8473_v25  ;;  %v8493_v34 = vsub.f32 %v222_v18, %v8475_v26  ;;  %v8495_v35 = vand.u32 4294901760, %v225_v27 }
   0xb   :  { %12760 = vst [vmem:[#allocation9_spill] sm:$0xff] %v8480_v28  ;;  %v702_v32 = vsub.f32 %v8452_v16, %v12270_v24  ;;  %v8498_v36 = vand.u32 4294901760, %v8480_v28  ;;  %v690_v37 = vsub.f32 %v8463_v21, %v689_v29  ;;  %v696_v38 = vsub.f32 %v8466_v22, %v12271_v30  ;;  %949 = vmatprep.subr.mxu0 %v8463_v21 }
   0xc   :  { %12761 = vst [vmem:[#allocation10_spill] sm:$0xff] %v8490_v33  ;;  %12762 = vst [vmem:[#allocation11_spill] sm:$0xff] %v8493_v34  ;;  %v708_v39 = vsub.f32 %v8469_v23, %v12269_v31  ;;  %v8514_v42 = vand.u32 4294901760, %v8490_v33  ;;  %v8517_v43 = vsub.f32 %v225_v27, %v8495_v35  ;;  %v8525_v48 = vand.u32 4294901760, %v8493_v34 }
   0xd   :  { %12763 = vst [vmem:[#allocation12_spill] sm:$0xff] %v8495_v35  ;;  %12764 = vst [vmem:[#allocation13_spill] sm:$0xff] %v8498_v36  ;;  %v703_v41 = vand.u32 4294901760, %v702_v32  ;;  %v387_v45 = vsub.f32 %v8480_v28, %v8498_v36  ;;  %v691_v46 = vand.u32 4294901760, %v690_v37  ;;  %v697_v47 = vand.u32 4294901760, %v696_v38 }
   0xe   :  { %12765 = vst [vmem:[#allocation14_spill] sm:$0xff] %v8514_v42  ;;  %12766 = vst [vmem:[#allocation15_spill] sm:$0xff] %v8517_v43  ;;  %v709_v49 = vand.u32 4294901760, %v708_v39  ;;  %v398_v50 = vsub.f32 %v8490_v33, %v8514_v42  ;;  %v228_v51 = vsel %vm214_vm1, %v27_v40, 0  ;;  %v231_v54 = vsel %vm214_vm1, %v28_v44, 0 }
   0xf   :  { %12767 = vst [vmem:[#allocation16_spill] sm:$0xff] %v8525_v48  ;;  %v8530_v52 = vand.u32 4294901760, %v387_v45  ;;  %692 = vmatprep.subr.mxu1 %v691_v46  ;;  %v8532_v53 = vand.u32 4294901760, %v228_v51  ;;  %v8539_v56 = vand.u32 4294901760, %v8517_v43  ;;  %v409_v58 = vsub.f32 %v8493_v34, %v8525_v48 }
  0x10   :  { %698 = vmatpush1.msra.mxu1 %v697_v47  ;;  %v8542_v57 = vand.u32 4294901760, %v398_v50  ;;  %v8549_v60 = vand.u32 4294901760, %v231_v54  ;;  %v234_v61 = vsel %vm214_vm1, %v29_v55, 0 }
  0x11   :  { %12768 = vst [vmem:[#allocation17_spill] sm:$0xff] %v8530_v52  ;;  %12769 = vst [vmem:[#allocation18_spill] sm:$0xff] %v8532_v53  ;;  %389 = vmatmul.mubr.f32.vlgmr.msra.gmra.mxu0 %v8530_v52  ;;  %704 = vmatprep.subr.mxu1 %v703_v41  ;;  %v8547_v59 = vsub.f32 %v228_v51, %v8532_v53  ;;  %v420_v63 = vsub.f32 %v8517_v43, %v8539_v56 }
  0x12   :  { %12770 = vst [vmem:[#allocation19_spill] sm:$0xff] %v8539_v56  ;;  %12771 = vst [vmem:[#allocation20_spill] sm:$0xff] %v8542_v57  ;;  %394 = vmatprep.mubr.f32.mxu0 %v12278_v12  ;;  %710 = vmatpush1.msra.mxu1 %v709_v49 }
  0x13   :  { %12772 = vst [vmem:[#allocation21_spill] sm:$0xff] %v8547_v59  ;;  %12773 = vst [vmem:[#allocation22_spill] sm:$0xff] %v8549_v60  ;;  %952 = vmatpush1.msra.mxu0 %v8466_v22  ;;  %745 = vmatmul.mubr.f32.vlgmr.msra.gmra.mxu1 %v8460_v20 }
  0x14   :  { %1221 = vmatprep.subr.mxu1 %v8436_v9  ;;  %750 = vmatprep.mubr.f32.mxu1 %v12278_v12 }
  0x15   :  { %12 = vsyncpa [#allocation4], 0  ;;  %400 = vmatmul.mubr.f32.gmra.mxu0 %v8542_v57  ;;  %1223 = vmatpush1.msra.mxu1 %v8438_v10  ;;  %v8564_v0 = vand.u32 4294901760, %v409_v58  ;;  %v8567_v1 = vand.u32 4294901760, %v8547_v59  ;;  %v8570_v2 = vsub.f32 %v231_v54, %v8549_v60  ;;  %v8572_v3 = vand.u32 4294901760, %v234_v61  ;;  %v31_v4 = vld [vmem:[%s12264_s1 + $0x40] sm:$0xff] }
  0x16   :  { %405 = vmatprep.mubr.f32.mxu0 %v12278_v12  ;;  %v237_v5 = vsel %vm214_vm1, %v30_v62, 0  ;;  %955 = vmatprep.subr.mxu0 %v8452_v16  ;;  %v8583_v7 = vand.u32 4294901760, %v420_v63  ;;  %v240_v8 = vsel %vm214_vm1, %v31_v4, 0  ;;  %v32_v18 = vld [vmem:[%s12264_s1 + $0x48] sm:$0xff]  ;;  %v64_v38 = vld [vmem:[%s12265_s2] sm:$0xff]  ;;  %v8381_v41 = vmov 0  }
  0x17   :  { %12774 = vst [vmem:[#allocation23_spill] sm:$0xff] %v8564_v0  ;;  %12775 = vst [vmem:[#allocation24_spill] sm:$0xff] %v8567_v1  ;;  %752 = vmatmul.mubr.f32.gmra.mxu1 %v8473_v25  ;;  %958 = vmatpush1.msra.mxu0 %v8469_v23  ;;  %v431_v13 = vsub.f32 %v8547_v59, %v8567_v1  ;;  %v8591_v14 = vand.u32 4294901760, %v8570_v2  ;;  %v8594_v15 = vsub.f32 %v234_v61, %v8572_v3  ;;  %v66_v44 = vld [vmem:[%s12265_s2 + $0x10] sm:$0xff]  ;;  %v34_v50 = vld [vmem:[%s12264_s1 + $0x58] sm:$0xff] }
  0x18   :  { %12776 = vst [vmem:[#allocation25_spill] sm:$0xff] %v8570_v2  ;;  %12777 = vst [vmem:[#allocation26_spill] sm:$0xff] %v8572_v3  ;;  %757 = vmatprep.mubr.f32.mxu1 %v12278_v12  ;;  %1225 = vmatprep.subr.mxu1 %v8428_v6  ;;  %v8596_v17 = vand.u32 4294901760, %v237_v5  ;;  %v8608_v19 = vand.u32 4294901760, %v240_v8  ;;  %v243_v37 = vsel %vm214_vm1, %v32_v18, 0  ;;  %v65_v51 = vld [vmem:[%s12265_s2 + $0x8] sm:$0xff] }
  0x19   :  { %12778 = vst [vmem:[#allocation27_spill] sm:$0xff] %v8583_v7  ;;  %411 = vmatmul.mubr.f32.gmra.mxu0 %v8564_v0  ;;  %12779 = vst [vmem:[#allocation28_spill] sm:$0xff] %v8591_v14  ;;  %1227 = vmatpush1.msra.mxu1 %v8440_v11  ;;  %v8611_v27 = vand.u32 4294901760, %v431_v13  ;;  %v442_v21 = vsub.f32 %v8570_v2, %v8591_v14  ;;  %v8646_v49 = vand.u32 4294901760, %v243_v37  ;;  %v249_v55 = vsel %vm214_vm1, %v34_v50, 0  ;;  %v67_v58 = vld [vmem:[%s12265_s2 + $0x18] sm:$0xff] }
  0x1a   :  { %12780 = vst [vmem:[#allocation29_spill] sm:$0xff] %v8594_v15  ;;  %12781 = vst [vmem:[#allocation30_spill] sm:$0xff] %v8596_v17  ;;  %416 = vmatprep.mubr.f32.mxu0 %v12278_v12  ;;  %1517 = vmatprep.subr.mxu0 %v689_v29  ;;  %v8616_v29 = vand.u32 4294901760, %v8594_v15  ;;  %v8619_v32 = vsub.f32 %v237_v5, %v8596_v17  ;;  %v8632_v39 = vsub.f32 %v240_v8, %v8608_v19  ;;  %v68_v5 = vld [vmem:[%s12265_s2 + $0x20] sm:$0xff] }
  0x1b   :  { %759 = vmatmul.mubr.f32.gmra.mxu1 %v8475_v26  ;;  %1767 = vmatprep.subr.mxu1 %v8436_v9  ;;  %12782 = vst [vmem:[#allocation31_spill] sm:$0xff] %v8608_v19  ;;  %12783 = vst [vmem:[#allocation32_spill] sm:$0xff] %v8611_v27  ;;  %v33_v9 = vld [vmem:[%s12264_s1 + $0x50] sm:$0xff]  ;;  %v8639_v45 = vand.u32 4294901760, %v442_v21  ;;  %v8672_v4 = vsub.f32 %v243_v37, %v8646_v49  ;;  %v35_v8 = vld [vmem:[%s12264_s1 + $0x60] sm:$0xff]  ;;  %v8686_v18 = vand.u32 4294901760, %v249_v55 }
  0x1c   :  { %764 = vmatprep.mubr.f32.mxu1 %v12278_v12  ;;  %12784 = vst [vmem:[#allocation33_spill] sm:$0xff] %v8616_v29  ;;  %12785 = vst [vmem:[#allocation34_spill] sm:$0xff] %v8619_v32  ;;  %v246_v40 = vsel %vm214_vm1, %v33_v9, 0  ;;  %7940 = vset.pattern.permute.xlu0 %v8381_v41  ;;  %v453_v46 = vsub.f32 %v8594_v15, %v8616_v29  ;;  %v8644_v47 = vand.u32 4294901760, %v8619_v32  ;;  %v8669_v63 = vand.u32 4294901760, %v8632_v39  ;;  %v69_v21 = vld [vmem:[%s12265_s2 + $0x28] sm:$0xff] }
  0x1d   :  { %422 = vmatmul.mubr.f32.gmra.mxu0 %v8583_v7  ;;  %12786 = vst [vmem:[#allocation35_spill] sm:$0xff] %v8632_v39  ;;  %12787 = vst [vmem:[#allocation36_spill] sm:$0xff] %v8639_v45  ;;  %91 = vperm.xlu0 %7940, %v64_v38   ;;  %v8657_v54 = vand.u32 4294901760, %v246_v40  ;;  %v8697_v38 = vand.u32 4294901760, %v8672_v4  ;;  %v8713_v50 = vsub.f32 %v249_v55, %v8686_v18  ;;  %v37_v55 = vld [vmem:[%s12264_s1 + $0x70] sm:$0xff]  ;;  %v83_v26 = vld [vmem:[%s12265_s2 + $0x98] sm:$0xff] }
  0x1e   :  { %427 = vmatprep.mubr.f32.mxu0 %v12278_v12  ;;  %12788 = vst [vmem:[#allocation37_spill] sm:$0xff] %v8644_v47  ;;  %12789 = vst [vmem:[#allocation38_spill] sm:$0xff] %v8646_v49  ;;  %7941 = vset.pattern.permute.xlu1 %v8381_v41  ;;  %v8664_v61 = vand.u32 4294901760, %v453_v46  ;;  %v464_v62 = vsub.f32 %v8619_v32, %v8644_v47  ;;  %v475_v37 = vsub.f32 %v8632_v39, %v8669_v63  ;;  %v70_v41 = vld [vmem:[%s12265_s2 + $0x30] sm:$0xff] }
  0x1f   :  { %766 = vmatmul.mubr.f32.gmra.mxu1 %v8495_v35  ;;  %101 = vperm.xlu1 %7941, %v66_v44   ;;  %12790 = vst [vmem:[#allocation39_spill] sm:$0xff] %v8657_v54  ;;  %12792 = vst [vmem:[#allocation41_spill] sm:$0xff] %v8669_v63  ;;  %v8684_v13 = vsub.f32 %v246_v40, %v8657_v54  ;;  %v252_v40 = vsel %vm214_vm1, %v35_v8, 0  ;;  %v36_v44 = vld [vmem:[%s12264_s1 + $0x68] sm:$0xff]  ;;  %v258_v30 = vsel %vm214_vm1, %v37_v55, 0  ;;  %v75_v55 = vld [vmem:[%s12265_s2 + $0x58] sm:$0xff] }
  0x20   :  { %771 = vmatprep.mubr.f32.mxu1 %v12278_v12  ;;  %12791 = vst [vmem:[#allocation40_spill] sm:$0xff] %v8664_v61  ;;  %12793 = vst [vmem:[#allocation42_spill] sm:$0xff] %v8672_v4  ;;  %v8692_v9 = vand.u32 4294901760, %v464_v62  ;;  %v486_v62 = vsub.f32 %v8672_v4, %v8697_v38  ;;  %v255_v8 = vsel %vm214_vm1, %v36_v44, 0  ;;  %v73_v44 = vld [vmem:[%s12265_s2 + $0x48] sm:$0xff] }
  0x21   :  { %433 = vmatmul.mubr.f32.gmra.mxu0 %v8611_v27  ;;  %96 = vperm.xlu0 %7940, %v65_v51   ;;  %12794 = vst [vmem:[#allocation43_spill] sm:$0xff] %v8684_v13  ;;  %12795 = vst [vmem:[#allocation44_spill] sm:$0xff] %v8686_v18  ;;  %v8710_v46 = vand.u32 4294901760, %v8684_v13  ;;  %v71_v51 = vld [vmem:[%s12265_s2 + $0x38] sm:$0xff] }
  0x22   :  { %438 = vmatprep.mubr.f32.mxu0 %v12278_v12  ;;  %12796 = vst [vmem:[#allocation45_spill] sm:$0xff] %v8692_v9  ;;  %12797 = vst [vmem:[#allocation46_spill] sm:$0xff] %v8697_v38  ;;  %v8744_v31 = vand.u32 4294901760, %v486_v62  ;;  %v38_v62 = vld [vmem:[%s12264_s1 + $0x78] sm:$0xff] }
  0x23   :  { %773 = vmatmul.mubr.f32.gmra.mxu1 %v8532_v53  ;;  %106 = vperm.xlu1 %7941, %v67_v58   ;;  %12798 = vst [vmem:[#allocation47_spill] sm:$0xff] %v8710_v46  ;;  %12799 = vst [vmem:[#allocation48_spill] sm:$0xff] %v8713_v50  ;;  %v8719_v58 = vand.u32 4294901760, %v475_v37  ;;  %v497_v37 = vsub.f32 %v8684_v13, %v8710_v46 }
  0x24   :  { %778 = vmatprep.mubr.f32.mxu1 %v12278_v12  ;;  %12803 = vst [vmem:[#allocation52_spill] sm:$0xff] %v8744_v31 }
  0x25   :  { %444 = vmatmul.mubr.f32.gmra.mxu0 %v8639_v45  ;;  %111 = vperm.xlu0 %7940, %v68_v5   ;;  %12800 = vst [vmem:[#allocation49_spill] sm:$0xff] %v8719_v58  ;;  %v8723_v5 = vand.u32 4294901760, %v252_v40  ;;  %v12810_v45 = vmov 0.0  }
  0x26   :  { %449 = vmatprep.mubr.f32.mxu0 %v12278_v12 }
  0x27   :  { %780 = vmatmul.mubr.f32.gmra.mxu1 %v8549_v60  ;;  %116 = vperm.xlu1 %7941, %v69_v21   ;;  %12801 = vst [vmem:[#allocation50_spill] sm:$0xff] %v8723_v5  ;;  %v72_v21 = vld [vmem:[%s12265_s2 + $0x40] sm:$0xff]  ;;  %v8747_v24 = vsub.f32 %v252_v40, %v8723_v5  ;;  %v8761_v40 = vand.u32 4294901760, %v258_v30 }
  0x28   :  { %785 = vmatprep.mubr.f32.mxu1 %v12278_v12 }
  0x29   :  { %455 = vmatmul.mubr.f32.gmra.mxu0 %v8664_v61  ;;  %121 = vperm.xlu0 %7940, %v70_v41   ;;  %v8738_v41 = vand.u32 4294901760, %v8713_v50  ;;  %12804 = vst [vmem:[#allocation53_spill] sm:$0xff] %v8747_v24  ;;  %12806 = vst [vmem:[#allocation55_spill] sm:$0xff] %v8761_v40  ;;  %v8772_v61 = vand.u32 4294901760, %v8747_v24 }
  0x2a   :  { %460 = vmatprep.mubr.f32.mxu0 %v12278_v12 }
  0x2b   :  { %787 = vmatmul.mubr.f32.gmra.mxu1 %v8572_v3  ;;  %126 = vperm.xlu1 %7941, %v71_v51   ;;  %12802 = vst [vmem:[#allocation51_spill] sm:$0xff] %v8738_v41  ;;  %v8749_v51 = vand.u32 4294901760, %v255_v8  ;;  %12808 = vst [vmem:[#allocation57_spill] sm:$0xff] %v8772_v61  ;;  %v519_v7 = vsub.f32 %v8747_v24, %v8772_v61 }
  0x2c   :  { %792 = vmatprep.mubr.f32.mxu1 %v12278_v12 }
  0x2d   :  { %466 = vmatmul.mubr.f32.gmra.mxu0 %v8692_v9  ;;  %12805 = vst [vmem:[#allocation54_spill] sm:$0xff] %v8749_v51  ;;  %131 = vperm.xlu0 %7940, %v72_v21   ;;  %v74_v9 = vld [vmem:[%s12265_s2 + $0x50] sm:$0xff]  ;;  %v8767_v21 = vand.u32 4294901760, %v497_v37  ;;  %v76_v37 = vld [vmem:[%s12265_s2 + $0x60] sm:$0xff] }
  0x2e   :  { %471 = vmatprep.mubr.f32.mxu0 %v12278_v12 }
  0x2f   :  { %794 = vmatmul.mubr.f32.gmra.mxu1 %v8596_v17  ;;  %136 = vperm.xlu1 %7941, %v73_v44   ;;  %12807 = vst [vmem:[#allocation56_spill] sm:$0xff] %v8767_v21  ;;  %v8775_v44 = vsub.f32 %v255_v8, %v8749_v51  ;;  %v8788_v8 = vsub.f32 %v258_v30, %v8761_v40  ;;  %v40_v30 = vld [vmem:[%s12264_s1 + $0x88] sm:$0xff] }
  0x30   :  { %799 = vmatprep.mubr.f32.mxu1 %v12278_v12 }
  0x31   :  { %477 = vmatmul.mubr.f32.gmra.mxu0 %v8719_v58  ;;  %v508_v58 = vsub.f32 %v8713_v50, %v8738_v41  ;;  %12809 = vst [vmem:[#allocation58_spill] sm:$0xff] %v8775_v44  ;;  %141 = vperm.xlu0 %7940, %v74_v9   ;;  %12811 = vst [vmem:[#allocation59_spill] sm:$0xff] %v8788_v8  ;;  %v77_v9 = vld [vmem:[%s12265_s2 + $0x68] sm:$0xff]  ;;  %v8824_v52 = vand.u32 4294901760, %v8788_v8 }
  0x32   :  { %482 = vmatprep.mubr.f32.mxu0 %v12278_v12 }
  0x33   :  { %801 = vmatmul.mubr.f32.gmra.mxu1 %v8608_v19  ;;  %146 = vperm.xlu1 %7941, %v75_v55   ;;  %v8800_v55 = vand.u32 4294901760, %v8775_v44  ;;  %12817 = vst [vmem:[#allocation65_spill] sm:$0xff] %v8824_v52  ;;  %v80_v19 = vld [vmem:[%s12265_s2 + $0x80] sm:$0xff] }
  0x34   :  { %806 = vmatprep.mubr.f32.mxu1 %v12278_v12  ;;  %v39_v12 = vld [vmem:[%s12264_s1 + $0x80] sm:$0xff] }
  0x35   :  { %488 = vmatmul.mubr.f32.gmra.mxu0 %v8744_v31  ;;  %v261_v31 = vsel %vm214_vm1, %v38_v62, 0  ;;  %v264_v27 = vsel %vm214_vm1, %v39_v12, 0  ;;  %v8795_v62 = vand.u32 4294901760, %v508_v58  ;;  %12813 = vst [vmem:[#allocation61_spill] sm:$0xff] %v8800_v55  ;;  %151 = vperm.xlu0 %7940, %v76_v37   ;;  %v78_v12 = vld [vmem:[%s12265_s2 + $0x70] sm:$0xff]  ;;  %v7183_v37 = vld [vmem:[%s12266_s3] sm:$0xff]  ;;  %v530_v57 = vsub.f32 %v8775_v44, %v8800_v55 }
  0x36   :  { %493 = vmatprep.mubr.f32.mxu0 %v12810_v45  ;;  %v8802_v0 = vand.u32 4294901760, %v261_v31  ;;  %v8813_v58 = vand.u32 4294901760, %v264_v27 }
  0x37   :  { %808 = vmatmul.mubr.f32.gmra.mxu1 %v8646_v49  ;;  %12812 = vst [vmem:[#allocation60_spill] sm:$0xff] %v8795_v62  ;;  %156 = vperm.xlu1 %7941, %v77_v9  }
  0x38   :  { %813 = vmatprep.mubr.f32.mxu1 %v12810_v45  ;;  %12814 = vst [vmem:[#allocation62_spill] sm:$0xff] %v8802_v0  ;;  %12815 = vst [vmem:[#allocation63_spill] sm:$0xff] %v8813_v58  ;;  %v8827_v9 = vsub.f32 %v261_v31, %v8802_v0  ;;  %v79_v31 = vld [vmem:[%s12265_s2 + $0x78] sm:$0xff] }
  0x39   :  { %499 = vmatmul.mubr.f32.gmra.mxu0 %v8767_v21  ;;  %v8819_v21 = vand.u32 4294901760, %v519_v7  ;;  %161 = vperm.xlu0 %7940, %v78_v12   ;;  %v41_v7 = vld [vmem:[%s12264_s1 + $0x90] sm:$0xff]  ;;  %v8843_v12 = vand.u32 4294901760, %v530_v57 }
  0x3a   :  { %504 = vmatprep.mubr.f32.mxu0 %v12810_v45  ;;  %12818 = vst [vmem:[#allocation66_spill] sm:$0xff] %v8827_v9  ;;  %v270_v49 = vsel %vm214_vm1, %v41_v7, 0 }
  0x3b   :  { %815 = vmatmul.mubr.f32.gmra.mxu1 %v8657_v54  ;;  %12816 = vst [vmem:[#allocation64_spill] sm:$0xff] %v8819_v21  ;;  %v267_v54 = vsel %vm214_vm1, %v40_v30, 0  ;;  %7210 = vperm.xlu1 %7941, %v7183_v37   ;;  %12820 = vst [vmem:[#allocation68_spill] sm:$0xff] %v8843_v12  ;;  %v541_v30 = vsub.f32 %v8788_v8, %v8824_v52 }
  0x3c   :  { %820 = vmatprep.mubr.f32.mxu1 %v12810_v45  ;;  %v8850_v37 = vand.u32 4294901760, %v267_v54 }
  0x3d   :  { %510 = vmatmul.mubr.f32.gmra.mxu0 %v8795_v62  ;;  %v8837_v62 = vsub.f32 %v264_v27, %v8813_v58  ;;  %v42_v27 = vld [vmem:[%s12264_s1 + $0x98] sm:$0xff]  ;;  %v8867_v17 = vand.u32 4294901760, %v541_v30 }
  0x3e   :  { %515 = vmatprep.mubr.f32.mxu0 %v12810_v45  ;;  %12822 = vst [vmem:[#allocation70_spill] sm:$0xff] %v8850_v37 }
  0x3f   :  { %822 = vmatmul.mubr.f32.gmra.mxu1 %v8686_v18  ;;  %12819 = vst [vmem:[#allocation67_spill] sm:$0xff] %v8837_v62  ;;  %v8848_v18 = vand.u32 4294901760, %v8827_v9  ;;  %166 = vperm.xlu1 %7941, %v79_v31   ;;  %v8860_v57 = vand.u32 4294901760, %v8837_v62  ;;  %12824 = vst [vmem:[#allocation72_spill] sm:$0xff] %v8867_v17  ;;  %v8872_v31 = vsub.f32 %v267_v54, %v8850_v37  ;;  %v81_v54 = vld [vmem:[%s12265_s2 + $0x88] sm:$0xff] }
  0x40   :  { %827 = vmatprep.mubr.f32.mxu1 %v12810_v45 }
  0x41   :  { %521 = vmatmul.mubr.f32.gmra.mxu0 %v8819_v21  ;;  %12821 = vst [vmem:[#allocation69_spill] sm:$0xff] %v8848_v18  ;;  %12823 = vst [vmem:[#allocation71_spill] sm:$0xff] %v8860_v57  ;;  %v273_v21 = vsel %vm214_vm1, %v42_v27, 0  ;;  %v552_v7 = vsub.f32 %v8827_v9, %v8848_v18  ;;  %v43_v27 = vld [vmem:[%s12264_s1 + $0xa0] sm:$0xff]  ;;  %v8893_v3 = vand.u32 4294901760, %v8872_v31 }
  0x42   :  { %526 = vmatprep.mubr.f32.mxu0 %v12810_v45  ;;  %12825 = vst [vmem:[#allocation73_spill] sm:$0xff] %v8872_v31  ;;  %v8882_v30 = vand.u32 4294901760, %v273_v21  ;;  %v276_v60 = vsel %vm214_vm1, %v43_v27, 0 }
  0x43   :  { %829 = vmatmul.mubr.f32.gmra.mxu1 %v8723_v5  ;;  %v8874_v5 = vand.u32 4294901760, %v270_v49  ;;  %171 = vperm.xlu1 %7941, %v80_v19   ;;  %12829 = vst [vmem:[#allocation77_spill] sm:$0xff] %v8893_v3  ;;  %v574_v27 = vsub.f32 %v8872_v31, %v8893_v3 }
  0x44   :  { %834 = vmatprep.mubr.f32.mxu1 %v12810_v45  ;;  %12827 = vst [vmem:[#allocation75_spill] sm:$0xff] %v8882_v30 }
  0x45   :  { %532 = vmatmul.mubr.f32.gmra.mxu0 %v8843_v12  ;;  %12826 = vst [vmem:[#allocation74_spill] sm:$0xff] %v8874_v5  ;;  %v8888_v12 = vand.u32 4294901760, %v552_v7  ;;  %v8896_v19 = vsub.f32 %v270_v49, %v8874_v5  ;;  %v44_v7 = vld [vmem:[%s12264_s1 + $0xa8] sm:$0xff]  ;;  %v82_v49 = vld [vmem:[%s12265_s2 + $0x90] sm:$0xff]  ;;  %v8936_v25 = vand.u32 4294901760, %v574_v27 }
  0x46   :  { %537 = vmatprep.mubr.f32.mxu0 %v12810_v45  ;;  %v279_v35 = vsel %vm214_vm1, %v44_v7, 0 }
  0x47   :  { %836 = vmatmul.mubr.f32.gmra.mxu1 %v8749_v51  ;;  %12828 = vst [vmem:[#allocation76_spill] sm:$0xff] %v8888_v12  ;;  %v563_v51 = vsub.f32 %v8837_v62, %v8860_v57  ;;  %12830 = vst [vmem:[#allocation78_spill] sm:$0xff] %v8896_v19  ;;  %176 = vperm.xlu1 %7941, %v81_v54   ;;  %v8919_v54 = vand.u32 4294901760, %v276_v60 }
  0x48   :  { %841 = vmatprep.mubr.f32.mxu1 %v12810_v45  ;;  %12836 = vst [vmem:[#allocation84_spill] sm:$0xff] %v8936_v25 }
  0x49   :  { %543 = vmatmul.mubr.f32.gmra.mxu0 %v8867_v17  ;;  %v8906_v17 = vsub.f32 %v273_v21, %v8882_v30  ;;  %v8912_v53 = vand.u32 4294901760, %v563_v51  ;;  %12834 = vst [vmem:[#allocation82_spill] sm:$0xff] %v8919_v54  ;;  %v45_v21 = vld [vmem:[%s12264_s1 + $0xb0] sm:$0xff] }
  0x4a   :  { %548 = vmatprep.mubr.f32.mxu0 %v12810_v45 }
  0x4b   :  { %843 = vmatmul.mubr.f32.gmra.mxu1 %v8761_v40  ;;  %12831 = vst [vmem:[#allocation79_spill] sm:$0xff] %v8906_v17  ;;  %12832 = vst [vmem:[#allocation80_spill] sm:$0xff] %v8912_v53  ;;  %v8917_v40 = vand.u32 4294901760, %v8896_v19  ;;  %181 = vperm.xlu1 %7941, %v82_v49   ;;  %v8929_v51 = vand.u32 4294901760, %v8906_v17  ;;  %v8941_v49 = vsub.f32 %v276_v60, %v8919_v54  ;;  %v84_v60 = vld [vmem:[%s12265_s2 + $0xa0] sm:$0xff] }
  0x4c   :  { %848 = vmatprep.mubr.f32.mxu1 %v12810_v45 }
  0x4d   :  { %554 = vmatmul.mubr.f32.gmra.mxu0 %v8888_v12  ;;  %12833 = vst [vmem:[#allocation81_spill] sm:$0xff] %v8917_v40  ;;  %12835 = vst [vmem:[#allocation83_spill] sm:$0xff] %v8929_v51  ;;  %v282_v12 = vsel %vm214_vm1, %v45_v21, 0  ;;  %v585_v7 = vsub.f32 %v8896_v19, %v8917_v40  ;;  %v46_v21 = vld [vmem:[%s12264_s1 + $0xb8] sm:$0xff]  ;;  %v596_v40 = vsub.f32 %v8906_v17, %v8929_v51 }
  0x4e   :  { %559 = vmatprep.mubr.f32.mxu0 %v12810_v45  ;;  %12837 = vst [vmem:[#allocation85_spill] sm:$0xff] %v8941_v49  ;;  %v8951_v27 = vand.u32 4294901760, %v282_v12 }
  0x4f   :  { %850 = vmatmul.mubr.f32.gmra.mxu1 %v8802_v0  ;;  %v8943_v0 = vand.u32 4294901760, %v279_v35  ;;  %186 = vperm.xlu1 %7941, %v83_v26   ;;  %v8958_v20 = vand.u32 4294901760, %v585_v7 }
  0x50   :  { %855 = vmatprep.mubr.f32.mxu1 %v12810_v45  ;;  %12839 = vst [vmem:[#allocation87_spill] sm:$0xff] %v8951_v27 }
  0x51   :  { %565 = vmatmul.mubr.f32.gmra.mxu0 %v8912_v53  ;;  %12838 = vst [vmem:[#allocation86_spill] sm:$0xff] %v8943_v0  ;;  %v285_v53 = vsel %vm214_vm1, %v46_v21, 0  ;;  %12840 = vst [vmem:[#allocation88_spill] sm:$0xff] %v8958_v20  ;;  %v8966_v26 = vsub.f32 %v279_v35, %v8943_v0  ;;  %v47_v21 = vld [vmem:[%s12264_s1 + $0xc0] sm:$0xff]  ;;  %v8980_v35 = vand.u32 4294901760, %v596_v40 }
  0x52   :  { %570 = vmatprep.mubr.f32.mxu0 %v12810_v45  ;;  %v8974_v7 = vand.u32 4294901760, %v285_v53  ;;  %v288_v17 = vsel %vm214_vm1, %v47_v21, 0 }
  0x53   :  { %857 = vmatmul.mubr.f32.gmra.mxu1 %v8813_v58  ;;  %v8963_v58 = vand.u32 4294901760, %v8941_v49  ;;  %12842 = vst [vmem:[#allocation90_spill] sm:$0xff] %v8966_v26  ;;  %191 = vperm.xlu1 %7941, %v84_v60   ;;  %12844 = vst [vmem:[#allocation92_spill] sm:$0xff] %v8980_v35  ;;  %v8985_v51 = vand.u32 4294901760, %v8966_v26  ;;  %v8988_v60 = vsub.f32 %v282_v12, %v8951_v27 }
  0x54   :  { %862 = vmatprep.mubr.f32.mxu1 %v12810_v45  ;;  %12843 = vst [vmem:[#allocation91_spill] sm:$0xff] %v8974_v7  ;;  %v8995_v40 = vsub.f32 %v285_v53, %v8974_v7  ;;  %v87_v53 = vld [vmem:[%s12265_s2 + $0xb8] sm:$0xff] }
  0x55   :  { %576 = vmatmul.mubr.f32.gmra.mxu0 %v8936_v25  ;;  %12841 = vst [vmem:[#allocation89_spill] sm:$0xff] %v8963_v58  ;;  %v85_v25 = vld [vmem:[%s12265_s2 + $0xa8] sm:$0xff]  ;;  %12845 = vst [vmem:[#allocation93_spill] sm:$0xff] %v8985_v51  ;;  %v9006_v21 = vand.u32 4294901760, %v8988_v60 }
  0x56   :  { %581 = vmatprep.mubr.f32.mxu0 %v12810_v45  ;;  %12846 = vst [vmem:[#allocation94_spill] sm:$0xff] %v8988_v60  ;;  %12847 = vst [vmem:[#allocation95_spill] sm:$0xff] %v8995_v40 }
  0x57   :  { %864 = vmatmul.mubr.f32.gmra.mxu1 %v8850_v37  ;;  %v607_v37 = vsub.f32 %v8941_v49, %v8963_v58  ;;  %196 = vperm.xlu1 %7941, %v85_v25   ;;  %v618_v58 = vsub.f32 %v8966_v26, %v8985_v51  ;;  %12849 = vst [vmem:[#allocation97_spill] sm:$0xff] %v9006_v21  ;;  %v9008_v25 = vand.u32 4294901760, %v288_v17 }
  0x58   :  { %869 = vmatprep.mubr.f32.mxu1 %v12810_v45 }
  0x59   :  { %587 = vmatmul.mubr.f32.gmra.mxu0 %v8958_v20  ;;  %v86_v20 = vld [vmem:[%s12265_s2 + $0xb0] sm:$0xff]  ;;  %v9001_v12 = vand.u32 4294901760, %v607_v37  ;;  %v9017_v37 = vand.u32 4294901760, %v618_v58  ;;  %v9025_v51 = vsub.f32 %v288_v17, %v9008_v25  ;;  %v88_v58 = vld [vmem:[%s12265_s2 + $0xc0] sm:$0xff] }
  0x5a   :  { %592 = vmatprep.mubr.f32.mxu0 %v12810_v45 }
  0x5b   :  { %871 = vmatmul.mubr.f32.gmra.mxu1 %v8874_v5  ;;  %12848 = vst [vmem:[#allocation96_spill] sm:$0xff] %v9001_v12  ;;  %201 = vperm.xlu1 %7941, %v86_v20   ;;  %12850 = vst [vmem:[#allocation98_spill] sm:$0xff] %v9017_v37  ;;  %v9022_v5 = vand.u32 4294901760, %v8995_v40  ;;  %v59_v20 = vld [vmem:[%s12263_s0 + $0x58] sm:$0x3] }
  0x5c   :  { %876 = vmatprep.mubr.f32.mxu1 %v12810_v45  ;;  %12852 = vst [vmem:[#allocation100_spill] sm:$0xff] %v9025_v51 }
  0x5d   :  { %598 = vmatmul.mubr.f32.gmra.mxu0 %v8980_v35  ;;  %v629_v35 = vsub.f32 %v8988_v60, %v9006_v21  ;;  %12851 = vst [vmem:[#allocation99_spill] sm:$0xff] %v9022_v5  ;;  %v640_v17 = vsub.f32 %v8995_v40, %v9022_v5 }
  0x5e   :  { %603 = vmatprep.mubr.f32.mxu0 %v12810_v45 }
  0x5f   :  { %878 = vmatmul.mubr.f32.gmra.mxu1 %v8882_v30  ;;  %206 = vperm.xlu1 %7941, %v87_v53   ;;  %v301_v53 = vsel %vm290_vm0, %v59_v20, 0 }
  0x60   :  { %883 = vmatprep.mubr.f32.mxu1 %v12810_v45  ;;  %v9053_v30 = vand.u32 4294901760, %v301_v53 }
  0x61   :  { %609 = vmatmul.mubr.f32.gmra.mxu0 %v9001_v12  ;;  %v9037_v12 = vand.u32 4294901760, %v629_v35 }
  0x62   :  { %614 = vmatprep.mubr.f32.mxu0 %v12810_v45 }
  0x63   :  { %885 = vmatmul.mubr.f32.gmra.mxu1 %v8919_v54  ;;  %12853 = vst [vmem:[#allocation101_spill] sm:$0xff] %v9037_v12  ;;  %v9042_v54 = vand.u32 4294901760, %v9025_v51  ;;  %211 = vperm.xlu1 %7941, %v88_v58   ;;  %v9062_v58 = vsub.f32 %v301_v53, %v9053_v30 }
  0x64   :  { %890 = vmatprep.mubr.f32.mxu1 %v12810_v45 }
  0x65   :  { %620 = vmatmul.mubr.f32.gmra.mxu0 %v9017_v37  ;;  %12854 = vst [vmem:[#allocation102_spill] sm:$0xff] %v9042_v54  ;;  %v9049_v37 = vand.u32 4294901760, %v640_v17  ;;  %v651_v35 = vsub.f32 %v9025_v51, %v9042_v54  ;;  %v12374_v17 = vand.u32 4294901760, %v9062_v58 }
  0x66   :  { %625 = vmatprep.mubr.f32.mxu0 %v12810_v45 }
  0x67   :  { %892 = vmatmul.mubr.f32.gmra.mxu1 %v8943_v0  ;;  %12855 = vst [vmem:[#allocation103_spill] sm:$0xff] %v9049_v37  ;;  %v9059_v20 = vand.u32 4294901760, %v651_v35  ;;  %v2357_v53 = vsub.f32 %v9062_v58, %v12374_v17  ;;  %v12857_v35 = vand.u32 4294901760, %v8466_v22  ;;  %v12859_v17 = vand.u32 4294901760, %v8469_v23  ;;  %v12861_v22 = vld [vmem:[#allocation79_spill] sm:$0xff]  ;;  %v7187_v23 = vld [vmem:[%s12266_s3 + $0x20] sm:$0xff] }
  0x68   :  { %897 = vmatprep.mubr.f32.mxu1 %v12810_v45 }
  0x69   :  { %631 = vmatmul.mubr.f32.gmra.mxu0 %v9037_v12  ;;  %12856 = vst [vmem:[#allocation104_spill] sm:$0xff] %v9059_v20 }
  0x6a   :  { %636 = vmatprep.mubr.f32.mxu0 %v12810_v45 }
  0x6b   :  { %899 = vmatmul.mubr.f32.gmra.mxu1 %v8951_v27 }
  0x6c   :  { %904 = vmatprep.mubr.f32.mxu1 %v12810_v45 }
  0x6d   :  { %642 = vmatmul.mubr.f32.gmra.mxu0 %v9049_v37 }
  0x6e   :  { %647 = vmatprep.mubr.f32.mxu0 %v12810_v45 }
  0x6f   :  { %906 = vmatmul.mubr.f32.gmra.mxu1 %v8974_v7 }
  0x70   :  { %911 = vmatprep.mubr.f32.mxu1 %v12810_v45 }
  0x71   :  { %653 = vmatmul.mubr.f32.gmra.mxu0 %v9059_v20  ;;  %v12858_v20 = vand.u32 4294901760, %v8452_v16  ;;  %v12860_v16 = vld [vmem:[#allocation81_spill] sm:$0xff] }
  0x72   :  { %991 = vmatprep.mubr.f32.mxu0 %v12810_v45 }
  0x73   :  { %913 = vmatmul.mubr.f32.gmra.mxu1 %v9008_v25 }
  0x74   :  { %1260 = vmatprep.mubr.f32.mxu1 %v12810_v45 }
  0x75   :  { %994 = vmatmul.mubr.f32.vlgmr.msra.gmra.mxu0 %v8480_v28  ;;  %v2358_v28 = vand.u32 4294901760, %v2357_v53  ;;  %v7188_v53 = vld [vmem:[%s12266_s3 + $0x28] sm:$0xff] }
  0x76   :  { %999 = vmatprep.mubr.f32.mxu0 %v12810_v45  ;;  %1521 = vmatpush1.msra.mxu0 %v12857_v35  ;;  %v51_v35 = vld [vmem:[%s12263_s0 + $0x18] sm:$0xff] }
  0x77   :  { %1264 = vmatmul.mubr.f32.vlgmr.msra.gmra.mxu1 %v8498_v36  ;;  %1525 = vmatprep.subr.mxu0 %v12858_v20  ;;  %v12862_v20 = vld [vmem:[#allocation83_spill] sm:$0xff] }
  0x78   :  { %1769 = vmatpush1.msra.mxu1 %v8438_v10  ;;  %1269 = vmatprep.mubr.f32.mxu1 %v12810_v45  ;;  %v7185_v10 = vld [vmem:[%s12266_s3 + $0x10] sm:$0xff] }
  0x79   :  { %1002 = vmatmul.mubr.f32.gmra.mxu0 %v8490_v33  ;;  %1771 = vmatprep.subr.mxu1 %v8428_v6  ;;  %v7184_v6 = vld [vmem:[%s12266_s3 + $0x8] sm:$0xff] }
  0x7a   :  { %1007 = vmatprep.mubr.f32.mxu0 %v12810_v45  ;;  %1529 = vmatpush1.msra.mxu0 %v12859_v17 }
  0x7b   :  { %1273 = vmatmul.mubr.f32.gmra.mxu1 %v8514_v42  ;;  %2011 = vmatprep.subr.mxu0 %v9053_v30 }
  0x7c   :  { %1278 = vmatprep.mubr.f32.mxu1 %v12810_v45  ;;  %1773 = vmatpush1.msra.mxu1 %v8440_v11  ;;  %v7186_v11 = vld [vmem:[%s12266_s3 + $0x18] sm:$0xff] }
  0x7d   :  { %1010 = vmatmul.mubr.f32.gmra.mxu0 %v8493_v34  ;;  %2359 = vmatprep.subr.mxu1 %v2358_v28  ;;  %v58_v28 = vld [vmem:[%s12263_s0 + $0x50] sm:$0x3] }
  0x7e   :  { %1015 = vmatprep.mubr.f32.mxu0 %v12810_v45  ;;  %7215 = vperm.xlu0 %7940, %v7184_v6   ;;  %v298_v17 = vsel %vm290_vm0, %v58_v28, 0  ;;  %v12863_v6 = vld [vmem:[#allocation89_spill] sm:$0xff]  ;;  %v7189_v28 = vld [vmem:[%s12266_s3 + $0x30] sm:$0xff] }
  0x7f   :  { %1282 = vmatmul.mubr.f32.gmra.mxu1 %v8525_v48 }
  0x80   :  { %1287 = vmatprep.mubr.f32.mxu1 %v12810_v45 }
  0x81   :  { %1018 = vmatmul.mubr.f32.gmra.mxu0 %v8517_v43  ;;  %v12892_v43 = vld [vmem:[#allocation38_spill] sm:$0xff] }
  0x82   :  { %1023 = vmatprep.mubr.f32.mxu0 %v12810_v45  ;;  %7220 = vperm.xlu0 %7940, %v7185_v10   ;;  %v9191_v10 = vand.u32 4294901760, %v298_v17 }
  0x83   :  { %1291 = vmatmul.mubr.f32.gmra.mxu1 %v8539_v56 }
  0x84   :  { %1296 = vmatprep.mubr.f32.mxu1 %v12810_v45 }
  0x85   :  { %1026 = vmatmul.mubr.f32.gmra.mxu0 %v8547_v59 }
  0x86   :  { %1031 = vmatprep.mubr.f32.mxu0 %v12810_v45  ;;  %7225 = vperm.xlu0 %7940, %v7186_v11   ;;  %v9194_v11 = vand.u32 4294901760, %v51_v35 }
  0x87   :  { %1300 = vmatmul.mubr.f32.gmra.mxu1 %v8567_v1 }
  0x88   :  { %1305 = vmatprep.mubr.f32.mxu1 %v12810_v45 }
  0x89   :  { %1034 = vmatmul.mubr.f32.gmra.mxu0 %v8570_v2 }
  0x8a   :  { %1039 = vmatprep.mubr.f32.mxu0 %v12810_v45  ;;  %7230 = vperm.xlu0 %7940, %v7187_v23   ;;  %v50_v23 = vld [vmem:[%s12263_s0 + $0x10] sm:$0xff] }
  0x8b   :  { %1309 = vmatmul.mubr.f32.gmra.mxu1 %v8591_v14 }
  0x8c   :  { %1314 = vmatprep.mubr.f32.mxu1 %v12810_v45 }
  0x8d   :  { %1042 = vmatmul.mubr.f32.gmra.mxu0 %v8594_v15 }
  0x8e   :  { %1047 = vmatprep.mubr.f32.mxu0 %v12810_v45  ;;  %7235 = vperm.xlu0 %7940, %v7188_v53   ;;  %v12864_v53 = vld [vmem:[#allocation93_spill] sm:$0xff] }
  0x8f   :  { %1318 = vmatmul.mubr.f32.gmra.mxu1 %v8616_v29 }
  0x90   :  { %1323 = vmatprep.mubr.f32.mxu1 %v12810_v45 }
  0x91   :  { %1050 = vmatmul.mubr.f32.gmra.mxu0 %v8619_v32 }
  0x92   :  { %1055 = vmatprep.mubr.f32.mxu0 %v12810_v45  ;;  %7240 = vperm.xlu0 %7940, %v7189_v28   ;;  %v7190_v28 = vld [vmem:[%s12266_s3 + $0x38] sm:$0xff] }
  0x93   :  { %1327 = vmatmul.mubr.f32.gmra.mxu1 %v8644_v47 }
  0x94   :  { %1332 = vmatprep.mubr.f32.mxu1 %v12810_v45 }
  0x95   :  { %1058 = vmatmul.mubr.f32.gmra.mxu0 %v8632_v39 }
  0x96   :  { %1063 = vmatprep.mubr.f32.mxu0 %v12810_v45  ;;  %7245 = vperm.xlu0 %7940, %v7190_v28  }
  0x97   :  { %1336 = vmatmul.mubr.f32.gmra.mxu1 %v8669_v63 }
  0x98   :  { %1341 = vmatprep.mubr.f32.mxu1 %v12810_v45 }
  0x99   :  { %1066 = vmatmul.mubr.f32.gmra.mxu0 %v8672_v4 }
  0x9a   :  { %1071 = vmatprep.mubr.f32.mxu0 %v12810_v45 }
  0x9b   :  { %1345 = vmatmul.mubr.f32.gmra.mxu1 %v8697_v38 }
  0x9c   :  { %1350 = vmatprep.mubr.f32.mxu1 %v12810_v45 }
  0x9d   :  { %1074 = vmatmul.mubr.f32.gmra.mxu0 %v8684_v13 }
  0x9e   :  { %1079 = vmatprep.mubr.f32.mxu0 %v12810_v45 }
  0x9f   :  { %1354 = vmatmul.mubr.f32.gmra.mxu1 %v8710_v46  ;;  %v7197_v46 = vld [vmem:[%s12266_s3 + $0x70] sm:$0xff] }
  0xa0   :  { %1359 = vmatprep.mubr.f32.mxu1 %v12810_v45 }
  0xa1   :  { %1082 = vmatmul.mubr.f32.gmra.mxu0 %v8713_v50 }
  0xa2   :  { %1087 = vmatprep.mubr.f32.mxu0 %v12810_v45 }
  0xa3   :  { %1363 = vmatmul.mubr.f32.gmra.mxu1 %v8738_v41 }
  0xa4   :  { %1368 = vmatprep.mubr.f32.mxu1 %v12810_v45 }
  0xa5   :  { %1090 = vmatmul.mubr.f32.gmra.mxu0 %v8747_v24 }
  0xa6   :  { %1095 = vmatprep.mubr.f32.mxu0 %v12810_v45 }
  0xa7   :  { %1372 = vmatmul.mubr.f32.gmra.mxu1 %v8772_v61 }
  0xa8   :  { %1377 = vmatprep.mubr.f32.mxu1 %v12810_v45 }
  0xa9   :  { %1098 = vmatmul.mubr.f32.gmra.mxu0 %v8775_v44 }
  0xaa   :  { %1103 = vmatprep.mubr.f32.mxu0 %v12810_v45 }
  0xab   :  { %1381 = vmatmul.mubr.f32.gmra.mxu1 %v8800_v55  ;;  %v7195_v55 = vld [vmem:[%s12266_s3 + $0x60] sm:$0xff] }
  0xac   :  { %1386 = vmatprep.mubr.f32.mxu1 %v12810_v45  ;;  %7270 = vperm.xlu1 %7941, %v7195_v55  }
  0xad   :  { %1106 = vmatmul.mubr.f32.gmra.mxu0 %v8788_v8 }
  0xae   :  { %1111 = vmatprep.mubr.f32.mxu0 %v12810_v45 }
  0xaf   :  { %1390 = vmatmul.mubr.f32.gmra.mxu1 %v8824_v52 }
  0xb0   :  { %1395 = vmatprep.mubr.f32.mxu1 %v12810_v45  ;;  %7280 = vperm.xlu1 %7941, %v7197_v46  }
  0xb1   :  { %1114 = vmatmul.mubr.f32.gmra.mxu0 %v8827_v9 }
  0xb2   :  { %1119 = vmatprep.mubr.f32.mxu0 %v12810_v45 }
  0xb3   :  { %1399 = vmatmul.mubr.f32.gmra.mxu1 %v8848_v18 }
  0xb4   :  { %1404 = vmatprep.mubr.f32.mxu1 %v12810_v45 }
  0xb5   :  { %1122 = vmatmul.mubr.f32.gmra.mxu0 %v8837_v62 }
  0xb6   :  { %1127 = vmatprep.mubr.f32.mxu0 %v12810_v45 }
  0xb7   :  { %1408 = vmatmul.mubr.f32.gmra.mxu1 %v8860_v57 }
  0xb8   :  { %1413 = vmatprep.mubr.f32.mxu1 %v12810_v45 }
  0xb9   :  { %1130 = vmatmul.mubr.f32.gmra.mxu0 %v8872_v31 }
  0xba   :  { %1135 = vmatprep.mubr.f32.mxu0 %v12810_v45 }
  0xbb   :  { %1417 = vmatmul.mubr.f32.gmra.mxu1 %v8893_v3 }
  0xbc   :  { %1422 = vmatprep.mubr.f32.mxu1 %v12810_v45 }
  0xbd   :  { %1138 = vmatmul.mubr.f32.gmra.mxu0 %v8896_v19 }
  0xbe   :  { %1143 = vmatprep.mubr.f32.mxu0 %v12810_v45 }
  0xbf   :  { %1426 = vmatmul.mubr.f32.gmra.mxu1 %v12860_v16  ;;  %v9235_v16 = vpop.permute.xlu1 %101 }
  0xc0   :  { %1431 = vmatprep.mubr.f32.mxu1 %v12810_v45  ;;  %12867 = vst [vmem:[#allocation107_spill] sm:$0xff] %v9235_v16 }
  0xc1   :  { %1146 = vmatmul.mubr.f32.gmra.mxu0 %v12861_v22  ;;  %v7191_v22 = vld [vmem:[%s12266_s3 + $0x40] sm:$0xff] }
  0xc2   :  { %1151 = vmatprep.mubr.f32.mxu0 %v12810_v45  ;;  %7250 = vperm.xlu0 %7940, %v7191_v22  }
  0xc3   :  { %1435 = vmatmul.mubr.f32.gmra.mxu1 %v12862_v20  ;;  %v9214_v20 = vsub.f32 %v51_v35, %v9194_v11  ;;  %v9262_v62 = vpop.permute.xlu1 %106 }
  0xc4   :  { %1440 = vmatprep.mubr.f32.mxu1 %v12810_v45  ;;  %12870 = vst [vmem:[#allocation108_spill] sm:$0xff] %v9262_v62 }
  0xc5   :  { %1154 = vmatmul.mubr.f32.gmra.mxu0 %v8941_v49  ;;  %v9210_v49 = vand.u32 4294901760, %v50_v23  ;;  %v12869_v57 = vand.u32 4294901760, %v9214_v20 }
  0xc6   :  { %1159 = vmatprep.mubr.f32.mxu0 %v12810_v45 }
  0xc7   :  { %1444 = vmatmul.mubr.f32.gmra.mxu1 %v12863_v6  ;;  %v9205_v6 = vpop.permute.xlu0 %91 }
  0xc8   :  { %1449 = vmatprep.mubr.f32.mxu1 %v12810_v45  ;;  %12865 = vst [vmem:[#allocation105_spill] sm:$0xff] %v9205_v6 }
  0xc9   :  { %1162 = vmatmul.mubr.f32.gmra.mxu0 %v8966_v26  ;;  %v9208_v26 = vsub.f32 %v298_v17, %v9191_v10 }
  0xca   :  { %1167 = vmatprep.mubr.f32.mxu0 %v12810_v45 }
  0xcb   :  { %1453 = vmatmul.mubr.f32.gmra.mxu1 %v12864_v53  ;;  %v9224_v53 = vsub.f32 %v50_v23, %v9210_v49  ;;  %v12868_v19 = vand.u32 4294901760, %v9208_v26 }
  0xcc   :  { %1458 = vmatprep.mubr.f32.mxu1 %v12810_v45 }
  0xcd   :  { %1170 = vmatmul.mubr.f32.gmra.mxu0 %v8988_v60  ;;  %v2363_v3 = vsub.f32 %v9208_v26, %v12868_v19 }
  0xce   :  { %1175 = vmatprep.mubr.f32.mxu0 %v12810_v45 }
  0xcf   :  { %1462 = vmatmul.mubr.f32.gmra.mxu1 %v9006_v21  ;;  %v9233_v21 = vpop.permute.xlu0 %96 }
  0xd0   :  { %1467 = vmatprep.mubr.f32.mxu1 %v12810_v45  ;;  %12866 = vst [vmem:[#allocation106_spill] sm:$0xff] %v9233_v21 }
  0xd1   :  { %v390_v60 = vpop.f32.mrf.mxu0  ;;  %1178 = vmatmul.mubr.f32.gmra.mxu0 %v8995_v40 }
  0xd2   :  { %1183 = vmatprep.mubr.f32.mxu0 %v12810_v45  ;;  %v391_v28 = vadd.f32 %v390_v60, %v9205_v6 }
  0xd3   :  { %v392_v23 = vpop.f32.mrf.mxu0  ;;  %v746_v17 = vpop.f32.mrf.mxu1  ;;  %1471 = vmatmul.mubr.f32.gmra.mxu1 %v9022_v5  ;;  %v2369_v5 = vsub.f32 %v9214_v20, %v12869_v57  ;;  %v2364_v57 = vand.u32 4294901760, %v2363_v3 }
  0xd4   :  { %v9238_v40 = vadd.f32 %v746_v17, %v391_v28  ;;  %v393_v35 = vadd.f32 %v392_v23, %v9205_v6  ;;  %1476 = vmatprep.mubr.f32.mxu1 %v12810_v45  ;;  %v7192_v17 = vld [vmem:[%s12266_s3 + $0x48] sm:$0xff] }
  0xd5   :  { %v401_v31 = vpop.f32.mrf.mxu0  ;;  %1186 = vmatmul.mubr.f32.gmra.mxu0 %v9025_v51  ;;  %v748_v22 = vpop.f32.mrf.mxu1  ;;  %7255 = vperm.xlu0 %7940, %v7192_v17   ;;  %v2370_v9 = vand.u32 4294901760, %v2369_v5 }
  0xd6   :  { %v9253_v28 = vadd.f32 %v748_v22, %v393_v35  ;;  %1562 = vmatprep.mubr.f32.mxu0 %v12810_v45  ;;  %v402_v19 = vadd.f32 %v401_v31, %v9233_v21  ;;  %v12871_v35 = vand.u32 4294901760, %v9224_v53  ;;  %v12872_v31 = vld [vmem:[#allocation6_spill] sm:$0xff]  ;;  %v9279_v5 = vpop.permute.xlu1 %116 }
  0xd7   :  { %v403_v23 = vpop.f32.mrf.mxu0  ;;  %v753_v60 = vpop.f32.mrf.mxu1  ;;  %1480 = vmatmul.mubr.f32.gmra.mxu1 %v9042_v54  ;;  %12873 = vst [vmem:[#allocation109_spill] sm:$0xff] %v9279_v5  ;;  %v12874_v54 = vld [vmem:[#allocation7_spill] sm:$0xff] }
  0xd8   :  { %v9258_v51 = vadd.f32 %v753_v60, %v402_v19  ;;  %v404_v6 = vadd.f32 %v403_v23, %v9233_v21  ;;  %1806 = vmatprep.mubr.f32.mxu1 %v12810_v45  ;;  %v2375_v22 = vsub.f32 %v9224_v53, %v12871_v35 }
  0xd9   :  { %v412_v18 = vpop.f32.mrf.mxu0  ;;  %1564 = vmatmul.mubr.f32.vlgmr.msra.gmra.mxu0 %v12872_v31  ;;  %v755_v17 = vpop.f32.mrf.mxu1 }
  0xda   :  { %v9268_v52 = vadd.f32 %v755_v17, %v404_v6  ;;  %1569 = vmatprep.mubr.f32.mxu0 %v12810_v45  ;;  %2013 = vmatpush1.msra.mxu0 %v9191_v10  ;;  %v413_v60 = vadd.f32 %v412_v18, %v9235_v16  ;;  %v2376_v6 = vand.u32 4294901760, %v2375_v22 }
  0xdb   :  { %v414_v3 = vpop.f32.mrf.mxu0  ;;  %v760_v19 = vpop.f32.mrf.mxu1  ;;  %1808 = vmatmul.mubr.f32.vlgmr.msra.gmra.mxu1 %v12872_v31  ;;  %2015 = vmatprep.subr.mxu0 %v9194_v11 }
  0xdc   :  { %v9275_v23 = vadd.f32 %v760_v19, %v413_v60  ;;  %2365 = vmatpush1.msra.mxu1 %v2364_v57  ;;  %v415_v35 = vadd.f32 %v414_v3, %v9235_v16  ;;  %1813 = vmatprep.mubr.f32.mxu1 %v12810_v45  ;;  %v9286_v19 = vpop.permute.xlu0 %111  ;;  %v12877_v16 = vld [vmem:[#allocation8_spill] sm:$0xff] }
  0xdd   :  { %v423_v17 = vpop.f32.mrf.mxu0  ;;  %1571 = vmatmul.mubr.f32.gmra.mxu0 %v12874_v54  ;;  %v762_v18 = vpop.f32.mrf.mxu1  ;;  %2371 = vmatprep.subr.mxu1 %v2370_v9  ;;  %12875 = vst [vmem:[#allocation110_spill] sm:$0xff] %v9286_v19  ;;  %v7193_v9 = vld [vmem:[%s12266_s3 + $0x50] sm:$0xff] }
  0xde   :  { %v9282_v21 = vadd.f32 %v762_v18, %v415_v35  ;;  %1576 = vmatprep.mubr.f32.mxu0 %v12810_v45  ;;  %v424_v60 = vadd.f32 %v423_v17, %v9262_v62  ;;  %2017 = vmatpush1.msra.mxu0 %v9210_v49  ;;  %v9298_v17 = vpop.permute.xlu1 %126 }
  0xdf   :  { %v425_v57 = vpop.f32.mrf.mxu0  ;;  %v767_v3 = vpop.f32.mrf.mxu1  ;;  %1815 = vmatmul.mubr.f32.gmra.mxu1 %v12874_v54  ;;  %2616 = vmatprep.subr.mxu0 %v9062_v58  ;;  %12876 = vst [vmem:[#allocation111_spill] sm:$0xff] %v9298_v17 }
  0xe0   :  { %v9294_v22 = vadd.f32 %v767_v3, %v424_v60  ;;  %v426_v35 = vadd.f32 %v425_v57, %v9262_v62  ;;  %1820 = vmatprep.mubr.f32.mxu1 %v12810_v45  ;;  %2377 = vmatpush1.msra.mxu1 %v2376_v6  ;;  %v7194_v6 = vld [vmem:[%s12266_s3 + $0x58] sm:$0xff]  ;;  %v9324_v50 = vpop.permute.xlu0 %121 }
  0xe1   :  { %v434_v18 = vpop.f32.mrf.mxu0  ;;  %1578 = vmatmul.mubr.f32.gmra.mxu0 %v12877_v16  ;;  %v769_v8 = vpop.f32.mrf.mxu1  ;;  %2888 = vmatprep.subr.mxu1 %v9053_v30  ;;  %12880 = vst [vmem:[#allocation113_spill] sm:$0xff] %v9324_v50 }
  0xe2   :  { %v9305_v44 = vadd.f32 %v769_v8, %v426_v35  ;;  %1583 = vmatprep.mubr.f32.mxu0 %v12810_v45  ;;  %v435_v60 = vadd.f32 %v434_v18, %v9286_v19  ;;  %7260 = vperm.xlu0 %7940, %v7193_v9   ;;  %v9317_v8 = vpop.permute.xlu1 %136  ;;  %v12879_v18 = vld [vmem:[#allocation12_spill] sm:$0xff] }
  0xe3   :  { %v436_v57 = vpop.f32.mrf.mxu0  ;;  %v774_v3 = vpop.f32.mrf.mxu1  ;;  %1822 = vmatmul.mubr.f32.gmra.mxu1 %v12877_v16  ;;  %12878 = vst [vmem:[#allocation112_spill] sm:$0xff] %v9317_v8 }
  0xe4   :  { %v9313_v62 = vadd.f32 %v774_v3, %v435_v60  ;;  %v437_v61 = vadd.f32 %v436_v57, %v9286_v19  ;;  %1827 = vmatprep.mubr.f32.mxu1 %v12810_v45  ;;  %v7196_v57 = vld [vmem:[%s12266_s3 + $0x68] sm:$0xff] }
  0xe5   :  { %v445_v35 = vpop.f32.mrf.mxu0  ;;  %1585 = vmatmul.mubr.f32.gmra.mxu0 %v12879_v18  ;;  %v776_v9 = vpop.f32.mrf.mxu1  ;;  %v12882_v19 = vld [vmem:[#allocation18_spill] sm:$0xff] }
  0xe6   :  { %v9320_v24 = vadd.f32 %v776_v9, %v437_v61  ;;  %1590 = vmatprep.mubr.f32.mxu0 %v12810_v45  ;;  %v446_v41 = vadd.f32 %v445_v35, %v9279_v5  ;;  %7265 = vperm.xlu0 %7940, %v7194_v6   ;;  %v9334_v9 = vpop.permute.xlu1 %146 }
  0xe7   :  { %v447_v55 = vpop.f32.mrf.mxu0  ;;  %v781_v60 = vpop.f32.mrf.mxu1  ;;  %1829 = vmatmul.mubr.f32.gmra.mxu1 %v12879_v18  ;;  %12881 = vst [vmem:[#allocation114_spill] sm:$0xff] %v9334_v9 }
  0xe8   :  { %v9330_v3 = vadd.f32 %v781_v60, %v446_v41  ;;  %v448_v61 = vadd.f32 %v447_v55, %v9279_v5  ;;  %1834 = vmatprep.mubr.f32.mxu1 %v12810_v45 }
  0xe9   :  { %v456_v35 = vpop.f32.mrf.mxu0  ;;  %1592 = vmatmul.mubr.f32.gmra.mxu0 %v12882_v19  ;;  %v783_v6 = vpop.f32.mrf.mxu1 }
  0xea   :  { %v9340_v13 = vadd.f32 %v783_v6, %v448_v61  ;;  %1597 = vmatprep.mubr.f32.mxu0 %v12810_v45  ;;  %v457_v41 = vadd.f32 %v456_v35, %v9324_v50  ;;  %7275 = vperm.xlu0 %7940, %v7196_v57   ;;  %v9349_v4 = vpop.permute.xlu1 %156  ;;  %v12884_v6 = vld [vmem:[#allocation22_spill] sm:$0xff]  ;;  %v7198_v57 = vld [vmem:[%s12266_s3 + $0x78] sm:$0xff] }
  0xeb   :  { %v458_v55 = vpop.f32.mrf.mxu0  ;;  %v788_v60 = vpop.f32.mrf.mxu1  ;;  %1836 = vmatmul.mubr.f32.gmra.mxu1 %v12882_v19  ;;  %12883 = vst [vmem:[#allocation115_spill] sm:$0xff] %v9349_v4 }
  0xec   :  { %v9345_v5 = vadd.f32 %v788_v60, %v457_v41  ;;  %v459_v38 = vadd.f32 %v458_v55, %v9324_v50  ;;  %1841 = vmatprep.mubr.f32.mxu1 %v12810_v45  ;;  %v9359_v41 = vpop.permute.xlu0 %131 }
  0xed   :  { %v467_v61 = vpop.f32.mrf.mxu0  ;;  %1599 = vmatmul.mubr.f32.gmra.mxu0 %v12884_v6  ;;  %v790_v63 = vpop.f32.mrf.mxu1  ;;  %12885 = vst [vmem:[#allocation116_spill] sm:$0xff] %v9359_v41 }
  0xee   :  { %v9355_v35 = vadd.f32 %v790_v63, %v459_v38  ;;  %1604 = vmatprep.mubr.f32.mxu0 %v12810_v45  ;;  %v468_v46 = vadd.f32 %v467_v61, %v9298_v17  ;;  %7285 = vperm.xlu0 %7940, %v7198_v57   ;;  %v12886_v63 = vld [vmem:[#allocation26_spill] sm:$0xff]  ;;  %v7199_v61 = vld [vmem:[%s12266_s3 + $0x80] sm:$0xff] }
  0xef   :  { %v469_v55 = vpop.f32.mrf.mxu0  ;;  %v795_v60 = vpop.f32.mrf.mxu1  ;;  %1843 = vmatmul.mubr.f32.gmra.mxu1 %v12884_v6  ;;  %7290 = vperm.xlu1 %7941, %v7199_v61  }
  0xf0   :  { %v9362_v50 = vadd.f32 %v795_v60, %v468_v46  ;;  %v470_v39 = vadd.f32 %v469_v55, %v9298_v17  ;;  %1848 = vmatprep.mubr.f32.mxu1 %v12810_v45  ;;  %v9374_v46 = vpop.permute.xlu1 %7210 }
  0xf1   :  { %v478_v47 = vpop.f32.mrf.mxu0  ;;  %1606 = vmatmul.mubr.f32.gmra.mxu0 %v12886_v63  ;;  %v797_v38 = vpop.f32.mrf.mxu1  ;;  %12887 = vst [vmem:[#allocation117_spill] sm:$0xff] %v9374_v46 }
  0xf2   :  { %v9370_v32 = vadd.f32 %v797_v38, %v470_v39  ;;  %1611 = vmatprep.mubr.f32.mxu0 %v12810_v45  ;;  %v479_v57 = vadd.f32 %v478_v47, %v9359_v41  ;;  %v12888_v39 = vld [vmem:[#allocation30_spill] sm:$0xff] }
  0xf3   :  { %v480_v55 = vpop.f32.mrf.mxu0  ;;  %v802_v60 = vpop.f32.mrf.mxu1  ;;  %1850 = vmatmul.mubr.f32.gmra.mxu1 %v12886_v63  ;;  %v7200_v47 = vld [vmem:[%s12266_s3 + $0x88] sm:$0xff] }
  0xf4   :  { %v9377_v17 = vadd.f32 %v802_v60, %v479_v57  ;;  %v481_v29 = vadd.f32 %v480_v55, %v9359_v41  ;;  %1855 = vmatprep.mubr.f32.mxu1 %v12810_v45  ;;  %v9389_v57 = vpop.permute.xlu0 %141  ;;  %7295 = vperm.xlu0 %7940, %v7200_v47   ;;  %v9396_v1 = vpop.permute.xlu1 %166 }
  0xf5   :  { %v489_v15 = vpop.f32.mrf.mxu0  ;;  %1613 = vmatmul.mubr.f32.gmra.mxu0 %v12888_v39  ;;  %v804_v38 = vpop.f32.mrf.mxu1  ;;  %12889 = vst [vmem:[#allocation118_spill] sm:$0xff] %v9389_v57  ;;  %12890 = vst [vmem:[#allocation119_spill] sm:$0xff] %v9396_v1 }
  0xf6   :  { %v9385_v14 = vadd.f32 %v804_v38, %v481_v29  ;;  %1618 = vmatprep.mubr.f32.mxu0 %v12810_v45  ;;  %v490_v61 = vadd.f32 %v489_v15, %v9317_v8  ;;  %v12891_v38 = vld [vmem:[#allocation31_spill] sm:$0xff] }
  0xf7   :  { %v491_v55 = vpop.f32.mrf.mxu0  ;;  %v809_v60 = vpop.f32.mrf.mxu1  ;;  %1857 = vmatmul.mubr.f32.gmra.mxu1 %v12888_v39  ;;  %v7201_v15 = vld [vmem:[%s12266_s3 + $0x90] sm:$0xff] }
  0xf8   :  { %v9392_v41 = vadd.f32 %v809_v60, %v490_v61  ;;  %v492_v2 = vadd.f32 %v491_v55, %v9317_v8  ;;  %1862 = vmatprep.mubr.f32.mxu1 %v12810_v45  ;;  %7300 = vperm.xlu1 %7941, %v7201_v15  }
  0xf9   :  { %v500_v29 = vpop.f32.mrf.mxu0  ;;  %1620 = vmatmul.mubr.f32.gmra.mxu0 %v12891_v38  ;;  %v811_v59 = vpop.f32.mrf.mxu1 }
  0xfa   :  { %v9402_v47 = vadd.f32 %v811_v59, %v492_v2  ;;  %1625 = vmatprep.mubr.f32.mxu0 %v12810_v45  ;;  %v501_v61 = vadd.f32 %v500_v29, %v9389_v57  ;;  %v7202_v2 = vld [vmem:[%s12266_s3 + $0x98] sm:$0xff] }
  0xfb   :  { %v502_v55 = vpop.f32.mrf.mxu0  ;;  %v816_v60 = vpop.f32.mrf.mxu1  ;;  %1864 = vmatmul.mubr.f32.gmra.mxu1 %v12891_v38  ;;  %7305 = vperm.xlu0 %7940, %v7202_v2  }
  0xfc   :  { %v9407_v8 = vadd.f32 %v816_v60, %v501_v61  ;;  %v503_v56 = vadd.f32 %v502_v55, %v9389_v57  ;;  %1869 = vmatprep.mubr.f32.mxu1 %v12810_v45  ;;  %v9419_v61 = vpop.permute.xlu0 %151  ;;  %v9421_v60 = vpop.permute.xlu1 %171 }
  0xfd   :  { %v511_v46 = vpop.f32.mrf.mxu0  ;;  %1627 = vmatmul.mubr.f32.gmra.mxu0 %v12892_v43  ;;  %v818_v59 = vpop.f32.mrf.mxu1  ;;  %12893 = vst [vmem:[#allocation120_spill] sm:$0xff] %v9419_v61  ;;  %12894 = vst [vmem:[#allocation121_spill] sm:$0xff] %v9421_v60 }
  0xfe   :  { %v9415_v29 = vadd.f32 %v818_v59, %v503_v56  ;;  %1632 = vmatprep.mubr.f32.mxu0 %v12810_v45  ;;  %v512_v15 = vadd.f32 %v511_v46, %v9334_v9  ;;  %v12895_v59 = vld [vmem:[#allocation39_spill] sm:$0xff]  ;;  %v7203_v46 = vld [vmem:[%s12266_s3 + $0xa0] sm:$0xff] }
  0xff   :  { %v513_v55 = vpop.f32.mrf.mxu0  ;;  %v823_v57 = vpop.f32.mrf.mxu1  ;;  %1871 = vmatmul.mubr.f32.gmra.mxu1 %v12892_v43  ;;  %7310 = vperm.xlu1 %7941, %v7203_v46  }
 0x100   :  { %v9424_v48 = vadd.f32 %v823_v57, %v512_v15  ;;  %v514_v34 = vadd.f32 %v513_v55, %v9334_v9  ;;  %1876 = vmatprep.mubr.f32.mxu1 %v12810_v45  ;;  %v9441_v36 = vpop.permute.xlu1 %176 }
 0x101   :  { %v522_v56 = vpop.f32.mrf.mxu0  ;;  %1634 = vmatmul.mubr.f32.gmra.mxu0 %v12895_v59  ;;  %v825_v42 = vpop.f32.mrf.mxu1  ;;  %12897 = vst [vmem:[#allocation123_spill] sm:$0xff] %v9441_v36 }
 0x102   :  { %v9432_v33 = vadd.f32 %v825_v42, %v514_v34  ;;  %1639 = vmatprep.mubr.f32.mxu0 %v12810_v45  ;;  %v523_v2 = vadd.f32 %v522_v56, %v9419_v61  ;;  %v12898_v34 = vld [vmem:[#allocation44_spill] sm:$0xff]  ;;  %v7204_v56 = vld [vmem:[%s12266_s3 + $0xa8] sm:$0xff] }
 0x103   :  { %v524_v57 = vpop.f32.mrf.mxu0  ;;  %v830_v15 = vpop.f32.mrf.mxu1  ;;  %1878 = vmatmul.mubr.f32.gmra.mxu1 %v12895_v59  ;;  %7315 = vperm.xlu0 %7940, %v7204_v56  }
 0x104   :  { %v9437_v55 = vadd.f32 %v830_v15, %v523_v2  ;;  %v525_v9 = vadd.f32 %v524_v57, %v9419_v61  ;;  %1883 = vmatprep.mubr.f32.mxu1 %v12810_v45  ;;  %v9451_v15 = vpop.permute.xlu0 %161 }
 0x105   :  { %v533_v37 = vpop.f32.mrf.mxu0  ;;  %1641 = vmatmul.mubr.f32.gmra.mxu0 %v12898_v34  ;;  %v832_v42 = vpop.f32.mrf.mxu1  ;;  %12900 = vst [vmem:[#allocation125_spill] sm:$0xff] %v9451_v15 }
 0x106   :  { %12896 = vst [vmem:[#allocation122_spill] sm:$0xff] %v9437_v55  ;;  %v9447_v46 = vadd.f32 %v832_v42, %v525_v9  ;;  %1646 = vmatprep.mubr.f32.mxu0 %v12810_v45  ;;  %v534_v2 = vadd.f32 %v533_v37, %v9349_v4  ;;  %v12902_v9 = vld [vmem:[#allocation50_spill] sm:$0xff] }
 0x107   :  { %v535_v57 = vpop.f32.mrf.mxu0  ;;  %v837_v61 = vpop.f32.mrf.mxu1  ;;  %1885 = vmatmul.mubr.f32.gmra.mxu1 %v12898_v34  ;;  %v7205_v37 = vld [vmem:[%s12266_s3 + $0xb0] sm:$0xff] }
 0x108   :  { %12899 = vst [vmem:[#allocation124_spill] sm:$0xff] %v9447_v46  ;;  %v9454_v12 = vadd.f32 %v837_v61, %v534_v2  ;;  %v536_v59 = vadd.f32 %v535_v57, %v9349_v4  ;;  %1890 = vmatprep.mubr.f32.mxu1 %v12810_v45  ;;  %v9466_v61 = vpop.permute.xlu1 %181  ;;  %7320 = vperm.xlu1 %7941, %v7205_v37  }
 0x109   :  { %v544_v55 = vpop.f32.mrf.mxu0  ;;  %1648 = vmatmul.mubr.f32.gmra.mxu0 %v12902_v9  ;;  %v839_v42 = vpop.f32.mrf.mxu1  ;;  %12904 = vst [vmem:[#allocation128_spill] sm:$0xff] %v9466_v61 }
 0x10a   :  { %12901 = vst [vmem:[#allocation126_spill] sm:$0xff] %v9454_v12  ;;  %v9462_v46 = vadd.f32 %v839_v42, %v536_v59  ;;  %1653 = vmatprep.mubr.f32.mxu0 %v12810_v45  ;;  %v545_v56 = vadd.f32 %v544_v55, %v9451_v15  ;;  %v12906_v59 = vld [vmem:[#allocation54_spill] sm:$0xff]  ;;  %v7206_v55 = vld [vmem:[%s12266_s3 + $0xb8] sm:$0xff] }
 0x10b   :  { %v546_v2 = vpop.f32.mrf.mxu0  ;;  %v844_v57 = vpop.f32.mrf.mxu1  ;;  %1892 = vmatmul.mubr.f32.gmra.mxu1 %v12902_v9  ;;  %7325 = vperm.xlu0 %7940, %v7206_v55  }
 0x10c   :  { %12903 = vst [vmem:[#allocation127_spill] sm:$0xff] %v9462_v46  ;;  %v9469_v4 = vadd.f32 %v844_v57, %v545_v56  ;;  %v547_v34 = vadd.f32 %v546_v2, %v9451_v15  ;;  %1897 = vmatprep.mubr.f32.mxu1 %v12810_v45  ;;  %v9486_v9 = vpop.permute.xlu1 %186 }
 0x10d   :  { %v555_v12 = vpop.f32.mrf.mxu0  ;;  %1655 = vmatmul.mubr.f32.gmra.mxu0 %v12906_v59  ;;  %v846_v42 = vpop.f32.mrf.mxu1  ;;  %12909 = vst [vmem:[#allocation132_spill] sm:$0xff] %v9486_v9 }
 0x10e   :  { %12905 = vst [vmem:[#allocation129_spill] sm:$0xff] %v9469_v4  ;;  %v9477_v46 = vadd.f32 %v846_v42, %v547_v34  ;;  %1660 = vmatprep.mubr.f32.mxu0 %v12810_v45  ;;  %v556_v37 = vadd.f32 %v555_v12, %v9396_v1  ;;  %v12910_v34 = vld [vmem:[#allocation55_spill] sm:$0xff]  ;;  %v7207_v12 = vld [vmem:[%s12266_s3 + $0xc0] sm:$0xff] }
 0x10f   :  { %v557_v56 = vpop.f32.mrf.mxu0  ;;  %v851_v57 = vpop.f32.mrf.mxu1  ;;  %1899 = vmatmul.mubr.f32.gmra.mxu1 %v12906_v59  ;;  %7330 = vperm.xlu1 %7941, %v7207_v12  }
 0x110   :  { %12907 = vst [vmem:[#allocation130_spill] sm:$0xff] %v9477_v46  ;;  %v9482_v2 = vadd.f32 %v851_v57, %v556_v37  ;;  %v558_v15 = vadd.f32 %v557_v56, %v9396_v1  ;;  %1904 = vmatprep.mubr.f32.mxu1 %v12810_v45  ;;  %v12913_v46 = vld [vmem:[#allocation62_spill] sm:$0xff]  ;;  %v9506_v12 = vpop.permute.xlu1 %191 }
 0x111   :  { %v566_v4 = vpop.f32.mrf.mxu0  ;;  %1662 = vmatmul.mubr.f32.gmra.mxu0 %v12910_v34  ;;  %v853_v42 = vpop.f32.mrf.mxu1  ;;  %12915 = vst [vmem:[#allocation136_spill] sm:$0xff] %v9506_v12 }
 0x112   :  { %12908 = vst [vmem:[#allocation131_spill] sm:$0xff] %v9482_v2  ;;  %v9492_v55 = vadd.f32 %v853_v42, %v558_v15  ;;  %1667 = vmatprep.mubr.f32.mxu0 %v12810_v45  ;;  %v567_v37 = vadd.f32 %v566_v4, %v9421_v60 }
 0x113   :  { %v568_v56 = vpop.f32.mrf.mxu0  ;;  %v858_v57 = vpop.f32.mrf.mxu1  ;;  %1906 = vmatmul.mubr.f32.gmra.mxu1 %v12910_v34 }
 0x114   :  { %12911 = vst [vmem:[#allocation133_spill] sm:$0xff] %v9492_v55  ;;  %v9497_v1 = vadd.f32 %v858_v57, %v567_v37  ;;  %v569_v59 = vadd.f32 %v568_v56, %v9421_v60  ;;  %1911 = vmatprep.mubr.f32.mxu1 %v12810_v45  ;;  %v12916_v60 = vld [vmem:[#allocation63_spill] sm:$0xff] }
 0x115   :  { %v577_v2 = vpop.f32.mrf.mxu0  ;;  %1669 = vmatmul.mubr.f32.gmra.mxu0 %v12913_v46  ;;  %v860_v15 = vpop.f32.mrf.mxu1 }
 0x116   :  { %12912 = vst [vmem:[#allocation134_spill] sm:$0xff] %v9497_v1  ;;  %v9502_v42 = vadd.f32 %v860_v15, %v569_v59  ;;  %1674 = vmatprep.mubr.f32.mxu0 %v12810_v45  ;;  %v578_v4 = vadd.f32 %v577_v2, %v9441_v36 }
 0x117   :  { %v579_v55 = vpop.f32.mrf.mxu0  ;;  %v865_v34 = vpop.f32.mrf.mxu1  ;;  %1913 = vmatmul.mubr.f32.gmra.mxu1 %v12913_v46  ;;  %v12920_v46 = vld [vmem:[#allocation70_spill] sm:$0xff] }
 0x118   :  { %12914 = vst [vmem:[#allocation135_spill] sm:$0xff] %v9502_v42  ;;  %v9509_v37 = vadd.f32 %v865_v34, %v578_v4  ;;  %v580_v56 = vadd.f32 %v579_v55, %v9441_v36  ;;  %1918 = vmatprep.mubr.f32.mxu1 %v12810_v45  ;;  %v9523_v4 = vpop.permute.xlu1 %196 }
 0x119   :  { %v588_v57 = vpop.f32.mrf.mxu0  ;;  %1676 = vmatmul.mubr.f32.gmra.mxu0 %v12916_v60  ;;  %v867_v59 = vpop.f32.mrf.mxu1  ;;  %12919 = vst [vmem:[#allocation139_spill] sm:$0xff] %v9523_v4 }
 0x11a   :  { %v9514_v15 = vadd.f32 %v867_v59, %v580_v56  ;;  %1681 = vmatprep.mubr.f32.mxu0 %v12810_v45  ;;  %v589_v2 = vadd.f32 %v588_v57, %v9466_v61 }
 0x11b   :  { %v590_v42 = vpop.f32.mrf.mxu0  ;;  %v872_v1 = vpop.f32.mrf.mxu1  ;;  %1920 = vmatmul.mubr.f32.gmra.mxu1 %v12916_v60 }
 0x11c   :  { %12917 = vst [vmem:[#allocation137_spill] sm:$0xff] %v9514_v15  ;;  %v9519_v34 = vadd.f32 %v872_v1, %v589_v2  ;;  %v591_v55 = vadd.f32 %v590_v42, %v9466_v61  ;;  %1925 = vmatprep.mubr.f32.mxu1 %v12810_v45  ;;  %v7773_v1 = vld [vmem:[#allocation2] sm:$0x1] }
 0x11d   :  { %v599_v36 = vpop.f32.mrf.mxu0  ;;  %1683 = vmatmul.mubr.f32.gmra.mxu0 %v12920_v46  ;;  %v874_v56 = vpop.f32.mrf.mxu1  ;;  %7776 = vperm.xlu0 %7940, %v7773_v1  }
 0x11e   :  { %12918 = vst [vmem:[#allocation138_spill] sm:$0xff] %v9519_v34  ;;  %v9526_v59 = vadd.f32 %v874_v56, %v591_v55  ;;  %1688 = vmatprep.mubr.f32.mxu0 %v12810_v45  ;;  %v600_v57 = vadd.f32 %v599_v36, %v9486_v9  ;;  %v12923_v34 = vld [vmem:[#allocation74_spill] sm:$0xff] }
 0x11f   :  { %v601_v15 = vpop.f32.mrf.mxu0  ;;  %v879_v60 = vpop.f32.mrf.mxu1  ;;  %1927 = vmatmul.mubr.f32.gmra.mxu1 %v12920_v46 }
 0x120   :  { %12921 = vst [vmem:[#allocation140_spill] sm:$0xff] %v9526_v59  ;;  %v9531_v42 = vadd.f32 %v879_v60, %v600_v57  ;;  %v602_v2 = vadd.f32 %v601_v15, %v9486_v9  ;;  %1932 = vmatprep.mubr.f32.mxu1 %v12810_v45  ;;  %v9540_v59 = vpop.permute.xlu1 %201  ;;  %v12926_v9 = vld [vmem:[#allocation75_spill] sm:$0xff] }
 0x121   :  { %v610_v61 = vpop.f32.mrf.mxu0  ;;  %1690 = vmatmul.mubr.f32.gmra.mxu0 %v12923_v34  ;;  %v881_v55 = vpop.f32.mrf.mxu1  ;;  %12925 = vst [vmem:[#allocation143_spill] sm:$0xff] %v9540_v59 }
 0x122   :  { %12922 = vst [vmem:[#allocation141_spill] sm:$0xff] %v9531_v42  ;;  %v9536_v56 = vadd.f32 %v881_v55, %v602_v2  ;;  %1695 = vmatprep.mubr.f32.mxu0 %v12810_v45  ;;  %v611_v36 = vadd.f32 %v610_v61, %v9506_v12 }
 0x123   :  { %v612_v46 = vpop.f32.mrf.mxu0  ;;  %v886_v60 = vpop.f32.mrf.mxu1  ;;  %1934 = vmatmul.mubr.f32.gmra.mxu1 %v12923_v34  ;;  %v12929_v34 = vld [vmem:[#allocation82_spill] sm:$0xff] }
 0x124   :  { %12924 = vst [vmem:[#allocation142_spill] sm:$0xff] %v9536_v56  ;;  %v9543_v15 = vadd.f32 %v886_v60, %v611_v36  ;;  %v613_v57 = vadd.f32 %v612_v46, %v9506_v12  ;;  %1939 = vmatprep.mubr.f32.mxu1 %v12810_v45  ;;  %v9557_v60 = vpop.permute.xlu1 %206 }
 0x125   :  { %v621_v1 = vpop.f32.mrf.mxu0  ;;  %1697 = vmatmul.mubr.f32.gmra.mxu0 %v12926_v9  ;;  %v888_v2 = vpop.f32.mrf.mxu1  ;;  %12928 = vst [vmem:[#allocation145_spill] sm:$0xff] %v9557_v60 }
 0x126   :  { %v9548_v55 = vadd.f32 %v888_v2, %v613_v57  ;;  %1702 = vmatprep.mubr.f32.mxu0 %v12810_v45  ;;  %v622_v61 = vadd.f32 %v621_v1, %v9523_v4 }
 0x127   :  { %v623_v56 = vpop.f32.mrf.mxu0  ;;  %v893_v42 = vpop.f32.mrf.mxu1  ;;  %1941 = vmatmul.mubr.f32.gmra.mxu1 %v12926_v9 }
 0x128   :  { %12927 = vst [vmem:[#allocation144_spill] sm:$0xff] %v9548_v55  ;;  %v9553_v36 = vadd.f32 %v893_v42, %v622_v61  ;;  %v624_v46 = vadd.f32 %v623_v56, %v9523_v4  ;;  %1946 = vmatprep.mubr.f32.mxu1 %v12810_v45 }
 0x129   :  { %v632_v12 = vpop.f32.mrf.mxu0  ;;  %1704 = vmatmul.mubr.f32.gmra.mxu0 %v12929_v34  ;;  %v895_v57 = vpop.f32.mrf.mxu1 }
 0x12a   :  { %v9560_v2 = vadd.f32 %v895_v57, %v624_v46  ;;  %1709 = vmatprep.mubr.f32.mxu0 %v12810_v45  ;;  %v633_v1 = vadd.f32 %v632_v12, %v9540_v59  ;;  %v9574_v57 = vpop.permute.xlu1 %211 }
 0x12b   :  { %v634_v55 = vpop.f32.mrf.mxu0  ;;  %v900_v9 = vpop.f32.mrf.mxu1  ;;  %1948 = vmatmul.mubr.f32.gmra.mxu1 %v12929_v34  ;;  %12932 = vst [vmem:[#allocation148_spill] sm:$0xff] %v9574_v57 }
 0x12c   :  { %12930 = vst [vmem:[#allocation146_spill] sm:$0xff] %v9560_v2  ;;  %v9565_v42 = vadd.f32 %v900_v9, %v633_v1  ;;  %v635_v56 = vadd.f32 %v634_v55, %v9540_v59  ;;  %1953 = vmatprep.mubr.f32.mxu1 %v12810_v45 }
 0x12d   :  { %v643_v61 = vpop.f32.mrf.mxu0  ;;  %1711 = vmatmul.mubr.f32.gmra.mxu0 %v8943_v0  ;;  %v902_v4 = vpop.f32.mrf.mxu1 }
 0x12e   :  { %v9570_v46 = vadd.f32 %v902_v4, %v635_v56  ;;  %1716 = vmatprep.mubr.f32.mxu0 %v12810_v45  ;;  %v644_v12 = vadd.f32 %v643_v61, %v9557_v60 }
 0x12f   :  { %v645_v2 = vpop.f32.mrf.mxu0  ;;  %v907_v34 = vpop.f32.mrf.mxu1  ;;  %1955 = vmatmul.mubr.f32.gmra.mxu1 %v8943_v0 }
 0x130   :  { %12931 = vst [vmem:[#allocation147_spill] sm:$0xff] %v9570_v46  ;;  %v9577_v9 = vadd.f32 %v907_v34, %v644_v12  ;;  %v646_v55 = vadd.f32 %v645_v2, %v9557_v60  ;;  %1960 = vmatprep.mubr.f32.mxu1 %v12810_v45 }
 0x131   :  { %v654_v1 = vpop.f32.mrf.mxu0  ;;  %1718 = vmatmul.mubr.f32.gmra.mxu0 %v8951_v27  ;;  %v909_v4 = vpop.f32.mrf.mxu1 }
 0x132   :  { %v9582_v56 = vadd.f32 %v909_v4, %v646_v55  ;;  %1723 = vmatprep.mubr.f32.mxu0 %v12810_v45  ;;  %v655_v61 = vadd.f32 %v654_v1, %v9574_v57 }
 0x133   :  { %v656_v59 = vpop.f32.mrf.mxu0  ;;  %v914_v46 = vpop.f32.mrf.mxu1  ;;  %1962 = vmatmul.mubr.f32.gmra.mxu1 %v8951_v27 }
 0x134   :  { %12933 = vst [vmem:[#allocation149_spill] sm:$0xff] %v9582_v56  ;;  %v9587_v34 = vadd.f32 %v914_v46, %v655_v61  ;;  %v657_v2 = vadd.f32 %v656_v59, %v9574_v57  ;;  %1967 = vmatprep.mubr.f32.mxu1 %v12810_v45 }
 0x135   :  { %v995_v12 = vpop.f32.mrf.mxu0  ;;  %1725 = vmatmul.mubr.f32.gmra.mxu0 %v8974_v7  ;;  %v916_v60 = vpop.f32.mrf.mxu1 }
 0x136   :  { %v996_v55 = vadd.f32 %v995_v12, %v9238_v40  ;;  %v9593_v4 = vadd.f32 %v916_v60, %v657_v2  ;;  %1730 = vmatprep.mubr.f32.mxu0 %v12810_v45 }
 0x137   :  { %v997_v1 = vpop.f32.mrf.mxu0  ;;  %v1265_v56 = vpop.f32.mrf.mxu1  ;;  %1969 = vmatmul.mubr.f32.gmra.mxu1 %v8974_v7 }
 0x138   :  { %v998_v46 = vadd.f32 %v997_v1, %v9253_v28  ;;  %v9598_v61 = vadd.f32 %v1265_v56, %v996_v55  ;;  %1974 = vmatprep.mubr.f32.mxu1 %v12810_v45  ;;  %v12934_v1 = vld [vmem:[#allocation17_spill] sm:$0xff] }
 0x139   :  { %v1003_v59 = vpop.f32.mrf.mxu0  ;;  %1732 = vmatmul.mubr.f32.gmra.mxu0 %v9008_v25  ;;  %v1267_v57 = vpop.f32.mrf.mxu1 }
 0x13a   :  { %v1004_v40 = vadd.f32 %v1003_v59, %v9258_v51  ;;  %v9603_v60 = vadd.f32 %v1267_v57, %v998_v46  ;;  %2050 = vmatprep.mubr.f32.mxu0 %v12810_v45 }
 0x13b   :  { %v1005_v2 = vpop.f32.mrf.mxu0  ;;  %v1274_v12 = vpop.f32.mrf.mxu1  ;;  %1976 = vmatmul.mubr.f32.gmra.mxu1 %v9008_v25 }
 0x13c   :  { %v1006_v28 = vadd.f32 %v1005_v2, %v9268_v52  ;;  %v9608_v56 = vadd.f32 %v1274_v12, %v1004_v40  ;;  %2410 = vmatprep.mubr.f32.mxu1 %v12810_v45 }
 0x13d   :  { %v1011_v55 = vpop.f32.mrf.mxu0  ;;  %2056 = vmatmul.mubr.f32.vlgmr.msra.gmra.mxu0 %v12934_v1  ;;  %v1276_v7 = vpop.f32.mrf.mxu1  ;;  %v12947_v1 = vld [vmem:[#allocation39_spill] sm:$0xff] }
 0x13e   :  { %v1012_v51 = vadd.f32 %v1011_v55, %v9275_v23  ;;  %v9613_v57 = vadd.f32 %v1276_v7, %v1006_v28  ;;  %2061 = vmatprep.mubr.f32.mxu0 %v12810_v45  ;;  %2619 = vmatpush1.msra.mxu0 %v9208_v26  ;;  %v12935_v23 = vld [vmem:[#allocation20_spill] sm:$0xff] }
 0x13f   :  { %v1013_v46 = vpop.f32.mrf.mxu0  ;;  %v1283_v59 = vpop.f32.mrf.mxu1  ;;  %2412 = vmatmul.mubr.f32.vlgmr.msra.gmra.mxu1 %v12872_v31  ;;  %2622 = vmatprep.subr.mxu0 %v9214_v20  ;;  %v12968_v31 = vld [vmem:[#allocation62_spill] sm:$0xff] }
 0x140   :  { %v1014_v52 = vadd.f32 %v1013_v46, %v9282_v21  ;;  %v9620_v40 = vadd.f32 %v1283_v59, %v1012_v51  ;;  %2890 = vmatpush1.msra.mxu1 %v9191_v10  ;;  %2417 = vmatprep.mubr.f32.mxu1 %v12810_v45  ;;  %v12936_v51 = vand.u32 4294901760, %v9062_v58 }
 0x141   :  { %v1019_v7 = vpop.f32.mrf.mxu0  ;;  %2067 = vmatmul.mubr.f32.gmra.mxu0 %v12935_v23  ;;  %v1285_v2 = vpop.f32.mrf.mxu1  ;;  %2892 = vmatprep.subr.mxu1 %v9194_v11 }
 0x142   :  { %v1020_v12 = vadd.f32 %v1019_v7, %v9294_v22  ;;  %v9627_v28 = vadd.f32 %v1285_v2, %v1014_v52  ;;  %2072 = vmatprep.mubr.f32.mxu0 %v12810_v45  ;;  %2625 = vmatpush1.msra.mxu0 %v9224_v53  ;;  %v12937_v52 = vld [vmem:[#allocation23_spill] sm:$0xff] }
 0x143   :  { %v1021_v21 = vpop.f32.mrf.mxu0  ;;  %v1292_v55 = vpop.f32.mrf.mxu1  ;;  %2419 = vmatmul.mubr.f32.gmra.mxu1 %v12874_v54  ;;  %3184 = vmatprep.subr.mxu0 %v12936_v51  ;;  %v12938_v51 = vld [vmem:[#allocation27_spill] sm:$0xff] }
 0x144   :  { %v1022_v46 = vadd.f32 %v1021_v21, %v9305_v44  ;;  %v9635_v59 = vadd.f32 %v1292_v55, %v1020_v12  ;;  %2424 = vmatprep.mubr.f32.mxu1 %v12810_v45  ;;  %2894 = vmatpush1.msra.mxu1 %v9210_v49  ;;  %v12963_v54 = vld [vmem:[#allocation55_spill] sm:$0xff] }
 0x145   :  { %v1027_v22 = vpop.f32.mrf.mxu0  ;;  %2078 = vmatmul.mubr.f32.gmra.mxu0 %v12937_v52  ;;  %v1294_v7 = vpop.f32.mrf.mxu1  ;;  %3434 = vmatprep.subr.mxu1 %v9053_v30  ;;  %v12946_v52 = vld [vmem:[#allocation122_spill] sm:$0xff] }
 0x146   :  { %v1028_v2 = vadd.f32 %v1027_v22, %v9313_v62  ;;  %v9642_v23 = vadd.f32 %v1294_v7, %v1022_v46  ;;  %2083 = vmatprep.mubr.f32.mxu0 %v12810_v45 }
 0x147   :  { %v1029_v58 = vpop.f32.mrf.mxu0  ;;  %v1301_v44 = vpop.f32.mrf.mxu1  ;;  %2426 = vmatmul.mubr.f32.gmra.mxu1 %v12877_v16  ;;  %v12962_v16 = vld [vmem:[#allocation134_spill] sm:$0xff] }
 0x148   :  { %v1030_v12 = vadd.f32 %v1029_v58, %v9320_v24  ;;  %v9647_v21 = vadd.f32 %v1301_v44, %v1028_v2  ;;  %2431 = vmatprep.mubr.f32.mxu1 %v12810_v45  ;;  %v12939_v44 = vld [vmem:[#allocation32_spill] sm:$0xff] }
 0x149   :  { %v1035_v55 = vpop.f32.mrf.mxu0  ;;  %2089 = vmatmul.mubr.f32.gmra.mxu0 %v12938_v51  ;;  %v1303_v30 = vpop.f32.mrf.mxu1 }
 0x14a   :  { %v1036_v62 = vadd.f32 %v1035_v55, %v9330_v3  ;;  %v9652_v46 = vadd.f32 %v1303_v30, %v1030_v12  ;;  %2094 = vmatprep.mubr.f32.mxu0 %v12810_v45 }
 0x14b   :  { %v1037_v22 = vpop.f32.mrf.mxu0  ;;  %v1310_v7 = vpop.f32.mrf.mxu1  ;;  %2433 = vmatmul.mubr.f32.gmra.mxu1 %v12879_v18  ;;  %v12959_v18 = vld [vmem:[#allocation54_spill] sm:$0xff] }
 0x14c   :  { %v1038_v24 = vadd.f32 %v1037_v22, %v9340_v13  ;;  %v9657_v2 = vadd.f32 %v1310_v7, %v1036_v62  ;;  %2438 = vmatprep.mubr.f32.mxu1 %v12810_v45  ;;  %v12940_v7 = vld [vmem:[#allocation36_spill] sm:$0xff] }
 0x14d   :  { %v1043_v58 = vpop.f32.mrf.mxu0  ;;  %2100 = vmatmul.mubr.f32.gmra.mxu0 %v12939_v44  ;;  %v1312_v51 = vpop.f32.mrf.mxu1 }
 0x14e   :  { %v1044_v3 = vadd.f32 %v1043_v58, %v9345_v5  ;;  %v9662_v12 = vadd.f32 %v1312_v51, %v1038_v24  ;;  %2105 = vmatprep.mubr.f32.mxu0 %v12810_v45 }
 0x14f   :  { %v1045_v55 = vpop.f32.mrf.mxu0  ;;  %v1319_v30 = vpop.f32.mrf.mxu1  ;;  %2440 = vmatmul.mubr.f32.gmra.mxu1 %v12882_v19  ;;  %v12958_v19 = vld [vmem:[#allocation131_spill] sm:$0xff] }
 0x150   :  { %v1046_v13 = vadd.f32 %v1045_v55, %v9355_v35  ;;  %v9667_v62 = vadd.f32 %v1319_v30, %v1044_v3  ;;  %2445 = vmatprep.mubr.f32.mxu1 %v12810_v45  ;;  %v12941_v30 = vld [vmem:[#allocation40_spill] sm:$0xff] }
 0x151   :  { %v1051_v22 = vpop.f32.mrf.mxu0  ;;  %2111 = vmatmul.mubr.f32.gmra.mxu0 %v12940_v7  ;;  %v1321_v44 = vpop.f32.mrf.mxu1 }
 0x152   :  { %v1052_v5 = vadd.f32 %v1051_v22, %v9362_v50  ;;  %v9672_v51 = vadd.f32 %v1321_v44, %v1046_v13  ;;  %2116 = vmatprep.mubr.f32.mxu0 %v12810_v45 }
 0x153   :  { %v1053_v24 = vpop.f32.mrf.mxu0  ;;  %v1328_v58 = vpop.f32.mrf.mxu1  ;;  %2447 = vmatmul.mubr.f32.gmra.mxu1 %v12884_v6  ;;  %v12955_v6 = vld [vmem:[#allocation50_spill] sm:$0xff] }
 0x154   :  { %v1054_v35 = vadd.f32 %v1053_v24, %v9370_v32  ;;  %v9677_v3 = vadd.f32 %v1328_v58, %v1052_v5  ;;  %2452 = vmatprep.mubr.f32.mxu1 %v12810_v45  ;;  %v12942_v58 = vld [vmem:[#allocation45_spill] sm:$0xff] }
 0x155   :  { %v1059_v55 = vpop.f32.mrf.mxu0  ;;  %2122 = vmatmul.mubr.f32.gmra.mxu0 %v12941_v30  ;;  %v1330_v7 = vpop.f32.mrf.mxu1 }
 0x156   :  { %v1060_v50 = vadd.f32 %v1059_v55, %v9377_v17  ;;  %v9682_v44 = vadd.f32 %v1330_v7, %v1054_v35  ;;  %2127 = vmatprep.mubr.f32.mxu0 %v12810_v45 }
 0x157   :  { %v1061_v13 = vpop.f32.mrf.mxu0  ;;  %v1337_v22 = vpop.f32.mrf.mxu1  ;;  %2454 = vmatmul.mubr.f32.gmra.mxu1 %v12886_v63  ;;  %v12954_v63 = vld [vmem:[#allocation129_spill] sm:$0xff] }
 0x158   :  { %v1062_v32 = vadd.f32 %v1061_v13, %v9385_v14  ;;  %v9687_v5 = vadd.f32 %v1337_v22, %v1060_v50  ;;  %2459 = vmatprep.mubr.f32.mxu1 %v12810_v45  ;;  %v12943_v22 = vld [vmem:[#allocation49_spill] sm:$0xff] }
 0x159   :  { %v1067_v24 = vpop.f32.mrf.mxu0  ;;  %2133 = vmatmul.mubr.f32.gmra.mxu0 %v12942_v58  ;;  %v1339_v30 = vpop.f32.mrf.mxu1 }
 0x15a   :  { %v1068_v17 = vadd.f32 %v1067_v24, %v9392_v41  ;;  %v9692_v7 = vadd.f32 %v1339_v30, %v1062_v32  ;;  %2138 = vmatprep.mubr.f32.mxu0 %v12810_v45 }
 0x15b   :  { %v1069_v35 = vpop.f32.mrf.mxu0  ;;  %v1346_v55 = vpop.f32.mrf.mxu1  ;;  %2461 = vmatmul.mubr.f32.gmra.mxu1 %v12888_v39  ;;  %v12951_v39 = vld [vmem:[#allocation44_spill] sm:$0xff] }
 0x15c   :  { %v1070_v14 = vadd.f32 %v1069_v35, %v9402_v47  ;;  %v9697_v50 = vadd.f32 %v1346_v55, %v1068_v17  ;;  %2466 = vmatprep.mubr.f32.mxu1 %v12810_v45  ;;  %v12944_v55 = vld [vmem:[#allocation52_spill] sm:$0xff] }
 0x15d   :  { %v1075_v13 = vpop.f32.mrf.mxu0  ;;  %2144 = vmatmul.mubr.f32.gmra.mxu0 %v12943_v22  ;;  %v1348_v58 = vpop.f32.mrf.mxu1 }
 0x15e   :  { %v1076_v41 = vadd.f32 %v1075_v13, %v9407_v8  ;;  %v9702_v30 = vadd.f32 %v1348_v58, %v1070_v14  ;;  %2149 = vmatprep.mubr.f32.mxu0 %v12810_v45 }
 0x15f   :  { %v1077_v32 = vpop.f32.mrf.mxu0  ;;  %v1355_v24 = vpop.f32.mrf.mxu1  ;;  %2468 = vmatmul.mubr.f32.gmra.mxu1 %v12891_v38  ;;  %v12950_v38 = vld [vmem:[#allocation126_spill] sm:$0xff] }
 0x160   :  { %v1078_v47 = vadd.f32 %v1077_v32, %v9415_v29  ;;  %v9707_v17 = vadd.f32 %v1355_v24, %v1076_v41  ;;  %2473 = vmatprep.mubr.f32.mxu1 %v12810_v45  ;;  %v12945_v24 = vld [vmem:[#allocation56_spill] sm:$0xff] }
 0x161   :  { %v1083_v35 = vpop.f32.mrf.mxu0  ;;  %2155 = vmatmul.mubr.f32.gmra.mxu0 %v12944_v55  ;;  %v1357_v22 = vpop.f32.mrf.mxu1 }
 0x162   :  { %v1084_v8 = vadd.f32 %v1083_v35, %v9424_v48  ;;  %v9712_v58 = vadd.f32 %v1357_v22, %v1078_v47  ;;  %2160 = vmatprep.mubr.f32.mxu0 %v12810_v45 }
 0x163   :  { %v1085_v14 = vpop.f32.mrf.mxu0  ;;  %v1364_v13 = vpop.f32.mrf.mxu1  ;;  %2475 = vmatmul.mubr.f32.gmra.mxu1 %v12892_v43  ;;  %v12948_v43 = vld [vmem:[#allocation124_spill] sm:$0xff] }
 0x164   :  { %v1086_v29 = vadd.f32 %v1085_v14, %v9432_v33  ;;  %v9717_v41 = vadd.f32 %v1364_v13, %v1084_v8  ;;  %2480 = vmatprep.mubr.f32.mxu1 %v12810_v45  ;;  %v12949_v13 = vld [vmem:[#allocation60_spill] sm:$0xff] }
 0x165   :  { %v1091_v32 = vpop.f32.mrf.mxu0  ;;  %2166 = vmatmul.mubr.f32.gmra.mxu0 %v12945_v24  ;;  %v1366_v55 = vpop.f32.mrf.mxu1 }
 0x166   :  { %v1092_v48 = vadd.f32 %v1091_v32, %v12946_v52  ;;  %v9722_v22 = vadd.f32 %v1366_v55, %v1086_v29  ;;  %2171 = vmatprep.mubr.f32.mxu0 %v12810_v45 }
 0x167   :  { %v1093_v47 = vpop.f32.mrf.mxu0  ;;  %v1373_v35 = vpop.f32.mrf.mxu1  ;;  %2482 = vmatmul.mubr.f32.gmra.mxu1 %v12947_v1  ;;  %v12952_v1 = vld [vmem:[#allocation127_spill] sm:$0xff] }
 0x168   :  { %v1094_v33 = vadd.f32 %v1093_v47, %v12948_v43  ;;  %v9727_v8 = vadd.f32 %v1373_v35, %v1092_v48  ;;  %2487 = vmatprep.mubr.f32.mxu1 %v12810_v45  ;;  %v12953_v35 = vld [vmem:[#allocation64_spill] sm:$0xff] }
 0x169   :  { %v1099_v14 = vpop.f32.mrf.mxu0  ;;  %2177 = vmatmul.mubr.f32.gmra.mxu0 %v12949_v13  ;;  %v1375_v24 = vpop.f32.mrf.mxu1 }
 0x16a   :  { %v1100_v52 = vadd.f32 %v1099_v14, %v12950_v38  ;;  %v9732_v55 = vadd.f32 %v1375_v24, %v1094_v33  ;;  %2182 = vmatprep.mubr.f32.mxu0 %v12810_v45 }
 0x16b   :  { %v1101_v29 = vpop.f32.mrf.mxu0  ;;  %v1382_v32 = vpop.f32.mrf.mxu1  ;;  %2489 = vmatmul.mubr.f32.gmra.mxu1 %v12951_v39  ;;  %v12956_v39 = vld [vmem:[#allocation130_spill] sm:$0xff] }
 0x16c   :  { %v1102_v43 = vadd.f32 %v1101_v29, %v12952_v1  ;;  %v9737_v48 = vadd.f32 %v1382_v32, %v1100_v52  ;;  %2494 = vmatprep.mubr.f32.mxu1 %v12810_v45  ;;  %v12957_v32 = vld [vmem:[#allocation68_spill] sm:$0xff] }
 0x16d   :  { %v1107_v47 = vpop.f32.mrf.mxu0  ;;  %2188 = vmatmul.mubr.f32.gmra.mxu0 %v12953_v35  ;;  %v1384_v13 = vpop.f32.mrf.mxu1 }
 0x16e   :  { %v1108_v38 = vadd.f32 %v1107_v47, %v12954_v63  ;;  %v9742_v24 = vadd.f32 %v1384_v13, %v1102_v43  ;;  %2193 = vmatprep.mubr.f32.mxu0 %v12810_v45 }
 0x16f   :  { %v1109_v33 = vpop.f32.mrf.mxu0  ;;  %v1391_v14 = vpop.f32.mrf.mxu1  ;;  %2496 = vmatmul.mubr.f32.gmra.mxu1 %v12955_v6  ;;  %v12960_v6 = vld [vmem:[#allocation133_spill] sm:$0xff] }
 0x170   :  { %v1110_v1 = vadd.f32 %v1109_v33, %v12956_v39  ;;  %v9747_v52 = vadd.f32 %v1391_v14, %v1108_v38  ;;  %2501 = vmatprep.mubr.f32.mxu1 %v12810_v45  ;;  %v12961_v14 = vld [vmem:[#allocation72_spill] sm:$0xff] }
 0x171   :  { %v1115_v29 = vpop.f32.mrf.mxu0  ;;  %2199 = vmatmul.mubr.f32.gmra.mxu0 %v12957_v32  ;;  %v1393_v35 = vpop.f32.mrf.mxu1 }
 0x172   :  { %v1116_v63 = vadd.f32 %v1115_v29, %v12958_v19  ;;  %v9752_v13 = vadd.f32 %v1393_v35, %v1110_v1  ;;  %2204 = vmatprep.mubr.f32.mxu0 %v12810_v45 }
 0x173   :  { %v1117_v43 = vpop.f32.mrf.mxu0  ;;  %v1400_v47 = vpop.f32.mrf.mxu1  ;;  %2503 = vmatmul.mubr.f32.gmra.mxu1 %v12959_v18  ;;  %v12964_v18 = vld [vmem:[#allocation135_spill] sm:$0xff] }
 0x174   :  { %v1118_v39 = vadd.f32 %v1117_v43, %v12960_v6  ;;  %v9757_v38 = vadd.f32 %v1400_v47, %v1116_v63  ;;  %2508 = vmatprep.mubr.f32.mxu1 %v12810_v45  ;;  %v12966_v47 = vld [vmem:[#allocation76_spill] sm:$0xff] }
 0x175   :  { %v1123_v33 = vpop.f32.mrf.mxu0  ;;  %2210 = vmatmul.mubr.f32.gmra.mxu0 %v12961_v14  ;;  %v1402_v32 = vpop.f32.mrf.mxu1 }
 0x176   :  { %v1124_v19 = vadd.f32 %v1123_v33, %v12962_v16  ;;  %v9762_v35 = vadd.f32 %v1402_v32, %v1118_v39  ;;  %2215 = vmatprep.mubr.f32.mxu0 %v12810_v45 }
 0x177   :  { %v1125_v1 = vpop.f32.mrf.mxu0  ;;  %v1409_v29 = vpop.f32.mrf.mxu1  ;;  %2510 = vmatmul.mubr.f32.gmra.mxu1 %v12963_v54  ;;  %v12969_v54 = vld [vmem:[#allocation137_spill] sm:$0xff] }
 0x178   :  { %v1126_v6 = vadd.f32 %v1125_v1, %v12964_v18  ;;  %v9767_v63 = vadd.f32 %v1409_v29, %v1124_v19  ;;  %2515 = vmatprep.mubr.f32.mxu1 %v12810_v45  ;;  %v12971_v29 = vld [vmem:[#allocation80_spill] sm:$0xff] }
 0x179   :  { %v1131_v43 = vpop.f32.mrf.mxu0  ;;  %2221 = vmatmul.mubr.f32.gmra.mxu0 %v12966_v47  ;;  %v1411_v14 = vpop.f32.mrf.mxu1 }
 0x17a   :  { %12965 = vst [vmem:[#allocation122_spill] sm:$0xff] %v9767_v63  ;;  %v1132_v16 = vadd.f32 %v1131_v43, %v9509_v37  ;;  %v9772_v32 = vadd.f32 %v1411_v14, %v1126_v6  ;;  %2226 = vmatprep.mubr.f32.mxu0 %v12810_v45  ;;  %v12972_v63 = vld [vmem:[#allocation138_spill] sm:$0xff] }
 0x17b   :  { %v1133_v39 = vpop.f32.mrf.mxu0  ;;  %v1418_v33 = vpop.f32.mrf.mxu1  ;;  %2517 = vmatmul.mubr.f32.gmra.mxu1 %v12968_v31  ;;  %v12975_v31 = vld [vmem:[#allocation140_spill] sm:$0xff] }
 0x17c   :  { %12967 = vst [vmem:[#allocation124_spill] sm:$0xff] %v9772_v32  ;;  %v1134_v18 = vadd.f32 %v1133_v39, %v12969_v54  ;;  %v9777_v19 = vadd.f32 %v1418_v33, %v1132_v16  ;;  %2522 = vmatprep.mubr.f32.mxu1 %v12810_v45  ;;  %v12974_v32 = vld [vmem:[#allocation63_spill] sm:$0xff]  ;;  %v12976_v33 = vld [vmem:[#allocation84_spill] sm:$0xff] }
 0x17d   :  { %v1139_v1 = vpop.f32.mrf.mxu0  ;;  %2232 = vmatmul.mubr.f32.gmra.mxu0 %v12971_v29  ;;  %v1420_v47 = vpop.f32.mrf.mxu1 }
 0x17e   :  { %12970 = vst [vmem:[#allocation126_spill] sm:$0xff] %v9777_v19  ;;  %v1140_v37 = vadd.f32 %v1139_v1, %v12972_v63  ;;  %v9782_v14 = vadd.f32 %v1420_v47, %v1134_v18  ;;  %2237 = vmatprep.mubr.f32.mxu0 %v12810_v45  ;;  %v12977_v19 = vld [vmem:[#allocation141_spill] sm:$0xff] }
 0x17f   :  { %v1141_v6 = vpop.f32.mrf.mxu0  ;;  %v1427_v43 = vpop.f32.mrf.mxu1  ;;  %2524 = vmatmul.mubr.f32.gmra.mxu1 %v12974_v32  ;;  %v12980_v32 = vld [vmem:[#allocation142_spill] sm:$0xff] }
 0x180   :  { %12973 = vst [vmem:[#allocation127_spill] sm:$0xff] %v9782_v14  ;;  %v1142_v54 = vadd.f32 %v1141_v6, %v12975_v31  ;;  %v9787_v16 = vadd.f32 %v1427_v43, %v1140_v37  ;;  %2529 = vmatprep.mubr.f32.mxu1 %v12810_v45  ;;  %v12979_v14 = vld [vmem:[#allocation70_spill] sm:$0xff]  ;;  %v12981_v43 = vld [vmem:[#allocation88_spill] sm:$0xff] }
 0x181   :  { %v1147_v39 = vpop.f32.mrf.mxu0  ;;  %2243 = vmatmul.mubr.f32.gmra.mxu0 %v12976_v33  ;;  %v1429_v29 = vpop.f32.mrf.mxu1 }
 0x182   :  { %v1148_v63 = vadd.f32 %v1147_v39, %v12977_v19  ;;  %v9792_v47 = vadd.f32 %v1429_v29, %v1142_v54  ;;  %2248 = vmatprep.mubr.f32.mxu0 %v12810_v45 }
 0x183   :  { %v1149_v18 = vpop.f32.mrf.mxu0  ;;  %v1436_v1 = vpop.f32.mrf.mxu1  ;;  %2531 = vmatmul.mubr.f32.gmra.mxu1 %v12979_v14  ;;  %v12984_v14 = vld [vmem:[#allocation144_spill] sm:$0xff] }
 0x184   :  { %12978 = vst [vmem:[#allocation129_spill] sm:$0xff] %v9792_v47  ;;  %v1150_v31 = vadd.f32 %v1149_v18, %v12980_v32  ;;  %v9797_v37 = vadd.f32 %v1436_v1, %v1148_v63  ;;  %2536 = vmatprep.mubr.f32.mxu1 %v12810_v45  ;;  %v12983_v47 = vld [vmem:[#allocation74_spill] sm:$0xff]  ;;  %v12985_v1 = vld [vmem:[#allocation92_spill] sm:$0xff] }
 0x185   :  { %v1155_v6 = vpop.f32.mrf.mxu0  ;;  %2254 = vmatmul.mubr.f32.gmra.mxu0 %v12981_v43  ;;  %v1438_v33 = vpop.f32.mrf.mxu1 }
 0x186   :  { %v1156_v19 = vadd.f32 %v1155_v6, %v9543_v15  ;;  %v9802_v29 = vadd.f32 %v1438_v33, %v1150_v31  ;;  %2259 = vmatprep.mubr.f32.mxu0 %v12810_v45 }
 0x187   :  { %v1157_v54 = vpop.f32.mrf.mxu0  ;;  %v1445_v39 = vpop.f32.mrf.mxu1  ;;  %2538 = vmatmul.mubr.f32.gmra.mxu1 %v12983_v47  ;;  %v12988_v47 = vld [vmem:[#allocation146_spill] sm:$0xff] }
 0x188   :  { %12982 = vst [vmem:[#allocation130_spill] sm:$0xff] %v9802_v29  ;;  %v1158_v32 = vadd.f32 %v1157_v54, %v12984_v14  ;;  %v9807_v63 = vadd.f32 %v1445_v39, %v1156_v19  ;;  %2543 = vmatprep.mubr.f32.mxu1 %v12810_v45  ;;  %v12987_v29 = vld [vmem:[#allocation75_spill] sm:$0xff]  ;;  %v12989_v39 = vld [vmem:[#allocation96_spill] sm:$0xff] }
 0x189   :  { %v1163_v18 = vpop.f32.mrf.mxu0  ;;  %2265 = vmatmul.mubr.f32.gmra.mxu0 %v12985_v1  ;;  %v1447_v43 = vpop.f32.mrf.mxu1 }
 0x18a   :  { %v1164_v15 = vadd.f32 %v1163_v18, %v9553_v36  ;;  %v9812_v33 = vadd.f32 %v1447_v43, %v1158_v32  ;;  %2270 = vmatprep.mubr.f32.mxu0 %v12810_v45 }
 0x18b   :  { %v1165_v31 = vpop.f32.mrf.mxu0  ;;  %v1454_v6 = vpop.f32.mrf.mxu1  ;;  %2545 = vmatmul.mubr.f32.gmra.mxu1 %v12987_v29 }
 0x18c   :  { %12986 = vst [vmem:[#allocation131_spill] sm:$0xff] %v9812_v33  ;;  %v1166_v14 = vadd.f32 %v1165_v31, %v12988_v47  ;;  %v9817_v19 = vadd.f32 %v1454_v6, %v1164_v15  ;;  %2550 = vmatprep.mubr.f32.mxu1 %v12810_v45  ;;  %v12991_v33 = vld [vmem:[#allocation82_spill] sm:$0xff]  ;;  %v12992_v15 = vld [vmem:[#allocation147_spill] sm:$0xff] }
 0x18d   :  { %v1171_v54 = vpop.f32.mrf.mxu0  ;;  %2276 = vmatmul.mubr.f32.gmra.mxu0 %v12989_v39  ;;  %v1456_v1 = vpop.f32.mrf.mxu1  ;;  %v61_v47 = vld [vmem:[%s12263_s0 + $0x68] sm:$0x3] }
 0x18e   :  { %v1172_v36 = vadd.f32 %v1171_v54, %v9565_v42  ;;  %v9822_v43 = vadd.f32 %v1456_v1, %v1166_v14  ;;  %2281 = vmatprep.mubr.f32.mxu0 %v12810_v45  ;;  %v12993_v42 = vld [vmem:[#allocation98_spill] sm:$0xff] }
 0x18f   :  { %v1173_v32 = vpop.f32.mrf.mxu0  ;;  %v1463_v18 = vpop.f32.mrf.mxu1  ;;  %2552 = vmatmul.mubr.f32.gmra.mxu1 %v12991_v33  ;;  %v307_v33 = vsel %vm290_vm0, %v61_v47, 0 }
 0x190   :  { %12990 = vst [vmem:[#allocation133_spill] sm:$0xff] %v9822_v43  ;;  %v1174_v31 = vadd.f32 %v1173_v32, %v12992_v15  ;;  %v9830_v6 = vadd.f32 %v1463_v18, %v1172_v36  ;;  %2557 = vmatprep.mubr.f32.mxu1 %v12810_v45  ;;  %v12994_v36 = vld [vmem:[#allocation149_spill] sm:$0xff] }
 0x191   :  { %v1179_v39 = vpop.f32.mrf.mxu0  ;;  %2287 = vmatmul.mubr.f32.gmra.mxu0 %v12993_v42  ;;  %v1465_v1 = vpop.f32.mrf.mxu1  ;;  %v12995_v42 = vld [vmem:[#allocation101_spill] sm:$0xff] }
 0x192   :  { %v1180_v14 = vadd.f32 %v1179_v39, %v9577_v9  ;;  %v9835_v54 = vadd.f32 %v1465_v1, %v1174_v31  ;;  %2292 = vmatprep.mubr.f32.mxu0 %v12810_v45  ;;  %v9845_v39 = vand.u32 4294901760, %v307_v33 }
 0x193   :  { %v1181_v29 = vpop.f32.mrf.mxu0  ;;  %v1472_v43 = vpop.f32.mrf.mxu1  ;;  %2559 = vmatmul.mubr.f32.gmra.mxu1 %v8943_v0 }
 0x194   :  { %v1182_v32 = vadd.f32 %v1181_v29, %v12994_v36  ;;  %v9841_v18 = vadd.f32 %v1472_v43, %v1180_v14  ;;  %2564 = vmatprep.mubr.f32.mxu1 %v12810_v45  ;;  %v9856_v14 = vpop.permute.xlu0 %7215 }
 0x195   :  { %v1187_v15 = vpop.f32.mrf.mxu0  ;;  %2298 = vmatmul.mubr.f32.gmra.mxu0 %v12995_v42  ;;  %v1474_v9 = vpop.f32.mrf.mxu1  ;;  %12998 = vst [vmem:[#allocation137_spill] sm:$0xff] %v9856_v14  ;;  %v12999_v42 = vld [vmem:[#allocation103_spill] sm:$0xff] }
 0x196   :  { %v1188_v31 = vadd.f32 %v1187_v15, %v9587_v34  ;;  %v9848_v1 = vadd.f32 %v1474_v9, %v1182_v32  ;;  %2303 = vmatprep.mubr.f32.mxu0 %v12810_v45  ;;  %v9860_v32 = vsub.f32 %v307_v33, %v9845_v39 }
 0x197   :  { %v1189_v47 = vpop.f32.mrf.mxu0  ;;  %v1481_v0 = vpop.f32.mrf.mxu1  ;;  %2566 = vmatmul.mubr.f32.gmra.mxu1 %v8951_v27 }
 0x198   :  { %12996 = vst [vmem:[#allocation134_spill] sm:$0xff] %v9848_v1  ;;  %v1190_v29 = vadd.f32 %v1189_v47, %v9593_v4  ;;  %v9853_v43 = vadd.f32 %v1481_v0, %v1188_v31  ;;  %2571 = vmatprep.mubr.f32.mxu1 %v12810_v45  ;;  %v13000_v31 = vld [vmem:[#allocation91_spill] sm:$0xff]  ;;  %v12545_v1 = vand.u32 4294901760, %v9860_v32 }
 0x199   :  { %v1565_v36 = vpop.f32.mrf.mxu0  ;;  %2309 = vmatmul.mubr.f32.gmra.mxu0 %v12999_v42  ;;  %v1483_v34 = vpop.f32.mrf.mxu1 }
 0x19a   :  { %12997 = vst [vmem:[#allocation135_spill] sm:$0xff] %v9853_v43  ;;  %v1566_v15 = vadd.f32 %v1565_v36, %v9598_v61  ;;  %v9863_v9 = vadd.f32 %v1483_v34, %v1190_v29  ;;  %2314 = vmatprep.mubr.f32.mxu0 %v12810_v45  ;;  %v13001_v43 = vld [vmem:[#allocation104_spill] sm:$0xff]  ;;  %v9873_v36 = vpop.permute.xlu0 %7220 }
 0x19b   :  { %v1567_v4 = vpop.f32.mrf.mxu0  ;;  %v1809_v0 = vpop.f32.mrf.mxu1  ;;  %2573 = vmatmul.mubr.f32.gmra.mxu1 %v13000_v31  ;;  %13002 = vst [vmem:[#allocation138_spill] sm:$0xff] %v9873_v36 }
 0x19c   :  { %v1568_v47 = vadd.f32 %v1567_v4, %v9603_v60  ;;  %v1810_v27 = vadd.f32 %v1809_v0, %v1566_v15  ;;  %2578 = vmatprep.mubr.f32.mxu1 %v12810_v45  ;;  %v13003_v0 = vld [vmem:[#allocation9_spill] sm:$0xff] }
 0x19d   :  { %v1572_v42 = vpop.f32.mrf.mxu0  ;;  %2320 = vmatmul.mubr.f32.gmra.mxu0 %v13001_v43  ;;  %v1811_v33 = vpop.f32.mrf.mxu1 }
 0x19e   :  { %v1573_v61 = vadd.f32 %v1572_v42, %v9608_v56  ;;  %v1812_v29 = vadd.f32 %v1811_v33, %v1568_v47  ;;  %2658 = vmatprep.mubr.f32.mxu0 %v12810_v45  ;;  %7942 = vtanh.f32 %v1810_v27  ;;  %v4024_v42 = vsub.f32 %v9860_v32, %v12545_v1 }
 0x19f   :  { %v1574_v34 = vpop.f32.mrf.mxu0  ;;  %v1816_v31 = vpop.f32.mrf.mxu1  ;;  %2580 = vmatmul.mubr.f32.gmra.mxu1 %v9008_v25 }
 0x1a0   :  { %v1575_v60 = vadd.f32 %v1574_v34, %v9613_v57  ;;  %v1817_v15 = vadd.f32 %v1816_v31, %v1573_v61  ;;  %2927 = vmatprep.mubr.f32.mxu1 %v12810_v45  ;;  %7944 = vtanh.f32 %v1812_v29  ;;  %v13004_v57 = vand.u32 4294901760, %v9208_v26  ;;  %v13005_v61 = vld [vmem:[#allocation13_spill] sm:$0xff]  ;;  %v13008_v26 = vld [vmem:[#allocation10_spill] sm:$0xff] }
 0x1a1   :  { %v1579_v4 = vpop.f32.mrf.mxu0  ;;  %2661 = vmatmul.mubr.f32.vlgmr.msra.gmra.mxu0 %v13003_v0  ;;  %v1818_v56 = vpop.f32.mrf.mxu1  ;;  %v13006_v29 = vand.u32 4294901760, %v9214_v20 }
 0x1a2   :  { %v1580_v27 = vadd.f32 %v1579_v4, %v9620_v40  ;;  %7946 = vtanh.f32 %v1817_v15  ;;  %v1819_v47 = vadd.f32 %v1818_v56, %v1575_v60  ;;  %2666 = vmatprep.mubr.f32.mxu0 %v12810_v45  ;;  %3188 = vmatpush1.msra.mxu0 %v13004_v57  ;;  %v9892_v40 = vpop.permute.xlu0 %7225  ;;  %v4025_v4 = vand.u32 4294901760, %v4024_v42 }
 0x1a3   :  { %v1581_v31 = vpop.f32.mrf.mxu0  ;;  %v1823_v33 = vpop.f32.mrf.mxu1  ;;  %2931 = vmatmul.mubr.f32.vlgmr.msra.gmra.mxu1 %v13005_v61  ;;  %3192 = vmatprep.subr.mxu0 %v13006_v29  ;;  %13007 = vst [vmem:[#allocation140_spill] sm:$0xff] %v9892_v40 }
 0x1a4   :  { %v1582_v34 = vadd.f32 %v1581_v31, %v9627_v28  ;;  %7948 = vtanh.f32 %v1819_v47  ;;  %v1824_v1 = vadd.f32 %v1823_v33, %v1580_v27  ;;  %3436 = vmatpush1.msra.mxu1 %v9191_v10  ;;  %2936 = vmatprep.mubr.f32.mxu1 %v12810_v45  ;;  %v13009_v28 = vand.u32 4294901760, %v9224_v53  ;;  %v13010_v47 = vld [vmem:[#allocation14_spill] sm:$0xff] }
 0x1a5   :  { %v1586_v60 = vpop.f32.mrf.mxu0  ;;  %2669 = vmatmul.mubr.f32.gmra.mxu0 %v13008_v26  ;;  %v1825_v15 = vpop.f32.mrf.mxu1  ;;  %3438 = vmatprep.subr.mxu1 %v9194_v11 }
 0x1a6   :  { %v1587_v20 = vadd.f32 %v1586_v60, %v9635_v59  ;;  %7950 = vtanh.f32 %v1824_v1  ;;  %v1826_v56 = vadd.f32 %v1825_v15, %v1582_v34  ;;  %2674 = vmatprep.mubr.f32.mxu0 %v12810_v45  ;;  %3196 = vmatpush1.msra.mxu0 %v13009_v28  ;;  %v13011_v1 = vld [vmem:[#allocation11_spill] sm:$0xff]  ;;  %v9908_v33 = vpop.permute.xlu0 %7230  ;;  %v13013_v34 = vld [vmem:[#allocation16_spill] sm:$0xff] }
 0x1a7   :  { %v1588_v10 = vpop.f32.mrf.mxu0  ;;  %v1830_v27 = vpop.f32.mrf.mxu1  ;;  %2940 = vmatmul.mubr.f32.gmra.mxu1 %v13010_v47  ;;  %3678 = vmatprep.subr.mxu0 %v9845_v39  ;;  %13012 = vst [vmem:[#allocation141_spill] sm:$0xff] %v9908_v33  ;;  %v13118_v47 = vld [vmem:[#allocation44_spill] sm:$0xff] }
 0x1a8   :  { %v1589_v57 = vadd.f32 %v1588_v10, %v9642_v23  ;;  %7952 = vtanh.f32 %v1826_v56  ;;  %v1831_v11 = vadd.f32 %v1830_v27, %v1587_v20  ;;  %2945 = vmatprep.mubr.f32.mxu1 %v12810_v45  ;;  %3440 = vmatpush1.msra.mxu1 %v9210_v49  ;;  %v13014_v20 = vld [vmem:[#allocation15_spill] sm:$0xff] }
 0x1a9   :  { %v1593_v59 = vpop.f32.mrf.mxu0  ;;  %2677 = vmatmul.mubr.f32.gmra.mxu0 %v13011_v1  ;;  %v1832_v42 = vpop.f32.mrf.mxu1  ;;  %4026 = vmatprep.subr.mxu1 %v4025_v4 }
 0x1aa   :  { %v1594_v53 = vadd.f32 %v1593_v59, %v9647_v21  ;;  %7954 = vtanh.f32 %v1831_v11  ;;  %v1833_v31 = vadd.f32 %v1832_v42, %v1589_v57  ;;  %2682 = vmatprep.mubr.f32.mxu0 %v12810_v45  ;;  %v13015_v57 = vld [vmem:[#allocation117_spill] sm:$0xff]  ;;  %v13016_v42 = vld [vmem:[#allocation19_spill] sm:$0xff] }
 0x1ab   :  { %v1595_v23 = vpop.f32.mrf.mxu0  ;;  %v1837_v29 = vpop.f32.mrf.mxu1  ;;  %2949 = vmatmul.mubr.f32.gmra.mxu1 %v13013_v34 }
 0x1ac   :  { %v7943_v60 = vpop.eup %7942  ;;  %v1596_v49 = vadd.f32 %v1595_v23, %v9652_v46  ;;  %7956 = vtanh.f32 %v1833_v31  ;;  %v1838_v15 = vadd.f32 %v1837_v29, %v1594_v53  ;;  %2954 = vmatprep.mubr.f32.mxu1 %v12810_v45 }
 0x1ad   :  { %v1600_v4 = vpop.f32.mrf.mxu0  ;;  %2685 = vmatmul.mubr.f32.gmra.mxu0 %v13014_v20  ;;  %v1839_v21 = vpop.f32.mrf.mxu1  ;;  %v7333_v11 = vmul.f32 %v7943_v60, %v13015_v57 }
 0x1ae   :  { %v7945_v56 = vpop.eup %7944  ;;  %v1601_v28 = vadd.f32 %v1600_v4, %v9657_v2  ;;  %7958 = vtanh.f32 %v1838_v15  ;;  %v1840_v10 = vadd.f32 %v1839_v21, %v1596_v49  ;;  %2690 = vmatprep.mubr.f32.mxu0 %v12810_v45  ;;  %v9921_v2 = vpop.permute.xlu0 %7235  ;;  %v13018_v4 = vld [vmem:[#allocation21_spill] sm:$0xff] }
 0x1af   :  { %v7947_v27 = vpop.eup %7946  ;;  %v1602_v59 = vpop.f32.mrf.mxu0  ;;  %2958 = vmatmul.mubr.f32.gmra.mxu1 %v13016_v42  ;;  %13017 = vst [vmem:[#allocation142_spill] sm:$0xff] %v9921_v2  ;;  %v7334_v49 = vmul.f32 %v7945_v56, %v13015_v57 }
 0x1b0   :  { %v1844_v46 = vpop.f32.mrf.mxu1  ;;  %v1603_v53 = vadd.f32 %v1602_v59, %v9662_v12  ;;  %7960 = vtanh.f32 %v1840_v10  ;;  %v7341_v31 = vmul.f32 %v7947_v27, %v9856_v14  ;;  %2963 = vmatprep.mubr.f32.mxu1 %v12810_v45 }
 0x1b1   :  { %v1845_v23 = vadd.f32 %v1844_v46, %v1601_v28  ;;  %v7949_v29 = vpop.eup %7948  ;;  %v1607_v15 = vpop.f32.mrf.mxu0  ;;  %2693 = vmatmul.mubr.f32.gmra.mxu0 %v13018_v4  ;;  %v13019_v46 = vld [vmem:[#allocation24_spill] sm:$0xff] }
 0x1b2   :  { %v1846_v60 = vpop.f32.mrf.mxu1  ;;  %v7342_v21 = vmul.f32 %v7949_v29, %v9856_v14  ;;  %v7533_v42 = vadd.f32 %v7341_v31, %v7333_v11  ;;  %v1608_v12 = vadd.f32 %v1607_v15, %v9667_v62  ;;  %2698 = vmatprep.mubr.f32.mxu0 %v12810_v45  ;;  %v13020_v31 = vld [vmem:[#allocation25_spill] sm:$0xff]  ;;  %v13117_v14 = vld [vmem:[#allocation120_spill] sm:$0xff] }
 0x1b3   :  { %7962 = vtanh.f32 %v1845_v23  ;;  %v7951_v28 = vpop.eup %7950  ;;  %v1609_v10 = vpop.f32.mrf.mxu0  ;;  %v1847_v27 = vadd.f32 %v1846_v60, %v1603_v53  ;;  %2967 = vmatmul.mubr.f32.gmra.mxu1 %v13019_v46 }
 0x1b4   :  { %v1851_v59 = vpop.f32.mrf.mxu1  ;;  %v7563_v20 = vadd.f32 %v7342_v21, %v7334_v49  ;;  %v1610_v56 = vadd.f32 %v1609_v10, %v9672_v51  ;;  %v7349_v4 = vmul.f32 %v7951_v28, %v9873_v36  ;;  %2972 = vmatprep.mubr.f32.mxu1 %v12810_v45  ;;  %v9936_v51 = vpop.permute.xlu0 %7240  ;;  %v13022_v28 = vld [vmem:[#allocation28_spill] sm:$0xff] }
 0x1b5   :  { %v1852_v57 = vadd.f32 %v1851_v59, %v1608_v12  ;;  %v7953_v11 = vpop.eup %7952  ;;  %7964 = vtanh.f32 %v1847_v27  ;;  %v1614_v62 = vpop.f32.mrf.mxu0  ;;  %2701 = vmatmul.mubr.f32.gmra.mxu0 %v13020_v31  ;;  %13021 = vst [vmem:[#allocation144_spill] sm:$0xff] %v9936_v51  ;;  %v13115_v31 = vld [vmem:[#allocation114_spill] sm:$0xff] }
 0x1b6   :  { %v1853_v23 = vpop.f32.mrf.mxu1  ;;  %v7350_v29 = vmul.f32 %v7953_v11, %v9873_v36  ;;  %v7534_v53 = vadd.f32 %v7533_v42, %v7349_v4  ;;  %v1615_v15 = vadd.f32 %v1614_v62, %v9677_v3  ;;  %2706 = vmatprep.mubr.f32.mxu0 %v12810_v45  ;;  %v13023_v42 = vld [vmem:[#allocation29_spill] sm:$0xff] }
 0x1b7   :  { %7966 = vtanh.f32 %v1852_v57  ;;  %v7955_v49 = vpop.eup %7954  ;;  %v1616_v60 = vpop.f32.mrf.mxu0  ;;  %v1854_v21 = vadd.f32 %v1853_v23, %v1610_v56  ;;  %2976 = vmatmul.mubr.f32.gmra.mxu1 %v13022_v28 }
 0x1b8   :  { %v1858_v12 = vpop.f32.mrf.mxu1  ;;  %v7564_v10 = vadd.f32 %v7563_v20, %v7350_v29  ;;  %v1617_v27 = vadd.f32 %v1616_v60, %v9682_v44  ;;  %v7357_v59 = vmul.f32 %v7955_v49, %v9892_v40  ;;  %2981 = vmatprep.mubr.f32.mxu1 %v12810_v45  ;;  %v13024_v49 = vld [vmem:[#allocation33_spill] sm:$0xff] }
 0x1b9   :  { %v1859_v11 = vadd.f32 %v1858_v12, %v1615_v15  ;;  %v7957_v3 = vpop.eup %7956  ;;  %7968 = vtanh.f32 %v1854_v21  ;;  %v1621_v57 = vpop.f32.mrf.mxu0  ;;  %2709 = vmatmul.mubr.f32.gmra.mxu0 %v13023_v42 }
 0x1ba   :  { %v1860_v4 = vpop.f32.mrf.mxu1  ;;  %v7358_v62 = vmul.f32 %v7957_v3, %v9892_v40  ;;  %v7535_v56 = vadd.f32 %v7534_v53, %v7357_v59  ;;  %v1622_v23 = vadd.f32 %v1621_v57, %v9687_v5  ;;  %2714 = vmatprep.mubr.f32.mxu0 %v12810_v45  ;;  %v9950_v53 = vpop.permute.xlu0 %7245 }
 0x1bb   :  { %7970 = vtanh.f32 %v1859_v11  ;;  %v7959_v44 = vpop.eup %7958  ;;  %v1623_v20 = vpop.f32.mrf.mxu0  ;;  %v1861_v29 = vadd.f32 %v1860_v4, %v1617_v27  ;;  %2985 = vmatmul.mubr.f32.gmra.mxu1 %v13024_v49  ;;  %13025 = vst [vmem:[#allocation146_spill] sm:$0xff] %v9950_v53  ;;  %v13026_v11 = vld [vmem:[#allocation34_spill] sm:$0xff] }
 0x1bc   :  { %v1865_v15 = vpop.f32.mrf.mxu1  ;;  %v7565_v60 = vadd.f32 %v7564_v10, %v7358_v62  ;;  %v1624_v21 = vadd.f32 %v1623_v20, %v9692_v7  ;;  %v7365_v12 = vmul.f32 %v7959_v44, %v9908_v33  ;;  %2990 = vmatprep.mubr.f32.mxu1 %v12810_v45  ;;  %v13027_v44 = vld [vmem:[#allocation37_spill] sm:$0xff] }
 0x1bd   :  { %v1866_v42 = vadd.f32 %v1865_v15, %v1622_v23  ;;  %v7961_v5 = vpop.eup %7960  ;;  %7972 = vtanh.f32 %v1861_v29  ;;  %v1628_v59 = vpop.f32.mrf.mxu0  ;;  %2717 = vmatmul.mubr.f32.gmra.mxu0 %v13026_v11 }
 0x1be   :  { %v1867_v3 = vpop.f32.mrf.mxu1  ;;  %v7366_v27 = vmul.f32 %v7961_v5, %v9908_v33  ;;  %v7536_v57 = vadd.f32 %v7535_v56, %v7365_v12  ;;  %v1629_v10 = vadd.f32 %v1628_v59, %v9697_v50  ;;  %2722 = vmatprep.mubr.f32.mxu0 %v12810_v45  ;;  %v13028_v50 = vld [vmem:[#allocation35_spill] sm:$0xff] }
 0x1bf   :  { %7974 = vtanh.f32 %v1866_v42  ;;  %v1630_v4 = vpop.f32.mrf.mxu0  ;;  %v1868_v62 = vadd.f32 %v1867_v3, %v1624_v21  ;;  %2994 = vmatmul.mubr.f32.gmra.mxu1 %v13027_v44 }
 0x1c0   :  { %v7963_v7 = vpop.eup %7962  ;;  %v1872_v23 = vpop.f32.mrf.mxu1  ;;  %v7566_v20 = vadd.f32 %v7565_v60, %v7366_v27  ;;  %v1631_v29 = vadd.f32 %v1630_v4, %v9702_v30  ;;  %2999 = vmatprep.mubr.f32.mxu1 %v12810_v45 }
 0x1c1   :  { %v7373_v15 = vmul.f32 %v7963_v7, %v9921_v2  ;;  %v1873_v11 = vadd.f32 %v1872_v23, %v1629_v10  ;;  %7976 = vtanh.f32 %v1868_v62  ;;  %v1635_v56 = vpop.f32.mrf.mxu0  ;;  %2725 = vmatmul.mubr.f32.gmra.mxu0 %v13028_v50  ;;  %v9963_v60 = vpop.permute.xlu0 %7250  ;;  %v13030_v7 = vld [vmem:[#allocation41_spill] sm:$0xff]  ;;  %v13031_v23 = vld [vmem:[#allocation42_spill] sm:$0xff] }
 0x1c2   :  { %v1874_v42 = vpop.f32.mrf.mxu1  ;;  %v7965_v12 = vpop.eup %7964  ;;  %v1636_v21 = vadd.f32 %v1635_v56, %v9707_v17  ;;  %2730 = vmatprep.mubr.f32.mxu0 %v12810_v45  ;;  %13029 = vst [vmem:[#allocation147_spill] sm:$0xff] %v9963_v60 }
 0x1c3   :  { %v7537_v5 = vadd.f32 %v7536_v57, %v7373_v15  ;;  %7978 = vtanh.f32 %v1873_v11  ;;  %v1875_v59 = vadd.f32 %v1874_v42, %v1631_v29  ;;  %v7374_v3 = vmul.f32 %v7965_v12, %v9921_v2  ;;  %v1637_v27 = vpop.f32.mrf.mxu0  ;;  %3003 = vmatmul.mubr.f32.gmra.mxu1 %v13030_v7  ;;  %v13107_v7 = vld [vmem:[#allocation111_spill] sm:$0xff] }
 0x1c4   :  { %v7967_v30 = vpop.eup %7966  ;;  %v1879_v10 = vpop.f32.mrf.mxu1  ;;  %v1638_v4 = vadd.f32 %v1637_v27, %v9712_v58  ;;  %3008 = vmatprep.mubr.f32.mxu1 %v12810_v45  ;;  %v13032_v27 = vld [vmem:[#allocation46_spill] sm:$0xff] }
 0x1c5   :  { %7980 = vtanh.f32 %v1875_v59  ;;  %v7381_v57 = vmul.f32 %v7967_v30, %v9936_v51  ;;  %v1880_v62 = vadd.f32 %v1879_v10, %v1636_v21  ;;  %v7567_v17 = vadd.f32 %v7566_v20, %v7374_v3  ;;  %v1642_v11 = vpop.f32.mrf.mxu0  ;;  %2733 = vmatmul.mubr.f32.gmra.mxu0 %v13031_v23 }
 0x1c6   :  { %v1881_v29 = vpop.f32.mrf.mxu1  ;;  %v7969_v15 = vpop.eup %7968  ;;  %v1643_v42 = vadd.f32 %v1642_v11, %v9717_v41  ;;  %2738 = vmatprep.mubr.f32.mxu0 %v12810_v45 }
 0x1c7   :  { %v7538_v56 = vadd.f32 %v7537_v5, %v7381_v57  ;;  %7982 = vtanh.f32 %v1880_v62  ;;  %v1882_v12 = vadd.f32 %v1881_v29, %v1638_v4  ;;  %v7382_v59 = vmul.f32 %v7969_v15, %v9936_v51  ;;  %v1644_v30 = vpop.f32.mrf.mxu0  ;;  %3012 = vmatmul.mubr.f32.gmra.mxu1 %v13032_v27  ;;  %v9978_v41 = vpop.permute.xlu0 %7255  ;;  %v13034_v57 = vld [vmem:[#allocation43_spill] sm:$0xff] }
 0x1c8   :  { %v7971_v58 = vpop.eup %7970  ;;  %v1886_v21 = vpop.f32.mrf.mxu1  ;;  %v1645_v20 = vadd.f32 %v1644_v30, %v9722_v22  ;;  %3017 = vmatprep.mubr.f32.mxu1 %v12810_v45  ;;  %13033 = vst [vmem:[#allocation149_spill] sm:$0xff] %v9978_v41  ;;  %v13035_v30 = vld [vmem:[#allocation47_spill] sm:$0xff] }
 0x1c9   :  { %7984 = vtanh.f32 %v1882_v12  ;;  %v7389_v3 = vmul.f32 %v7971_v58, %v9950_v53  ;;  %v1887_v10 = vadd.f32 %v1886_v21, %v1643_v42  ;;  %v7568_v5 = vadd.f32 %v7567_v17, %v7382_v59  ;;  %v1649_v4 = vpop.f32.mrf.mxu0  ;;  %2741 = vmatmul.mubr.f32.gmra.mxu0 %v13034_v57 }
 0x1ca   :  { %v1888_v62 = vpop.f32.mrf.mxu1  ;;  %v7973_v11 = vpop.eup %7972  ;;  %v1650_v15 = vadd.f32 %v1649_v4, %v9727_v8  ;;  %2746 = vmatprep.mubr.f32.mxu0 %v12810_v45 }
 0x1cb   :  { %v7539_v29 = vadd.f32 %v7538_v56, %v7389_v3  ;;  %7986 = vtanh.f32 %v1887_v10  ;;  %v1889_v27 = vadd.f32 %v1888_v62, %v1645_v20  ;;  %v7390_v42 = vmul.f32 %v7973_v11, %v9950_v53  ;;  %v1651_v12 = vpop.f32.mrf.mxu0  ;;  %3021 = vmatmul.mubr.f32.gmra.mxu1 %v13035_v30  ;;  %v13036_v20 = vld [vmem:[#allocation48_spill] sm:$0xff]  ;;  %v13104_v53 = vld [vmem:[#allocation113_spill] sm:$0xff] }
 0x1cc   :  { %v7975_v22 = vpop.eup %7974  ;;  %v1893_v58 = vpop.f32.mrf.mxu1  ;;  %v1652_v17 = vadd.f32 %v1651_v12, %v9732_v55  ;;  %3026 = vmatprep.mubr.f32.mxu1 %v12810_v45 }
 0x1cd   :  { %7988 = vtanh.f32 %v1889_v27  ;;  %v7397_v59 = vmul.f32 %v7975_v22, %v9963_v60  ;;  %v1894_v21 = vadd.f32 %v1893_v58, %v1650_v15  ;;  %v7569_v8 = vadd.f32 %v7568_v5, %v7390_v42  ;;  %v1656_v56 = vpop.f32.mrf.mxu0  ;;  %2749 = vmatmul.mubr.f32.gmra.mxu0 %v13036_v20  ;;  %v9991_v55 = vpop.permute.xlu0 %7260  ;;  %v13038_v5 = vld [vmem:[#allocation51_spill] sm:$0xff] }
 0x1ce   :  { %v1895_v3 = vpop.f32.mrf.mxu1  ;;  %v7977_v10 = vpop.eup %7976  ;;  %v1657_v62 = vadd.f32 %v1656_v56, %v9737_v48  ;;  %2754 = vmatprep.mubr.f32.mxu0 %v12810_v45  ;;  %13037 = vst [vmem:[#allocation150_spill] sm:$0xff] %v9991_v55 }
 0x1cf   :  { %v7540_v4 = vadd.f32 %v7539_v29, %v7397_v59  ;;  %7990 = vtanh.f32 %v1894_v21  ;;  %v1896_v11 = vadd.f32 %v1895_v3, %v1652_v17  ;;  %v7398_v15 = vmul.f32 %v7977_v10, %v9963_v60  ;;  %v1658_v22 = vpop.f32.mrf.mxu0  ;;  %3030 = vmatmul.mubr.f32.gmra.mxu1 %v13038_v5  ;;  %v13039_v21 = vld [vmem:[#allocation53_spill] sm:$0xff] }
 0x1d0   :  { %v7979_v27 = vpop.eup %7978  ;;  %v1900_v12 = vpop.f32.mrf.mxu1  ;;  %v1659_v42 = vadd.f32 %v1658_v22, %v9742_v24  ;;  %3035 = vmatprep.mubr.f32.mxu1 %v12810_v45  ;;  %v13040_v22 = vld [vmem:[#allocation57_spill] sm:$0xff] }
 0x1d1   :  { %7992 = vtanh.f32 %v1896_v11  ;;  %v7405_v29 = vmul.f32 %v7979_v27, %v9978_v41  ;;  %v1901_v58 = vadd.f32 %v1900_v12, %v1657_v62  ;;  %v7570_v17 = vadd.f32 %v7569_v8, %v7398_v15  ;;  %v1663_v59 = vpop.f32.mrf.mxu0  ;;  %2757 = vmatmul.mubr.f32.gmra.mxu0 %v13039_v21 }
 0x1d2   :  { %v7981_v48 = vpop.eup %7980  ;;  %v1902_v56 = vpop.f32.mrf.mxu1  ;;  %v1664_v20 = vadd.f32 %v1663_v59, %v9747_v52  ;;  %2762 = vmatprep.mubr.f32.mxu0 %v12810_v45 }
 0x1d3   :  { %v7406_v3 = vmul.f32 %v7981_v48, %v9978_v41  ;;  %v7541_v10 = vadd.f32 %v7540_v4, %v7405_v29  ;;  %7994 = vtanh.f32 %v1901_v58  ;;  %v1665_v11 = vpop.f32.mrf.mxu0  ;;  %v1903_v27 = vadd.f32 %v1902_v56, %v1659_v42  ;;  %3039 = vmatmul.mubr.f32.gmra.mxu1 %v13040_v22  ;;  %v10006_v4 = vpop.permute.xlu0 %7265  ;;  %v13042_v58 = vld [vmem:[#allocation58_spill] sm:$0xff]  ;;  %v13097_v41 = vld [vmem:[#allocation108_spill] sm:$0xff] }
 0x1d4   :  { %v7983_v24 = vpop.eup %7982  ;;  %v1907_v62 = vpop.f32.mrf.mxu1  ;;  %v1666_v8 = vadd.f32 %v1665_v11, %v9752_v13  ;;  %3044 = vmatprep.mubr.f32.mxu1 %v12810_v45  ;;  %13041 = vst [vmem:[#allocation151_spill] sm:$0xff] %v10006_v4 }
 0x1d5   :  { %v7571_v12 = vadd.f32 %v7570_v17, %v7406_v3  ;;  %v7413_v15 = vmul.f32 %v7983_v24, %v9991_v55  ;;  %v1908_v21 = vadd.f32 %v1907_v62, %v1664_v20  ;;  %7996 = vtanh.f32 %v1903_v27  ;;  %v1670_v29 = vpop.f32.mrf.mxu0  ;;  %2765 = vmatmul.mubr.f32.gmra.mxu0 %v13042_v58  ;;  %v13043_v24 = vld [vmem:[#allocation61_spill] sm:$0xff] }
 0x1d6   :  { %v7985_v52 = vpop.eup %7984  ;;  %v1909_v48 = vpop.f32.mrf.mxu1  ;;  %v1671_v17 = vadd.f32 %v1670_v29, %v9757_v38  ;;  %2770 = vmatprep.mubr.f32.mxu0 %v12810_v45 }
 0x1d7   :  { %v7414_v42 = vmul.f32 %v7985_v52, %v9991_v55  ;;  %v7542_v59 = vadd.f32 %v7541_v10, %v7413_v15  ;;  %7998 = vtanh.f32 %v1908_v21  ;;  %v1672_v20 = vpop.f32.mrf.mxu0  ;;  %v1910_v56 = vadd.f32 %v1909_v48, %v1666_v8  ;;  %3048 = vmatmul.mubr.f32.gmra.mxu1 %v13043_v24  ;;  %v10016_v10 = vpop.permute.xlu1 %7270  ;;  %v13045_v15 = vld [vmem:[#allocation59_spill] sm:$0xff]  ;;  %v13046_v48 = vld [vmem:[#allocation122_spill] sm:$0xff] }
 0x1d8   :  { %v7987_v13 = vpop.eup %7986  ;;  %v1914_v3 = vpop.f32.mrf.mxu1  ;;  %v1673_v27 = vadd.f32 %v1672_v20, %v9762_v35  ;;  %3053 = vmatprep.mubr.f32.mxu1 %v12810_v45  ;;  %13044 = vst [vmem:[#allocation152_spill] sm:$0xff] %v10016_v10  ;;  %v13047_v20 = vld [vmem:[#allocation65_spill] sm:$0xff] }
 0x1d9   :  { %v7572_v11 = vadd.f32 %v7571_v12, %v7414_v42  ;;  %v7421_v62 = vmul.f32 %v7987_v13, %v10006_v4  ;;  %v1915_v58 = vadd.f32 %v1914_v3, %v1671_v17  ;;  %8000 = vtanh.f32 %v1910_v56  ;;  %v1677_v21 = vpop.f32.mrf.mxu0  ;;  %2773 = vmatmul.mubr.f32.gmra.mxu0 %v13045_v15  ;;  %v13048_v56 = vld [vmem:[#allocation124_spill] sm:$0xff] }
 0x1da   :  { %v7989_v38 = vpop.eup %7988  ;;  %v1916_v52 = vpop.f32.mrf.mxu1  ;;  %v1678_v12 = vadd.f32 %v1677_v21, %v13046_v48  ;;  %2778 = vmatprep.mubr.f32.mxu0 %v12810_v45  ;;  %v13051_v48 = vld [vmem:[#allocation126_spill] sm:$0xff] }
 0x1db   :  { %v7422_v8 = vmul.f32 %v7989_v38, %v10006_v4  ;;  %v7543_v29 = vadd.f32 %v7542_v59, %v7421_v62  ;;  %8002 = vtanh.f32 %v1915_v58  ;;  %v1679_v42 = vpop.f32.mrf.mxu0  ;;  %v1917_v17 = vadd.f32 %v1916_v52, %v1673_v27  ;;  %3057 = vmatmul.mubr.f32.gmra.mxu1 %v13047_v20  ;;  %v10026_v59 = vpop.permute.xlu0 %7275  ;;  %v13050_v38 = vld [vmem:[#allocation66_spill] sm:$0xff] }
 0x1dc   :  { %v7991_v35 = vpop.eup %7990  ;;  %v1921_v13 = vpop.f32.mrf.mxu1  ;;  %v1680_v24 = vadd.f32 %v1679_v42, %v13048_v56  ;;  %3062 = vmatprep.mubr.f32.mxu1 %v12810_v45  ;;  %13049 = vst [vmem:[#allocation122_spill] sm:$0xff] %v10026_v59 }
 0x1dd   :  { %v7573_v3 = vadd.f32 %v7572_v11, %v7422_v8  ;;  %v7429_v15 = vmul.f32 %v7991_v35, %v10016_v10  ;;  %v1922_v55 = vadd.f32 %v1921_v13, %v1678_v12  ;;  %8004 = vtanh.f32 %v1917_v17  ;;  %v1684_v58 = vpop.f32.mrf.mxu0  ;;  %2781 = vmatmul.mubr.f32.gmra.mxu0 %v13050_v38  ;;  %v13052_v13 = vld [vmem:[#allocation69_spill] sm:$0xff]  ;;  %v13053_v17 = vld [vmem:[#allocation127_spill] sm:$0xff] }
 0x1de   :  { %v7993_v62 = vpop.eup %7992  ;;  %v1923_v21 = vpop.f32.mrf.mxu1  ;;  %v1685_v11 = vadd.f32 %v1684_v58, %v13051_v48  ;;  %2786 = vmatprep.mubr.f32.mxu0 %v12810_v45 }
 0x1df   :  { %v7430_v27 = vmul.f32 %v7993_v62, %v10016_v10  ;;  %v7544_v52 = vadd.f32 %v7543_v29, %v7429_v15  ;;  %8006 = vtanh.f32 %v1922_v55  ;;  %v1686_v12 = vpop.f32.mrf.mxu0  ;;  %v1924_v35 = vadd.f32 %v1923_v21, %v1680_v24  ;;  %3066 = vmatmul.mubr.f32.gmra.mxu1 %v13052_v13  ;;  %v10036_v15 = vpop.permute.xlu1 %7280  ;;  %v13055_v29 = vld [vmem:[#allocation67_spill] sm:$0xff] }
 0x1e0   :  { %v7995_v8 = vpop.eup %7994  ;;  %v1928_v42 = vpop.f32.mrf.mxu1  ;;  %v1687_v20 = vadd.f32 %v1686_v12, %v13053_v17  ;;  %3071 = vmatprep.mubr.f32.mxu1 %v12810_v45  ;;  %13054 = vst [vmem:[#allocation124_spill] sm:$0xff] %v10036_v15  ;;  %v13056_v12 = vld [vmem:[#allocation71_spill] sm:$0xff] }
 0x1e1   :  { %v7574_v56 = vadd.f32 %v7573_v3, %v7430_v27  ;;  %v7437_v38 = vmul.f32 %v7995_v8, %v10026_v59  ;;  %v1929_v4 = vadd.f32 %v1928_v42, %v1685_v11  ;;  %8008 = vtanh.f32 %v1924_v35  ;;  %v1691_v55 = vpop.f32.mrf.mxu0  ;;  %2789 = vmatmul.mubr.f32.gmra.mxu0 %v13055_v29  ;;  %v13057_v35 = vld [vmem:[#allocation129_spill] sm:$0xff] }
 0x1e2   :  { %v1930_v62 = vpop.f32.mrf.mxu1  ;;  %v7997_v58 = vpop.eup %7996  ;;  %v1692_v21 = vadd.f32 %v1691_v55, %v9787_v16  ;;  %2794 = vmatprep.mubr.f32.mxu0 %v12810_v45 }
 0x1e3   :  { %v7545_v24 = vadd.f32 %v7544_v52, %v7437_v38  ;;  %8010 = vtanh.f32 %v1929_v4  ;;  %v1931_v3 = vadd.f32 %v1930_v62, %v1687_v20  ;;  %v7438_v48 = vmul.f32 %v7997_v58, %v10026_v59  ;;  %v1693_v11 = vpop.f32.mrf.mxu0  ;;  %3075 = vmatmul.mubr.f32.gmra.mxu1 %v13056_v12  ;;  %v10046_v16 = vpop.permute.xlu0 %7285  ;;  %v13059_v38 = vld [vmem:[#allocation73_spill] sm:$0xff] }
 0x1e4   :  { %v7999_v27 = vpop.eup %7998  ;;  %v1935_v8 = vpop.f32.mrf.mxu1  ;;  %v1694_v42 = vadd.f32 %v1693_v11, %v13057_v35  ;;  %3080 = vmatprep.mubr.f32.mxu1 %v12810_v45  ;;  %13058 = vst [vmem:[#allocation126_spill] sm:$0xff] %v10046_v16 }
 0x1e5   :  { %8012 = vtanh.f32 %v1931_v3  ;;  %v7445_v17 = vmul.f32 %v7999_v27, %v10036_v15  ;;  %v1936_v29 = vadd.f32 %v1935_v8, %v1692_v21  ;;  %v7575_v4 = vadd.f32 %v7574_v56, %v7438_v48  ;;  %v1698_v20 = vpop.f32.mrf.mxu0  ;;  %2797 = vmatmul.mubr.f32.gmra.mxu0 %v13059_v38  ;;  %v13060_v8 = vld [vmem:[#allocation77_spill] sm:$0xff]  ;;  %v13061_v56 = vld [vmem:[#allocation130_spill] sm:$0xff] }
 0x1e6   :  { %v1937_v52 = vpop.f32.mrf.mxu1  ;;  %v8001_v55 = vpop.eup %8000  ;;  %v1699_v58 = vadd.f32 %v1698_v20, %v9797_v37  ;;  %2802 = vmatprep.mubr.f32.mxu0 %v12810_v45 }
 0x1e7   :  { %v7546_v62 = vadd.f32 %v7545_v24, %v7445_v17  ;;  %8014 = vtanh.f32 %v1936_v29  ;;  %v1938_v12 = vadd.f32 %v1937_v52, %v1694_v42  ;;  %v7446_v21 = vmul.f32 %v8001_v55, %v10036_v15  ;;  %v1700_v27 = vpop.f32.mrf.mxu0  ;;  %3084 = vmatmul.mubr.f32.gmra.mxu1 %v13060_v8  ;;  %v10056_v37 = vpop.permute.xlu1 %7290  ;;  %v13063_v42 = vld [vmem:[#allocation78_spill] sm:$0xff] }
 0x1e8   :  { %v8003_v3 = vpop.eup %8002  ;;  %v1942_v11 = vpop.f32.mrf.mxu1  ;;  %v1701_v48 = vadd.f32 %v1700_v27, %v13061_v56  ;;  %3089 = vmatprep.mubr.f32.mxu1 %v12810_v45  ;;  %13062 = vst [vmem:[#allocation127_spill] sm:$0xff] %v10056_v37  ;;  %v13076_v15 = vld [vmem:[#allocation134_spill] sm:$0xff] }
 0x1e9   :  { %8016 = vtanh.f32 %v1938_v12  ;;  %v7453_v35 = vmul.f32 %v8003_v3, %v10046_v16  ;;  %v1943_v38 = vadd.f32 %v1942_v11, %v1699_v58  ;;  %v7576_v29 = vadd.f32 %v7575_v4, %v7446_v21  ;;  %v1705_v24 = vpop.f32.mrf.mxu0  ;;  %2805 = vmatmul.mubr.f32.gmra.mxu0 %v13063_v42  ;;  %v13064_v11 = vld [vmem:[#allocation81_spill] sm:$0xff]  ;;  %v13065_v4 = vld [vmem:[#allocation131_spill] sm:$0xff] }
 0x1ea   :  { %v1944_v17 = vpop.f32.mrf.mxu1  ;;  %v8005_v20 = vpop.eup %8004  ;;  %v1706_v55 = vadd.f32 %v1705_v24, %v9807_v63  ;;  %2810 = vmatprep.mubr.f32.mxu0 %v12810_v45 }
 0x1eb   :  { %v7547_v52 = vadd.f32 %v7546_v62, %v7453_v35  ;;  %8018 = vtanh.f32 %v1943_v38  ;;  %v1945_v8 = vadd.f32 %v1944_v17, %v1701_v48  ;;  %v7454_v58 = vmul.f32 %v8005_v20, %v10046_v16  ;;  %v1707_v3 = vpop.f32.mrf.mxu0  ;;  %3093 = vmatmul.mubr.f32.gmra.mxu1 %v13064_v11  ;;  %v10066_v63 = vpop.permute.xlu0 %7295  ;;  %v60_v38 = vld [vmem:[%s12263_s0 + $0x60] sm:$0x3]  ;;  %v13067_v35 = vld [vmem:[#allocation79_spill] sm:$0xff] }
 0x1ec   :  { %v8007_v12 = vpop.eup %8006  ;;  %v1949_v27 = vpop.f32.mrf.mxu1  ;;  %v1708_v21 = vadd.f32 %v1707_v3, %v13065_v4  ;;  %3098 = vmatprep.mubr.f32.mxu1 %v12810_v45  ;;  %13066 = vst [vmem:[#allocation129_spill] sm:$0xff] %v10066_v63  ;;  %v13068_v11 = vld [vmem:[#allocation83_spill] sm:$0xff] }
 0x1ed   :  { %8020 = vtanh.f32 %v1945_v8  ;;  %v7461_v56 = vmul.f32 %v8007_v12, %v10056_v37  ;;  %v1950_v42 = vadd.f32 %v1949_v27, %v1706_v55  ;;  %v7577_v62 = vadd.f32 %v7576_v29, %v7454_v58  ;;  %v1712_v48 = vpop.f32.mrf.mxu0  ;;  %2813 = vmatmul.mubr.f32.gmra.mxu0 %v13067_v35  ;;  %v13069_v58 = vld [vmem:[#allocation133_spill] sm:$0xff] }
 0x1ee   :  { %v1951_v24 = vpop.f32.mrf.mxu1  ;;  %v8009_v17 = vpop.eup %8008  ;;  %v1713_v8 = vadd.f32 %v1712_v48, %v9817_v19  ;;  %2818 = vmatprep.mubr.f32.mxu0 %v12810_v45  ;;  %v304_v29 = vsel %vm290_vm0, %v60_v38, 0 }
 0x1ef   :  { %v7548_v20 = vadd.f32 %v7547_v52, %v7461_v56  ;;  %8022 = vtanh.f32 %v1950_v42  ;;  %v1952_v12 = vadd.f32 %v1951_v24, %v1708_v21  ;;  %v7462_v3 = vmul.f32 %v8009_v17, %v10056_v37  ;;  %v1714_v27 = vpop.f32.mrf.mxu0  ;;  %3102 = vmatmul.mubr.f32.gmra.mxu1 %v13068_v11  ;;  %v10080_v19 = vpop.permute.xlu1 %7300  ;;  %v13071_v24 = vld [vmem:[#allocation85_spill] sm:$0xff] }
 0x1f0   :  { %v8011_v55 = vpop.eup %8010  ;;  %v1956_v4 = vpop.f32.mrf.mxu1  ;;  %v1715_v35 = vadd.f32 %v1714_v27, %v13069_v58  ;;  %3107 = vmatprep.mubr.f32.mxu1 %v12810_v45  ;;  %13070 = vst [vmem:[#allocation130_spill] sm:$0xff] %v10080_v19 }
 0x1f1   :  { %8024 = vtanh.f32 %v1952_v12  ;;  %v7469_v52 = vmul.f32 %v8011_v55, %v10066_v63  ;;  %v1957_v56 = vadd.f32 %v1956_v4, %v1713_v8  ;;  %v7578_v21 = vadd.f32 %v7577_v62, %v7462_v3  ;;  %v1719_v48 = vpop.f32.mrf.mxu0  ;;  %2821 = vmatmul.mubr.f32.gmra.mxu0 %v13071_v24  ;;  %v53_v8 = vld [vmem:[%s12263_s0 + $0x28] sm:$0xff] }
 0x1f2   :  { %v8013_v42 = vpop.eup %8012  ;;  %v1958_v17 = vpop.f32.mrf.mxu1  ;;  %v1720_v38 = vadd.f32 %v1719_v48, %v9830_v6  ;;  %2826 = vmatprep.mubr.f32.mxu0 %v12810_v45  ;;  %v13072_v3 = vld [vmem:[#allocation89_spill] sm:$0xff]  ;;  %v10090_v4 = vand.u32 4294901760, %v304_v29 }
 0x1f3   :  { %v7470_v11 = vmul.f32 %v8013_v42, %v10066_v63  ;;  %v7549_v37 = vadd.f32 %v7548_v20, %v7469_v52  ;;  %8026 = vtanh.f32 %v1957_v56  ;;  %v1721_v55 = vpop.f32.mrf.mxu0  ;;  %v1959_v27 = vadd.f32 %v1958_v17, %v1715_v35  ;;  %3111 = vmatmul.mubr.f32.gmra.mxu1 %v13072_v3  ;;  %v10095_v56 = vpop.permute.xlu0 %7305  ;;  %v52_v42 = vld [vmem:[%s12263_s0 + $0x20] sm:$0xff]  ;;  %v13074_v17 = vld [vmem:[#allocation90_spill] sm:$0xff] }
 0x1f4   :  { %v8015_v12 = vpop.eup %8014  ;;  %v1963_v62 = vpop.f32.mrf.mxu1  ;;  %v1722_v20 = vadd.f32 %v1721_v55, %v9835_v54  ;;  %3116 = vmatprep.mubr.f32.mxu1 %v12810_v45  ;;  %13073 = vst [vmem:[#allocation131_spill] sm:$0xff] %v10095_v56  ;;  %v13075_v63 = vld [vmem:[#allocation93_spill] sm:$0xff] }
 0x1f5   :  { %v7579_v58 = vadd.f32 %v7578_v21, %v7470_v11  ;;  %v7477_v6 = vmul.f32 %v8015_v12, %v10080_v19  ;;  %v1964_v52 = vadd.f32 %v1963_v62, %v1720_v38  ;;  %8028 = vtanh.f32 %v1959_v27  ;;  %v1726_v48 = vpop.f32.mrf.mxu0  ;;  %2829 = vmatmul.mubr.f32.gmra.mxu0 %v13074_v17 }
 0x1f6   :  { %v8017_v35 = vpop.eup %8016  ;;  %v1965_v3 = vpop.f32.mrf.mxu1  ;;  %v10101_v11 = vand.u32 4294901760, %v53_v8  ;;  %v1727_v38 = vadd.f32 %v1726_v48, %v9841_v18  ;;  %2834 = vmatprep.mubr.f32.mxu0 %v12810_v45  ;;  %v10108_v27 = vsub.f32 %v304_v29, %v10090_v4  ;;  %v10110_v17 = vand.u32 4294901760, %v52_v42 }
 0x1f7   :  { %v7478_v54 = vmul.f32 %v8017_v35, %v10080_v19  ;;  %v7550_v21 = vadd.f32 %v7549_v37, %v7477_v6  ;;  %8030 = vtanh.f32 %v1964_v52  ;;  %v1728_v55 = vpop.f32.mrf.mxu0  ;;  %v1966_v62 = vadd.f32 %v1965_v3, %v1722_v20  ;;  %3120 = vmatmul.mubr.f32.gmra.mxu1 %v13075_v63  ;;  %v10115_v6 = vpop.permute.xlu1 %7310  ;;  %v13078_v20 = vld [vmem:[#allocation94_spill] sm:$0xff] }
 0x1f8   :  { %v8019_v12 = vpop.eup %8018  ;;  %v1970_v24 = vpop.f32.mrf.mxu1  ;;  %v1729_v35 = vadd.f32 %v1728_v55, %v13076_v15  ;;  %3125 = vmatprep.mubr.f32.mxu1 %v12810_v45  ;;  %13077 = vst [vmem:[#allocation133_spill] sm:$0xff] %v10115_v6  ;;  %v10119_v29 = vsub.f32 %v53_v8, %v10101_v11  ;;  %v13079_v15 = vld [vmem:[#allocation135_spill] sm:$0xff]  ;;  %v10127_v19 = vsub.f32 %v52_v42, %v10110_v17 }
 0x1f9   :  { %v7580_v16 = vadd.f32 %v7579_v58, %v7478_v54  ;;  %v7485_v37 = vmul.f32 %v8019_v12, %v10095_v56  ;;  %v1971_v18 = vadd.f32 %v1970_v24, %v1727_v38  ;;  %8032 = vtanh.f32 %v1966_v62  ;;  %v1733_v3 = vpop.f32.mrf.mxu0  ;;  %2837 = vmatmul.mubr.f32.gmra.mxu0 %v13078_v20  ;;  %v13080_v62 = vld [vmem:[#allocation97_spill] sm:$0xff] }
 0x1fa   :  { %v8021_v52 = vpop.eup %8020  ;;  %v1972_v48 = vpop.f32.mrf.mxu1  ;;  %v1734_v55 = vadd.f32 %v1733_v3, %v13079_v15  ;;  %2842 = vmatprep.mubr.f32.mxu0 %v12810_v45 }
 0x1fb   :  { %v7486_v58 = vmul.f32 %v8021_v52, %v10095_v56  ;;  %v7551_v54 = vadd.f32 %v7550_v21, %v7485_v37  ;;  %8034 = vtanh.f32 %v1971_v18  ;;  %v1735_v38 = vpop.f32.mrf.mxu0  ;;  %v1973_v12 = vadd.f32 %v1972_v48, %v1729_v35  ;;  %3129 = vmatmul.mubr.f32.gmra.mxu1 %v13080_v62  ;;  %v10132_v18 = vpop.permute.xlu0 %7315  ;;  %v13082_v48 = vld [vmem:[#allocation95_spill] sm:$0xff] }
 0x1fc   :  { %v8023_v24 = vpop.eup %8022  ;;  %v1977_v63 = vpop.f32.mrf.mxu1  ;;  %v1736_v52 = vadd.f32 %v1735_v38, %v9863_v9  ;;  %3134 = vmatprep.mubr.f32.mxu1 %v12810_v45  ;;  %13081 = vst [vmem:[#allocation134_spill] sm:$0xff] %v10132_v18  ;;  %v13083_v9 = vld [vmem:[#allocation105_spill] sm:$0xff]  ;;  %v13084_v62 = vld [vmem:[#allocation99_spill] sm:$0xff] }
 0x1fd   :  { %v7581_v8 = vadd.f32 %v7580_v16, %v7486_v58  ;;  %v7493_v21 = vmul.f32 %v8023_v24, %v10115_v6  ;;  %v1978_v37 = vadd.f32 %v1977_v63, %v1734_v55  ;;  %8036 = vtanh.f32 %v1973_v12  ;;  %v2057_v35 = vpop.f32.mrf.mxu0  ;;  %2845 = vmatmul.mubr.f32.gmra.mxu0 %v13082_v48 }
 0x1fe   :  { %v8025_v3 = vpop.eup %8024  ;;  %v1979_v15 = vpop.f32.mrf.mxu1  ;;  %v2058_v58 = vadd.f32 %v2057_v35, %v13083_v9  ;;  %2850 = vmatprep.mubr.f32.mxu0 %v12810_v45  ;;  %v13085_v12 = vand.u32 4294901760, %v10108_v27  ;;  %v13087_v35 = vld [vmem:[#allocation100_spill] sm:$0xff] }
 0x1ff   :  { %v7494_v42 = vmul.f32 %v8025_v3, %v10115_v6  ;;  %v7552_v16 = vadd.f32 %v7551_v54, %v7493_v21  ;;  %8038 = vtanh.f32 %v1978_v37  ;;  %v1980_v55 = vadd.f32 %v1979_v15, %v1736_v52  ;;  %v2059_v24 = vpop.f32.mrf.mxu0  ;;  %3138 = vmatmul.mubr.f32.gmra.mxu1 %v13084_v62  ;;  %v10149_v52 = vpop.permute.xlu1 %7320  ;;  %v13090_v6 = vld [vmem:[#allocation102_spill] sm:$0xff] }
 0x200   :  { %v8027_v63 = vpop.eup %8026  ;;  %v2413_v38 = vpop.f32.mrf.mxu1  ;;  %v4030_v48 = vsub.f32 %v10108_v27, %v13085_v12  ;;  %v2060_v54 = vadd.f32 %v2059_v24, %v13083_v9  ;;  %3143 = vmatprep.mubr.f32.mxu1 %v12810_v45  ;;  %13086 = vst [vmem:[#allocation135_spill] sm:$0xff] %v10149_v52  ;;  %v13088_v12 = vand.u32 4294901760, %v10119_v29  ;;  %v13089_v24 = vld [vmem:[#allocation106_spill] sm:$0xff] }
 0x201   :  { %v7582_v56 = vadd.f32 %v7581_v8, %v7494_v42  ;;  %v7501_v21 = vmul.f32 %v8027_v63, %v10132_v18  ;;  %v10146_v37 = vadd.f32 %v2413_v38, %v2058_v58  ;;  %8040 = vtanh.f32 %v1980_v55  ;;  %v2068_v3 = vpop.f32.mrf.mxu0  ;;  %2853 = vmatmul.mubr.f32.gmra.mxu0 %v13087_v35 }
 0x202   :  { %v2415_v15 = vpop.f32.mrf.mxu1  ;;  %v4036_v20 = vsub.f32 %v10119_v29, %v13088_v12  ;;  %v8029_v8 = vpop.eup %8028  ;;  %v2069_v62 = vadd.f32 %v2068_v3, %v13089_v24  ;;  %3229 = vmatprep.mubr.f32.mxu0 %v12810_v45  ;;  %v4031_v35 = vand.u32 4294901760, %v4030_v48 }
 0x203   :  { %v7553_v42 = vadd.f32 %v7552_v16, %v7501_v21  ;;  %v10156_v63 = vadd.f32 %v2415_v15, %v2060_v54  ;;  %v7502_v38 = vmul.f32 %v8029_v8, %v10132_v18  ;;  %v2070_v55 = vpop.f32.mrf.mxu0  ;;  %3147 = vmatmul.mubr.f32.gmra.mxu1 %v13090_v6  ;;  %v10166_v16 = vpop.permute.xlu0 %7325  ;;  %v13092_v54 = vand.u32 4294901760, %v10127_v19  ;;  %v13093_v8 = vld [vmem:[#allocation6_spill] sm:$0xff] }
 0x204   :  { %v8031_v58 = vpop.eup %8030  ;;  %v2420_v9 = vpop.f32.mrf.mxu1  ;;  %v2071_v59 = vadd.f32 %v2070_v55, %v13089_v24  ;;  %3473 = vmatprep.mubr.f32.mxu1 %v12810_v45  ;;  %13091 = vst [vmem:[#allocation153_spill] sm:$0xff] %v10166_v16  ;;  %v4037_v48 = vand.u32 4294901760, %v4036_v20  ;;  %v13094_v55 = vld [vmem:[#allocation107_spill] sm:$0xff] }
 0x205   :  { %v7509_v12 = vmul.f32 %v8031_v58, %v10149_v52  ;;  %v10163_v13 = vadd.f32 %v2420_v9, %v2069_v62  ;;  %v4042_v21 = vsub.f32 %v10127_v19, %v13092_v54  ;;  %v7583_v3 = vadd.f32 %v7582_v56, %v7502_v38  ;;  %v2079_v15 = vpop.f32.mrf.mxu0  ;;  %3231 = vmatmul.mubr.f32.vlgmr.msra.gmra.mxu0 %v13093_v8 }
 0x206   :  { %v2422_v6 = vpop.f32.mrf.mxu1  ;;  %v8033_v18 = vpop.eup %8032  ;;  %v2080_v24 = vadd.f32 %v2079_v15, %v13094_v55  ;;  %3236 = vmatprep.mubr.f32.mxu0 %v12810_v45  ;;  %3680 = vmatpush1.msra.mxu0 %v10090_v4 }
 0x207   :  { %v10173_v58 = vadd.f32 %v2422_v6, %v2071_v59  ;;  %v7554_v62 = vadd.f32 %v7553_v42, %v7509_v12  ;;  %v7510_v10 = vmul.f32 %v8033_v18, %v10149_v52  ;;  %v2081_v54 = vpop.f32.mrf.mxu0  ;;  %3475 = vmatmul.mubr.f32.vlgmr.msra.gmra.mxu1 %v13093_v8  ;;  %3682 = vmatprep.subr.mxu0 %v10101_v11  ;;  %v10185_v6 = vpop.permute.xlu1 %7330  ;;  %v4043_v42 = vand.u32 4294901760, %v4042_v21  ;;  %v13096_v18 = vld [vmem:[#allocation7_spill] sm:$0xff] }
 0x208   :  { %v8035_v9 = vpop.eup %8034  ;;  %v2427_v56 = vpop.f32.mrf.mxu1  ;;  %v2082_v20 = vadd.f32 %v2081_v54, %v13094_v55  ;;  %4032 = vmatpush1.msra.mxu1 %v4031_v35  ;;  %3480 = vmatprep.mubr.f32.mxu1 %v12810_v45  ;;  %13095 = vst [vmem:[#allocation154_spill] sm:$0xff] %v10185_v6  ;;  %v13099_v55 = vld [vmem:[#allocation110_spill] sm:$0xff] }
 0x209   :  { %v7517_v38 = vmul.f32 %v8035_v9, %v10166_v16  ;;  %v10182_v59 = vadd.f32 %v2427_v56, %v2080_v24  ;;  %v2090_v12 = vpop.f32.mrf.mxu0  ;;  %3238 = vmatmul.mubr.f32.gmra.mxu0 %v13096_v18  ;;  %v7584_v52 = vadd.f32 %v7583_v3, %v7510_v10  ;;  %4038 = vmatprep.subr.mxu1 %v4037_v48 }
 0x20a   :  { %v2429_v15 = vpop.f32.mrf.mxu1  ;;  %v8037_v22 = vpop.eup %8036  ;;  %v2091_v5 = vadd.f32 %v2090_v12, %v13097_v41  ;;  %3243 = vmatprep.mubr.f32.mxu0 %v12810_v45  ;;  %3684 = vmatpush1.msra.mxu0 %v10110_v17  ;;  %v13098_v12 = vld [vmem:[#allocation8_spill] sm:$0xff] }
 0x20b   :  { %v10189_v54 = vadd.f32 %v2429_v15, %v2082_v20  ;;  %v7555_v24 = vadd.f32 %v7554_v62, %v7517_v38  ;;  %v7518_v9 = vmul.f32 %v8037_v22, %v10166_v16  ;;  %v2092_v21 = vpop.f32.mrf.mxu0  ;;  %3482 = vmatmul.mubr.f32.gmra.mxu1 %v13096_v18  ;;  %4283 = vmatprep.subr.mxu0 %v9860_v32  ;;  %v7779_v62 = vlaneseq }
 0x20c   :  { %v8039_v35 = vpop.eup %8038  ;;  %v2434_v56 = vpop.f32.mrf.mxu1  ;;  %v2093_v10 = vadd.f32 %v2092_v21, %v13097_v41  ;;  %3487 = vmatprep.mubr.f32.mxu1 %v12810_v45  ;;  %4044 = vmatpush1.msra.mxu1 %v4043_v42 }
 0x20d   :  { %v7525_v3 = vmul.f32 %v8039_v35, %v10185_v6  ;;  %v10198_v48 = vadd.f32 %v2434_v56, %v2091_v5  ;;  %v7585_v20 = vadd.f32 %v7584_v52, %v7518_v9  ;;  %v2101_v38 = vpop.f32.mrf.mxu0  ;;  %3245 = vmatmul.mubr.f32.gmra.mxu0 %v13098_v12  ;;  %4555 = vmatprep.subr.mxu1 %v9845_v39 }
 0x20e   :  { %v2436_v22 = vpop.f32.mrf.mxu1  ;;  %v8041_v15 = vpop.eup %8040  ;;  %v2102_v60 = vadd.f32 %v2101_v38, %v13099_v55  ;;  %3250 = vmatprep.mubr.f32.mxu0 %v12810_v45  ;;  %v13101_v38 = vld [vmem:[#allocation12_spill] sm:$0xff] }
 0x20f   :  { %v7556_v16 = vadd.f32 %v7555_v24, %v7525_v3  ;;  %v10204_v21 = vadd.f32 %v2436_v22, %v2093_v10  ;;  %v7526_v5 = vmul.f32 %v8041_v15, %v10185_v6  ;;  %v2103_v35 = vpop.f32.mrf.mxu0  ;;  %3489 = vmatmul.mubr.f32.gmra.mxu1 %v13098_v12  ;;  %v10213_v24 = vshrl.u32 %v7779_v62, 7  ;;  %v13102_v15 = vld [vmem:[#allocation109_spill] sm:$0xff] }
 0x210   :  { %v2441_v56 = vpop.f32.mrf.mxu1  ;;  %v2104_v42 = vadd.f32 %v2103_v35, %v13099_v55  ;;  %3494 = vmatprep.mubr.f32.mxu1 %v12810_v45 }
 0x211   :  { %v7557_v52 = vrot.slane %v7556_v16, 4  ;;  %v10210_v9 = vadd.f32 %v2441_v56, %v2102_v60  ;;  %13100 = vst [vmem:[#allocation155_spill] sm:$0xff] %v10213_v24  ;;  %v7586_v3 = vadd.f32 %v7585_v20, %v7526_v5  ;;  %v2112_v10 = vpop.f32.mrf.mxu0  ;;  %3252 = vmatmul.mubr.f32.gmra.mxu0 %v13101_v38  ;;  %v7777_v5 = vpop.permute.xlu0 %7776 }
 0x212   :  { %v2443_v22 = vpop.f32.mrf.mxu1  ;;  %v2113_v6 = vadd.f32 %v2112_v10, %v13102_v15  ;;  %3257 = vmatprep.mubr.f32.mxu0 %v12810_v45  ;;  %v13103_v10 = vld [vmem:[#allocation18_spill] sm:$0xff] }
 0x213   :  { %v7558_v41 = vadd.f32 %v7557_v52, %v7556_v16  ;;  %v10217_v30 = vadd.f32 %v2443_v22, %v2104_v42  ;;  %v7587_v57 = vrot.slane %v7586_v3, 4  ;;  %v2114_v35 = vpop.f32.mrf.mxu0  ;;  %3496 = vmatmul.mubr.f32.gmra.mxu1 %v13101_v38  ;;  %v7781_v16 = vsub.s32 0, %v10213_v24 }
 0x214   :  { %v2448_v60 = vpop.f32.mrf.mxu1  ;;  %v2115_v62 = vadd.f32 %v2114_v35, %v13102_v15  ;;  %3501 = vmatprep.mubr.f32.mxu1 %v12810_v45 }
 0x215   :  { %v7559_v56 = vrot.slane %v7558_v41, 2  ;;  %v10222_v20 = vadd.f32 %v2448_v60, %v2113_v6  ;;  %v7588_v52 = vadd.f32 %v7587_v57, %v7586_v3  ;;  %v2123_v42 = vpop.f32.mrf.mxu0  ;;  %3259 = vmatmul.mubr.f32.gmra.mxu0 %v13103_v10  ;;  %v10235_v3 = vrot.slane %v7777_v5, %v7781_v16 }
 0x216   :  { %v2450_v22 = vpop.f32.mrf.mxu1  ;;  %v2124_v23 = vadd.f32 %v2123_v42, %v13104_v53  ;;  %3264 = vmatprep.mubr.f32.mxu0 %v12810_v45 }
 0x217   :  { %v7560_v55 = vadd.f32 %v7559_v56, %v7558_v41  ;;  %v10228_v51 = vadd.f32 %v2450_v22, %v2115_v62  ;;  %v7589_v35 = vrot.slane %v7588_v52, 2  ;;  %v2125_v6 = vpop.f32.mrf.mxu0  ;;  %3503 = vmatmul.mubr.f32.gmra.mxu1 %v13103_v10  ;;  %13105 = vst [vmem:[#allocation156_spill] sm:$0xff] %v10235_v3  ;;  %v13106_v62 = vld [vmem:[#allocation22_spill] sm:$0xff] }
 0x218   :  { %v2455_v60 = vpop.f32.mrf.mxu1  ;;  %v2126_v24 = vadd.f32 %v2125_v6, %v13104_v53  ;;  %3508 = vmatprep.mubr.f32.mxu1 %v12810_v45 }
 0x219   :  { %v7561_v15 = vrot.slane %v7560_v55, 1  ;;  %v10233_v57 = vadd.f32 %v2455_v60, %v2124_v23  ;;  %v7590_v41 = vadd.f32 %v7589_v35, %v7588_v52  ;;  %v2134_v56 = vpop.f32.mrf.mxu0  ;;  %3266 = vmatmul.mubr.f32.gmra.mxu0 %v13106_v62  ;;  %v13108_v35 = vld [vmem:[#allocation26_spill] sm:$0xff]  ;;  %v13109_v60 = vld [vmem:[#allocation116_spill] sm:$0xff] }
 0x21a   :  { %v2457_v42 = vpop.f32.mrf.mxu1  ;;  %v2135_v50 = vadd.f32 %v2134_v56, %v13107_v7  ;;  %3271 = vmatprep.mubr.f32.mxu0 %v12810_v45 }
 0x21b   :  { %v7562_v22 = vadd.f32 %v7561_v15, %v7560_v55  ;;  %v10240_v2 = vadd.f32 %v2457_v42, %v2126_v24  ;;  %v7591_v44 = vrot.slane %v7590_v41, 1  ;;  %v2136_v6 = vpop.f32.mrf.mxu0  ;;  %3510 = vmatmul.mubr.f32.gmra.mxu1 %v13106_v62 }
 0x21c   :  { %v2462_v23 = vpop.f32.mrf.mxu1  ;;  %v2137_v16 = vadd.f32 %v2136_v6, %v13107_v7  ;;  %3515 = vmatprep.mubr.f32.mxu1 %v12810_v45 }
 0x21d   :  { %v10245_v5 = vadd.f32 %v2462_v23, %v2135_v50  ;;  %v7783_v52 = vadd.f32 %v10235_v3, %v7562_v22  ;;  %v7592_v55 = vadd.f32 %v7591_v44, %v7590_v41  ;;  %v2145_v15 = vpop.f32.mrf.mxu0  ;;  %3273 = vmatmul.mubr.f32.gmra.mxu0 %v13108_v35 }
 0x21e   :  { %v2464_v24 = vpop.f32.mrf.mxu1  ;;  %v2146_v56 = vadd.f32 %v2145_v15, %v13109_v60  ;;  %3278 = vmatprep.mubr.f32.mxu0 %v12810_v45 }
 0x21f   :  { %v10251_v42 = vadd.f32 %v2464_v24, %v2137_v16  ;;  %v7791_v53 = vmul.f32 %v7783_v52, %v7783_v52  ;;  %v2147_v33 = vpop.f32.mrf.mxu0  ;;  %3517 = vmatmul.mubr.f32.gmra.mxu1 %v13108_v35  ;;  %v7784_v50 = vadd.f32 %v10235_v3, %v7592_v55  ;;  %v13110_v16 = vld [vmem:[#allocation30_spill] sm:$0xff]  ;;  %v13111_v52 = vld [vmem:[#allocation112_spill] sm:$0xff] }
 0x220   :  { %v2469_v6 = vpop.f32.mrf.mxu1  ;;  %v2148_v22 = vadd.f32 %v2147_v33, %v13109_v60  ;;  %3522 = vmatprep.mubr.f32.mxu1 %v12810_v45 }
 0x221   :  { %v10257_v44 = vadd.f32 %v2469_v6, %v2146_v56  ;;  %v10260_v41 = vadd.f32 0.1, %v7791_v53  ;;  %v2156_v23 = vpop.f32.mrf.mxu0  ;;  %3280 = vmatmul.mubr.f32.gmra.mxu0 %v13110_v16  ;;  %v7792_v24 = vmul.f32 %v7784_v50, %v7784_v50 }
 0x222   :  { %v2471_v15 = vpop.f32.mrf.mxu1  ;;  %v2157_v7 = vadd.f32 %v2156_v23, %v13111_v52  ;;  %3285 = vmatprep.mubr.f32.mxu0 %v12810_v45  ;;  %v13112_v23 = vld [vmem:[#allocation31_spill] sm:$0xff] }
 0x223   :  { %v10264_v49 = vadd.f32 %v2471_v15, %v2148_v22  ;;  %8042 = vrsqrt.f32 %v10260_v41  ;;  %v2158_v33 = vpop.f32.mrf.mxu0  ;;  %3524 = vmatmul.mubr.f32.gmra.mxu1 %v13110_v16  ;;  %v10269_v56 = vadd.f32 0.1, %v7792_v24  ;;  %v13113_v15 = vld [vmem:[#allocation118_spill] sm:$0xff]  ;;  %vm7809_vm2 = vcmp.eq.f32.partialorder %v10260_v41, inf }
 0x224   :  { %v2476_v55 = vpop.f32.mrf.mxu1  ;;  %v2159_v53 = vadd.f32 %v2158_v33, %v13111_v52  ;;  %3529 = vmatprep.mubr.f32.mxu1 %v12810_v45  ;;  %v13114_v52 = vld [vmem:[#allocation38_spill] sm:$0xff]  ;;  %vm7811_vm4 = vcmp.eq.f32.partialorder %v10260_v41, 0.0 }
 0x225   :  { %v10272_v6 = vadd.f32 %v2476_v55, %v2157_v7  ;;  %v2167_v50 = vpop.f32.mrf.mxu0  ;;  %3287 = vmatmul.mubr.f32.gmra.mxu0 %v13112_v23  ;;  %8044 = vrsqrt.f32 %v10269_v56  ;;  %vm7816_vm3 = vcmp.eq.f32.partialorder %v10269_v56, inf  ;;  %vm7818_vm5 = vcmp.eq.f32.partialorder %v10269_v56, 0.0 }
 0x226   :  { %v2478_v22 = vpop.f32.mrf.mxu1  ;;  %v2168_v60 = vadd.f32 %v2167_v50, %v13113_v15  ;;  %3292 = vmatprep.mubr.f32.mxu0 %v12810_v45 }
 0x227   :  { %v10278_v3 = vadd.f32 %v2478_v22, %v2159_v53  ;;  %v2169_v24 = vpop.f32.mrf.mxu0  ;;  %3531 = vmatmul.mubr.f32.gmra.mxu1 %v13112_v23 }
 0x228   :  { %v2483_v40 = vpop.f32.mrf.mxu1  ;;  %v2170_v7 = vadd.f32 %v2169_v24, %v13113_v15  ;;  %3536 = vmatprep.mubr.f32.mxu1 %v12810_v45  ;;  %v13116_v15 = vld [vmem:[#allocation39_spill] sm:$0xff] }
 0x229   :  { %v10283_v33 = vadd.f32 %v2483_v40, %v2168_v60  ;;  %v2178_v55 = vpop.f32.mrf.mxu0  ;;  %3294 = vmatmul.mubr.f32.gmra.mxu0 %v13114_v52 }
 0x22a   :  { %v2485_v28 = vpop.f32.mrf.mxu1  ;;  %v2179_v50 = vadd.f32 %v2178_v55, %v13115_v31  ;;  %3299 = vmatprep.mubr.f32.mxu0 %v12810_v45 }
 0x22b   :  { %v10288_v53 = vadd.f32 %v2485_v28, %v2170_v7  ;;  %v2180_v22 = vpop.f32.mrf.mxu0  ;;  %3538 = vmatmul.mubr.f32.gmra.mxu1 %v13114_v52 }
 0x22c   :  { %v2490_v36 = vpop.f32.mrf.mxu1  ;;  %v2181_v24 = vadd.f32 %v2180_v22, %v13115_v31  ;;  %3543 = vmatprep.mubr.f32.mxu1 %v12810_v45 }
 0x22d   :  { %v10293_v40 = vadd.f32 %v2490_v36, %v2179_v50  ;;  %v2189_v60 = vpop.f32.mrf.mxu0  ;;  %3301 = vmatmul.mubr.f32.gmra.mxu0 %v13116_v15 }
 0x22e   :  { %v2492_v46 = vpop.f32.mrf.mxu1  ;;  %v2190_v55 = vadd.f32 %v2189_v60, %v13117_v14  ;;  %3306 = vmatprep.mubr.f32.mxu0 %v12810_v45  ;;  %v13119_v60 = vld [vmem:[#allocation115_spill] sm:$0xff] }
 0x22f   :  { %v10298_v28 = vadd.f32 %v2492_v46, %v2181_v24  ;;  %v2191_v34 = vpop.f32.mrf.mxu0  ;;  %3545 = vmatmul.mubr.f32.gmra.mxu1 %v13116_v15 }
 0x230   :  { %v8043_v7 = vpop.eup %8042  ;;  %v2497_v1 = vpop.f32.mrf.mxu1  ;;  %v2192_v36 = vadd.f32 %v2191_v34, %v13117_v14  ;;  %3550 = vmatprep.mubr.f32.mxu1 %v12810_v45 }
 0x231   :  { %v10303_v50 = vadd.f32 %v2497_v1, %v2190_v55  ;;  %v7808_v22 = vmul.f32 %v8043_v7, %v10260_v41  ;;  %v2200_v31 = vpop.f32.mrf.mxu0  ;;  %3308 = vmatmul.mubr.f32.gmra.mxu0 %v13118_v47  ;;  %v7812_v7 = vand.u32 2147483648, %v10260_v41 }
 0x232   :  { %v2499_v46 = vpop.f32.mrf.mxu1  ;;  %v8045_v24 = vpop.eup %8044  ;;  %v2201_v26 = vadd.f32 %v2200_v31, %v13119_v60  ;;  %3313 = vmatprep.mubr.f32.mxu0 %v12810_v45  ;;  %v7819_v31 = vand.u32 2147483648, %v10269_v56 }
 0x233   :  { %v10309_v61 = vadd.f32 %v2499_v46, %v2192_v36  ;;  %v2202_v34 = vpop.f32.mrf.mxu0  ;;  %3552 = vmatmul.mubr.f32.gmra.mxu1 %v13118_v47  ;;  %v7810_v55 = vsel %vm7809_vm2, %v10260_v41, %v7808_v22  ;;  %v7815_v14 = vmul.f32 %v8045_v24, %v10269_v56  ;;  %v13122_v46 = vld [vmem:[#allocation50_spill] sm:$0xff]  ;;  %v13123_v24 = vld [vmem:[#allocation125_spill] sm:$0xff]  ;;  %v13129_v41 = vld [vmem:[#allocation55_spill] sm:$0xff] }
 0x234   :  { %v2504_v1 = vpop.f32.mrf.mxu1  ;;  %v2203_v0 = vadd.f32 %v2202_v34, %v13119_v60  ;;  %3557 = vmatprep.mubr.f32.mxu1 %v12810_v45 }
 0x235   :  { %13120 = vst [vmem:[#allocation157_spill] sm:$0xff] %v10309_v61  ;;  %v10318_v43 = vadd.f32 %v2504_v1, %v2201_v26  ;;  %v2211_v36 = vpop.f32.mrf.mxu0  ;;  %3315 = vmatmul.mubr.f32.gmra.mxu0 %v13122_v46  ;;  %v7817_v22 = vsel %vm7816_vm3, %v10269_v56, %v7815_v14  ;;  %v10331_v1 = vsel %vm7811_vm4, %v7812_v7, %v7810_v55  ;;  %v13127_v7 = vld [vmem:[#allocation119_spill] sm:$0xff] }
 0x236   :  { %v2506_v47 = vpop.f32.mrf.mxu1  ;;  %v2212_v34 = vadd.f32 %v2211_v36, %v13123_v24  ;;  %3320 = vmatprep.mubr.f32.mxu0 %v12810_v45  ;;  %13124 = vst [vmem:[#allocation159_spill] sm:$0xff] %v10331_v1  ;;  %v10333_v60 = vsel %vm7818_vm5, %v7819_v31, %v7817_v22  ;;  %v13130_v1 = vld [vmem:[#allocation121_spill] sm:$0xff] }
 0x237   :  { %13121 = vst [vmem:[#allocation158_spill] sm:$0xff] %v10318_v43  ;;  %v10328_v26 = vadd.f32 %v2506_v47, %v2203_v0  ;;  %13125 = vst [vmem:[#allocation160_spill] sm:$0xff] %v10333_v60  ;;  %v2213_v43 = vpop.f32.mrf.mxu0  ;;  %3559 = vmatmul.mubr.f32.gmra.mxu1 %v13122_v46  ;;  %v13126_v47 = vld [vmem:[#allocation54_spill] sm:$0xff] }
 0x238   :  { %v2511_v61 = vpop.f32.mrf.mxu1  ;;  %v2214_v14 = vadd.f32 %v2213_v43, %v13123_v24  ;;  %3564 = vmatprep.mubr.f32.mxu1 %v12810_v45 }
 0x239   :  { %v10339_v56 = vadd.f32 %v2511_v61, %v2212_v34  ;;  %v2222_v0 = vpop.f32.mrf.mxu0  ;;  %3322 = vmatmul.mubr.f32.gmra.mxu0 %v13126_v47 }
 0x23a   :  { %v2513_v55 = vpop.f32.mrf.mxu1  ;;  %v2223_v31 = vadd.f32 %v2222_v0, %v13127_v7  ;;  %3327 = vmatprep.mubr.f32.mxu0 %v12810_v45 }
 0x23b   :  { %v10344_v36 = vadd.f32 %v2513_v55, %v2214_v14  ;;  %v2224_v22 = vpop.f32.mrf.mxu0  ;;  %3566 = vmatmul.mubr.f32.gmra.mxu1 %v13126_v47 }
 0x23c   :  { %v2518_v46 = vpop.f32.mrf.mxu1  ;;  %v2225_v43 = vadd.f32 %v2224_v22, %v13127_v7  ;;  %3571 = vmatprep.mubr.f32.mxu1 %v12810_v45  ;;  %v13133_v7 = vld [vmem:[#allocation62_spill] sm:$0xff] }
 0x23d   :  { %v10349_v61 = vadd.f32 %v2518_v46, %v2223_v31  ;;  %v2233_v34 = vpop.f32.mrf.mxu0  ;;  %3329 = vmatmul.mubr.f32.gmra.mxu0 %v13129_v41 }
 0x23e   :  { %v2520_v60 = vpop.f32.mrf.mxu1  ;;  %v2234_v0 = vadd.f32 %v2233_v34, %v13130_v1  ;;  %3334 = vmatprep.mubr.f32.mxu0 %v12810_v45 }
 0x23f   :  { %13128 = vst [vmem:[#allocation161_spill] sm:$0xff] %v10349_v61  ;;  %v10354_v14 = vadd.f32 %v2520_v60, %v2225_v43  ;;  %v2235_v55 = vpop.f32.mrf.mxu0  ;;  %3573 = vmatmul.mubr.f32.gmra.mxu1 %v13129_v41  ;;  %v13134_v61 = vld [vmem:[#allocation123_spill] sm:$0xff] }
 0x240   :  { %v2525_v24 = vpop.f32.mrf.mxu1  ;;  %v2236_v22 = vadd.f32 %v2235_v55, %v13130_v1  ;;  %3578 = vmatprep.mubr.f32.mxu1 %v12810_v45  ;;  %v13137_v1 = vld [vmem:[#allocation63_spill] sm:$0xff] }
 0x241   :  { %13131 = vst [vmem:[#allocation162_spill] sm:$0xff] %v10354_v14  ;;  %v10359_v46 = vadd.f32 %v2525_v24, %v2234_v0  ;;  %v2244_v31 = vpop.f32.mrf.mxu0  ;;  %3336 = vmatmul.mubr.f32.gmra.mxu0 %v13133_v7 }
 0x242   :  { %v2527_v47 = vpop.f32.mrf.mxu1  ;;  %v2245_v34 = vadd.f32 %v2244_v31, %v13134_v61  ;;  %3341 = vmatprep.mubr.f32.mxu0 %v12810_v45 }
 0x243   :  { %13132 = vst [vmem:[#allocation163_spill] sm:$0xff] %v10359_v46  ;;  %v10364_v60 = vadd.f32 %v2527_v47, %v2236_v22  ;;  %v2246_v43 = vpop.f32.mrf.mxu0  ;;  %3580 = vmatmul.mubr.f32.gmra.mxu1 %v13133_v7  ;;  %v13138_v46 = vld [vmem:[#allocation128_spill] sm:$0xff] }
 0x244   :  { %v2532_v14 = vpop.f32.mrf.mxu1  ;;  %v2247_v55 = vadd.f32 %v2246_v43, %v13134_v61  ;;  %3585 = vmatprep.mubr.f32.mxu1 %v12810_v45  ;;  %v13141_v61 = vld [vmem:[#allocation70_spill] sm:$0xff] }
 0x245   :  { %13135 = vst [vmem:[#allocation164_spill] sm:$0xff] %v10364_v60  ;;  %v10369_v24 = vadd.f32 %v2532_v14, %v2245_v34  ;;  %v2255_v0 = vpop.f32.mrf.mxu0  ;;  %3343 = vmatmul.mubr.f32.gmra.mxu0 %v13137_v1 }
 0x246   :  { %v2534_v41 = vpop.f32.mrf.mxu1  ;;  %v2256_v31 = vadd.f32 %v2255_v0, %v13138_v46  ;;  %3348 = vmatprep.mubr.f32.mxu0 %v12810_v45 }
 0x247   :  { %13136 = vst [vmem:[#allocation165_spill] sm:$0xff] %v10369_v24  ;;  %v10374_v47 = vadd.f32 %v2534_v41, %v2247_v55  ;;  %v2257_v22 = vpop.f32.mrf.mxu0  ;;  %3587 = vmatmul.mubr.f32.gmra.mxu1 %v13137_v1  ;;  %v13142_v24 = vld [vmem:[#allocation132_spill] sm:$0xff] }
 0x248   :  { %v2539_v60 = vpop.f32.mrf.mxu1  ;;  %v2258_v43 = vadd.f32 %v2257_v22, %v13138_v46  ;;  %3592 = vmatprep.mubr.f32.mxu1 %v12810_v45  ;;  %v13145_v46 = vld [vmem:[#allocation74_spill] sm:$0xff] }
 0x249   :  { %13139 = vst [vmem:[#allocation166_spill] sm:$0xff] %v10374_v47  ;;  %v10379_v14 = vadd.f32 %v2539_v60, %v2256_v31  ;;  %v2266_v34 = vpop.f32.mrf.mxu0  ;;  %3350 = vmatmul.mubr.f32.gmra.mxu0 %v13141_v61 }
 0x24a   :  { %v2541_v7 = vpop.f32.mrf.mxu1  ;;  %v2267_v0 = vadd.f32 %v2266_v34, %v13142_v24  ;;  %3355 = vmatprep.mubr.f32.mxu0 %v12810_v45 }
 0x24b   :  { %13140 = vst [vmem:[#allocation167_spill] sm:$0xff] %v10379_v14  ;;  %v10384_v41 = vadd.f32 %v2541_v7, %v2258_v43  ;;  %v2268_v55 = vpop.f32.mrf.mxu0  ;;  %3594 = vmatmul.mubr.f32.gmra.mxu1 %v13141_v61  ;;  %v13146_v14 = vld [vmem:[#allocation136_spill] sm:$0xff] }
 0x24c   :  { %v2546_v47 = vpop.f32.mrf.mxu1  ;;  %v2269_v22 = vadd.f32 %v2268_v55, %v13142_v24  ;;  %3599 = vmatprep.mubr.f32.mxu1 %v12810_v45  ;;  %v13149_v24 = vld [vmem:[#allocation75_spill] sm:$0xff] }
 0x24d   :  { %13143 = vst [vmem:[#allocation168_spill] sm:$0xff] %v10384_v41  ;;  %v10389_v60 = vadd.f32 %v2546_v47, %v2267_v0  ;;  %v2277_v31 = vpop.f32.mrf.mxu0  ;;  %3357 = vmatmul.mubr.f32.gmra.mxu0 %v13145_v46 }
 0x24e   :  { %v2548_v1 = vpop.f32.mrf.mxu1  ;;  %v2278_v34 = vadd.f32 %v2277_v31, %v13146_v14  ;;  %3362 = vmatprep.mubr.f32.mxu0 %v12810_v45 }
 0x24f   :  { %13144 = vst [vmem:[#allocation169_spill] sm:$0xff] %v10389_v60  ;;  %v10394_v7 = vadd.f32 %v2548_v1, %v2269_v22  ;;  %v2279_v43 = vpop.f32.mrf.mxu0  ;;  %3601 = vmatmul.mubr.f32.gmra.mxu1 %v13145_v46  ;;  %v13150_v60 = vld [vmem:[#allocation139_spill] sm:$0xff] }
 0x250   :  { %v2553_v41 = vpop.f32.mrf.mxu1  ;;  %v2280_v55 = vadd.f32 %v2279_v43, %v13146_v14  ;;  %3606 = vmatprep.mubr.f32.mxu1 %v12810_v45  ;;  %v13153_v14 = vld [vmem:[#allocation82_spill] sm:$0xff] }
 0x251   :  { %13147 = vst [vmem:[#allocation170_spill] sm:$0xff] %v10394_v7  ;;  %v10399_v47 = vadd.f32 %v2553_v41, %v2278_v34  ;;  %v2288_v0 = vpop.f32.mrf.mxu0  ;;  %3364 = vmatmul.mubr.f32.gmra.mxu0 %v13149_v24 }
 0x252   :  { %v2555_v61 = vpop.f32.mrf.mxu1  ;;  %v2289_v31 = vadd.f32 %v2288_v0, %v13150_v60  ;;  %3369 = vmatprep.mubr.f32.mxu0 %v12810_v45 }
 0x253   :  { %13148 = vst [vmem:[#allocation171_spill] sm:$0xff] %v10399_v47  ;;  %v10404_v1 = vadd.f32 %v2555_v61, %v2280_v55  ;;  %v2290_v22 = vpop.f32.mrf.mxu0  ;;  %3608 = vmatmul.mubr.f32.gmra.mxu1 %v13149_v24  ;;  %v13154_v47 = vld [vmem:[#allocation143_spill] sm:$0xff] }
 0x254   :  { %v2560_v7 = vpop.f32.mrf.mxu1  ;;  %v2291_v43 = vadd.f32 %v2290_v22, %v13150_v60  ;;  %3613 = vmatprep.mubr.f32.mxu1 %v12810_v45  ;;  %v13157_v60 = vld [vmem:[#allocation86_spill] sm:$0xff] }
 0x255   :  { %13151 = vst [vmem:[#allocation172_spill] sm:$0xff] %v10404_v1  ;;  %v10409_v41 = vadd.f32 %v2560_v7, %v2289_v31  ;;  %v2299_v34 = vpop.f32.mrf.mxu0  ;;  %3371 = vmatmul.mubr.f32.gmra.mxu0 %v13153_v14 }
 0x256   :  { %v2562_v46 = vpop.f32.mrf.mxu1  ;;  %v2300_v0 = vadd.f32 %v2299_v34, %v13154_v47  ;;  %3376 = vmatprep.mubr.f32.mxu0 %v12810_v45 }
 0x257   :  { %13152 = vst [vmem:[#allocation173_spill] sm:$0xff] %v10409_v41  ;;  %v10414_v61 = vadd.f32 %v2562_v46, %v2291_v43  ;;  %v2301_v55 = vpop.f32.mrf.mxu0  ;;  %3615 = vmatmul.mubr.f32.gmra.mxu1 %v13153_v14  ;;  %v13158_v41 = vld [vmem:[#allocation145_spill] sm:$0xff] }
 0x258   :  { %v2567_v1 = vpop.f32.mrf.mxu1  ;;  %v2302_v22 = vadd.f32 %v2301_v55, %v13154_v47  ;;  %3620 = vmatprep.mubr.f32.mxu1 %v12810_v45  ;;  %v13160_v47 = vld [vmem:[#allocation87_spill] sm:$0xff] }
 0x259   :  { %13155 = vst [vmem:[#allocation174_spill] sm:$0xff] %v10414_v61  ;;  %v10419_v7 = vadd.f32 %v2567_v1, %v2300_v0  ;;  %v2310_v31 = vpop.f32.mrf.mxu0  ;;  %3378 = vmatmul.mubr.f32.gmra.mxu0 %v13157_v60 }
 0x25a   :  { %v2569_v24 = vpop.f32.mrf.mxu1  ;;  %v2311_v34 = vadd.f32 %v2310_v31, %v13158_v41  ;;  %3383 = vmatprep.mubr.f32.mxu0 %v12810_v45 }
 0x25b   :  { %13156 = vst [vmem:[#allocation175_spill] sm:$0xff] %v10419_v7  ;;  %v10424_v46 = vadd.f32 %v2569_v24, %v2302_v22  ;;  %v2312_v43 = vpop.f32.mrf.mxu0  ;;  %3622 = vmatmul.mubr.f32.gmra.mxu1 %v13157_v60  ;;  %v13161_v7 = vld [vmem:[#allocation148_spill] sm:$0xff] }
 0x25c   :  { %v2574_v61 = vpop.f32.mrf.mxu1  ;;  %v2313_v55 = vadd.f32 %v2312_v43, %v13158_v41  ;;  %3627 = vmatprep.mubr.f32.mxu1 %v12810_v45  ;;  %v13163_v41 = vld [vmem:[#allocation91_spill] sm:$0xff] }
 0x25d   :  { %13159 = vst [vmem:[#allocation176_spill] sm:$0xff] %v10424_v46  ;;  %v10429_v1 = vadd.f32 %v2574_v61, %v2311_v34  ;;  %v2321_v0 = vpop.f32.mrf.mxu0  ;;  %3385 = vmatmul.mubr.f32.gmra.mxu0 %v13160_v47 }
 0x25e   :  { %v2576_v14 = vpop.f32.mrf.mxu1  ;;  %v2322_v31 = vadd.f32 %v2321_v0, %v13161_v7  ;;  %3390 = vmatprep.mubr.f32.mxu0 %v12810_v45 }
 0x25f   :  { %v10434_v24 = vadd.f32 %v2576_v14, %v2313_v55  ;;  %v2323_v22 = vpop.f32.mrf.mxu0  ;;  %3629 = vmatmul.mubr.f32.gmra.mxu1 %v13160_v47 }
 0x260   :  { %v2581_v46 = vpop.f32.mrf.mxu1  ;;  %v2324_v43 = vadd.f32 %v2323_v22, %v13161_v7  ;;  %3634 = vmatprep.mubr.f32.mxu1 %v12810_v45 }
 0x261   :  { %13162 = vst [vmem:[#allocation177_spill] sm:$0xff] %v10434_v24  ;;  %v10439_v61 = vadd.f32 %v2581_v46, %v2322_v31  ;;  %v2662_v34 = vpop.f32.mrf.mxu0  ;;  %3392 = vmatmul.mubr.f32.gmra.mxu0 %v13163_v41 }
 0x262   :  { %v2583_v60 = vpop.f32.mrf.mxu1  ;;  %v2663_v0 = vadd.f32 %v2662_v34, %v10146_v37  ;;  %3397 = vmatprep.mubr.f32.mxu0 %v12810_v45 }
 0x263   :  { %v10444_v14 = vadd.f32 %v2583_v60, %v2324_v43  ;;  %v2664_v55 = vpop.f32.mrf.mxu0  ;;  %3636 = vmatmul.mubr.f32.gmra.mxu1 %v13163_v41 }
 0x264   :  { %v2932_v24 = vpop.f32.mrf.mxu1  ;;  %v2665_v22 = vadd.f32 %v2664_v55, %v10156_v63  ;;  %3641 = vmatprep.mubr.f32.mxu1 %v12810_v45  ;;  %v13164_v55 = vld [vmem:[#allocation17_spill] sm:$0xff] }
 0x265   :  { %v10449_v46 = vadd.f32 %v2932_v24, %v2663_v0  ;;  %v2670_v31 = vpop.f32.mrf.mxu0  ;;  %3399 = vmatmul.mubr.f32.gmra.mxu0 %v9008_v25 }
 0x266   :  { %v2934_v7 = vpop.f32.mrf.mxu1  ;;  %v2671_v37 = vadd.f32 %v2670_v31, %v10163_v13  ;;  %3717 = vmatprep.mubr.f32.mxu0 %v12810_v45 }
 0x267   :  { %v10454_v60 = vadd.f32 %v2934_v7, %v2665_v22  ;;  %v2672_v43 = vpop.f32.mrf.mxu0  ;;  %3643 = vmatmul.mubr.f32.gmra.mxu1 %v9008_v25 }
 0x268   :  { %v2941_v34 = vpop.f32.mrf.mxu1  ;;  %v2673_v63 = vadd.f32 %v2672_v43, %v10173_v58  ;;  %4077 = vmatprep.mubr.f32.mxu1 %v12810_v45 }
 0x269   :  { %v10459_v24 = vadd.f32 %v2941_v34, %v2671_v37  ;;  %v2678_v0 = vpop.f32.mrf.mxu0  ;;  %3723 = vmatmul.mubr.f32.vlgmr.msra.gmra.mxu0 %v13164_v55  ;;  %v13178_v55 = vld [vmem:[#allocation158_spill] sm:$0xff] }
 0x26a   :  { %v2943_v41 = vpop.f32.mrf.mxu1  ;;  %v2679_v13 = vadd.f32 %v2678_v0, %v10182_v59  ;;  %3728 = vmatprep.mubr.f32.mxu0 %v12810_v45  ;;  %4286 = vmatpush1.msra.mxu0 %v10108_v27 }
 0x26b   :  { %v10464_v7 = vadd.f32 %v2943_v41, %v2673_v63  ;;  %v2680_v22 = vpop.f32.mrf.mxu0  ;;  %4079 = vmatmul.mubr.f32.vlgmr.msra.gmra.mxu1 %v13093_v8  ;;  %4289 = vmatprep.subr.mxu0 %v10119_v29  ;;  %v13165_v41 = vld [vmem:[#allocation20_spill] sm:$0xff]  ;;  %v13202_v8 = vld [vmem:[#allocation70_spill] sm:$0xff] }
 0x26c   :  { %v2950_v31 = vpop.f32.mrf.mxu1  ;;  %v2681_v58 = vadd.f32 %v2680_v22, %v10189_v54  ;;  %4557 = vmatpush1.msra.mxu1 %v10090_v4  ;;  %4084 = vmatprep.mubr.f32.mxu1 %v12810_v45 }
 0x26d   :  { %v10471_v37 = vadd.f32 %v2950_v31, %v2679_v13  ;;  %v2686_v59 = vpop.f32.mrf.mxu0  ;;  %3734 = vmatmul.mubr.f32.gmra.mxu0 %v13165_v41  ;;  %4559 = vmatprep.subr.mxu1 %v10101_v11  ;;  %v13166_v13 = vand.u32 4294901760, %v9860_v32 }
 0x26e   :  { %v2952_v43 = vpop.f32.mrf.mxu1  ;;  %v2687_v34 = vadd.f32 %v2686_v59, %v10198_v48  ;;  %3739 = vmatprep.mubr.f32.mxu0 %v12810_v45  ;;  %4292 = vmatpush1.msra.mxu0 %v10127_v19 }
 0x26f   :  { %v10478_v63 = vadd.f32 %v2952_v43, %v2681_v58  ;;  %v2688_v54 = vpop.f32.mrf.mxu0  ;;  %4086 = vmatmul.mubr.f32.gmra.mxu1 %v13096_v18  ;;  %4851 = vmatprep.subr.mxu0 %v13166_v13  ;;  %v13167_v58 = vld [vmem:[#allocation23_spill] sm:$0xff]  ;;  %v13200_v18 = vld [vmem:[#allocation169_spill] sm:$0xff] }
 0x270   :  { %v2959_v0 = vpop.f32.mrf.mxu1  ;;  %v2689_v22 = vadd.f32 %v2688_v54, %v10204_v21  ;;  %4091 = vmatprep.mubr.f32.mxu1 %v12810_v45  ;;  %4561 = vmatpush1.msra.mxu1 %v10110_v17  ;;  %v13168_v13 = vld [vmem:[#allocation27_spill] sm:$0xff] }
 0x271   :  { %v10486_v31 = vadd.f32 %v2959_v0, %v2687_v34  ;;  %v2694_v48 = vpop.f32.mrf.mxu0  ;;  %3745 = vmatmul.mubr.f32.gmra.mxu0 %v13167_v58  ;;  %5101 = vmatprep.subr.mxu1 %v9845_v39  ;;  %v13176_v58 = vld [vmem:[#allocation157_spill] sm:$0xff] }
 0x272   :  { %v2961_v59 = vpop.f32.mrf.mxu1  ;;  %v2695_v43 = vadd.f32 %v2694_v48, %v10210_v9  ;;  %3750 = vmatprep.mubr.f32.mxu0 %v12810_v45 }
 0x273   :  { %v10493_v41 = vadd.f32 %v2961_v59, %v2689_v22  ;;  %v2696_v32 = vpop.f32.mrf.mxu0  ;;  %4093 = vmatmul.mubr.f32.gmra.mxu1 %v13098_v12  ;;  %v13196_v12 = vld [vmem:[#allocation63_spill] sm:$0xff] }
 0x274   :  { %v2968_v21 = vpop.f32.mrf.mxu1  ;;  %v2697_v34 = vadd.f32 %v2696_v32, %v10217_v30  ;;  %4098 = vmatprep.mubr.f32.mxu1 %v12810_v45 }
 0x275   :  { %v10498_v54 = vadd.f32 %v2968_v21, %v2695_v43  ;;  %v2702_v0 = vpop.f32.mrf.mxu0  ;;  %3756 = vmatmul.mubr.f32.gmra.mxu0 %v13168_v13  ;;  %v13169_v21 = vld [vmem:[#allocation32_spill] sm:$0xff] }
 0x276   :  { %v2970_v39 = vpop.f32.mrf.mxu1  ;;  %v2703_v9 = vadd.f32 %v2702_v0, %v10222_v20  ;;  %3761 = vmatprep.mubr.f32.mxu0 %v12810_v45 }
 0x277   :  { %v10503_v22 = vadd.f32 %v2970_v39, %v2697_v34  ;;  %v2704_v48 = vpop.f32.mrf.mxu0  ;;  %4100 = vmatmul.mubr.f32.gmra.mxu1 %v13101_v38  ;;  %v13195_v38 = vld [vmem:[#allocation167_spill] sm:$0xff] }
 0x278   :  { %v2977_v59 = vpop.f32.mrf.mxu1  ;;  %v2705_v30 = vadd.f32 %v2704_v48, %v10228_v51  ;;  %4105 = vmatprep.mubr.f32.mxu1 %v12810_v45 }
 0x279   :  { %v10508_v43 = vadd.f32 %v2977_v59, %v2703_v9  ;;  %v2710_v32 = vpop.f32.mrf.mxu0  ;;  %3767 = vmatmul.mubr.f32.gmra.mxu0 %v13169_v21  ;;  %v13170_v59 = vld [vmem:[#allocation36_spill] sm:$0xff] }
 0x27a   :  { %v2979_v13 = vpop.f32.mrf.mxu1  ;;  %v2711_v20 = vadd.f32 %v2710_v32, %v10233_v57  ;;  %3772 = vmatprep.mubr.f32.mxu0 %v12810_v45 }
 0x27b   :  { %v10513_v34 = vadd.f32 %v2979_v13, %v2705_v30  ;;  %v2712_v0 = vpop.f32.mrf.mxu0  ;;  %4107 = vmatmul.mubr.f32.gmra.mxu1 %v13103_v10  ;;  %v13192_v10 = vld [vmem:[#allocation62_spill] sm:$0xff] }
 0x27c   :  { %v2986_v39 = vpop.f32.mrf.mxu1  ;;  %v2713_v51 = vadd.f32 %v2712_v0, %v10240_v2  ;;  %4112 = vmatprep.mubr.f32.mxu1 %v12810_v45 }
 0x27d   :  { %v10518_v9 = vadd.f32 %v2986_v39, %v2711_v20  ;;  %v2718_v48 = vpop.f32.mrf.mxu0  ;;  %3778 = vmatmul.mubr.f32.gmra.mxu0 %v13170_v59  ;;  %v13171_v39 = vld [vmem:[#allocation40_spill] sm:$0xff] }
 0x27e   :  { %v2988_v21 = vpop.f32.mrf.mxu1  ;;  %v2719_v57 = vadd.f32 %v2718_v48, %v10245_v5  ;;  %3783 = vmatprep.mubr.f32.mxu0 %v12810_v45 }
 0x27f   :  { %v10523_v13 = vadd.f32 %v2988_v21, %v2713_v51  ;;  %v2720_v30 = vpop.f32.mrf.mxu0  ;;  %4114 = vmatmul.mubr.f32.gmra.mxu1 %v13106_v62  ;;  %v13191_v62 = vld [vmem:[#allocation165_spill] sm:$0xff] }
 0x280   :  { %v2995_v32 = vpop.f32.mrf.mxu1  ;;  %v2721_v2 = vadd.f32 %v2720_v30, %v10251_v42  ;;  %4119 = vmatprep.mubr.f32.mxu1 %v12810_v45 }
 0x281   :  { %v10528_v20 = vadd.f32 %v2995_v32, %v2719_v57  ;;  %v2726_v0 = vpop.f32.mrf.mxu0  ;;  %3789 = vmatmul.mubr.f32.gmra.mxu0 %v13171_v39  ;;  %v13172_v32 = vld [vmem:[#allocation45_spill] sm:$0xff] }
 0x282   :  { %v2997_v59 = vpop.f32.mrf.mxu1  ;;  %v2727_v5 = vadd.f32 %v2726_v0, %v10257_v44  ;;  %3794 = vmatprep.mubr.f32.mxu0 %v12810_v45 }
 0x283   :  { %v10533_v21 = vadd.f32 %v2997_v59, %v2721_v2  ;;  %v2728_v51 = vpop.f32.mrf.mxu0  ;;  %4121 = vmatmul.mubr.f32.gmra.mxu1 %v13108_v35  ;;  %v13188_v35 = vld [vmem:[#allocation55_spill] sm:$0xff] }
 0x284   :  { %v3004_v48 = vpop.f32.mrf.mxu1  ;;  %v2729_v42 = vadd.f32 %v2728_v51, %v10264_v49  ;;  %4126 = vmatprep.mubr.f32.mxu1 %v12810_v45 }
 0x285   :  { %v10538_v57 = vadd.f32 %v3004_v48, %v2727_v5  ;;  %v2734_v30 = vpop.f32.mrf.mxu0  ;;  %3800 = vmatmul.mubr.f32.gmra.mxu0 %v13172_v32  ;;  %v13173_v48 = vld [vmem:[#allocation49_spill] sm:$0xff] }
 0x286   :  { %v3006_v39 = vpop.f32.mrf.mxu1  ;;  %v2735_v44 = vadd.f32 %v2734_v30, %v10272_v6  ;;  %3805 = vmatprep.mubr.f32.mxu0 %v12810_v45 }
 0x287   :  { %v10543_v59 = vadd.f32 %v3006_v39, %v2729_v42  ;;  %v2736_v2 = vpop.f32.mrf.mxu0  ;;  %4128 = vmatmul.mubr.f32.gmra.mxu1 %v13110_v16  ;;  %v13187_v16 = vld [vmem:[#allocation163_spill] sm:$0xff] }
 0x288   :  { %v3013_v0 = vpop.f32.mrf.mxu1  ;;  %v2737_v49 = vadd.f32 %v2736_v2, %v10278_v3  ;;  %4133 = vmatprep.mubr.f32.mxu1 %v12810_v45 }
 0x289   :  { %v10548_v5 = vadd.f32 %v3013_v0, %v2735_v44  ;;  %v2742_v51 = vpop.f32.mrf.mxu0  ;;  %3811 = vmatmul.mubr.f32.gmra.mxu0 %v13173_v48  ;;  %v13174_v0 = vld [vmem:[#allocation52_spill] sm:$0xff] }
 0x28a   :  { %v3015_v32 = vpop.f32.mrf.mxu1  ;;  %v2743_v6 = vadd.f32 %v2742_v51, %v10283_v33  ;;  %3816 = vmatprep.mubr.f32.mxu0 %v12810_v45 }
 0x28b   :  { %v10553_v39 = vadd.f32 %v3015_v32, %v2737_v49  ;;  %v2744_v42 = vpop.f32.mrf.mxu0  ;;  %4135 = vmatmul.mubr.f32.gmra.mxu1 %v13112_v23  ;;  %v13184_v23 = vld [vmem:[#allocation54_spill] sm:$0xff] }
 0x28c   :  { %v3022_v30 = vpop.f32.mrf.mxu1  ;;  %v2745_v3 = vadd.f32 %v2744_v42, %v10288_v53  ;;  %4140 = vmatprep.mubr.f32.mxu1 %v12810_v45 }
 0x28d   :  { %v10558_v44 = vadd.f32 %v3022_v30, %v2743_v6  ;;  %v2750_v2 = vpop.f32.mrf.mxu0  ;;  %3822 = vmatmul.mubr.f32.gmra.mxu0 %v13174_v0  ;;  %v13175_v30 = vld [vmem:[#allocation56_spill] sm:$0xff] }
 0x28e   :  { %v3024_v48 = vpop.f32.mrf.mxu1  ;;  %v2751_v33 = vadd.f32 %v2750_v2, %v10293_v40  ;;  %3827 = vmatprep.mubr.f32.mxu0 %v12810_v45 }
 0x28f   :  { %v10563_v32 = vadd.f32 %v3024_v48, %v2745_v3  ;;  %v2752_v49 = vpop.f32.mrf.mxu0  ;;  %4142 = vmatmul.mubr.f32.gmra.mxu1 %v13114_v52  ;;  %v13179_v52 = vld [vmem:[#allocation44_spill] sm:$0xff] }
 0x290   :  { %v3031_v51 = vpop.f32.mrf.mxu1  ;;  %v2753_v53 = vadd.f32 %v2752_v49, %v10298_v28  ;;  %4147 = vmatprep.mubr.f32.mxu1 %v12810_v45 }
 0x291   :  { %v10568_v6 = vadd.f32 %v3031_v51, %v2751_v33  ;;  %v2758_v42 = vpop.f32.mrf.mxu0  ;;  %3833 = vmatmul.mubr.f32.gmra.mxu0 %v13175_v30  ;;  %v13177_v51 = vld [vmem:[#allocation60_spill] sm:$0xff] }
 0x292   :  { %v3033_v0 = vpop.f32.mrf.mxu1  ;;  %v2759_v40 = vadd.f32 %v2758_v42, %v10303_v50  ;;  %3838 = vmatprep.mubr.f32.mxu0 %v12810_v45 }
 0x293   :  { %v10573_v48 = vadd.f32 %v3033_v0, %v2753_v53  ;;  %v2760_v3 = vpop.f32.mrf.mxu0  ;;  %4149 = vmatmul.mubr.f32.gmra.mxu1 %v13116_v15  ;;  %v13181_v15 = vld [vmem:[#allocation50_spill] sm:$0xff] }
 0x294   :  { %v3040_v2 = vpop.f32.mrf.mxu1  ;;  %v2761_v28 = vadd.f32 %v2760_v3, %v13176_v58  ;;  %4154 = vmatprep.mubr.f32.mxu1 %v12810_v45 }
 0x295   :  { %v10578_v33 = vadd.f32 %v3040_v2, %v2759_v40  ;;  %v2766_v49 = vpop.f32.mrf.mxu0  ;;  %3844 = vmatmul.mubr.f32.gmra.mxu0 %v13177_v51  ;;  %v13180_v2 = vld [vmem:[#allocation64_spill] sm:$0xff] }
 0x296   :  { %v3042_v30 = vpop.f32.mrf.mxu1  ;;  %v2767_v50 = vadd.f32 %v2766_v49, %v13178_v55  ;;  %3849 = vmatprep.mubr.f32.mxu0 %v12810_v45 }
 0x297   :  { %v10583_v0 = vadd.f32 %v3042_v30, %v2761_v28  ;;  %v2768_v53 = vpop.f32.mrf.mxu0  ;;  %4156 = vmatmul.mubr.f32.gmra.mxu1 %v13179_v52  ;;  %v13183_v52 = vld [vmem:[#allocation161_spill] sm:$0xff] }
 0x298   :  { %v3049_v42 = vpop.f32.mrf.mxu1  ;;  %v2769_v58 = vadd.f32 %v2768_v53, %v10328_v26  ;;  %4161 = vmatprep.mubr.f32.mxu1 %v12810_v45 }
 0x299   :  { %v10588_v40 = vadd.f32 %v3049_v42, %v2767_v50  ;;  %v2774_v3 = vpop.f32.mrf.mxu0  ;;  %3855 = vmatmul.mubr.f32.gmra.mxu0 %v13180_v2  ;;  %v13182_v42 = vld [vmem:[#allocation68_spill] sm:$0xff] }
 0x29a   :  { %v3051_v51 = vpop.f32.mrf.mxu1  ;;  %v2775_v55 = vadd.f32 %v2774_v3, %v10339_v56  ;;  %3860 = vmatprep.mubr.f32.mxu0 %v12810_v45 }
 0x29b   :  { %v10593_v30 = vadd.f32 %v3051_v51, %v2769_v58  ;;  %v2776_v28 = vpop.f32.mrf.mxu0  ;;  %4163 = vmatmul.mubr.f32.gmra.mxu1 %v13181_v15  ;;  %v13185_v15 = vld [vmem:[#allocation162_spill] sm:$0xff] }
 0x29c   :  { %v3058_v49 = vpop.f32.mrf.mxu1  ;;  %v2777_v26 = vadd.f32 %v2776_v28, %v10344_v36  ;;  %4168 = vmatprep.mubr.f32.mxu1 %v12810_v45 }
 0x29d   :  { %v10598_v50 = vadd.f32 %v3058_v49, %v2775_v55  ;;  %v2782_v53 = vpop.f32.mrf.mxu0  ;;  %3866 = vmatmul.mubr.f32.gmra.mxu0 %v13182_v42  ;;  %v13186_v49 = vld [vmem:[#allocation72_spill] sm:$0xff] }
 0x29e   :  { %v3060_v2 = vpop.f32.mrf.mxu1  ;;  %v2783_v56 = vadd.f32 %v2782_v53, %v13183_v52  ;;  %3871 = vmatprep.mubr.f32.mxu0 %v12810_v45 }
 0x29f   :  { %v10603_v51 = vadd.f32 %v3060_v2, %v2777_v26  ;;  %v2784_v58 = vpop.f32.mrf.mxu0  ;;  %4170 = vmatmul.mubr.f32.gmra.mxu1 %v13184_v23  ;;  %v13189_v23 = vld [vmem:[#allocation164_spill] sm:$0xff] }
 0x2a0   :  { %v3067_v3 = vpop.f32.mrf.mxu1  ;;  %v2785_v36 = vadd.f32 %v2784_v58, %v13185_v15  ;;  %4175 = vmatprep.mubr.f32.mxu1 %v12810_v45 }
 0x2a1   :  { %v10608_v55 = vadd.f32 %v3067_v3, %v2783_v56  ;;  %v2790_v28 = vpop.f32.mrf.mxu0  ;;  %3877 = vmatmul.mubr.f32.gmra.mxu0 %v13186_v49  ;;  %v13190_v3 = vld [vmem:[#allocation76_spill] sm:$0xff] }
 0x2a2   :  { %v3069_v42 = vpop.f32.mrf.mxu1  ;;  %v2791_v52 = vadd.f32 %v2790_v28, %v13187_v16  ;;  %3882 = vmatprep.mubr.f32.mxu0 %v12810_v45 }
 0x2a3   :  { %v10613_v2 = vadd.f32 %v3069_v42, %v2785_v36  ;;  %v2792_v26 = vpop.f32.mrf.mxu0  ;;  %4177 = vmatmul.mubr.f32.gmra.mxu1 %v13188_v35  ;;  %v13193_v35 = vld [vmem:[#allocation166_spill] sm:$0xff] }
 0x2a4   :  { %v3076_v53 = vpop.f32.mrf.mxu1  ;;  %v2793_v15 = vadd.f32 %v2792_v26, %v13189_v23  ;;  %4182 = vmatprep.mubr.f32.mxu1 %v12810_v45 }
 0x2a5   :  { %v10618_v56 = vadd.f32 %v3076_v53, %v2791_v52  ;;  %v2798_v58 = vpop.f32.mrf.mxu0  ;;  %3888 = vmatmul.mubr.f32.gmra.mxu0 %v13190_v3  ;;  %v13194_v53 = vld [vmem:[#allocation80_spill] sm:$0xff] }
 0x2a6   :  { %v3078_v49 = vpop.f32.mrf.mxu1  ;;  %v2799_v16 = vadd.f32 %v2798_v58, %v13191_v62  ;;  %3893 = vmatprep.mubr.f32.mxu0 %v12810_v45 }
 0x2a7   :  { %v10623_v42 = vadd.f32 %v3078_v49, %v2793_v15  ;;  %v2800_v36 = vpop.f32.mrf.mxu0  ;;  %4184 = vmatmul.mubr.f32.gmra.mxu1 %v13192_v10  ;;  %v13197_v10 = vld [vmem:[#allocation168_spill] sm:$0xff] }
 0x2a8   :  { %v3085_v28 = vpop.f32.mrf.mxu1  ;;  %v2801_v23 = vadd.f32 %v2800_v36, %v13193_v35  ;;  %4189 = vmatprep.mubr.f32.mxu1 %v12810_v45 }
 0x2a9   :  { %v10628_v52 = vadd.f32 %v3085_v28, %v2799_v16  ;;  %v2806_v26 = vpop.f32.mrf.mxu0  ;;  %3899 = vmatmul.mubr.f32.gmra.mxu0 %v13194_v53  ;;  %v13199_v28 = vld [vmem:[#allocation84_spill] sm:$0xff] }
 0x2aa   :  { %v3087_v3 = vpop.f32.mrf.mxu1  ;;  %v2807_v62 = vadd.f32 %v2806_v26, %v13195_v38  ;;  %3904 = vmatprep.mubr.f32.mxu0 %v12810_v45 }
 0x2ab   :  { %v10633_v49 = vadd.f32 %v3087_v3, %v2801_v23  ;;  %v2808_v15 = vpop.f32.mrf.mxu0  ;;  %4191 = vmatmul.mubr.f32.gmra.mxu1 %v13196_v12  ;;  %v13203_v12 = vld [vmem:[#allocation170_spill] sm:$0xff] }
 0x2ac   :  { %v3094_v58 = vpop.f32.mrf.mxu1  ;;  %v2809_v35 = vadd.f32 %v2808_v15, %v13197_v10  ;;  %4196 = vmatprep.mubr.f32.mxu1 %v12810_v45 }
 0x2ad   :  { %v10638_v16 = vadd.f32 %v3094_v58, %v2807_v62  ;;  %v2814_v36 = vpop.f32.mrf.mxu0  ;;  %3910 = vmatmul.mubr.f32.gmra.mxu0 %v13199_v28  ;;  %v13205_v58 = vld [vmem:[#allocation88_spill] sm:$0xff] }
 0x2ae   :  { %v3096_v53 = vpop.f32.mrf.mxu1  ;;  %v2815_v38 = vadd.f32 %v2814_v36, %v13200_v18  ;;  %3915 = vmatprep.mubr.f32.mxu0 %v12810_v45 }
 0x2af   :  { %13198 = vst [vmem:[#allocation157_spill] sm:$0xff] %v10638_v16  ;;  %v10643_v3 = vadd.f32 %v3096_v53, %v2809_v35  ;;  %v2816_v23 = vpop.f32.mrf.mxu0  ;;  %4198 = vmatmul.mubr.f32.gmra.mxu1 %v13202_v8  ;;  %v13206_v16 = vld [vmem:[#allocation171_spill] sm:$0xff]  ;;  %v13209_v8 = vld [vmem:[#allocation172_spill] sm:$0xff] }
 0x2b0   :  { %v3103_v26 = vpop.f32.mrf.mxu1  ;;  %v2817_v10 = vadd.f32 %v2816_v23, %v13203_v12  ;;  %4203 = vmatprep.mubr.f32.mxu1 %v12810_v45 }
 0x2b1   :  { %13201 = vst [vmem:[#allocation158_spill] sm:$0xff] %v10643_v3  ;;  %v10648_v62 = vadd.f32 %v3103_v26, %v2815_v38  ;;  %v2822_v15 = vpop.f32.mrf.mxu0  ;;  %3921 = vmatmul.mubr.f32.gmra.mxu0 %v13205_v58  ;;  %v13208_v3 = vld [vmem:[#allocation74_spill] sm:$0xff]  ;;  %v13211_v26 = vld [vmem:[#allocation92_spill] sm:$0xff] }
 0x2b2   :  { %v3105_v28 = vpop.f32.mrf.mxu1  ;;  %v2823_v18 = vadd.f32 %v2822_v15, %v13206_v16  ;;  %3926 = vmatprep.mubr.f32.mxu0 %v12810_v45 }
 0x2b3   :  { %13204 = vst [vmem:[#allocation161_spill] sm:$0xff] %v10648_v62  ;;  %v10653_v53 = vadd.f32 %v3105_v28, %v2817_v10  ;;  %v2824_v35 = vpop.f32.mrf.mxu0  ;;  %4205 = vmatmul.mubr.f32.gmra.mxu1 %v13208_v3  ;;  %v13212_v62 = vld [vmem:[#allocation173_spill] sm:$0xff]  ;;  %v13215_v3 = vld [vmem:[#allocation174_spill] sm:$0xff] }
 0x2b4   :  { %v3112_v36 = vpop.f32.mrf.mxu1  ;;  %v2825_v12 = vadd.f32 %v2824_v35, %v13209_v8  ;;  %4210 = vmatprep.mubr.f32.mxu1 %v12810_v45 }
 0x2b5   :  { %13207 = vst [vmem:[#allocation162_spill] sm:$0xff] %v10653_v53  ;;  %v10658_v38 = vadd.f32 %v3112_v36, %v2823_v18  ;;  %v2830_v23 = vpop.f32.mrf.mxu0  ;;  %3932 = vmatmul.mubr.f32.gmra.mxu0 %v13211_v26  ;;  %v13214_v53 = vld [vmem:[#allocation75_spill] sm:$0xff]  ;;  %v13216_v36 = vld [vmem:[#allocation96_spill] sm:$0xff] }
 0x2b6   :  { %v3114_v58 = vpop.f32.mrf.mxu1  ;;  %v2831_v16 = vadd.f32 %v2830_v23, %v13212_v62  ;;  %3937 = vmatprep.mubr.f32.mxu0 %v12810_v45 }
 0x2b7   :  { %13210 = vst [vmem:[#allocation163_spill] sm:$0xff] %v10658_v38  ;;  %v10663_v28 = vadd.f32 %v3114_v58, %v2825_v12  ;;  %v2832_v10 = vpop.f32.mrf.mxu0  ;;  %4212 = vmatmul.mubr.f32.gmra.mxu1 %v13214_v53  ;;  %v13217_v38 = vld [vmem:[#allocation175_spill] sm:$0xff]  ;;  %v13220_v53 = vld [vmem:[#allocation176_spill] sm:$0xff] }
 0x2b8   :  { %v3121_v15 = vpop.f32.mrf.mxu1  ;;  %v2833_v8 = vadd.f32 %v2832_v10, %v13215_v3  ;;  %4217 = vmatprep.mubr.f32.mxu1 %v12810_v45 }
 0x2b9   :  { %13213 = vst [vmem:[#allocation164_spill] sm:$0xff] %v10663_v28  ;;  %v10668_v18 = vadd.f32 %v3121_v15, %v2831_v16  ;;  %v2838_v35 = vpop.f32.mrf.mxu0  ;;  %3943 = vmatmul.mubr.f32.gmra.mxu0 %v13216_v36  ;;  %v13219_v28 = vld [vmem:[#allocation82_spill] sm:$0xff] }
 0x2ba   :  { %v3123_v26 = vpop.f32.mrf.mxu1  ;;  %v2839_v62 = vadd.f32 %v2838_v35, %v13217_v38  ;;  %3948 = vmatprep.mubr.f32.mxu0 %v12810_v45  ;;  %v13221_v15 = vld [vmem:[#allocation98_spill] sm:$0xff] }
 0x2bb   :  { %v10673_v58 = vadd.f32 %v3123_v26, %v2833_v8  ;;  %v2840_v12 = vpop.f32.mrf.mxu0  ;;  %4219 = vmatmul.mubr.f32.gmra.mxu1 %v13219_v28  ;;  %v13223_v28 = vld [vmem:[#allocation177_spill] sm:$0xff] }
 0x2bc   :  { %v3130_v23 = vpop.f32.mrf.mxu1  ;;  %v2841_v3 = vadd.f32 %v2840_v12, %v13220_v53  ;;  %4224 = vmatprep.mubr.f32.mxu1 %v12810_v45 }
 0x2bd   :  { %13218 = vst [vmem:[#allocation165_spill] sm:$0xff] %v10673_v58  ;;  %v10678_v16 = vadd.f32 %v3130_v23, %v2839_v62  ;;  %v2846_v10 = vpop.f32.mrf.mxu0  ;;  %3954 = vmatmul.mubr.f32.gmra.mxu0 %v13221_v15  ;;  %v13222_v58 = vld [vmem:[#allocation86_spill] sm:$0xff]  ;;  %v13224_v23 = vld [vmem:[#allocation101_spill] sm:$0xff] }
 0x2be   :  { %v3132_v36 = vpop.f32.mrf.mxu1  ;;  %v2847_v38 = vadd.f32 %v2846_v10, %v10429_v1  ;;  %3959 = vmatprep.mubr.f32.mxu0 %v12810_v45 }
 0x2bf   :  { %v10683_v26 = vadd.f32 %v3132_v36, %v2841_v3  ;;  %v2848_v8 = vpop.f32.mrf.mxu0  ;;  %4226 = vmatmul.mubr.f32.gmra.mxu1 %v13222_v58  ;;  %v13226_v58 = vld [vmem:[#allocation91_spill] sm:$0xff] }
 0x2c0   :  { %v3139_v35 = vpop.f32.mrf.mxu1  ;;  %v2849_v53 = vadd.f32 %v2848_v8, %v13223_v28  ;;  %4231 = vmatprep.mubr.f32.mxu1 %v12810_v45 }
 0x2c1   :  { %v10688_v62 = vadd.f32 %v3139_v35, %v2847_v38  ;;  %v2854_v12 = vpop.f32.mrf.mxu0  ;;  %3965 = vmatmul.mubr.f32.gmra.mxu0 %v13224_v23  ;;  %v13225_v35 = vld [vmem:[#allocation103_spill] sm:$0xff] }
 0x2c2   :  { %v3141_v15 = vpop.f32.mrf.mxu1  ;;  %v2855_v1 = vadd.f32 %v2854_v12, %v10439_v61  ;;  %3970 = vmatprep.mubr.f32.mxu0 %v12810_v45 }
 0x2c3   :  { %v10693_v36 = vadd.f32 %v3141_v15, %v2849_v53  ;;  %v2856_v3 = vpop.f32.mrf.mxu0  ;;  %4233 = vmatmul.mubr.f32.gmra.mxu1 %v13160_v47 }
 0x2c4   :  { %v3148_v10 = vpop.f32.mrf.mxu1  ;;  %v2857_v28 = vadd.f32 %v2856_v3, %v10444_v14  ;;  %4238 = vmatprep.mubr.f32.mxu1 %v12810_v45 }
 0x2c5   :  { %v10698_v38 = vadd.f32 %v3148_v10, %v2855_v1  ;;  %v3232_v8 = vpop.f32.mrf.mxu0  ;;  %3976 = vmatmul.mubr.f32.gmra.mxu0 %v13225_v35  ;;  %v13227_v10 = vld [vmem:[#allocation104_spill] sm:$0xff] }
 0x2c6   :  { %v3150_v23 = vpop.f32.mrf.mxu1  ;;  %v3233_v61 = vadd.f32 %v3232_v8, %v10449_v46  ;;  %3981 = vmatprep.mubr.f32.mxu0 %v12810_v45 }
 0x2c7   :  { %v10703_v15 = vadd.f32 %v3150_v23, %v2857_v28  ;;  %v3234_v53 = vpop.f32.mrf.mxu0  ;;  %4240 = vmatmul.mubr.f32.gmra.mxu1 %v13226_v58 }
 0x2c8   :  { %v3476_v12 = vpop.f32.mrf.mxu1  ;;  %v3235_v14 = vadd.f32 %v3234_v53, %v10454_v60  ;;  %4245 = vmatprep.mubr.f32.mxu1 %v12810_v45  ;;  %v13228_v53 = vld [vmem:[#allocation9_spill] sm:$0xff] }
 0x2c9   :  { %v3477_v1 = vadd.f32 %v3476_v12, %v3233_v61  ;;  %v3239_v3 = vpop.f32.mrf.mxu0  ;;  %3987 = vmatmul.mubr.f32.gmra.mxu0 %v13227_v10 }
 0x2ca   :  { %v3478_v35 = vpop.f32.mrf.mxu1  ;;  %v3240_v47 = vadd.f32 %v3239_v3, %v10459_v24  ;;  %4325 = vmatprep.mubr.f32.mxu0 %v12810_v45 }
 0x2cb   :  { %v3479_v46 = vadd.f32 %v3478_v35, %v3235_v14  ;;  %8046 = vtanh.f32 %v3477_v1  ;;  %v3241_v23 = vpop.f32.mrf.mxu0  ;;  %4247 = vmatmul.mubr.f32.gmra.mxu1 %v9008_v25  ;;  %v13229_v14 = vand.u32 4294901760, %v10108_v27 }
 0x2cc   :  { %v3483_v28 = vpop.f32.mrf.mxu1  ;;  %v3242_v8 = vadd.f32 %v3241_v23, %v10464_v7  ;;  %4594 = vmatprep.mubr.f32.mxu1 %v12810_v45  ;;  %v13230_v7 = vld [vmem:[#allocation13_spill] sm:$0xff] }
 0x2cd   :  { %v3484_v60 = vadd.f32 %v3483_v28, %v3240_v47  ;;  %8048 = vtanh.f32 %v3479_v46  ;;  %v3246_v61 = vpop.f32.mrf.mxu0  ;;  %4328 = vmatmul.mubr.f32.vlgmr.msra.gmra.mxu0 %v13228_v53  ;;  %v13231_v47 = vand.u32 4294901760, %v10119_v29  ;;  %v63_v46 = vld [vmem:[%s12263_s0 + $0x78] sm:$0x3] }
 0x2ce   :  { %v3485_v12 = vpop.f32.mrf.mxu1  ;;  %v3247_v24 = vadd.f32 %v3246_v61, %v10471_v37  ;;  %4333 = vmatprep.mubr.f32.mxu0 %v12810_v45  ;;  %4855 = vmatpush1.msra.mxu0 %v13229_v14  ;;  %v313_v27 = vsel %vm290_vm0, %v63_v46, 0  ;;  %v13344_v53 = vld [vmem:[#allocation115_spill] sm:$0xff] }
 0x2cf   :  { %8050 = vtanh.f32 %v3484_v60  ;;  %v3486_v35 = vadd.f32 %v3485_v12, %v3242_v8  ;;  %v3248_v1 = vpop.f32.mrf.mxu0  ;;  %4598 = vmatmul.mubr.f32.vlgmr.msra.gmra.mxu1 %v13230_v7  ;;  %4859 = vmatprep.subr.mxu0 %v13231_v47  ;;  %v13232_v8 = vld [vmem:[#allocation10_spill] sm:$0xff]  ;;  %v10732_v29 = vand.u32 4294901760, %v313_v27 }
 0x2d0   :  { %v3490_v3 = vpop.f32.mrf.mxu1  ;;  %v3249_v37 = vadd.f32 %v3248_v1, %v10478_v63  ;;  %5103 = vmatpush1.msra.mxu1 %v10090_v4  ;;  %4603 = vmatprep.mubr.f32.mxu1 %v12810_v45  ;;  %v13233_v4 = vand.u32 4294901760, %v10127_v19  ;;  %v13235_v19 = vld [vmem:[#allocation11_spill] sm:$0xff] }
 0x2d1   :  { %8052 = vtanh.f32 %v3486_v35  ;;  %v3491_v23 = vadd.f32 %v3490_v3, %v3247_v24  ;;  %v3253_v28 = vpop.f32.mrf.mxu0  ;;  %4336 = vmatmul.mubr.f32.gmra.mxu0 %v13232_v8  ;;  %5105 = vmatprep.subr.mxu1 %v10101_v11  ;;  %v13234_v35 = vld [vmem:[#allocation14_spill] sm:$0xff]  ;;  %v10741_v14 = vsub.f32 %v313_v27, %v10732_v29  ;;  %v13236_v27 = vld [vmem:[#allocation16_spill] sm:$0xff] }
 0x2d2   :  { %v3492_v60 = vpop.f32.mrf.mxu1  ;;  %v3254_v61 = vadd.f32 %v3253_v28, %v10486_v31  ;;  %4341 = vmatprep.mubr.f32.mxu0 %v12810_v45  ;;  %4863 = vmatpush1.msra.mxu0 %v13233_v4 }
 0x2d3   :  { %8054 = vtanh.f32 %v3491_v23  ;;  %v3493_v63 = vadd.f32 %v3492_v60, %v3249_v37  ;;  %v3255_v12 = vpop.f32.mrf.mxu0  ;;  %4607 = vmatmul.mubr.f32.gmra.mxu1 %v13234_v35  ;;  %5345 = vmatprep.subr.mxu0 %v10732_v29  ;;  %v12649_v47 = vand.u32 4294901760, %v10741_v14 }
 0x2d4   :  { %v3497_v24 = vpop.f32.mrf.mxu1  ;;  %v3256_v11 = vadd.f32 %v3255_v12, %v10493_v41  ;;  %4612 = vmatprep.mubr.f32.mxu1 %v12810_v45  ;;  %5107 = vmatpush1.msra.mxu1 %v10110_v17 }
 0x2d5   :  { %8056 = vtanh.f32 %v3493_v63  ;;  %v3498_v31 = vadd.f32 %v3497_v24, %v3254_v61  ;;  %v3260_v1 = vpop.f32.mrf.mxu0  ;;  %4344 = vmatmul.mubr.f32.gmra.mxu0 %v13235_v19  ;;  %v5691_v17 = vsub.f32 %v10741_v14, %v12649_v47  ;;  %v13237_v63 = vld [vmem:[#allocation15_spill] sm:$0xff] }
 0x2d6   :  { %v3499_v3 = vpop.f32.mrf.mxu1  ;;  %v3261_v46 = vadd.f32 %v3260_v1, %v10498_v54  ;;  %4349 = vmatprep.mubr.f32.mxu0 %v12810_v45 }
 0x2d7   :  { %8058 = vtanh.f32 %v3498_v31  ;;  %v3500_v37 = vadd.f32 %v3499_v3, %v3256_v11  ;;  %v3262_v23 = vpop.f32.mrf.mxu0  ;;  %4616 = vmatmul.mubr.f32.gmra.mxu1 %v13236_v27  ;;  %v5692_v12 = vand.u32 4294901760, %v5691_v17  ;;  %v13238_v3 = vld [vmem:[#allocation117_spill] sm:$0xff] }
 0x2d8   :  { %v3504_v41 = vpop.f32.mrf.mxu1  ;;  %v8047_v28 = vpop.eup %8046  ;;  %v3263_v60 = vadd.f32 %v3262_v23, %v10503_v22  ;;  %4621 = vmatprep.mubr.f32.mxu1 %v12810_v45  ;;  %v13240_v23 = vld [vmem:[#allocation137_spill] sm:$0xff] }
 0x2d9   :  { %8060 = vtanh.f32 %v3500_v37  ;;  %v3505_v61 = vadd.f32 %v3504_v41, %v3261_v46  ;;  %v3267_v54 = vpop.f32.mrf.mxu0  ;;  %4352 = vmatmul.mubr.f32.gmra.mxu0 %v13237_v63  ;;  %v7335_v47 = vmul.f32 %v8047_v28, %v13238_v3  ;;  %v13239_v46 = vld [vmem:[#allocation19_spill] sm:$0xff]  ;;  %5693 = vmatprep.subr.mxu1 %v5692_v12 }
 0x2da   :  { %v3506_v4 = vpop.f32.mrf.mxu1  ;;  %v8049_v24 = vpop.eup %8048  ;;  %v3268_v11 = vadd.f32 %v3267_v54, %v10508_v43  ;;  %4357 = vmatprep.mubr.f32.mxu0 %v12810_v45  ;;  %v13241_v54 = vld [vmem:[#allocation21_spill] sm:$0xff] }
 0x2db   :  { %8062 = vtanh.f32 %v3505_v61  ;;  %v3507_v31 = vadd.f32 %v3506_v4, %v3263_v60  ;;  %v3269_v22 = vpop.f32.mrf.mxu0  ;;  %4625 = vmatmul.mubr.f32.gmra.mxu1 %v13239_v46  ;;  %v7336_v60 = vmul.f32 %v8049_v24, %v13238_v3  ;;  %v13243_v24 = vld [vmem:[#allocation138_spill] sm:$0xff] }
 0x2dc   :  { %v8051_v1 = vpop.eup %8050  ;;  %v3511_v37 = vpop.f32.mrf.mxu1  ;;  %v3270_v63 = vadd.f32 %v3269_v22, %v10513_v34  ;;  %4630 = vmatprep.mubr.f32.mxu1 %v12810_v45  ;;  %v13242_v22 = vld [vmem:[#allocation24_spill] sm:$0xff] }
 0x2dd   :  { %v7343_v41 = vmul.f32 %v8051_v1, %v13240_v23  ;;  %8064 = vtanh.f32 %v3507_v31  ;;  %v3512_v17 = vadd.f32 %v3511_v37, %v3268_v11  ;;  %v3274_v61 = vpop.f32.mrf.mxu0  ;;  %4360 = vmatmul.mubr.f32.gmra.mxu0 %v13241_v54 }
 0x2de   :  { %v8053_v43 = vpop.eup %8052  ;;  %v3513_v28 = vpop.f32.mrf.mxu1  ;;  %v3275_v12 = vadd.f32 %v3274_v61, %v10518_v9  ;;  %4365 = vmatprep.mubr.f32.mxu0 %v12810_v45 }
 0x2df   :  { %v7593_v4 = vadd.f32 %v7343_v41, %v7335_v47  ;;  %v7344_v27 = vmul.f32 %v8053_v43, %v13240_v23  ;;  %8066 = vtanh.f32 %v3512_v17  ;;  %v3276_v31 = vpop.f32.mrf.mxu0  ;;  %v3514_v11 = vadd.f32 %v3513_v28, %v3270_v63  ;;  %4634 = vmatmul.mubr.f32.gmra.mxu1 %v13242_v22  ;;  %v13244_v41 = vld [vmem:[#allocation25_spill] sm:$0xff]  ;;  %v13339_v23 = vld [vmem:[#allocation39_spill] sm:$0xff] }
 0x2e0   :  { %v8055_v34 = vpop.eup %8054  ;;  %v3518_v1 = vpop.f32.mrf.mxu1  ;;  %v3277_v54 = vadd.f32 %v3276_v31, %v10523_v13  ;;  %4639 = vmatprep.mubr.f32.mxu1 %v12810_v45  ;;  %v13246_v31 = vld [vmem:[#allocation140_spill] sm:$0xff] }
 0x2e1   :  { %v7623_v37 = vadd.f32 %v7344_v27, %v7336_v60  ;;  %v7351_v46 = vmul.f32 %v8055_v34, %v13243_v24  ;;  %v3519_v3 = vadd.f32 %v3518_v1, %v3275_v12  ;;  %8068 = vtanh.f32 %v3514_v11  ;;  %v3281_v9 = vpop.f32.mrf.mxu0  ;;  %4368 = vmatmul.mubr.f32.gmra.mxu0 %v13244_v41  ;;  %v13245_v12 = vld [vmem:[#allocation28_spill] sm:$0xff] }
 0x2e2   :  { %v8057_v47 = vpop.eup %8056  ;;  %v3520_v17 = vpop.f32.mrf.mxu1  ;;  %v3282_v61 = vadd.f32 %v3281_v9, %v10528_v20  ;;  %4373 = vmatprep.mubr.f32.mxu0 %v12810_v45 }
 0x2e3   :  { %v7594_v43 = vadd.f32 %v7593_v4, %v7351_v46  ;;  %v7352_v63 = vmul.f32 %v8057_v47, %v13243_v24  ;;  %8070 = vtanh.f32 %v3519_v3  ;;  %v3283_v60 = vpop.f32.mrf.mxu0  ;;  %v3521_v13 = vadd.f32 %v3520_v17, %v3277_v54  ;;  %4643 = vmatmul.mubr.f32.gmra.mxu1 %v13245_v12  ;;  %v13247_v3 = vld [vmem:[#allocation29_spill] sm:$0xff]  ;;  %v13338_v12 = vld [vmem:[#allocation114_spill] sm:$0xff] }
 0x2e4   :  { %v8059_v27 = vpop.eup %8058  ;;  %v3525_v28 = vpop.f32.mrf.mxu1  ;;  %v3284_v1 = vadd.f32 %v3283_v60, %v10533_v21  ;;  %4648 = vmatprep.mubr.f32.mxu1 %v12810_v45  ;;  %v13249_v60 = vld [vmem:[#allocation141_spill] sm:$0xff] }
 0x2e5   :  { %v7624_v34 = vadd.f32 %v7623_v37, %v7352_v63  ;;  %v7359_v11 = vmul.f32 %v8059_v27, %v13246_v31  ;;  %v3526_v41 = vadd.f32 %v3525_v28, %v3282_v61  ;;  %8072 = vtanh.f32 %v3521_v13  ;;  %v3288_v20 = vpop.f32.mrf.mxu0  ;;  %4376 = vmatmul.mubr.f32.gmra.mxu0 %v13247_v3  ;;  %v13248_v61 = vld [vmem:[#allocation33_spill] sm:$0xff] }
 0x2e6   :  { %v8061_v46 = vpop.eup %8060  ;;  %v3527_v4 = vpop.f32.mrf.mxu1  ;;  %v3289_v9 = vadd.f32 %v3288_v20, %v10538_v57  ;;  %4381 = vmatprep.mubr.f32.mxu0 %v12810_v45 }
 0x2e7   :  { %v7595_v47 = vadd.f32 %v7594_v43, %v7359_v11  ;;  %v7360_v54 = vmul.f32 %v8061_v46, %v13246_v31  ;;  %8074 = vtanh.f32 %v3526_v41  ;;  %v3290_v17 = vpop.f32.mrf.mxu0  ;;  %v3528_v21 = vadd.f32 %v3527_v4, %v3284_v1  ;;  %4652 = vmatmul.mubr.f32.gmra.mxu1 %v13248_v61  ;;  %v13250_v41 = vld [vmem:[#allocation34_spill] sm:$0xff] }
 0x2e8   :  { %v8063_v37 = vpop.eup %8062  ;;  %v3532_v63 = vpop.f32.mrf.mxu1  ;;  %v3291_v28 = vadd.f32 %v3290_v17, %v10543_v59  ;;  %4657 = vmatprep.mubr.f32.mxu1 %v12810_v45  ;;  %v13252_v17 = vld [vmem:[#allocation142_spill] sm:$0xff] }
 0x2e9   :  { %v7625_v27 = vadd.f32 %v7624_v34, %v7360_v54  ;;  %v7367_v13 = vmul.f32 %v8063_v37, %v13249_v60  ;;  %v3533_v3 = vadd.f32 %v3532_v63, %v3289_v9  ;;  %8076 = vtanh.f32 %v3528_v21  ;;  %v3295_v57 = vpop.f32.mrf.mxu0  ;;  %4384 = vmatmul.mubr.f32.gmra.mxu0 %v13250_v41  ;;  %v13251_v9 = vld [vmem:[#allocation37_spill] sm:$0xff] }
 0x2ea   :  { %v8065_v43 = vpop.eup %8064  ;;  %v3534_v11 = vpop.f32.mrf.mxu1  ;;  %v3296_v20 = vadd.f32 %v3295_v57, %v10548_v5  ;;  %4389 = vmatprep.mubr.f32.mxu0 %v12810_v45  ;;  %v13253_v5 = vld [vmem:[#allocation35_spill] sm:$0xff] }
 0x2eb   :  { %v7596_v46 = vadd.f32 %v7595_v47, %v7367_v13  ;;  %v7368_v1 = vmul.f32 %v8065_v43, %v13249_v60  ;;  %8078 = vtanh.f32 %v3533_v3  ;;  %v3297_v4 = vpop.f32.mrf.mxu0  ;;  %v3535_v59 = vadd.f32 %v3534_v11, %v3291_v28  ;;  %4661 = vmatmul.mubr.f32.gmra.mxu1 %v13251_v9 }
 0x2ec   :  { %v8067_v34 = vpop.eup %8066  ;;  %v3539_v54 = vpop.f32.mrf.mxu1  ;;  %v3298_v63 = vadd.f32 %v3297_v4, %v10553_v39  ;;  %4666 = vmatprep.mubr.f32.mxu1 %v12810_v45 }
 0x2ed   :  { %v7626_v37 = vadd.f32 %v7625_v27, %v7368_v1  ;;  %v7375_v21 = vmul.f32 %v8067_v34, %v13252_v17  ;;  %v3540_v41 = vadd.f32 %v3539_v54, %v3296_v20  ;;  %8080 = vtanh.f32 %v3535_v59  ;;  %v3302_v47 = vpop.f32.mrf.mxu0  ;;  %4392 = vmatmul.mubr.f32.gmra.mxu0 %v13253_v5  ;;  %v13254_v20 = vld [vmem:[#allocation41_spill] sm:$0xff]  ;;  %v13255_v34 = vld [vmem:[#allocation144_spill] sm:$0xff] }
 0x2ee   :  { %v3541_v3 = vpop.f32.mrf.mxu1  ;;  %v8069_v13 = vpop.eup %8068  ;;  %v3303_v28 = vadd.f32 %v3302_v47, %v10558_v44  ;;  %4397 = vmatprep.mubr.f32.mxu0 %v12810_v45 }
 0x2ef   :  { %v7597_v43 = vadd.f32 %v7596_v46, %v7375_v21  ;;  %8082 = vtanh.f32 %v3540_v41  ;;  %v3542_v57 = vadd.f32 %v3541_v3, %v3298_v63  ;;  %v7376_v11 = vmul.f32 %v8069_v13, %v13252_v17  ;;  %v3304_v39 = vpop.f32.mrf.mxu0  ;;  %4670 = vmatmul.mubr.f32.gmra.mxu1 %v13254_v20  ;;  %v13256_v46 = vld [vmem:[#allocation42_spill] sm:$0xff] }
 0x2f0   :  { %v8071_v27 = vpop.eup %8070  ;;  %v3546_v1 = vpop.f32.mrf.mxu1  ;;  %v3305_v59 = vadd.f32 %v3304_v39, %v10563_v32  ;;  %4675 = vmatprep.mubr.f32.mxu1 %v12810_v45  ;;  %v13257_v39 = vld [vmem:[#allocation46_spill] sm:$0xff] }
 0x2f1   :  { %v7383_v4 = vmul.f32 %v8071_v27, %v13255_v34  ;;  %8084 = vtanh.f32 %v3542_v57  ;;  %v3547_v54 = vadd.f32 %v3546_v1, %v3303_v28  ;;  %v7627_v44 = vadd.f32 %v7626_v37, %v7376_v11  ;;  %v3309_v41 = vpop.f32.mrf.mxu0  ;;  %4400 = vmatmul.mubr.f32.gmra.mxu0 %v13256_v46  ;;  %v13258_v37 = vld [vmem:[#allocation146_spill] sm:$0xff] }
 0x2f2   :  { %v3548_v21 = vpop.f32.mrf.mxu1  ;;  %v8073_v63 = vpop.eup %8072  ;;  %v3310_v3 = vadd.f32 %v3309_v41, %v10568_v6  ;;  %4405 = vmatprep.mubr.f32.mxu0 %v12810_v45 }
 0x2f3   :  { %v7598_v47 = vadd.f32 %v7597_v43, %v7383_v4  ;;  %8086 = vtanh.f32 %v3547_v54  ;;  %v3549_v13 = vadd.f32 %v3548_v21, %v3305_v59  ;;  %v7384_v32 = vmul.f32 %v8073_v63, %v13255_v34  ;;  %v3311_v57 = vpop.f32.mrf.mxu0  ;;  %4679 = vmatmul.mubr.f32.gmra.mxu1 %v13257_v39  ;;  %v13259_v4 = vld [vmem:[#allocation43_spill] sm:$0xff] }
 0x2f4   :  { %v8075_v27 = vpop.eup %8074  ;;  %v3553_v28 = vpop.f32.mrf.mxu1  ;;  %v3312_v1 = vadd.f32 %v3311_v57, %v10573_v48  ;;  %4684 = vmatprep.mubr.f32.mxu1 %v12810_v45  ;;  %v13260_v57 = vld [vmem:[#allocation47_spill] sm:$0xff] }
 0x2f5   :  { %v7391_v11 = vmul.f32 %v8075_v27, %v13258_v37  ;;  %8088 = vtanh.f32 %v3549_v13  ;;  %v3554_v46 = vadd.f32 %v3553_v28, %v3310_v3  ;;  %v7628_v6 = vadd.f32 %v7627_v44, %v7384_v32  ;;  %v3316_v43 = vpop.f32.mrf.mxu0  ;;  %4408 = vmatmul.mubr.f32.gmra.mxu0 %v13259_v4  ;;  %v13261_v44 = vld [vmem:[#allocation147_spill] sm:$0xff] }
 0x2f6   :  { %v3555_v59 = vpop.f32.mrf.mxu1  ;;  %v8077_v54 = vpop.eup %8076  ;;  %v3317_v21 = vadd.f32 %v3316_v43, %v10578_v33  ;;  %4413 = vmatprep.mubr.f32.mxu0 %v12810_v45 }
 0x2f7   :  { %v7599_v41 = vadd.f32 %v7598_v47, %v7391_v11  ;;  %8090 = vtanh.f32 %v3554_v46  ;;  %v3556_v63 = vadd.f32 %v3555_v59, %v3312_v1  ;;  %v7392_v48 = vmul.f32 %v8077_v54, %v13258_v37  ;;  %v3318_v13 = vpop.f32.mrf.mxu0  ;;  %4688 = vmatmul.mubr.f32.gmra.mxu1 %v13260_v57  ;;  %v13262_v47 = vld [vmem:[#allocation48_spill] sm:$0xff] }
 0x2f8   :  { %v8079_v27 = vpop.eup %8078  ;;  %v3560_v3 = vpop.f32.mrf.mxu1  ;;  %v3319_v28 = vadd.f32 %v3318_v13, %v10583_v0  ;;  %4693 = vmatprep.mubr.f32.mxu1 %v12810_v45  ;;  %v13263_v13 = vld [vmem:[#allocation51_spill] sm:$0xff] }
 0x2f9   :  { %v7399_v32 = vmul.f32 %v8079_v27, %v13261_v44  ;;  %8092 = vtanh.f32 %v3556_v63  ;;  %v3561_v4 = vadd.f32 %v3560_v3, %v3317_v21  ;;  %v7629_v33 = vadd.f32 %v7628_v6, %v7392_v48  ;;  %v3323_v46 = vpop.f32.mrf.mxu0  ;;  %4416 = vmatmul.mubr.f32.gmra.mxu0 %v13262_v47  ;;  %v13264_v6 = vld [vmem:[#allocation149_spill] sm:$0xff] }
 0x2fa   :  { %v3562_v11 = vpop.f32.mrf.mxu1  ;;  %v8081_v1 = vpop.eup %8080  ;;  %v3324_v59 = vadd.f32 %v3323_v46, %v10588_v40  ;;  %4421 = vmatprep.mubr.f32.mxu0 %v12810_v45 }
 0x2fb   :  { %v7600_v43 = vadd.f32 %v7599_v41, %v7399_v32  ;;  %8094 = vtanh.f32 %v3561_v4  ;;  %v3563_v54 = vadd.f32 %v3562_v11, %v3319_v28  ;;  %v7400_v0 = vmul.f32 %v8081_v1, %v13261_v44  ;;  %v3325_v63 = vpop.f32.mrf.mxu0  ;;  %4697 = vmatmul.mubr.f32.gmra.mxu1 %v13263_v13  ;;  %v13265_v32 = vld [vmem:[#allocation53_spill] sm:$0xff] }
 0x2fc   :  { %v8083_v27 = vpop.eup %8082  ;;  %v3567_v21 = vpop.f32.mrf.mxu1  ;;  %v3326_v3 = vadd.f32 %v3325_v63, %v10593_v30  ;;  %4702 = vmatprep.mubr.f32.mxu1 %v12810_v45  ;;  %v13266_v63 = vld [vmem:[#allocation57_spill] sm:$0xff] }
 0x2fd   :  { %v7407_v48 = vmul.f32 %v8083_v27, %v13264_v6  ;;  %8096 = vtanh.f32 %v3563_v54  ;;  %v3568_v47 = vadd.f32 %v3567_v21, %v3324_v59  ;;  %v7630_v4 = vadd.f32 %v7629_v33, %v7400_v0  ;;  %v3330_v41 = vpop.f32.mrf.mxu0  ;;  %4424 = vmatmul.mubr.f32.gmra.mxu0 %v13265_v32  ;;  %v13267_v33 = vld [vmem:[#allocation150_spill] sm:$0xff] }
 0x2fe   :  { %v8085_v40 = vpop.eup %8084  ;;  %v3569_v28 = vpop.f32.mrf.mxu1  ;;  %v3331_v1 = vadd.f32 %v3330_v41, %v10598_v50  ;;  %4429 = vmatprep.mubr.f32.mxu0 %v12810_v45 }
 0x2ff   :  { %v7601_v46 = vadd.f32 %v7600_v43, %v7407_v48  ;;  %v7408_v11 = vmul.f32 %v8085_v40, %v13264_v6  ;;  %8098 = vtanh.f32 %v3568_v47  ;;  %v3332_v30 = vpop.f32.mrf.mxu0  ;;  %v3570_v54 = vadd.f32 %v3569_v28, %v3326_v3  ;;  %4706 = vmatmul.mubr.f32.gmra.mxu1 %v13266_v63  ;;  %v13268_v47 = vld [vmem:[#allocation58_spill] sm:$0xff] }
 0x300   :  { %v8087_v27 = vpop.eup %8086  ;;  %v3574_v59 = vpop.f32.mrf.mxu1  ;;  %v3333_v32 = vadd.f32 %v3332_v30, %v10603_v51  ;;  %4711 = vmatprep.mubr.f32.mxu1 %v12810_v45  ;;  %v13270_v30 = vld [vmem:[#allocation151_spill] sm:$0xff] }
 0x301   :  { %v7631_v21 = vadd.f32 %v7630_v4, %v7408_v11  ;;  %v7415_v0 = vmul.f32 %v8087_v27, %v13267_v33  ;;  %v3575_v13 = vadd.f32 %v3574_v59, %v3331_v1  ;;  %8100 = vtanh.f32 %v3570_v54  ;;  %v3337_v50 = vpop.f32.mrf.mxu0  ;;  %4432 = vmatmul.mubr.f32.gmra.mxu0 %v13268_v47  ;;  %v13269_v1 = vld [vmem:[#allocation61_spill] sm:$0xff] }
 0x302   :  { %v8089_v43 = vpop.eup %8088  ;;  %v3576_v48 = vpop.f32.mrf.mxu1  ;;  %v3338_v41 = vadd.f32 %v3337_v50, %v10608_v55  ;;  %4437 = vmatprep.mubr.f32.mxu0 %v12810_v45 }
 0x303   :  { %v7602_v40 = vadd.f32 %v7601_v46, %v7415_v0  ;;  %v7416_v3 = vmul.f32 %v8089_v43, %v13267_v33  ;;  %8102 = vtanh.f32 %v3575_v13  ;;  %v3339_v28 = vpop.f32.mrf.mxu0  ;;  %v3577_v51 = vadd.f32 %v3576_v48, %v3333_v32  ;;  %4715 = vmatmul.mubr.f32.gmra.mxu1 %v13269_v1  ;;  %v13271_v13 = vld [vmem:[#allocation59_spill] sm:$0xff]  ;;  %v13320_v1 = vld [vmem:[#allocation108_spill] sm:$0xff] }
 0x304   :  { %v8091_v4 = vpop.eup %8090  ;;  %v3581_v11 = vpop.f32.mrf.mxu1  ;;  %v3340_v59 = vadd.f32 %v3339_v28, %v10613_v2  ;;  %4720 = vmatprep.mubr.f32.mxu1 %v12810_v45  ;;  %v13273_v28 = vld [vmem:[#allocation152_spill] sm:$0xff] }
 0x305   :  { %v7632_v27 = vadd.f32 %v7631_v21, %v7416_v3  ;;  %v7423_v54 = vmul.f32 %v8091_v4, %v13270_v30  ;;  %v3582_v47 = vadd.f32 %v3581_v11, %v3338_v41  ;;  %8104 = vtanh.f32 %v3577_v51  ;;  %v3344_v55 = vpop.f32.mrf.mxu0  ;;  %4440 = vmatmul.mubr.f32.gmra.mxu0 %v13271_v13  ;;  %v13272_v41 = vld [vmem:[#allocation65_spill] sm:$0xff] }
 0x306   :  { %v8093_v46 = vpop.eup %8092  ;;  %v3583_v0 = vpop.f32.mrf.mxu1  ;;  %v3345_v50 = vadd.f32 %v3344_v55, %v10618_v56  ;;  %4445 = vmatprep.mubr.f32.mxu0 %v12810_v45 }
 0x307   :  { %v7603_v43 = vadd.f32 %v7602_v40, %v7423_v54  ;;  %v7424_v32 = vmul.f32 %v8093_v46, %v13270_v30  ;;  %8106 = vtanh.f32 %v3582_v47  ;;  %v3346_v48 = vpop.f32.mrf.mxu0  ;;  %v3584_v2 = vadd.f32 %v3583_v0, %v3340_v59  ;;  %4724 = vmatmul.mubr.f32.gmra.mxu1 %v13272_v41  ;;  %v13274_v47 = vld [vmem:[#allocation66_spill] sm:$0xff]  ;;  %v13317_v41 = vld [vmem:[#allocation107_spill] sm:$0xff] }
 0x308   :  { %v8095_v21 = vpop.eup %8094  ;;  %v3588_v3 = vpop.f32.mrf.mxu1  ;;  %v3347_v11 = vadd.f32 %v3346_v48, %v10623_v42  ;;  %4729 = vmatprep.mubr.f32.mxu1 %v12810_v45  ;;  %v13276_v48 = vld [vmem:[#allocation122_spill] sm:$0xff] }
 0x309   :  { %v7633_v4 = vadd.f32 %v7632_v27, %v7424_v32  ;;  %v7431_v51 = vmul.f32 %v8095_v21, %v13273_v28  ;;  %v3589_v13 = vadd.f32 %v3588_v3, %v3345_v50  ;;  %8108 = vtanh.f32 %v3584_v2  ;;  %v3351_v56 = vpop.f32.mrf.mxu0  ;;  %4448 = vmatmul.mubr.f32.gmra.mxu0 %v13274_v47  ;;  %v13275_v50 = vld [vmem:[#allocation69_spill] sm:$0xff] }
 0x30a   :  { %v8097_v40 = vpop.eup %8096  ;;  %v3590_v54 = vpop.f32.mrf.mxu1  ;;  %v3352_v55 = vadd.f32 %v3351_v56, %v10628_v52  ;;  %4453 = vmatprep.mubr.f32.mxu0 %v12810_v45  ;;  %v13277_v52 = vld [vmem:[#allocation67_spill] sm:$0xff]  ;;  %v13278_v56 = vld [vmem:[#allocation157_spill] sm:$0xff] }
 0x30b   :  { %v7604_v46 = vadd.f32 %v7603_v43, %v7431_v51  ;;  %v7432_v59 = vmul.f32 %v8097_v40, %v13273_v28  ;;  %8110 = vtanh.f32 %v3589_v13  ;;  %v3353_v0 = vpop.f32.mrf.mxu0  ;;  %v3591_v42 = vadd.f32 %v3590_v54, %v3347_v11  ;;  %4733 = vmatmul.mubr.f32.gmra.mxu1 %v13275_v50 }
 0x30c   :  { %v8099_v27 = vpop.eup %8098  ;;  %v3595_v32 = vpop.f32.mrf.mxu1  ;;  %v3354_v3 = vadd.f32 %v3353_v0, %v10633_v49  ;;  %4738 = vmatprep.mubr.f32.mxu1 %v12810_v45  ;;  %v13280_v0 = vld [vmem:[#allocation124_spill] sm:$0xff] }
 0x30d   :  { %v7634_v21 = vadd.f32 %v7633_v4, %v7432_v59  ;;  %v7439_v2 = vmul.f32 %v8099_v27, %v13276_v48  ;;  %v3596_v47 = vadd.f32 %v3595_v32, %v3352_v55  ;;  %8112 = vtanh.f32 %v3591_v42  ;;  %v3358_v43 = vpop.f32.mrf.mxu0  ;;  %4456 = vmatmul.mubr.f32.gmra.mxu0 %v13277_v52  ;;  %v13279_v27 = vld [vmem:[#allocation71_spill] sm:$0xff]  ;;  %v13281_v32 = vld [vmem:[#allocation158_spill] sm:$0xff] }
 0x30e   :  { %v3597_v13 = vpop.f32.mrf.mxu1  ;;  %v8101_v51 = vpop.eup %8100  ;;  %v3359_v11 = vadd.f32 %v3358_v43, %v13278_v56  ;;  %4461 = vmatprep.mubr.f32.mxu0 %v12810_v45 }
 0x30f   :  { %v7605_v40 = vadd.f32 %v7604_v46, %v7439_v2  ;;  %8114 = vtanh.f32 %v3596_v47  ;;  %v3598_v54 = vadd.f32 %v3597_v13, %v3354_v3  ;;  %v7440_v59 = vmul.f32 %v8101_v51, %v13276_v48  ;;  %v3360_v49 = vpop.f32.mrf.mxu0  ;;  %4742 = vmatmul.mubr.f32.gmra.mxu1 %v13279_v27  ;;  %v13282_v2 = vld [vmem:[#allocation73_spill] sm:$0xff] }
 0x310   :  { %v8103_v4 = vpop.eup %8102  ;;  %v3602_v55 = vpop.f32.mrf.mxu1  ;;  %v3361_v52 = vadd.f32 %v3360_v49, %v13281_v32  ;;  %4747 = vmatprep.mubr.f32.mxu1 %v12810_v45  ;;  %v13283_v51 = vld [vmem:[#allocation161_spill] sm:$0xff]  ;;  %v13286_v32 = vld [vmem:[#allocation162_spill] sm:$0xff] }
 0x311   :  { %v7447_v42 = vmul.f32 %v8103_v4, %v13280_v0  ;;  %8116 = vtanh.f32 %v3598_v54  ;;  %v3603_v50 = vadd.f32 %v3602_v55, %v3359_v11  ;;  %v7635_v46 = vadd.f32 %v7634_v21, %v7440_v59  ;;  %v3365_v47 = vpop.f32.mrf.mxu0  ;;  %4464 = vmatmul.mubr.f32.gmra.mxu0 %v13282_v2  ;;  %v13284_v55 = vld [vmem:[#allocation77_spill] sm:$0xff]  ;;  %v13285_v21 = vld [vmem:[#allocation126_spill] sm:$0xff] }
 0x312   :  { %v3604_v3 = vpop.f32.mrf.mxu1  ;;  %v8105_v43 = vpop.eup %8104  ;;  %v3366_v56 = vadd.f32 %v3365_v47, %v13283_v51  ;;  %4469 = vmatprep.mubr.f32.mxu0 %v12810_v45 }
 0x313   :  { %v7606_v13 = vadd.f32 %v7605_v40, %v7447_v42  ;;  %8118 = vtanh.f32 %v3603_v50  ;;  %v3605_v48 = vadd.f32 %v3604_v3, %v3361_v52  ;;  %v7448_v49 = vmul.f32 %v8105_v43, %v13280_v0  ;;  %v3367_v54 = vpop.f32.mrf.mxu0  ;;  %4751 = vmatmul.mubr.f32.gmra.mxu1 %v13284_v55  ;;  %v13287_v52 = vld [vmem:[#allocation78_spill] sm:$0xff]  ;;  %v13288_v43 = vld [vmem:[#allocation163_spill] sm:$0xff] }
 0x314   :  { %v8107_v4 = vpop.eup %8106  ;;  %v3609_v11 = vpop.f32.mrf.mxu1  ;;  %v3368_v2 = vadd.f32 %v3367_v54, %v13286_v32  ;;  %4756 = vmatprep.mubr.f32.mxu1 %v12810_v45  ;;  %v13291_v32 = vld [vmem:[#allocation164_spill] sm:$0xff] }
 0x315   :  { %v7455_v59 = vmul.f32 %v8107_v4, %v13285_v21  ;;  %8120 = vtanh.f32 %v3605_v48  ;;  %v3610_v27 = vadd.f32 %v3609_v11, %v3366_v56  ;;  %v7636_v40 = vadd.f32 %v7635_v46, %v7448_v49  ;;  %v3372_v50 = vpop.f32.mrf.mxu0  ;;  %4472 = vmatmul.mubr.f32.gmra.mxu0 %v13287_v52  ;;  %v13289_v11 = vld [vmem:[#allocation81_spill] sm:$0xff]  ;;  %v13290_v46 = vld [vmem:[#allocation127_spill] sm:$0xff] }
 0x316   :  { %v3611_v42 = vpop.f32.mrf.mxu1  ;;  %v8109_v47 = vpop.eup %8108  ;;  %v3373_v51 = vadd.f32 %v3372_v50, %v13288_v43  ;;  %4477 = vmatprep.mubr.f32.mxu0 %v12810_v45 }
 0x317   :  { %v7607_v3 = vadd.f32 %v7606_v13, %v7455_v59  ;;  %8122 = vtanh.f32 %v3610_v27  ;;  %v3612_v0 = vadd.f32 %v3611_v42, %v3368_v2  ;;  %v7456_v54 = vmul.f32 %v8109_v47, %v13285_v21  ;;  %v3374_v48 = vpop.f32.mrf.mxu0  ;;  %4760 = vmatmul.mubr.f32.gmra.mxu1 %v13289_v11  ;;  %v62_v27 = vld [vmem:[%s12263_s0 + $0x70] sm:$0x3]  ;;  %v13295_v11 = vld [vmem:[#allocation165_spill] sm:$0xff] }
 0x318   :  { %v8111_v4 = vpop.eup %8110  ;;  %v3616_v56 = vpop.f32.mrf.mxu1  ;;  %v3375_v52 = vadd.f32 %v3374_v48, %v13291_v32  ;;  %4765 = vmatprep.mubr.f32.mxu1 %v12810_v45  ;;  %v13292_v59 = vld [vmem:[#allocation79_spill] sm:$0xff] }
 0x319   :  { %v7463_v49 = vmul.f32 %v8111_v4, %v13290_v46  ;;  %8124 = vtanh.f32 %v3612_v0  ;;  %v3617_v55 = vadd.f32 %v3616_v56, %v3373_v51  ;;  %v7637_v2 = vadd.f32 %v7636_v40, %v7456_v54  ;;  %v3379_v13 = vpop.f32.mrf.mxu0  ;;  %4480 = vmatmul.mubr.f32.gmra.mxu0 %v13292_v59  ;;  %v13293_v32 = vld [vmem:[#allocation83_spill] sm:$0xff]  ;;  %v13294_v54 = vld [vmem:[#allocation129_spill] sm:$0xff] }
 0x31a   :  { %v3618_v50 = vpop.f32.mrf.mxu1  ;;  %v8113_v42 = vpop.eup %8112  ;;  %v3380_v43 = vadd.f32 %v3379_v13, %v10668_v18  ;;  %4485 = vmatprep.mubr.f32.mxu0 %v12810_v45  ;;  %v310_v40 = vsel %vm290_vm0, %v62_v27, 0 }
 0x31b   :  { %v7608_v47 = vadd.f32 %v7607_v3, %v7463_v49  ;;  %8126 = vtanh.f32 %v3617_v55  ;;  %v3619_v4 = vadd.f32 %v3618_v50, %v3375_v52  ;;  %v7464_v51 = vmul.f32 %v8113_v42, %v13290_v46  ;;  %v3381_v48 = vpop.f32.mrf.mxu0  ;;  %4769 = vmatmul.mubr.f32.gmra.mxu1 %v13293_v32  ;;  %v13296_v49 = vld [vmem:[#allocation85_spill] sm:$0xff] }
 0x31c   :  { %v8115_v0 = vpop.eup %8114  ;;  %v3623_v56 = vpop.f32.mrf.mxu1  ;;  %v3382_v21 = vadd.f32 %v3381_v48, %v13295_v11  ;;  %4774 = vmatprep.mubr.f32.mxu1 %v12810_v45  ;;  %v55_v11 = vld [vmem:[%s12263_s0 + $0x38] sm:$0xff] }
 0x31d   :  { %v7471_v59 = vmul.f32 %v8115_v0, %v13294_v54  ;;  %8128 = vtanh.f32 %v3619_v4  ;;  %v3624_v3 = vadd.f32 %v3623_v56, %v3380_v43  ;;  %v7638_v55 = vadd.f32 %v7637_v2, %v7464_v51  ;;  %v3386_v52 = vpop.f32.mrf.mxu0  ;;  %4488 = vmatmul.mubr.f32.gmra.mxu0 %v13296_v49  ;;  %v13297_v0 = vld [vmem:[#allocation89_spill] sm:$0xff] }
 0x31e   :  { %v8117_v18 = vpop.eup %8116  ;;  %v3625_v13 = vpop.f32.mrf.mxu1  ;;  %v3387_v32 = vadd.f32 %v3386_v52, %v10678_v16  ;;  %4493 = vmatprep.mubr.f32.mxu0 %v12810_v45  ;;  %v10905_v51 = vand.u32 4294901760, %v310_v40  ;;  %v13299_v52 = vld [vmem:[#allocation90_spill] sm:$0xff]  ;;  %v13300_v49 = vld [vmem:[#allocation93_spill] sm:$0xff] }
 0x31f   :  { %v7609_v50 = vadd.f32 %v7608_v47, %v7471_v59  ;;  %v7472_v42 = vmul.f32 %v8117_v18, %v13294_v54  ;;  %8130 = vtanh.f32 %v3624_v3  ;;  %v3388_v43 = vpop.f32.mrf.mxu0  ;;  %v3626_v4 = vadd.f32 %v3625_v13, %v3382_v21  ;;  %4778 = vmatmul.mubr.f32.gmra.mxu1 %v13297_v0  ;;  %v13298_v47 = vld [vmem:[#allocation130_spill] sm:$0xff] }
 0x320   :  { %v8119_v27 = vpop.eup %8118  ;;  %v3630_v2 = vpop.f32.mrf.mxu1  ;;  %v3389_v16 = vadd.f32 %v3388_v43, %v10683_v26  ;;  %4783 = vmatprep.mubr.f32.mxu1 %v12810_v45  ;;  %v54_v3 = vld [vmem:[%s12263_s0 + $0x30] sm:$0xff]  ;;  %v10914_v0 = vand.u32 4294901760, %v55_v11  ;;  %s8383_s0 = smov [#allocation3]  }
 0x321   :  { %v7639_v59 = vadd.f32 %v7638_v55, %v7472_v42  ;;  %v7479_v48 = vmul.f32 %v8119_v27, %v13298_v47  ;;  %v3631_v56 = vadd.f32 %v3630_v2, %v3387_v32  ;;  %8132 = vtanh.f32 %v3626_v4  ;;  %v3393_v21 = vpop.f32.mrf.mxu0  ;;  %4496 = vmatmul.mubr.f32.gmra.mxu0 %v13299_v52  ;;  %s7928_s13 = sshll.u32 %s8383_s0, 4  ;;  %s7929_s13 = int_to_ptr.vmem [resolvable:$true] %s7928_s13 }
 0x322   :  { %v8121_v18 = vpop.eup %8120  ;;  %v3632_v13 = vpop.f32.mrf.mxu1  ;;  %v3394_v26 = vadd.f32 %v3393_v21, %v10688_v62  ;;  %4501 = vmatprep.mubr.f32.mxu0 %v12810_v45  ;;  %v10921_v4 = vsub.f32 %v310_v40, %v10905_v51  ;;  %v10923_v52 = vand.u32 4294901760, %v54_v3  ;;  %s8358_s14 = scalar_lea.vmem %s7929_s13, 128  ;;  %p8363_p1 = scmp.lt.s32.totalorder %s7929_s13, %s7929_s13 }
 0x323   :  { %v7610_v55 = vadd.f32 %v7609_v50, %v7479_v48  ;;  %v7480_v42 = vmul.f32 %v8121_v18, %v13298_v47  ;;  %8134 = vtanh.f32 %v3631_v56  ;;  %v3395_v27 = vpop.f32.mrf.mxu0  ;;  %v3633_v43 = vadd.f32 %v3632_v13, %v3389_v16  ;;  %4787 = vmatmul.mubr.f32.gmra.mxu1 %v13300_v49  ;;  %v13301_v50 = vld [vmem:[#allocation131_spill] sm:$0xff]  ;;  %v13302_v16 = vld [vmem:[#allocation94_spill] sm:$0xff]  ;;  %p8359_p0 = scmp.ne.s32.totalorder %s7929_s13, %s8358_s14  ;;  %p8364_p2 = scmp.lt.s32.totalorder %s8358_s14, %s8358_s14 }
 0x324   :  { %v8123_v32 = vpop.eup %8122  ;;  %v3637_v2 = vpop.f32.mrf.mxu1  ;;  %v3396_v18 = vadd.f32 %v3395_v27, %v10693_v36  ;;  %4792 = vmatprep.mubr.f32.mxu1 %v12810_v45  ;;  %v10930_v49 = vsub.f32 %v55_v11, %v10914_v0  ;;  %v13303_v27 = vld [vmem:[#allocation97_spill] sm:$0xff] }
 0x325   :  { %v7640_v54 = vadd.f32 %v7639_v59, %v7480_v42  ;;  %v7487_v48 = vmul.f32 %v8123_v32, %v13301_v50  ;;  %v3638_v62 = vadd.f32 %v3637_v2, %v3394_v26  ;;  %8136 = vtanh.f32 %v3633_v43  ;;  %v3400_v21 = vpop.f32.mrf.mxu0  ;;  %4504 = vmatmul.mubr.f32.gmra.mxu0 %v13302_v16  ;;  %p8365_p3 = por %p8364_p2, %p8363_p1 }
 0x326   :  { %v8125_v56 = vpop.eup %8124  ;;  %v3639_v13 = vpop.f32.mrf.mxu1  ;;  %v3401_v59 = vadd.f32 %v3400_v21, %v10698_v38  ;;  %4509 = vmatprep.mubr.f32.mxu0 %v12810_v45  ;;  %v10938_v2 = vsub.f32 %v54_v3, %v10923_v52 }
 0x327   :  { %v7611_v40 = vadd.f32 %v7610_v55, %v7487_v48  ;;  %v7488_v47 = vmul.f32 %v8125_v56, %v13301_v50  ;;  %8138 = vtanh.f32 %v3638_v62  ;;  %v3402_v42 = vpop.f32.mrf.mxu0  ;;  %v3640_v26 = vadd.f32 %v3639_v13, %v3396_v18  ;;  %4796 = vmatmul.mubr.f32.gmra.mxu1 %v13303_v27  ;;  %v13304_v55 = vld [vmem:[#allocation133_spill] sm:$0xff]  ;;  %v13305_v18 = vld [vmem:[#allocation95_spill] sm:$0xff]  ;;  %p8366_p4 = pnand %p8365_p3, %p8359_p0 }
 0x328   :  { %v8127_v36 = vpop.eup %8126  ;;  %v3644_v32 = vpop.f32.mrf.mxu1  ;;  %v3403_v56 = vadd.f32 %v3402_v42, %v10703_v15  ;;  %4801 = vmatprep.mubr.f32.mxu1 %v12810_v45  ;;  %v13314_v50 = vld [vmem:[#allocation135_spill] sm:$0xff] }
 0x329   :  { %v7641_v11 = vadd.f32 %v7640_v54, %v7488_v47  ;;  %v7495_v48 = vmul.f32 %v8127_v36, %v13304_v55  ;;  %v3645_v38 = vadd.f32 %v3644_v32, %v3401_v59  ;;  %8140 = vtanh.f32 %v3640_v26  ;;  %v3724_v21 = vpop.f32.mrf.mxu0  ;;  %4512 = vmatmul.mubr.f32.gmra.mxu0 %v13305_v18  ;;  %v13306_v54 = vld [vmem:[#allocation105_spill] sm:$0xff]  ;;  %v13307_v32 = vld [vmem:[#allocation99_spill] sm:$0xff] }
 0x32a   :  { %v8129_v62 = vpop.eup %8128  ;;  %v3646_v13 = vpop.f32.mrf.mxu1  ;;  %v3725_v47 = vadd.f32 %v3724_v21, %v13306_v54  ;;  %4517 = vmatprep.mubr.f32.mxu0 %v12810_v45  ;;  %v13308_v26 = vand.u32 4294901760, %v10921_v4 }
 0x32b   :  { %v7612_v43 = vadd.f32 %v7611_v40, %v7495_v48  ;;  %v7496_v3 = vmul.f32 %v8129_v62, %v13304_v55  ;;  %8142 = vtanh.f32 %v3645_v38  ;;  %v3647_v59 = vadd.f32 %v3646_v13, %v3403_v56  ;;  %v3726_v36 = vpop.f32.mrf.mxu0  ;;  %4805 = vmatmul.mubr.f32.gmra.mxu1 %v13307_v32  ;;  %v13309_v48 = vld [vmem:[#allocation134_spill] sm:$0xff]  ;;  %v13310_v13 = vld [vmem:[#allocation100_spill] sm:$0xff] }
 0x32c   :  { %v8131_v15 = vpop.eup %8130  ;;  %v4080_v42 = vpop.f32.mrf.mxu1  ;;  %v5697_v18 = vsub.f32 %v10921_v4, %v13308_v26  ;;  %v3727_v38 = vadd.f32 %v3726_v36, %v13306_v54  ;;  %4810 = vmatprep.mubr.f32.mxu1 %v12810_v45  ;;  %v13311_v55 = vand.u32 4294901760, %v10930_v49  ;;  %v13313_v54 = vld [vmem:[#allocation102_spill] sm:$0xff] }
 0x32d   :  { %v7642_v40 = vadd.f32 %v7641_v11, %v7496_v3  ;;  %v7503_v62 = vmul.f32 %v8131_v15, %v13309_v48  ;;  %v10955_v21 = vadd.f32 %v4080_v42, %v3725_v47  ;;  %8144 = vtanh.f32 %v3647_v59  ;;  %v3735_v56 = vpop.f32.mrf.mxu0  ;;  %4520 = vmatmul.mubr.f32.gmra.mxu0 %v13310_v13  ;;  %v13312_v11 = vld [vmem:[#allocation106_spill] sm:$0xff] }
 0x32e   :  { %v4082_v32 = vpop.f32.mrf.mxu1  ;;  %v5703_v26 = vsub.f32 %v10930_v49, %v13311_v55  ;;  %v8133_v16 = vpop.eup %8132  ;;  %v3736_v3 = vadd.f32 %v3735_v56, %v13312_v11  ;;  %4896 = vmatprep.mubr.f32.mxu0 %v12810_v45  ;;  %v5698_v13 = vand.u32 4294901760, %v5697_v18 }
 0x32f   :  { %v7613_v27 = vadd.f32 %v7612_v43, %v7503_v62  ;;  %v10963_v15 = vadd.f32 %v4082_v32, %v3727_v38  ;;  %v7504_v36 = vmul.f32 %v8133_v16, %v13309_v48  ;;  %v3737_v59 = vpop.f32.mrf.mxu0  ;;  %4814 = vmatmul.mubr.f32.gmra.mxu1 %v13313_v54  ;;  %v13315_v43 = vand.u32 4294901760, %v10938_v2  ;;  %v13316_v16 = vld [vmem:[#allocation6_spill] sm:$0xff] }
 0x330   :  { %v8135_v47 = vpop.eup %8134  ;;  %v4087_v42 = vpop.f32.mrf.mxu1  ;;  %v3738_v55 = vadd.f32 %v3737_v59, %v13312_v11  ;;  %5140 = vmatprep.mubr.f32.mxu1 %v12810_v45  ;;  %v5704_v48 = vand.u32 4294901760, %v5703_v26  ;;  %v13318_v26 = vld [vmem:[#allocation153_spill] sm:$0xff] }
 0x331   :  { %v7511_v46 = vmul.f32 %v8135_v47, %v13314_v50  ;;  %v10970_v28 = vadd.f32 %v4087_v42, %v3736_v3  ;;  %v5709_v32 = vsub.f32 %v10938_v2, %v13315_v43  ;;  %v7643_v62 = vadd.f32 %v7642_v40, %v7504_v36  ;;  %v3746_v38 = vpop.f32.mrf.mxu0  ;;  %4898 = vmatmul.mubr.f32.vlgmr.msra.gmra.mxu0 %v13316_v16 }
 0x332   :  { %v4089_v56 = vpop.f32.mrf.mxu1  ;;  %v8137_v54 = vpop.eup %8136  ;;  %v3747_v47 = vadd.f32 %v3746_v38, %v13317_v41  ;;  %4903 = vmatprep.mubr.f32.mxu0 %v12810_v45  ;;  %5347 = vmatpush1.msra.mxu0 %v10905_v51 }
 0x333   :  { %v7614_v18 = vadd.f32 %v7613_v27, %v7511_v46  ;;  %v10978_v30 = vadd.f32 %v4089_v56, %v3738_v55  ;;  %v7512_v59 = vmul.f32 %v8137_v54, %v13314_v50  ;;  %v3748_v42 = vpop.f32.mrf.mxu0  ;;  %5142 = vmatmul.mubr.f32.vlgmr.msra.gmra.mxu1 %v13316_v16  ;;  %5349 = vmatprep.subr.mxu0 %v10914_v0  ;;  %v5710_v55 = vand.u32 4294901760, %v5709_v32  ;;  %v13319_v56 = vld [vmem:[#allocation7_spill] sm:$0xff] }
 0x334   :  { %v8139_v3 = vpop.eup %8138  ;;  %v4094_v40 = vpop.f32.mrf.mxu1  ;;  %v3749_v46 = vadd.f32 %v3748_v42, %v13317_v41  ;;  %5699 = vmatpush1.msra.mxu1 %v5698_v13  ;;  %5147 = vmatprep.mubr.f32.mxu1 %v12810_v45 }
 0x335   :  { %v7519_v36 = vmul.f32 %v8139_v3, %v13318_v26  ;;  %v10987_v27 = vadd.f32 %v4094_v40, %v3747_v47  ;;  %v7644_v43 = vadd.f32 %v7643_v62, %v7512_v59  ;;  %v3757_v38 = vpop.f32.mrf.mxu0  ;;  %4905 = vmatmul.mubr.f32.gmra.mxu0 %v13319_v56  ;;  %5705 = vmatprep.subr.mxu1 %v5704_v48  ;;  %v13321_v48 = vld [vmem:[#allocation154_spill] sm:$0xff] }
 0x336   :  { %v4096_v54 = vpop.f32.mrf.mxu1  ;;  %v8141_v50 = vpop.eup %8140  ;;  %v3758_v33 = vadd.f32 %v3757_v38, %v13320_v1  ;;  %4910 = vmatprep.mubr.f32.mxu0 %v12810_v45  ;;  %5351 = vmatpush1.msra.mxu0 %v10923_v52 }
 0x337   :  { %v7615_v11 = vadd.f32 %v7614_v18, %v7519_v36  ;;  %v10992_v63 = vadd.f32 %v4096_v54, %v3749_v46  ;;  %v7520_v47 = vmul.f32 %v8141_v50, %v13318_v26  ;;  %v3759_v32 = vpop.f32.mrf.mxu0  ;;  %5149 = vmatmul.mubr.f32.gmra.mxu1 %v13319_v56  ;;  %5950 = vmatprep.subr.mxu0 %v10741_v14  ;;  %v13322_v36 = vld [vmem:[#allocation8_spill] sm:$0xff]  ;;  %v13323_v54 = vld [vmem:[#allocation110_spill] sm:$0xff] }
 0x338   :  { %v8143_v13 = vpop.eup %8142  ;;  %v4101_v62 = vpop.f32.mrf.mxu1  ;;  %v3760_v18 = vadd.f32 %v3759_v32, %v13320_v1  ;;  %5154 = vmatprep.mubr.f32.mxu1 %v12810_v45  ;;  %5711 = vmatpush1.msra.mxu1 %v5710_v55 }
 0x339   :  { %v7527_v3 = vmul.f32 %v8143_v13, %v13321_v48  ;;  %v11001_v59 = vadd.f32 %v4101_v62, %v3758_v33  ;;  %v7645_v42 = vadd.f32 %v7644_v43, %v7520_v47  ;;  %v3768_v40 = vpop.f32.mrf.mxu0  ;;  %4912 = vmatmul.mubr.f32.gmra.mxu0 %v13322_v36  ;;  %6222 = vmatprep.subr.mxu1 %v10732_v29 }
 0x33a   :  { %v4103_v50 = vpop.f32.mrf.mxu1  ;;  %v8145_v46 = vpop.eup %8144  ;;  %v3769_v26 = vadd.f32 %v3768_v40, %v13323_v54  ;;  %4917 = vmatprep.mubr.f32.mxu0 %v12810_v45 }
 0x33b   :  { %v7616_v38 = vadd.f32 %v7615_v11, %v7527_v3  ;;  %v11007_v41 = vadd.f32 %v4103_v50, %v3760_v18  ;;  %v7528_v33 = vmul.f32 %v8145_v46, %v13321_v48  ;;  %v3770_v13 = vpop.f32.mrf.mxu0  ;;  %5156 = vmatmul.mubr.f32.gmra.mxu1 %v13322_v36  ;;  %v13324_v3 = vld [vmem:[#allocation12_spill] sm:$0xff]  ;;  %v13325_v50 = vld [vmem:[#allocation109_spill] sm:$0xff] }
 0x33c   :  { %v4108_v32 = vpop.f32.mrf.mxu1  ;;  %v3771_v43 = vadd.f32 %v3770_v13, %v13323_v54  ;;  %5161 = vmatprep.mubr.f32.mxu1 %v12810_v45 }
 0x33d   :  { %v7617_v55 = vrot.slane %v7616_v38, 4  ;;  %v11013_v47 = vadd.f32 %v4108_v32, %v3769_v26  ;;  %v7646_v11 = vadd.f32 %v7645_v42, %v7528_v33  ;;  %v3779_v62 = vpop.f32.mrf.mxu0  ;;  %4919 = vmatmul.mubr.f32.gmra.mxu0 %v13324_v3  ;;  %v13326_v32 = vld [vmem:[#allocation18_spill] sm:$0xff] }
 0x33e   :  { %v4110_v18 = vpop.f32.mrf.mxu1  ;;  %v3780_v1 = vadd.f32 %v3779_v62, %v13325_v50  ;;  %4924 = vmatprep.mubr.f32.mxu0 %v12810_v45  ;;  %v13327_v62 = vld [vmem:[#allocation113_spill] sm:$0xff] }
 0x33f   :  { %v7618_v40 = vadd.f32 %v7617_v55, %v7616_v38  ;;  %v11018_v46 = vadd.f32 %v4110_v18, %v3771_v43  ;;  %v7647_v48 = vrot.slane %v7646_v11, 4  ;;  %v3781_v6 = vpop.f32.mrf.mxu0  ;;  %5163 = vmatmul.mubr.f32.gmra.mxu1 %v13324_v3 }
 0x340   :  { %v4115_v44 = vpop.f32.mrf.mxu1  ;;  %v3782_v13 = vadd.f32 %v3781_v6, %v13325_v50  ;;  %5168 = vmatprep.mubr.f32.mxu1 %v12810_v45 }
 0x341   :  { %v7619_v26 = vrot.slane %v7618_v40, 2  ;;  %v11023_v42 = vadd.f32 %v4115_v44, %v3780_v1  ;;  %v7648_v33 = vadd.f32 %v7647_v48, %v7646_v11  ;;  %v3790_v38 = vpop.f32.mrf.mxu0  ;;  %4926 = vmatmul.mubr.f32.gmra.mxu0 %v13326_v32 }
 0x342   :  { %v4117_v55 = vpop.f32.mrf.mxu1  ;;  %v3791_v18 = vadd.f32 %v3790_v38, %v13327_v62  ;;  %4931 = vmatprep.mubr.f32.mxu0 %v12810_v45  ;;  %v13329_v38 = vld [vmem:[#allocation111_spill] sm:$0xff] }
 0x343   :  { %v7620_v43 = vadd.f32 %v7619_v26, %v7618_v40  ;;  %v11028_v54 = vadd.f32 %v4117_v55, %v3782_v13  ;;  %v7649_v57 = vrot.slane %v7648_v33, 2  ;;  %v3792_v37 = vpop.f32.mrf.mxu0  ;;  %5170 = vmatmul.mubr.f32.gmra.mxu1 %v13326_v32  ;;  %v13328_v40 = vld [vmem:[#allocation22_spill] sm:$0xff] }
 0x344   :  { %v4122_v39 = vpop.f32.mrf.mxu1  ;;  %v3793_v6 = vadd.f32 %v3792_v37, %v13327_v62  ;;  %5175 = vmatprep.mubr.f32.mxu1 %v12810_v45 }
 0x345   :  { %v7621_v44 = vrot.slane %v7620_v43, 1  ;;  %v11033_v1 = vadd.f32 %v4122_v39, %v3791_v18  ;;  %v7650_v48 = vadd.f32 %v7649_v57, %v7648_v33  ;;  %v3801_v11 = vpop.f32.mrf.mxu0  ;;  %4933 = vmatmul.mubr.f32.gmra.mxu0 %v13328_v40  ;;  %v13330_v39 = vld [vmem:[#allocation156_spill] sm:$0xff] }
 0x346   :  { %v4124_v26 = vpop.f32.mrf.mxu1  ;;  %v3802_v55 = vadd.f32 %v3801_v11, %v13329_v38  ;;  %4938 = vmatprep.mubr.f32.mxu0 %v12810_v45 }
 0x347   :  { %v7622_v13 = vadd.f32 %v7621_v44, %v7620_v43  ;;  %v11038_v50 = vadd.f32 %v4124_v26, %v3793_v6  ;;  %v7651_v34 = vrot.slane %v7650_v48, 1  ;;  %v3803_v20 = vpop.f32.mrf.mxu0  ;;  %5177 = vmatmul.mubr.f32.gmra.mxu1 %v13328_v40  ;;  %v13331_v44 = vld [vmem:[#allocation26_spill] sm:$0xff]  ;;  %v13332_v26 = vld [vmem:[#allocation116_spill] sm:$0xff] }
 0x348   :  { %v4129_v5 = vpop.f32.mrf.mxu1  ;;  %v3804_v57 = vadd.f32 %v3803_v20, %v13329_v38  ;;  %5182 = vmatprep.mubr.f32.mxu1 %v12810_v45 }
 0x349   :  { %v7785_v37 = vadd.f32 %v13330_v39, %v7622_v13  ;;  %v11044_v33 = vadd.f32 %v4129_v5, %v3802_v55  ;;  %v7652_v43 = vadd.f32 %v7651_v34, %v7650_v48  ;;  %v3812_v18 = vpop.f32.mrf.mxu0  ;;  %4940 = vmatmul.mubr.f32.gmra.mxu0 %v13331_v44 }
 0x34a   :  { %v4131_v6 = vpop.f32.mrf.mxu1  ;;  %v3813_v62 = vadd.f32 %v3812_v18, %v13332_v26  ;;  %4945 = vmatprep.mubr.f32.mxu0 %v12810_v45 }
 0x34b   :  { %v7793_v11 = vmul.f32 %v7785_v37, %v7785_v37  ;;  %v11049_v17 = vadd.f32 %v4131_v6, %v3804_v57  ;;  %v7786_v13 = vadd.f32 %v13330_v39, %v7652_v43  ;;  %v3814_v9 = vpop.f32.mrf.mxu0  ;;  %5184 = vmatmul.mubr.f32.gmra.mxu1 %v13331_v44  ;;  %v13333_v57 = vld [vmem:[#allocation30_spill] sm:$0xff]  ;;  %v13334_v6 = vld [vmem:[#allocation112_spill] sm:$0xff] }
 0x34c   :  { %v4136_v20 = vpop.f32.mrf.mxu1  ;;  %v3815_v34 = vadd.f32 %v3814_v9, %v13332_v26  ;;  %5189 = vmatprep.mubr.f32.mxu1 %v12810_v45 }
 0x34d   :  { %v11054_v5 = vadd.f32 0.1, %v7793_v11  ;;  %v11057_v48 = vadd.f32 %v4136_v20, %v3813_v62  ;;  %v7794_v55 = vmul.f32 %v7786_v13, %v7786_v13  ;;  %v3823_v37 = vpop.f32.mrf.mxu0  ;;  %4947 = vmatmul.mubr.f32.gmra.mxu0 %v13333_v57 }
 0x34e   :  { %v4138_v18 = vpop.f32.mrf.mxu1  ;;  %v3824_v38 = vadd.f32 %v3823_v37, %v13334_v6  ;;  %4952 = vmatprep.mubr.f32.mxu0 %v12810_v45  ;;  %v13335_v37 = vld [vmem:[#allocation31_spill] sm:$0xff] }
 0x34f   :  { %v11062_v43 = vadd.f32 %v4138_v18, %v3815_v34  ;;  %8146 = vrsqrt.f32 %v11054_v5  ;;  %v11066_v11 = vadd.f32 0.1, %v7794_v55  ;;  %v3825_v9 = vpop.f32.mrf.mxu0  ;;  %5191 = vmatmul.mubr.f32.gmra.mxu1 %v13333_v57  ;;  %v13336_v18 = vld [vmem:[#allocation118_spill] sm:$0xff]  ;;  %vm7823_vm6 = vcmp.eq.f32.partialorder %v11054_v5, inf }
 0x350   :  { %v4143_v62 = vpop.f32.mrf.mxu1  ;;  %v3826_v13 = vadd.f32 %v3825_v9, %v13334_v6  ;;  %5196 = vmatprep.mubr.f32.mxu1 %v12810_v45  ;;  %v13337_v6 = vld [vmem:[#allocation38_spill] sm:$0xff]  ;;  %vm7825_vm8 = vcmp.eq.f32.partialorder %v11054_v5, 0.0 }
 0x351   :  { %v11070_v20 = vadd.f32 %v4143_v62, %v3824_v38  ;;  %v3834_v26 = vpop.f32.mrf.mxu0  ;;  %4954 = vmatmul.mubr.f32.gmra.mxu0 %v13335_v37  ;;  %8148 = vrsqrt.f32 %v11066_v11  ;;  %vm7830_vm7 = vcmp.eq.f32.partialorder %v11066_v11, inf  ;;  %vm7832_vm9 = vcmp.eq.f32.partialorder %v11066_v11, 0.0 }
 0x352   :  { %v4145_v34 = vpop.f32.mrf.mxu1  ;;  %v3835_v39 = vadd.f32 %v3834_v26, %v13336_v18  ;;  %4959 = vmatprep.mubr.f32.mxu0 %v12810_v45 }
 0x353   :  { %v11076_v55 = vadd.f32 %v4145_v34, %v3826_v13  ;;  %v3836_v60 = vpop.f32.mrf.mxu0  ;;  %5198 = vmatmul.mubr.f32.gmra.mxu1 %v13335_v37 }
 0x354   :  { %v4150_v61 = vpop.f32.mrf.mxu1  ;;  %v3837_v38 = vadd.f32 %v3836_v60, %v13336_v18  ;;  %5203 = vmatprep.mubr.f32.mxu1 %v12810_v45 }
 0x355   :  { %v11081_v9 = vadd.f32 %v4150_v61, %v3835_v39  ;;  %v3845_v62 = vpop.f32.mrf.mxu0  ;;  %4961 = vmatmul.mubr.f32.gmra.mxu0 %v13337_v6  ;;  %v8382_v39 = vmov 1966171168  }
 0x356   :  { %v4152_v31 = vpop.f32.mrf.mxu1  ;;  %v3846_v26 = vadd.f32 %v3845_v62, %v13338_v12  ;;  %4966 = vmatprep.mubr.f32.mxu0 %v12810_v45  ;;  %v7876_v18 = vunpack.c.l.s4 %v8382_v39 }
 0x357   :  { %v11086_v13 = vadd.f32 %v4152_v31, %v3837_v38  ;;  %v3847_v34 = vpop.f32.mrf.mxu0  ;;  %5205 = vmatmul.mubr.f32.gmra.mxu1 %v13337_v6  ;;  %v13340_v31 = vld [vmem:[#allocation120_spill] sm:$0xff] }
 0x358   :  { %v4157_v24 = vpop.f32.mrf.mxu1  ;;  %v3848_v60 = vadd.f32 %v3847_v34, %v13338_v12  ;;  %5210 = vmatprep.mubr.f32.mxu1 %v12810_v45  ;;  %v7877_v39 = vunpack.c.0.s8 %v7876_v18  ;;  %v7826_v18 = vand.u32 2147483648, %v11054_v5 }
 0x359   :  { %v11091_v61 = vadd.f32 %v4157_v24, %v3846_v26  ;;  %v3856_v22 = vpop.f32.mrf.mxu0  ;;  %4968 = vmatmul.mubr.f32.gmra.mxu0 %v13339_v23 }
 0x35a   :  { %v4159_v62 = vpop.f32.mrf.mxu1  ;;  %v3857_v38 = vadd.f32 %v3856_v22, %v13340_v31  ;;  %4973 = vmatprep.mubr.f32.mxu0 %v12810_v45  ;;  %v13343_v22 = vld [vmem:[#allocation44_spill] sm:$0xff] }
 0x35b   :  { %v11096_v19 = vadd.f32 %v4159_v62, %v3848_v60  ;;  %v3858_v8 = vpop.f32.mrf.mxu0  ;;  %5212 = vmatmul.mubr.f32.gmra.mxu1 %v13339_v23 }
 0x35c   :  { %v8147_v35 = vpop.eup %8146  ;;  %v4164_v7 = vpop.f32.mrf.mxu1  ;;  %v3859_v24 = vadd.f32 %v3858_v8, %v13340_v31  ;;  %5217 = vmatprep.mubr.f32.mxu1 %v12810_v45 }
 0x35d   :  { %13341 = vst [vmem:[#allocation166_spill] sm:$0xff] %v11096_v19  ;;  %v11101_v26 = vadd.f32 %v4164_v7, %v3857_v38  ;;  %v7822_v34 = vmul.f32 %v8147_v35, %v11054_v5  ;;  %v3867_v12 = vpop.f32.mrf.mxu0  ;;  %4975 = vmatmul.mubr.f32.gmra.mxu0 %v13343_v22 }
 0x35e   :  { %v4166_v60 = vpop.f32.mrf.mxu1  ;;  %v8149_v62 = vpop.eup %8148  ;;  %v3868_v10 = vadd.f32 %v3867_v12, %v13344_v53  ;;  %4980 = vmatprep.mubr.f32.mxu0 %v12810_v45  ;;  %v7833_v12 = vand.u32 2147483648, %v11066_v11 }
 0x35f   :  { %13342 = vst [vmem:[#allocation167_spill] sm:$0xff] %v11101_v26  ;;  %v11107_v19 = vadd.f32 %v4166_v60, %v3859_v24  ;;  %v3869_v7 = vpop.f32.mrf.mxu0  ;;  %5219 = vmatmul.mubr.f32.gmra.mxu1 %v13343_v22  ;;  %v7824_v35 = vsel %vm7823_vm6, %v11054_v5, %v7822_v34  ;;  %v7829_v38 = vmul.f32 %v8149_v62, %v11066_v11  ;;  %v13347_v24 = vld [vmem:[#allocation155_spill] sm:$0xff] }
 0x360   :  { %v4171_v8 = vpop.f32.mrf.mxu1  ;;  %v3870_v31 = vadd.f32 %v3869_v7, %v13344_v53  ;;  %5224 = vmatprep.mubr.f32.mxu1 %v12810_v45  ;;  %v11122_v60 = vsub.s32 %v7877_v39, %v13347_v24  ;;  %v7827_v53 = vsel %vm7825_vm8, %v7826_v18, %v7824_v35 }
 0x361   :  { %13345 = vst [vmem:[#allocation168_spill] sm:$0xff] %v11107_v19  ;;  %v11116_v23 = vadd.f32 %v4171_v8, %v3868_v10  ;;  %v3878_v22 = vpop.f32.mrf.mxu0  ;;  %v13349_v19 = vld [vmem:[#allocation50_spill] sm:$0xff]  ;;  %v7831_v62 = vsel %vm7830_vm7, %v11066_v11, %v7829_v38  ;;  %v13350_v10 = vld [vmem:[#allocation125_spill] sm:$0xff] }
 0x362   :  { %13348 = vst [vmem:[#allocation170_spill] sm:$0xff] %v11122_v60  ;;  %4982 = vmatmul.mubr.f32.gmra.mxu0 %v13349_v19  ;;  %v4173_v34 = vpop.f32.mrf.mxu1  ;;  %v3879_v7 = vadd.f32 %v3878_v22, %v13350_v10  ;;  %v13351_v38 = vld [vmem:[#allocation54_spill] sm:$0xff]  ;;  %v13352_v22 = vld [vmem:[#allocation159_spill] sm:$0xff] }
 0x363   :  { %13346 = vst [vmem:[#allocation169_spill] sm:$0xff] %v11116_v23  ;;  %v11129_v8 = vadd.f32 %v4173_v34, %v3870_v31  ;;  %4987 = vmatprep.mubr.f32.mxu0 %v12810_v45  ;;  %v7834_v23 = vsel %vm7832_vm9, %v7833_v12, %v7831_v62  ;;  %v3880_v39 = vpop.f32.mrf.mxu0  ;;  %5226 = vmatmul.mubr.f32.gmra.mxu1 %v13349_v19  ;;  %v13353_v34 = vld [vmem:[#allocation160_spill] sm:$0xff] }
 0x364   :  { %v4178_v24 = vpop.f32.mrf.mxu1  ;;  %v7872_v26 = vcombine.low %v7827_v53, %v7834_v23  ;;  %v3881_v6 = vadd.f32 %v3880_v39, %v13350_v10  ;;  %5231 = vmatprep.mubr.f32.mxu1 %v12810_v45  ;;  %v13354_v35 = vcombine.low %v13352_v22, %v13353_v34  ;;  %v13357_v53 = vld [vmem:[#allocation119_spill] sm:$0xff] }
 0x365   :  { %v11134_v5 = vadd.f32 %v4178_v24, %v3879_v7  ;;  %v3889_v11 = vpop.f32.mrf.mxu0  ;;  %v13361_v24 = vld [vmem:[#allocation62_spill] sm:$0xff] }
 0x366   :  { %4989 = vmatmul.mubr.f32.gmra.mxu0 %v13351_v38  ;;  %v4180_v31 = vpop.f32.mrf.mxu1  ;;  %v11142_v18 = vrot.slane %v13354_v35, %v11122_v60  ;;  %v11145_v12 = vrot.slane %v7872_v26, %v11122_v60  ;;  %v3890_v23 = vadd.f32 %v3889_v11, %v13357_v53  ;;  %v13358_v35 = vld [vmem:[#allocation55_spill] sm:$0xff]  ;;  %v13359_v11 = vld [vmem:[#allocation121_spill] sm:$0xff] }
 0x367   :  { %v11148_v62 = vadd.f32 %v4180_v31, %v3881_v6  ;;  %4994 = vmatprep.mubr.f32.mxu0 %v12810_v45  ;;  %v3891_v7 = vpop.f32.mrf.mxu0  ;;  %5233 = vmatmul.mubr.f32.gmra.mxu1 %v13351_v38 }
 0x368   :  { %13355 = vst [vmem:[#allocation171_spill] sm:$0xff] %v11142_v18  ;;  %13356 = vst [vmem:[#allocation172_spill] sm:$0xff] %v11145_v12  ;;  %v4185_v39 = vpop.f32.mrf.mxu1  ;;  %v3892_v22 = vadd.f32 %v3891_v7, %v13357_v53  ;;  %5238 = vmatprep.mubr.f32.mxu1 %v12810_v45  ;;  %v13362_v18 = vld [vmem:[#allocation123_spill] sm:$0xff] }
 0x369   :  { %v11155_v34 = vadd.f32 %v4185_v39, %v3890_v23  ;;  %v3900_v26 = vpop.f32.mrf.mxu0 }
 0x36a   :  { %4996 = vmatmul.mubr.f32.gmra.mxu0 %v13358_v35  ;;  %v4187_v6 = vpop.f32.mrf.mxu1  ;;  %v3901_v31 = vadd.f32 %v3900_v26, %v13359_v11 }
 0x36b   :  { %v11160_v60 = vadd.f32 %v4187_v6, %v3892_v22  ;;  %5001 = vmatprep.mubr.f32.mxu0 %v12810_v45  ;;  %v3902_v10 = vpop.f32.mrf.mxu0  ;;  %5240 = vmatmul.mubr.f32.gmra.mxu1 %v13358_v35 }
 0x36c   :  { %v4192_v38 = vpop.f32.mrf.mxu1  ;;  %v3903_v7 = vadd.f32 %v3902_v10, %v13359_v11  ;;  %5245 = vmatprep.mubr.f32.mxu1 %v12810_v45  ;;  %v13365_v11 = vld [vmem:[#allocation63_spill] sm:$0xff] }
 0x36d   :  { %v11165_v23 = vadd.f32 %v4192_v38, %v3901_v31  ;;  %v3911_v39 = vpop.f32.mrf.mxu0 }
 0x36e   :  { %5003 = vmatmul.mubr.f32.gmra.mxu0 %v13361_v24  ;;  %v4194_v12 = vpop.f32.mrf.mxu1  ;;  %v3912_v26 = vadd.f32 %v3911_v39, %v13362_v18 }
 0x36f   :  { %13360 = vst [vmem:[#allocation173_spill] sm:$0xff] %v11165_v23  ;;  %v11170_v22 = vadd.f32 %v4194_v12, %v3903_v7  ;;  %5008 = vmatprep.mubr.f32.mxu0 %v12810_v45  ;;  %v3913_v6 = vpop.f32.mrf.mxu0  ;;  %5247 = vmatmul.mubr.f32.gmra.mxu1 %v13361_v24  ;;  %v13366_v23 = vld [vmem:[#allocation128_spill] sm:$0xff] }
 0x370   :  { %v4199_v53 = vpop.f32.mrf.mxu1  ;;  %v3914_v10 = vadd.f32 %v3913_v6, %v13362_v18  ;;  %5252 = vmatprep.mubr.f32.mxu1 %v12810_v45  ;;  %v13369_v18 = vld [vmem:[#allocation70_spill] sm:$0xff] }
 0x371   :  { %13363 = vst [vmem:[#allocation174_spill] sm:$0xff] %v11170_v22  ;;  %v11175_v38 = vadd.f32 %v4199_v53, %v3912_v26  ;;  %v3922_v31 = vpop.f32.mrf.mxu0 }
 0x372   :  { %5010 = vmatmul.mubr.f32.gmra.mxu0 %v13365_v11  ;;  %v4201_v35 = vpop.f32.mrf.mxu1  ;;  %v3923_v39 = vadd.f32 %v3922_v31, %v13366_v23 }
 0x373   :  { %13364 = vst [vmem:[#allocation175_spill] sm:$0xff] %v11175_v38  ;;  %v11180_v12 = vadd.f32 %v4201_v35, %v3914_v10  ;;  %5015 = vmatprep.mubr.f32.mxu0 %v12810_v45  ;;  %v3924_v7 = vpop.f32.mrf.mxu0  ;;  %5254 = vmatmul.mubr.f32.gmra.mxu1 %v13365_v11  ;;  %v13370_v38 = vld [vmem:[#allocation132_spill] sm:$0xff] }
 0x374   :  { %v4206_v22 = vpop.f32.mrf.mxu1  ;;  %v3925_v6 = vadd.f32 %v3924_v7, %v13366_v23  ;;  %5259 = vmatprep.mubr.f32.mxu1 %v12810_v45  ;;  %v13373_v23 = vld [vmem:[#allocation74_spill] sm:$0xff] }
 0x375   :  { %13367 = vst [vmem:[#allocation176_spill] sm:$0xff] %v11180_v12  ;;  %v11185_v53 = vadd.f32 %v4206_v22, %v3923_v39  ;;  %v3933_v26 = vpop.f32.mrf.mxu0 }
 0x376   :  { %5017 = vmatmul.mubr.f32.gmra.mxu0 %v13369_v18  ;;  %v4208_v24 = vpop.f32.mrf.mxu1  ;;  %v3934_v31 = vadd.f32 %v3933_v26, %v13370_v38 }
 0x377   :  { %13368 = vst [vmem:[#allocation177_spill] sm:$0xff] %v11185_v53  ;;  %v11190_v35 = vadd.f32 %v4208_v24, %v3925_v6  ;;  %5022 = vmatprep.mubr.f32.mxu0 %v12810_v45  ;;  %v3935_v10 = vpop.f32.mrf.mxu0  ;;  %5261 = vmatmul.mubr.f32.gmra.mxu1 %v13369_v18  ;;  %v13374_v53 = vld [vmem:[#allocation136_spill] sm:$0xff] }
 0x378   :  { %v4213_v12 = vpop.f32.mrf.mxu1  ;;  %v3936_v7 = vadd.f32 %v3935_v10, %v13370_v38  ;;  %5266 = vmatprep.mubr.f32.mxu1 %v12810_v45  ;;  %v13377_v38 = vld [vmem:[#allocation75_spill] sm:$0xff] }
 0x379   :  { %13371 = vst [vmem:[#allocation157_spill] sm:$0xff] %v11190_v35  ;;  %v11195_v22 = vadd.f32 %v4213_v12, %v3934_v31  ;;  %v3944_v39 = vpop.f32.mrf.mxu0 }
 0x37a   :  { %5024 = vmatmul.mubr.f32.gmra.mxu0 %v13373_v23  ;;  %v4215_v11 = vpop.f32.mrf.mxu1  ;;  %v3945_v26 = vadd.f32 %v3944_v39, %v13374_v53 }
 0x37b   :  { %13372 = vst [vmem:[#allocation158_spill] sm:$0xff] %v11195_v22  ;;  %v11200_v24 = vadd.f32 %v4215_v11, %v3936_v7  ;;  %5029 = vmatprep.mubr.f32.mxu0 %v12810_v45  ;;  %v3946_v6 = vpop.f32.mrf.mxu0  ;;  %5268 = vmatmul.mubr.f32.gmra.mxu1 %v13373_v23  ;;  %v13378_v22 = vld [vmem:[#allocation139_spill] sm:$0xff] }
 0x37c   :  { %v4220_v35 = vpop.f32.mrf.mxu1  ;;  %v3947_v10 = vadd.f32 %v3946_v6, %v13374_v53  ;;  %5273 = vmatprep.mubr.f32.mxu1 %v12810_v45  ;;  %v13381_v53 = vld [vmem:[#allocation82_spill] sm:$0xff] }
 0x37d   :  { %13375 = vst [vmem:[#allocation161_spill] sm:$0xff] %v11200_v24  ;;  %v11205_v12 = vadd.f32 %v4220_v35, %v3945_v26  ;;  %v3955_v31 = vpop.f32.mrf.mxu0 }
 0x37e   :  { %5031 = vmatmul.mubr.f32.gmra.mxu0 %v13377_v38  ;;  %v4222_v18 = vpop.f32.mrf.mxu1  ;;  %v3956_v39 = vadd.f32 %v3955_v31, %v13378_v22 }
 0x37f   :  { %13376 = vst [vmem:[#allocation162_spill] sm:$0xff] %v11205_v12  ;;  %v11210_v11 = vadd.f32 %v4222_v18, %v3947_v10  ;;  %5036 = vmatprep.mubr.f32.mxu0 %v12810_v45  ;;  %v3957_v7 = vpop.f32.mrf.mxu0  ;;  %5275 = vmatmul.mubr.f32.gmra.mxu1 %v13377_v38  ;;  %v13382_v12 = vld [vmem:[#allocation143_spill] sm:$0xff] }
 0x380   :  { %v4227_v24 = vpop.f32.mrf.mxu1  ;;  %v3958_v6 = vadd.f32 %v3957_v7, %v13378_v22  ;;  %5280 = vmatprep.mubr.f32.mxu1 %v12810_v45  ;;  %v13385_v22 = vld [vmem:[#allocation86_spill] sm:$0xff] }
 0x381   :  { %13379 = vst [vmem:[#allocation163_spill] sm:$0xff] %v11210_v11  ;;  %v11215_v35 = vadd.f32 %v4227_v24, %v3956_v39  ;;  %v3966_v26 = vpop.f32.mrf.mxu0 }
 0x382   :  { %5038 = vmatmul.mubr.f32.gmra.mxu0 %v13381_v53  ;;  %v4229_v23 = vpop.f32.mrf.mxu1  ;;  %v3967_v31 = vadd.f32 %v3966_v26, %v13382_v12 }
 0x383   :  { %13380 = vst [vmem:[#allocation164_spill] sm:$0xff] %v11215_v35  ;;  %v11220_v18 = vadd.f32 %v4229_v23, %v3958_v6  ;;  %5043 = vmatprep.mubr.f32.mxu0 %v12810_v45  ;;  %v3968_v10 = vpop.f32.mrf.mxu0  ;;  %5282 = vmatmul.mubr.f32.gmra.mxu1 %v13381_v53  ;;  %v13386_v35 = vld [vmem:[#allocation145_spill] sm:$0xff] }
 0x384   :  { %v4234_v11 = vpop.f32.mrf.mxu1  ;;  %v3969_v7 = vadd.f32 %v3968_v10, %v13382_v12  ;;  %5287 = vmatprep.mubr.f32.mxu1 %v12810_v45  ;;  %v13388_v12 = vld [vmem:[#allocation87_spill] sm:$0xff] }
 0x385   :  { %13383 = vst [vmem:[#allocation165_spill] sm:$0xff] %v11220_v18  ;;  %v11225_v24 = vadd.f32 %v4234_v11, %v3967_v31  ;;  %v3977_v39 = vpop.f32.mrf.mxu0 }
 0x386   :  { %5045 = vmatmul.mubr.f32.gmra.mxu0 %v13385_v22  ;;  %v4236_v38 = vpop.f32.mrf.mxu1  ;;  %v3978_v26 = vadd.f32 %v3977_v39, %v13386_v35 }
 0x387   :  { %13384 = vst [vmem:[#allocation155_spill] sm:$0xff] %v11225_v24  ;;  %v11230_v23 = vadd.f32 %v4236_v38, %v3969_v7  ;;  %5050 = vmatprep.mubr.f32.mxu0 %v12810_v45  ;;  %v3979_v6 = vpop.f32.mrf.mxu0  ;;  %5289 = vmatmul.mubr.f32.gmra.mxu1 %v13385_v22  ;;  %v13389_v24 = vld [vmem:[#allocation148_spill] sm:$0xff] }
 0x388   :  { %v4241_v18 = vpop.f32.mrf.mxu1  ;;  %v3980_v10 = vadd.f32 %v3979_v6, %v13386_v35  ;;  %5294 = vmatprep.mubr.f32.mxu1 %v12810_v45 }
 0x389   :  { %13387 = vst [vmem:[#allocation159_spill] sm:$0xff] %v11230_v23  ;;  %v11235_v11 = vadd.f32 %v4241_v18, %v3978_v26  ;;  %v3988_v31 = vpop.f32.mrf.mxu0 }
 0x38a   :  { %5052 = vmatmul.mubr.f32.gmra.mxu0 %v13388_v12  ;;  %v4243_v53 = vpop.f32.mrf.mxu1  ;;  %v3989_v39 = vadd.f32 %v3988_v31, %v13389_v24 }
 0x38b   :  { %v11240_v38 = vadd.f32 %v4243_v53, %v3980_v10  ;;  %5057 = vmatprep.mubr.f32.mxu0 %v12810_v45  ;;  %v3990_v7 = vpop.f32.mrf.mxu0  ;;  %5296 = vmatmul.mubr.f32.gmra.mxu1 %v13388_v12 }
 0x38c   :  { %v4248_v23 = vpop.f32.mrf.mxu1  ;;  %v3991_v6 = vadd.f32 %v3990_v7, %v13389_v24  ;;  %5301 = vmatprep.mubr.f32.mxu1 %v12810_v45 }
 0x38d   :  { %13390 = vst [vmem:[#allocation160_spill] sm:$0xff] %v11240_v38  ;;  %v11245_v18 = vadd.f32 %v4248_v23, %v3989_v39  ;;  %v4329_v26 = vpop.f32.mrf.mxu0 }
 0x38e   :  { %5059 = vmatmul.mubr.f32.gmra.mxu0 %v13226_v58  ;;  %v4250_v35 = vpop.f32.mrf.mxu1  ;;  %v4330_v31 = vadd.f32 %v4329_v26, %v10955_v21 }
 0x38f   :  { %v11250_v53 = vadd.f32 %v4250_v35, %v3991_v6  ;;  %5064 = vmatprep.mubr.f32.mxu0 %v12810_v45  ;;  %v4331_v10 = vpop.f32.mrf.mxu0  ;;  %5303 = vmatmul.mubr.f32.gmra.mxu1 %v13226_v58 }
 0x390   :  { %v4599_v38 = vpop.f32.mrf.mxu1  ;;  %v4332_v7 = vadd.f32 %v4331_v10, %v10963_v15  ;;  %5308 = vmatprep.mubr.f32.mxu1 %v12810_v45  ;;  %v13391_v10 = vld [vmem:[#allocation17_spill] sm:$0xff] }
 0x391   :  { %v11255_v23 = vadd.f32 %v4599_v38, %v4330_v31  ;;  %v4337_v39 = vpop.f32.mrf.mxu0 }
 0x392   :  { %5066 = vmatmul.mubr.f32.gmra.mxu0 %v9008_v25  ;;  %v4601_v24 = vpop.f32.mrf.mxu1  ;;  %v4338_v21 = vadd.f32 %v4337_v39, %v10970_v28 }
 0x393   :  { %v11260_v35 = vadd.f32 %v4601_v24, %v4332_v7  ;;  %5384 = vmatprep.mubr.f32.mxu0 %v12810_v45  ;;  %v4339_v6 = vpop.f32.mrf.mxu0  ;;  %5310 = vmatmul.mubr.f32.gmra.mxu1 %v9008_v25 }
 0x394   :  { %v4608_v26 = vpop.f32.mrf.mxu1  ;;  %v4340_v15 = vadd.f32 %v4339_v6, %v10978_v30  ;;  %5744 = vmatprep.mubr.f32.mxu1 %v12810_v45 }
 0x395   :  { %v11265_v38 = vadd.f32 %v4608_v26, %v4338_v21  ;;  %v4345_v31 = vpop.f32.mrf.mxu0 }
 0x396   :  { %5390 = vmatmul.mubr.f32.vlgmr.msra.gmra.mxu0 %v13391_v10  ;;  %v4610_v58 = vpop.f32.mrf.mxu1  ;;  %v4346_v28 = vadd.f32 %v4345_v31, %v10987_v27  ;;  %v13392_v27 = vld [vmem:[#allocation20_spill] sm:$0xff]  ;;  %v13393_v10 = vand.u32 4294901760, %v10741_v14 }
 0x397   :  { %v11270_v24 = vadd.f32 %v4610_v58, %v4340_v15  ;;  %5395 = vmatprep.mubr.f32.mxu0 %v12810_v45  ;;  %5953 = vmatpush1.msra.mxu0 %v10921_v4  ;;  %v4347_v7 = vpop.f32.mrf.mxu0 }
 0x398   :  { %v4617_v39 = vpop.f32.mrf.mxu1  ;;  %5746 = vmatmul.mubr.f32.vlgmr.msra.gmra.mxu1 %v13316_v16  ;;  %5956 = vmatprep.subr.mxu0 %v10930_v49  ;;  %v4348_v30 = vadd.f32 %v4347_v7, %v10992_v63  ;;  %v13429_v16 = vld [vmem:[#allocation158_spill] sm:$0xff] }
 0x399   :  { %v11277_v21 = vadd.f32 %v4617_v39, %v4346_v28  ;;  %6224 = vmatpush1.msra.mxu1 %v10905_v51  ;;  %5751 = vmatprep.mubr.f32.mxu1 %v12810_v45  ;;  %v4353_v58 = vpop.f32.mrf.mxu0  ;;  %v13394_v39 = vld [vmem:[#allocation23_spill] sm:$0xff] }
 0x39a   :  { %5401 = vmatmul.mubr.f32.gmra.mxu0 %v13392_v27  ;;  %v4619_v6 = vpop.f32.mrf.mxu1  ;;  %6226 = vmatprep.subr.mxu1 %v10914_v0  ;;  %v4354_v26 = vadd.f32 %v4353_v58, %v11001_v59 }
 0x39b   :  { %v11284_v15 = vadd.f32 %v4619_v6, %v4348_v30  ;;  %5406 = vmatprep.mubr.f32.mxu0 %v12810_v45  ;;  %5959 = vmatpush1.msra.mxu0 %v10938_v2  ;;  %v4355_v63 = vpop.f32.mrf.mxu0 }
 0x39c   :  { %v4626_v31 = vpop.f32.mrf.mxu1  ;;  %5753 = vmatmul.mubr.f32.gmra.mxu1 %v13319_v56  ;;  %6518 = vmatprep.subr.mxu0 %v13393_v10  ;;  %v4356_v28 = vadd.f32 %v4355_v63, %v11007_v41  ;;  %v13425_v56 = vld [vmem:[#allocation63_spill] sm:$0xff] }
 0x39d   :  { %v11292_v7 = vadd.f32 %v4626_v31, %v4354_v26  ;;  %5758 = vmatprep.mubr.f32.mxu1 %v12810_v45  ;;  %6228 = vmatpush1.msra.mxu1 %v10923_v52  ;;  %v4361_v59 = vpop.f32.mrf.mxu0  ;;  %v13395_v31 = vld [vmem:[#allocation27_spill] sm:$0xff] }
 0x39e   :  { %5412 = vmatmul.mubr.f32.gmra.mxu0 %v13394_v39  ;;  %v4628_v30 = vpop.f32.mrf.mxu1  ;;  %6768 = vmatprep.subr.mxu1 %v10732_v29  ;;  %v4362_v58 = vadd.f32 %v4361_v59, %v11013_v47 }
 0x39f   :  { %v11299_v27 = vadd.f32 %v4628_v30, %v4356_v28  ;;  %5417 = vmatprep.mubr.f32.mxu0 %v12810_v45  ;;  %v4363_v14 = vpop.f32.mrf.mxu0 }
 0x3a0   :  { %v4635_v41 = vpop.f32.mrf.mxu1  ;;  %5760 = vmatmul.mubr.f32.gmra.mxu1 %v13322_v36  ;;  %v4364_v6 = vadd.f32 %v4363_v14, %v11018_v46  ;;  %v13423_v36 = vld [vmem:[#allocation177_spill] sm:$0xff] }
 0x3a1   :  { %v11304_v26 = vadd.f32 %v4635_v41, %v4362_v58  ;;  %5765 = vmatprep.mubr.f32.mxu1 %v12810_v45  ;;  %v4369_v63 = vpop.f32.mrf.mxu0  ;;  %v13396_v58 = vld [vmem:[#allocation32_spill] sm:$0xff] }
 0x3a2   :  { %5423 = vmatmul.mubr.f32.gmra.mxu0 %v13395_v31  ;;  %v4637_v29 = vpop.f32.mrf.mxu1  ;;  %v4370_v47 = vadd.f32 %v4369_v63, %v11023_v42 }
 0x3a3   :  { %v11309_v10 = vadd.f32 %v4637_v29, %v4364_v6  ;;  %5428 = vmatprep.mubr.f32.mxu0 %v12810_v45  ;;  %v4371_v28 = vpop.f32.mrf.mxu0 }
 0x3a4   :  { %v4644_v59 = vpop.f32.mrf.mxu1  ;;  %5767 = vmatmul.mubr.f32.gmra.mxu1 %v13324_v3  ;;  %v4372_v46 = vadd.f32 %v4371_v28, %v11028_v54  ;;  %v13420_v3 = vld [vmem:[#allocation62_spill] sm:$0xff] }
 0x3a5   :  { %v11314_v39 = vadd.f32 %v4644_v59, %v4370_v47  ;;  %5772 = vmatprep.mubr.f32.mxu1 %v12810_v45  ;;  %v4377_v30 = vpop.f32.mrf.mxu0  ;;  %v13397_v47 = vld [vmem:[#allocation36_spill] sm:$0xff] }
 0x3a6   :  { %5434 = vmatmul.mubr.f32.gmra.mxu0 %v13396_v58  ;;  %v4646_v14 = vpop.f32.mrf.mxu1  ;;  %v4378_v42 = vadd.f32 %v4377_v30, %v11033_v1 }
 0x3a7   :  { %v11319_v41 = vadd.f32 %v4646_v14, %v4372_v46  ;;  %5439 = vmatprep.mubr.f32.mxu0 %v12810_v45  ;;  %v4379_v6 = vpop.f32.mrf.mxu0 }
 0x3a8   :  { %v4653_v63 = vpop.f32.mrf.mxu1  ;;  %5774 = vmatmul.mubr.f32.gmra.mxu1 %v13326_v32  ;;  %v4380_v54 = vadd.f32 %v4379_v6, %v11038_v50  ;;  %v13419_v32 = vld [vmem:[#allocation175_spill] sm:$0xff] }
 0x3a9   :  { %v11324_v31 = vadd.f32 %v4653_v63, %v4378_v42  ;;  %5779 = vmatprep.mubr.f32.mxu1 %v12810_v45  ;;  %v4385_v29 = vpop.f32.mrf.mxu0  ;;  %v13398_v42 = vld [vmem:[#allocation40_spill] sm:$0xff] }
 0x3aa   :  { %5445 = vmatmul.mubr.f32.gmra.mxu0 %v13397_v47  ;;  %v4655_v28 = vpop.f32.mrf.mxu1  ;;  %v4386_v1 = vadd.f32 %v4385_v29, %v11044_v33 }
 0x3ab   :  { %v11329_v59 = vadd.f32 %v4655_v28, %v4380_v54  ;;  %5450 = vmatprep.mubr.f32.mxu0 %v12810_v45  ;;  %v4387_v46 = vpop.f32.mrf.mxu0 }
 0x3ac   :  { %v4662_v30 = vpop.f32.mrf.mxu1  ;;  %5781 = vmatmul.mubr.f32.gmra.mxu1 %v13328_v40  ;;  %v4388_v50 = vadd.f32 %v4387_v46, %v11049_v17  ;;  %v13410_v40 = vld [vmem:[#allocation44_spill] sm:$0xff] }
 0x3ad   :  { %v11334_v58 = vadd.f32 %v4662_v30, %v4386_v1  ;;  %5786 = vmatprep.mubr.f32.mxu1 %v12810_v45  ;;  %v4393_v14 = vpop.f32.mrf.mxu0  ;;  %v13399_v1 = vld [vmem:[#allocation45_spill] sm:$0xff] }
 0x3ae   :  { %5456 = vmatmul.mubr.f32.gmra.mxu0 %v13398_v42  ;;  %v4664_v6 = vpop.f32.mrf.mxu1  ;;  %v4394_v33 = vadd.f32 %v4393_v14, %v11057_v48 }
 0x3af   :  { %v11339_v63 = vadd.f32 %v4664_v6, %v4388_v50  ;;  %5461 = vmatprep.mubr.f32.mxu0 %v12810_v45  ;;  %v4395_v54 = vpop.f32.mrf.mxu0 }
 0x3b0   :  { %v4671_v29 = vpop.f32.mrf.mxu1  ;;  %5788 = vmatmul.mubr.f32.gmra.mxu1 %v13331_v44  ;;  %v4396_v17 = vadd.f32 %v4395_v54, %v11062_v43  ;;  %v13409_v44 = vld [vmem:[#allocation169_spill] sm:$0xff] }
 0x3b1   :  { %v11344_v47 = vadd.f32 %v4671_v29, %v4394_v33  ;;  %5793 = vmatprep.mubr.f32.mxu1 %v12810_v45  ;;  %v4401_v28 = vpop.f32.mrf.mxu0  ;;  %v13400_v33 = vld [vmem:[#allocation49_spill] sm:$0xff] }
 0x3b2   :  { %5467 = vmatmul.mubr.f32.gmra.mxu0 %v13399_v1  ;;  %v4673_v46 = vpop.f32.mrf.mxu1  ;;  %v4402_v48 = vadd.f32 %v4401_v28, %v11070_v20 }
 0x3b3   :  { %v11349_v30 = vadd.f32 %v4673_v46, %v4396_v17  ;;  %5472 = vmatprep.mubr.f32.mxu0 %v12810_v45  ;;  %v4403_v50 = vpop.f32.mrf.mxu0 }
 0x3b4   :  { %v4680_v14 = vpop.f32.mrf.mxu1  ;;  %5795 = vmatmul.mubr.f32.gmra.mxu1 %v13333_v57  ;;  %v4404_v43 = vadd.f32 %v4403_v50, %v11076_v55  ;;  %v13406_v57 = vld [vmem:[#allocation39_spill] sm:$0xff] }
 0x3b5   :  { %v11354_v42 = vadd.f32 %v4680_v14, %v4402_v48  ;;  %5800 = vmatprep.mubr.f32.mxu1 %v12810_v45  ;;  %v4409_v6 = vpop.f32.mrf.mxu0  ;;  %v13401_v48 = vld [vmem:[#allocation52_spill] sm:$0xff] }
 0x3b6   :  { %5478 = vmatmul.mubr.f32.gmra.mxu0 %v13400_v33  ;;  %v4682_v54 = vpop.f32.mrf.mxu1  ;;  %v4410_v20 = vadd.f32 %v4409_v6, %v11081_v9  ;;  %v13402_v33 = vld [vmem:[#allocation38_spill] sm:$0xff] }
 0x3b7   :  { %v11359_v29 = vadd.f32 %v4682_v54, %v4404_v43  ;;  %5483 = vmatprep.mubr.f32.mxu0 %v12810_v45  ;;  %v4411_v17 = vpop.f32.mrf.mxu0  ;;  %v13403_v54 = vld [vmem:[#allocation166_spill] sm:$0xff] }
 0x3b8   :  { %v4689_v28 = vpop.f32.mrf.mxu1  ;;  %5802 = vmatmul.mubr.f32.gmra.mxu1 %v13335_v37  ;;  %v4412_v55 = vadd.f32 %v4411_v17, %v11086_v13  ;;  %v13405_v37 = vld [vmem:[#allocation167_spill] sm:$0xff] }
 0x3b9   :  { %v11364_v1 = vadd.f32 %v4689_v28, %v4410_v20  ;;  %5807 = vmatprep.mubr.f32.mxu1 %v12810_v45  ;;  %v4417_v46 = vpop.f32.mrf.mxu0  ;;  %v13404_v28 = vld [vmem:[#allocation56_spill] sm:$0xff] }
 0x3ba   :  { %5489 = vmatmul.mubr.f32.gmra.mxu0 %v13401_v48  ;;  %v4691_v50 = vpop.f32.mrf.mxu1  ;;  %v4418_v9 = vadd.f32 %v4417_v46, %v11091_v61 }
 0x3bb   :  { %v11369_v14 = vadd.f32 %v4691_v50, %v4412_v55  ;;  %5494 = vmatprep.mubr.f32.mxu0 %v12810_v45  ;;  %v4419_v43 = vpop.f32.mrf.mxu0 }
 0x3bc   :  { %v4698_v6 = vpop.f32.mrf.mxu1  ;;  %5809 = vmatmul.mubr.f32.gmra.mxu1 %v13402_v33  ;;  %v4420_v13 = vadd.f32 %v4419_v43, %v13403_v54  ;;  %v13407_v33 = vld [vmem:[#allocation168_spill] sm:$0xff] }
 0x3bd   :  { %v11374_v20 = vadd.f32 %v4698_v6, %v4418_v9  ;;  %5814 = vmatprep.mubr.f32.mxu1 %v12810_v45  ;;  %v4425_v17 = vpop.f32.mrf.mxu0  ;;  %v13408_v54 = vld [vmem:[#allocation60_spill] sm:$0xff] }
 0x3be   :  { %5500 = vmatmul.mubr.f32.gmra.mxu0 %v13404_v28  ;;  %v4700_v48 = vpop.f32.mrf.mxu1  ;;  %v4426_v61 = vadd.f32 %v4425_v17, %v13405_v37 }
 0x3bf   :  { %v11379_v55 = vadd.f32 %v4700_v48, %v4420_v13  ;;  %5505 = vmatprep.mubr.f32.mxu0 %v12810_v45  ;;  %v4427_v46 = vpop.f32.mrf.mxu0 }
 0x3c0   :  { %v4707_v50 = vpop.f32.mrf.mxu1  ;;  %5816 = vmatmul.mubr.f32.gmra.mxu1 %v13406_v57  ;;  %v4428_v43 = vadd.f32 %v4427_v46, %v13407_v33  ;;  %v13416_v57 = vld [vmem:[#allocation55_spill] sm:$0xff] }
 0x3c1   :  { %v11384_v9 = vadd.f32 %v4707_v50, %v4426_v61  ;;  %5821 = vmatprep.mubr.f32.mxu1 %v12810_v45  ;;  %v4433_v6 = vpop.f32.mrf.mxu0  ;;  %v13411_v50 = vld [vmem:[#allocation64_spill] sm:$0xff] }
 0x3c2   :  { %5511 = vmatmul.mubr.f32.gmra.mxu0 %v13408_v54  ;;  %v4709_v28 = vpop.f32.mrf.mxu1  ;;  %v4434_v37 = vadd.f32 %v4433_v6, %v13409_v44 }
 0x3c3   :  { %v11389_v13 = vadd.f32 %v4709_v28, %v4428_v43  ;;  %5516 = vmatprep.mubr.f32.mxu0 %v12810_v45  ;;  %v4435_v17 = vpop.f32.mrf.mxu0 }
 0x3c4   :  { %v4716_v48 = vpop.f32.mrf.mxu1  ;;  %5823 = vmatmul.mubr.f32.gmra.mxu1 %v13410_v40  ;;  %v4436_v33 = vadd.f32 %v4435_v17, %v11129_v8  ;;  %v13413_v40 = vld [vmem:[#allocation54_spill] sm:$0xff] }
 0x3c5   :  { %v11394_v61 = vadd.f32 %v4716_v48, %v4434_v37  ;;  %5828 = vmatprep.mubr.f32.mxu1 %v12810_v45  ;;  %v4441_v46 = vpop.f32.mrf.mxu0  ;;  %v13412_v48 = vld [vmem:[#allocation68_spill] sm:$0xff] }
 0x3c6   :  { %5522 = vmatmul.mubr.f32.gmra.mxu0 %v13411_v50  ;;  %v4718_v54 = vpop.f32.mrf.mxu1  ;;  %v4442_v44 = vadd.f32 %v4441_v46, %v11134_v5 }
 0x3c7   :  { %v11399_v43 = vadd.f32 %v4718_v54, %v4436_v33  ;;  %5527 = vmatprep.mubr.f32.mxu0 %v12810_v45  ;;  %v4443_v6 = vpop.f32.mrf.mxu0 }
 0x3c8   :  { %v4725_v28 = vpop.f32.mrf.mxu1  ;;  %5830 = vmatmul.mubr.f32.gmra.mxu1 %v13349_v19  ;;  %v4444_v8 = vadd.f32 %v4443_v6, %v11148_v62  ;;  %v13415_v19 = vld [vmem:[#allocation173_spill] sm:$0xff] }
 0x3c9   :  { %v11404_v37 = vadd.f32 %v4725_v28, %v4442_v44  ;;  %5835 = vmatprep.mubr.f32.mxu1 %v12810_v45  ;;  %v4449_v17 = vpop.f32.mrf.mxu0  ;;  %v13414_v28 = vld [vmem:[#allocation72_spill] sm:$0xff] }
 0x3ca   :  { %5533 = vmatmul.mubr.f32.gmra.mxu0 %v13412_v48  ;;  %v4727_v50 = vpop.f32.mrf.mxu1  ;;  %v4450_v5 = vadd.f32 %v4449_v17, %v11155_v34 }
 0x3cb   :  { %v11409_v33 = vadd.f32 %v4727_v50, %v4444_v8  ;;  %5538 = vmatprep.mubr.f32.mxu0 %v12810_v45  ;;  %v4451_v46 = vpop.f32.mrf.mxu0 }
 0x3cc   :  { %v4734_v54 = vpop.f32.mrf.mxu1  ;;  %5837 = vmatmul.mubr.f32.gmra.mxu1 %v13413_v40  ;;  %v4452_v62 = vadd.f32 %v4451_v46, %v11160_v60  ;;  %v13417_v40 = vld [vmem:[#allocation174_spill] sm:$0xff] }
 0x3cd   :  { %v11414_v44 = vadd.f32 %v4734_v54, %v4450_v5  ;;  %5842 = vmatprep.mubr.f32.mxu1 %v12810_v45  ;;  %v4457_v6 = vpop.f32.mrf.mxu0  ;;  %v13418_v54 = vld [vmem:[#allocation76_spill] sm:$0xff] }
 0x3ce   :  { %5544 = vmatmul.mubr.f32.gmra.mxu0 %v13414_v28  ;;  %v4736_v48 = vpop.f32.mrf.mxu1  ;;  %v4458_v34 = vadd.f32 %v4457_v6, %v13415_v19 }
 0x3cf   :  { %v11419_v8 = vadd.f32 %v4736_v48, %v4452_v62  ;;  %5549 = vmatprep.mubr.f32.mxu0 %v12810_v45  ;;  %v4459_v17 = vpop.f32.mrf.mxu0 }
 0x3d0   :  { %v4743_v50 = vpop.f32.mrf.mxu1  ;;  %5844 = vmatmul.mubr.f32.gmra.mxu1 %v13416_v57  ;;  %v4460_v60 = vadd.f32 %v4459_v17, %v13417_v40  ;;  %v13421_v57 = vld [vmem:[#allocation176_spill] sm:$0xff] }
 0x3d1   :  { %v11424_v5 = vadd.f32 %v4743_v50, %v4458_v34  ;;  %5849 = vmatprep.mubr.f32.mxu1 %v12810_v45  ;;  %v4465_v46 = vpop.f32.mrf.mxu0  ;;  %v13422_v50 = vld [vmem:[#allocation80_spill] sm:$0xff] }
 0x3d2   :  { %5555 = vmatmul.mubr.f32.gmra.mxu0 %v13418_v54  ;;  %v4745_v28 = vpop.f32.mrf.mxu1  ;;  %v4466_v19 = vadd.f32 %v4465_v46, %v13419_v32 }
 0x3d3   :  { %v11429_v62 = vadd.f32 %v4745_v28, %v4460_v60  ;;  %5560 = vmatprep.mubr.f32.mxu0 %v12810_v45  ;;  %v4467_v6 = vpop.f32.mrf.mxu0 }
 0x3d4   :  { %v4752_v48 = vpop.f32.mrf.mxu1  ;;  %5851 = vmatmul.mubr.f32.gmra.mxu1 %v13420_v3  ;;  %v4468_v40 = vadd.f32 %v4467_v6, %v13421_v57  ;;  %v13426_v3 = vld [vmem:[#allocation157_spill] sm:$0xff] }
 0x3d5   :  { %v11434_v34 = vadd.f32 %v4752_v48, %v4466_v19  ;;  %5856 = vmatprep.mubr.f32.mxu1 %v12810_v45  ;;  %v4473_v17 = vpop.f32.mrf.mxu0  ;;  %v13428_v48 = vld [vmem:[#allocation84_spill] sm:$0xff] }
 0x3d6   :  { %5566 = vmatmul.mubr.f32.gmra.mxu0 %v13422_v50  ;;  %v4754_v54 = vpop.f32.mrf.mxu1  ;;  %v4474_v32 = vadd.f32 %v4473_v17, %v13423_v36 }
 0x3d7   :  { %v11439_v60 = vadd.f32 %v4754_v54, %v4468_v40  ;;  %5571 = vmatprep.mubr.f32.mxu0 %v12810_v45  ;;  %v4475_v46 = vpop.f32.mrf.mxu0 }
 0x3d8   :  { %v4761_v28 = vpop.f32.mrf.mxu1  ;;  %5858 = vmatmul.mubr.f32.gmra.mxu1 %v13425_v56  ;;  %v4476_v57 = vadd.f32 %v4475_v46, %v13426_v3  ;;  %v13432_v56 = vld [vmem:[#allocation161_spill] sm:$0xff] }
 0x3d9   :  { %13424 = vst [vmem:[#allocation17_spill] sm:$0xff] %v11439_v60  ;;  %v11444_v19 = vadd.f32 %v4761_v28, %v4474_v32  ;;  %5863 = vmatprep.mubr.f32.mxu1 %v12810_v45  ;;  %v4481_v6 = vpop.f32.mrf.mxu0  ;;  %v13431_v60 = vld [vmem:[#allocation70_spill] sm:$0xff]  ;;  %v13434_v28 = vld [vmem:[#allocation88_spill] sm:$0xff] }
 0x3da   :  { %5577 = vmatmul.mubr.f32.gmra.mxu0 %v13428_v48  ;;  %v4763_v50 = vpop.f32.mrf.mxu1  ;;  %v4482_v36 = vadd.f32 %v4481_v6, %v13429_v16 }
 0x3db   :  { %13427 = vst [vmem:[#allocation20_spill] sm:$0xff] %v11444_v19  ;;  %v11449_v40 = vadd.f32 %v4763_v50, %v4476_v57  ;;  %5582 = vmatprep.mubr.f32.mxu0 %v12810_v45  ;;  %v4483_v17 = vpop.f32.mrf.mxu0  ;;  %v13435_v19 = vld [vmem:[#allocation162_spill] sm:$0xff] }
 0x3dc   :  { %v4770_v54 = vpop.f32.mrf.mxu1  ;;  %5865 = vmatmul.mubr.f32.gmra.mxu1 %v13431_v60  ;;  %v4484_v3 = vadd.f32 %v4483_v17, %v13432_v56  ;;  %v13438_v60 = vld [vmem:[#allocation163_spill] sm:$0xff] }
 0x3dd   :  { %13430 = vst [vmem:[#allocation23_spill] sm:$0xff] %v11449_v40  ;;  %v11454_v32 = vadd.f32 %v4770_v54, %v4482_v36  ;;  %5870 = vmatprep.mubr.f32.mxu1 %v12810_v45  ;;  %v4489_v46 = vpop.f32.mrf.mxu0  ;;  %v13437_v40 = vld [vmem:[#allocation74_spill] sm:$0xff]  ;;  %v13440_v54 = vld [vmem:[#allocation92_spill] sm:$0xff] }
 0x3de   :  { %5588 = vmatmul.mubr.f32.gmra.mxu0 %v13434_v28  ;;  %v4772_v48 = vpop.f32.mrf.mxu1  ;;  %v4490_v16 = vadd.f32 %v4489_v46, %v13435_v19 }
 0x3df   :  { %13433 = vst [vmem:[#allocation27_spill] sm:$0xff] %v11454_v32  ;;  %v11459_v57 = vadd.f32 %v4772_v48, %v4484_v3  ;;  %5593 = vmatprep.mubr.f32.mxu0 %v12810_v45  ;;  %v4491_v6 = vpop.f32.mrf.mxu0  ;;  %v13441_v32 = vld [vmem:[#allocation164_spill] sm:$0xff] }
 0x3e0   :  { %v4779_v50 = vpop.f32.mrf.mxu1  ;;  %5872 = vmatmul.mubr.f32.gmra.mxu1 %v13437_v40  ;;  %v4492_v56 = vadd.f32 %v4491_v6, %v13438_v60  ;;  %v13444_v40 = vld [vmem:[#allocation165_spill] sm:$0xff] }
 0x3e1   :  { %13436 = vst [vmem:[#allocation32_spill] sm:$0xff] %v11459_v57  ;;  %v11464_v36 = vadd.f32 %v4779_v50, %v4490_v16  ;;  %5877 = vmatprep.mubr.f32.mxu1 %v12810_v45  ;;  %v4497_v17 = vpop.f32.mrf.mxu0  ;;  %v13443_v57 = vld [vmem:[#allocation75_spill] sm:$0xff]  ;;  %v13445_v50 = vld [vmem:[#allocation96_spill] sm:$0xff] }
 0x3e2   :  { %5599 = vmatmul.mubr.f32.gmra.mxu0 %v13440_v54  ;;  %v4781_v28 = vpop.f32.mrf.mxu1  ;;  %v4498_v19 = vadd.f32 %v4497_v17, %v13441_v32 }
 0x3e3   :  { %13439 = vst [vmem:[#allocation36_spill] sm:$0xff] %v11464_v36  ;;  %v11469_v3 = vadd.f32 %v4781_v28, %v4492_v56  ;;  %5604 = vmatprep.mubr.f32.mxu0 %v12810_v45  ;;  %v4499_v46 = vpop.f32.mrf.mxu0  ;;  %v13446_v36 = vld [vmem:[#allocation155_spill] sm:$0xff] }
 0x3e4   :  { %v4788_v48 = vpop.f32.mrf.mxu1  ;;  %5879 = vmatmul.mubr.f32.gmra.mxu1 %v13443_v57  ;;  %v4500_v60 = vadd.f32 %v4499_v46, %v13444_v40  ;;  %v13448_v57 = vld [vmem:[#allocation159_spill] sm:$0xff] }
 0x3e5   :  { %13442 = vst [vmem:[#allocation40_spill] sm:$0xff] %v11469_v3  ;;  %v11474_v16 = vadd.f32 %v4788_v48, %v4498_v19  ;;  %5884 = vmatprep.mubr.f32.mxu1 %v12810_v45  ;;  %v4505_v6 = vpop.f32.mrf.mxu0  ;;  %v13447_v3 = vld [vmem:[#allocation82_spill] sm:$0xff] }
 0x3e6   :  { %5610 = vmatmul.mubr.f32.gmra.mxu0 %v13445_v50  ;;  %v4790_v54 = vpop.f32.mrf.mxu1  ;;  %v4506_v32 = vadd.f32 %v4505_v6, %v13446_v36  ;;  %v13449_v48 = vld [vmem:[#allocation98_spill] sm:$0xff] }
 0x3e7   :  { %v11479_v56 = vadd.f32 %v4790_v54, %v4500_v60  ;;  %5615 = vmatprep.mubr.f32.mxu0 %v12810_v45  ;;  %v4507_v17 = vpop.f32.mrf.mxu0 }
 0x3e8   :  { %v4797_v28 = vpop.f32.mrf.mxu1  ;;  %5886 = vmatmul.mubr.f32.gmra.mxu1 %v13447_v3  ;;  %v4508_v40 = vadd.f32 %v4507_v17, %v13448_v57  ;;  %v13450_v3 = vld [vmem:[#allocation160_spill] sm:$0xff] }
 0x3e9   :  { %v11484_v19 = vadd.f32 %v4797_v28, %v4506_v32  ;;  %5891 = vmatprep.mubr.f32.mxu1 %v12810_v45  ;;  %v4513_v46 = vpop.f32.mrf.mxu0  ;;  %v13451_v28 = vld [vmem:[#allocation101_spill] sm:$0xff] }
 0x3ea   :  { %5621 = vmatmul.mubr.f32.gmra.mxu0 %v13449_v48  ;;  %v4799_v50 = vpop.f32.mrf.mxu1  ;;  %v4514_v36 = vadd.f32 %v4513_v46, %v11235_v11 }
 0x3eb   :  { %v11489_v60 = vadd.f32 %v4799_v50, %v4508_v40  ;;  %5626 = vmatprep.mubr.f32.mxu0 %v12810_v45  ;;  %v4515_v6 = vpop.f32.mrf.mxu0 }
 0x3ec   :  { %v4806_v54 = vpop.f32.mrf.mxu1  ;;  %5893 = vmatmul.mubr.f32.gmra.mxu1 %v13385_v22  ;;  %v4516_v57 = vadd.f32 %v4515_v6, %v13450_v3  ;;  %v13453_v22 = vld [vmem:[#allocation91_spill] sm:$0xff] }
 0x3ed   :  { %v11494_v32 = vadd.f32 %v4806_v54, %v4514_v36  ;;  %5898 = vmatprep.mubr.f32.mxu1 %v12810_v45  ;;  %v4521_v17 = vpop.f32.mrf.mxu0  ;;  %v13452_v54 = vld [vmem:[#allocation103_spill] sm:$0xff] }
 0x3ee   :  { %5632 = vmatmul.mubr.f32.gmra.mxu0 %v13451_v28  ;;  %v4808_v48 = vpop.f32.mrf.mxu1  ;;  %v4522_v11 = vadd.f32 %v4521_v17, %v11245_v18 }
 0x3ef   :  { %v11499_v40 = vadd.f32 %v4808_v48, %v4516_v57  ;;  %5637 = vmatprep.mubr.f32.mxu0 %v12810_v45  ;;  %v4523_v46 = vpop.f32.mrf.mxu0 }
 0x3f0   :  { %v4815_v50 = vpop.f32.mrf.mxu1  ;;  %5900 = vmatmul.mubr.f32.gmra.mxu1 %v13388_v12  ;;  %v4524_v3 = vadd.f32 %v4523_v46, %v11250_v53 }
 0x3f1   :  { %v11504_v36 = vadd.f32 %v4815_v50, %v4522_v11  ;;  %5905 = vmatprep.mubr.f32.mxu1 %v12810_v45  ;;  %v4899_v6 = vpop.f32.mrf.mxu0  ;;  %v13454_v50 = vld [vmem:[#allocation104_spill] sm:$0xff] }
 0x3f2   :  { %5643 = vmatmul.mubr.f32.gmra.mxu0 %v13452_v54  ;;  %v4817_v28 = vpop.f32.mrf.mxu1  ;;  %v4900_v18 = vadd.f32 %v4899_v6, %v11255_v23 }
 0x3f3   :  { %v11509_v57 = vadd.f32 %v4817_v28, %v4524_v3  ;;  %5648 = vmatprep.mubr.f32.mxu0 %v12810_v45  ;;  %v4901_v17 = vpop.f32.mrf.mxu0 }
 0x3f4   :  { %v5143_v48 = vpop.f32.mrf.mxu1  ;;  %5907 = vmatmul.mubr.f32.gmra.mxu1 %v13453_v22  ;;  %v4902_v53 = vadd.f32 %v4901_v17, %v11260_v35  ;;  %v13455_v17 = vld [vmem:[#allocation9_spill] sm:$0xff] }
 0x3f5   :  { %v5144_v11 = vadd.f32 %v5143_v48, %v4900_v18  ;;  %5912 = vmatprep.mubr.f32.mxu1 %v12810_v45  ;;  %v4906_v46 = vpop.f32.mrf.mxu0 }
 0x3f6   :  { %5654 = vmatmul.mubr.f32.gmra.mxu0 %v13454_v50  ;;  %v5145_v54 = vpop.f32.mrf.mxu1  ;;  %v4907_v12 = vadd.f32 %v4906_v46, %v11265_v38 }
 0x3f7   :  { %v5146_v23 = vadd.f32 %v5145_v54, %v4902_v53  ;;  %5992 = vmatprep.mubr.f32.mxu0 %v12810_v45  ;;  %8150 = vtanh.f32 %v5144_v11  ;;  %v4908_v3 = vpop.f32.mrf.mxu0  ;;  %v13456_v11 = vand.u32 4294901760, %v10921_v4 }
 0x3f8   :  { %v5150_v6 = vpop.f32.mrf.mxu1  ;;  %5914 = vmatmul.mubr.f32.gmra.mxu1 %v9008_v25  ;;  %v4909_v28 = vadd.f32 %v4908_v3, %v11270_v24  ;;  %v13457_v24 = vld [vmem:[#allocation13_spill] sm:$0xff]  ;;  %v13459_v3 = vld [vmem:[#allocation10_spill] sm:$0xff] }
 0x3f9   :  { %v5151_v35 = vadd.f32 %v5150_v6, %v4907_v12  ;;  %6261 = vmatprep.mubr.f32.mxu1 %v12810_v45  ;;  %8152 = vtanh.f32 %v5146_v23  ;;  %v4913_v18 = vpop.f32.mrf.mxu0  ;;  %v13458_v12 = vand.u32 4294901760, %v10930_v49  ;;  %v13460_v49 = vand.u32 4294901760, %v10938_v2 }
 0x3fa   :  { %5995 = vmatmul.mubr.f32.vlgmr.msra.gmra.mxu0 %v13455_v17  ;;  %v5152_v48 = vpop.f32.mrf.mxu1  ;;  %v4914_v38 = vadd.f32 %v4913_v18, %v11277_v21 }
 0x3fb   :  { %8154 = vtanh.f32 %v5151_v35  ;;  %v5153_v53 = vadd.f32 %v5152_v48, %v4909_v28  ;;  %6000 = vmatprep.mubr.f32.mxu0 %v12810_v45  ;;  %6522 = vmatpush1.msra.mxu0 %v13456_v11  ;;  %v4915_v46 = vpop.f32.mrf.mxu0 }
 0x3fc   :  { %v5157_v50 = vpop.f32.mrf.mxu1  ;;  %6265 = vmatmul.mubr.f32.vlgmr.msra.gmra.mxu1 %v13457_v24  ;;  %6526 = vmatprep.subr.mxu0 %v13458_v12  ;;  %v4916_v54 = vadd.f32 %v4915_v46, %v11284_v15  ;;  %v13463_v46 = vld [vmem:[#allocation16_spill] sm:$0xff]  ;;  %v13464_v12 = vld [vmem:[#allocation15_spill] sm:$0xff] }
 0x3fd   :  { %8156 = vtanh.f32 %v5153_v53  ;;  %v5158_v23 = vadd.f32 %v5157_v50, %v4914_v38  ;;  %6770 = vmatpush1.msra.mxu1 %v10905_v51  ;;  %6270 = vmatprep.mubr.f32.mxu1 %v12810_v45  ;;  %v4920_v21 = vpop.f32.mrf.mxu0  ;;  %v13461_v51 = vld [vmem:[#allocation14_spill] sm:$0xff] }
 0x3fe   :  { %6003 = vmatmul.mubr.f32.gmra.mxu0 %v13459_v3  ;;  %v5159_v4 = vpop.f32.mrf.mxu1  ;;  %6772 = vmatprep.subr.mxu1 %v10914_v0  ;;  %v4921_v6 = vadd.f32 %v4920_v21, %v11292_v7  ;;  %v13462_v7 = vld [vmem:[#allocation11_spill] sm:$0xff] }
 0x3ff   :  { %8158 = vtanh.f32 %v5158_v23  ;;  %v5160_v28 = vadd.f32 %v5159_v4, %v4916_v54  ;;  %6008 = vmatprep.mubr.f32.mxu0 %v12810_v45  ;;  %6530 = vmatpush1.msra.mxu0 %v13460_v49  ;;  %v4922_v15 = vpop.f32.mrf.mxu0  ;;  %v13465_v4 = vld [vmem:[#allocation117_spill] sm:$0xff]  ;;  %v13466_v49 = vld [vmem:[#allocation19_spill] sm:$0xff] }
 0x400   :  { %v5164_v35 = vpop.f32.mrf.mxu1  ;;  %6274 = vmatmul.mubr.f32.gmra.mxu1 %v13461_v51  ;;  %v4923_v18 = vadd.f32 %v4922_v15, %v11299_v27  ;;  %v13467_v15 = vld [vmem:[#allocation137_spill] sm:$0xff] }
 0x401   :  { %8160 = vtanh.f32 %v5160_v28  ;;  %v5165_v17 = vadd.f32 %v5164_v35, %v4921_v6  ;;  %6279 = vmatprep.mubr.f32.mxu1 %v12810_v45  ;;  %6774 = vmatpush1.msra.mxu1 %v10923_v52  ;;  %v4927_v0 = vpop.f32.mrf.mxu0 }
 0x402   :  { %6011 = vmatmul.mubr.f32.gmra.mxu0 %v13462_v7  ;;  %v5166_v48 = vpop.f32.mrf.mxu1  ;;  %v4928_v38 = vadd.f32 %v4927_v0, %v11304_v26  ;;  %v13468_v7 = vld [vmem:[#allocation21_spill] sm:$0xff] }
 0x403   :  { %8162 = vtanh.f32 %v5165_v17  ;;  %v5167_v2 = vadd.f32 %v5166_v48, %v4923_v18  ;;  %6016 = vmatprep.mubr.f32.mxu0 %v12810_v45  ;;  %v4929_v53 = vpop.f32.mrf.mxu0 }
 0x404   :  { %v5171_v11 = vpop.f32.mrf.mxu1  ;;  %6283 = vmatmul.mubr.f32.gmra.mxu1 %v13463_v46  ;;  %v8151_v27 = vpop.eup %8150  ;;  %v4930_v50 = vadd.f32 %v4929_v53, %v11309_v10 }
 0x405   :  { %8164 = vtanh.f32 %v5167_v2  ;;  %v5172_v24 = vadd.f32 %v5171_v11, %v4928_v38  ;;  %6288 = vmatprep.mubr.f32.mxu1 %v12810_v45  ;;  %v4934_v52 = vpop.f32.mrf.mxu0  ;;  %v7337_v6 = vmul.f32 %v8151_v27, %v13465_v4 }
 0x406   :  { %6019 = vmatmul.mubr.f32.gmra.mxu0 %v13464_v12  ;;  %v5173_v54 = vpop.f32.mrf.mxu1  ;;  %v8153_v26 = vpop.eup %8152  ;;  %v4935_v23 = vadd.f32 %v4934_v52, %v11314_v39  ;;  %v13470_v52 = vld [vmem:[#allocation138_spill] sm:$0xff] }
 0x407   :  { %8166 = vtanh.f32 %v5172_v24  ;;  %v5174_v21 = vadd.f32 %v5173_v54, %v4930_v50  ;;  %6024 = vmatprep.mubr.f32.mxu0 %v12810_v45  ;;  %v4936_v28 = vpop.f32.mrf.mxu0  ;;  %v7338_v17 = vmul.f32 %v8153_v26, %v13465_v4  ;;  %v13469_v50 = vld [vmem:[#allocation24_spill] sm:$0xff] }
 0x408   :  { %v8155_v3 = vpop.eup %8154  ;;  %v5178_v10 = vpop.f32.mrf.mxu1  ;;  %6292 = vmatmul.mubr.f32.gmra.mxu1 %v13466_v49  ;;  %v4937_v51 = vadd.f32 %v4936_v28, %v11319_v41 }
 0x409   :  { %v7345_v35 = vmul.f32 %v8155_v3, %v13467_v15  ;;  %8168 = vtanh.f32 %v5174_v21  ;;  %v5179_v18 = vadd.f32 %v5178_v10, %v4935_v23  ;;  %6297 = vmatprep.mubr.f32.mxu1 %v12810_v45  ;;  %v4941_v0 = vpop.f32.mrf.mxu0  ;;  %v13471_v21 = vld [vmem:[#allocation25_spill] sm:$0xff] }
 0x40a   :  { %v8157_v39 = vpop.eup %8156  ;;  %6027 = vmatmul.mubr.f32.gmra.mxu0 %v13468_v7  ;;  %v5180_v48 = vpop.f32.mrf.mxu1  ;;  %v4942_v53 = vadd.f32 %v4941_v0, %v11324_v31 }
 0x40b   :  { %v7653_v38 = vadd.f32 %v7345_v35, %v7337_v6  ;;  %v7346_v2 = vmul.f32 %v8157_v39, %v13467_v15  ;;  %8170 = vtanh.f32 %v5179_v18  ;;  %6032 = vmatprep.mubr.f32.mxu0 %v12810_v45  ;;  %v4943_v11 = vpop.f32.mrf.mxu0  ;;  %v5181_v46 = vadd.f32 %v5180_v48, %v4937_v51  ;;  %v13472_v18 = vld [vmem:[#allocation28_spill] sm:$0xff] }
 0x40c   :  { %v8159_v41 = vpop.eup %8158  ;;  %v5185_v27 = vpop.f32.mrf.mxu1  ;;  %6301 = vmatmul.mubr.f32.gmra.mxu1 %v13469_v50  ;;  %v4944_v54 = vadd.f32 %v4943_v11, %v11329_v59  ;;  %v13590_v15 = vld [vmem:[#allocation148_spill] sm:$0xff] }
 0x40d   :  { %v7683_v24 = vadd.f32 %v7346_v2, %v7338_v17  ;;  %v7353_v12 = vmul.f32 %v8159_v41, %v13470_v52  ;;  %v5186_v26 = vadd.f32 %v5185_v27, %v4942_v53  ;;  %6306 = vmatprep.mubr.f32.mxu1 %v12810_v45  ;;  %8172 = vtanh.f32 %v5181_v46  ;;  %v4948_v31 = vpop.f32.mrf.mxu0  ;;  %v13473_v17 = vld [vmem:[#allocation140_spill] sm:$0xff]  ;;  %v13474_v2 = vld [vmem:[#allocation29_spill] sm:$0xff] }
 0x40e   :  { %v8161_v23 = vpop.eup %8160  ;;  %6035 = vmatmul.mubr.f32.gmra.mxu0 %v13471_v21  ;;  %v5187_v3 = vpop.f32.mrf.mxu1  ;;  %v4949_v10 = vadd.f32 %v4948_v31, %v11334_v58 }
 0x40f   :  { %v7654_v6 = vadd.f32 %v7653_v38, %v7353_v12  ;;  %v7354_v28 = vmul.f32 %v8161_v23, %v13470_v52  ;;  %8174 = vtanh.f32 %v5186_v26  ;;  %6040 = vmatprep.mubr.f32.mxu0 %v12810_v45  ;;  %v4950_v35 = vpop.f32.mrf.mxu0  ;;  %v5188_v59 = vadd.f32 %v5187_v3, %v4944_v54  ;;  %v13475_v12 = vld [vmem:[#allocation33_spill] sm:$0xff] }
 0x410   :  { %v8163_v49 = vpop.eup %8162  ;;  %v5192_v51 = vpop.f32.mrf.mxu1  ;;  %6310 = vmatmul.mubr.f32.gmra.mxu1 %v13472_v18  ;;  %v4951_v7 = vadd.f32 %v4950_v35, %v11339_v63  ;;  %v13476_v26 = vld [vmem:[#allocation141_spill] sm:$0xff] }
 0x411   :  { %v7684_v39 = vadd.f32 %v7683_v24, %v7354_v28  ;;  %v7361_v0 = vmul.f32 %v8163_v49, %v13473_v17  ;;  %v5193_v48 = vadd.f32 %v5192_v51, %v4949_v10  ;;  %6315 = vmatprep.mubr.f32.mxu1 %v12810_v45  ;;  %8176 = vtanh.f32 %v5188_v59  ;;  %v4955_v58 = vpop.f32.mrf.mxu0 }
 0x412   :  { %v8165_v38 = vpop.eup %8164  ;;  %6043 = vmatmul.mubr.f32.gmra.mxu0 %v13474_v2  ;;  %v5194_v53 = vpop.f32.mrf.mxu1  ;;  %v4956_v46 = vadd.f32 %v4955_v58, %v11344_v47 }
 0x413   :  { %v7655_v41 = vadd.f32 %v7654_v6, %v7361_v0  ;;  %v7362_v11 = vmul.f32 %v8165_v38, %v13473_v17  ;;  %8178 = vtanh.f32 %v5193_v48  ;;  %6048 = vmatprep.mubr.f32.mxu0 %v12810_v45  ;;  %v4957_v50 = vpop.f32.mrf.mxu0  ;;  %v5195_v63 = vadd.f32 %v5194_v53, %v4951_v7  ;;  %v13477_v6 = vld [vmem:[#allocation34_spill] sm:$0xff]  ;;  %v13588_v17 = vld [vmem:[#allocation145_spill] sm:$0xff] }
 0x414   :  { %v8167_v27 = vpop.eup %8166  ;;  %v5199_v24 = vpop.f32.mrf.mxu1  ;;  %6319 = vmatmul.mubr.f32.gmra.mxu1 %v13475_v12  ;;  %v4958_v31 = vadd.f32 %v4957_v50, %v11349_v30  ;;  %v13479_v7 = vld [vmem:[#allocation142_spill] sm:$0xff]  ;;  %v13481_v12 = vld [vmem:[#allocation41_spill] sm:$0xff] }
 0x415   :  { %v7685_v54 = vadd.f32 %v7684_v39, %v7362_v11  ;;  %v7369_v23 = vmul.f32 %v8167_v27, %v13476_v26  ;;  %v5200_v21 = vadd.f32 %v5199_v24, %v4956_v46  ;;  %6324 = vmatprep.mubr.f32.mxu1 %v12810_v45  ;;  %8180 = vtanh.f32 %v5195_v63  ;;  %v4962_v47 = vpop.f32.mrf.mxu0  ;;  %v13478_v39 = vld [vmem:[#allocation37_spill] sm:$0xff] }
 0x416   :  { %v8169_v3 = vpop.eup %8168  ;;  %6051 = vmatmul.mubr.f32.gmra.mxu0 %v13477_v6  ;;  %v5201_v28 = vpop.f32.mrf.mxu1  ;;  %v4963_v35 = vadd.f32 %v4962_v47, %v11354_v42  ;;  %v13480_v42 = vld [vmem:[#allocation35_spill] sm:$0xff]  ;;  %v13483_v47 = vld [vmem:[#allocation42_spill] sm:$0xff] }
 0x417   :  { %v7656_v10 = vadd.f32 %v7655_v41, %v7369_v23  ;;  %v7370_v49 = vmul.f32 %v8169_v3, %v13476_v26  ;;  %8182 = vtanh.f32 %v5200_v21  ;;  %6056 = vmatprep.mubr.f32.mxu0 %v12810_v45  ;;  %v4964_v51 = vpop.f32.mrf.mxu0  ;;  %v5202_v30 = vadd.f32 %v5201_v28, %v4958_v31 }
 0x418   :  { %v8171_v59 = vpop.eup %8170  ;;  %v5206_v18 = vpop.f32.mrf.mxu1  ;;  %6328 = vmatmul.mubr.f32.gmra.mxu1 %v13478_v39  ;;  %v4965_v38 = vadd.f32 %v4964_v51, %v11359_v29  ;;  %v13485_v39 = vld [vmem:[#allocation146_spill] sm:$0xff] }
 0x419   :  { %v7686_v0 = vadd.f32 %v7685_v54, %v7370_v49  ;;  %v7377_v48 = vmul.f32 %v8171_v59, %v13479_v7  ;;  %v5207_v58 = vadd.f32 %v5206_v18, %v4963_v35  ;;  %6333 = vmatprep.mubr.f32.mxu1 %v12810_v45  ;;  %8184 = vtanh.f32 %v5202_v30  ;;  %v4969_v2 = vpop.f32.mrf.mxu0  ;;  %v13482_v54 = vld [vmem:[#allocation144_spill] sm:$0xff]  ;;  %v13484_v18 = vld [vmem:[#allocation46_spill] sm:$0xff] }
 0x41a   :  { %6059 = vmatmul.mubr.f32.gmra.mxu0 %v13480_v42  ;;  %v5208_v53 = vpop.f32.mrf.mxu1  ;;  %v8173_v41 = vpop.eup %8172  ;;  %v4970_v46 = vadd.f32 %v4969_v2, %v11364_v1  ;;  %v13486_v2 = vld [vmem:[#allocation43_spill] sm:$0xff] }
 0x41b   :  { %v7657_v11 = vadd.f32 %v7656_v10, %v7377_v48  ;;  %8186 = vtanh.f32 %v5207_v58  ;;  %v5209_v27 = vadd.f32 %v5208_v53, %v4965_v38  ;;  %6064 = vmatprep.mubr.f32.mxu0 %v12810_v45  ;;  %v7378_v63 = vmul.f32 %v8173_v41, %v13479_v7  ;;  %v4971_v29 = vpop.f32.mrf.mxu0  ;;  %v13586_v7 = vld [vmem:[#allocation143_spill] sm:$0xff] }
 0x41c   :  { %v8175_v50 = vpop.eup %8174  ;;  %v5213_v24 = vpop.f32.mrf.mxu1  ;;  %6337 = vmatmul.mubr.f32.gmra.mxu1 %v13481_v12  ;;  %v4972_v31 = vadd.f32 %v4971_v29, %v11369_v14  ;;  %v13487_v29 = vld [vmem:[#allocation47_spill] sm:$0xff] }
 0x41d   :  { %v7385_v23 = vmul.f32 %v8175_v50, %v13482_v54  ;;  %8188 = vtanh.f32 %v5209_v27  ;;  %v5214_v21 = vadd.f32 %v5213_v24, %v4970_v46  ;;  %6342 = vmatprep.mubr.f32.mxu1 %v12810_v45  ;;  %v7687_v1 = vadd.f32 %v7686_v0, %v7378_v63  ;;  %v4976_v3 = vpop.f32.mrf.mxu0  ;;  %v13488_v24 = vld [vmem:[#allocation147_spill] sm:$0xff] }
 0x41e   :  { %6067 = vmatmul.mubr.f32.gmra.mxu0 %v13483_v47  ;;  %v5215_v6 = vpop.f32.mrf.mxu1  ;;  %v8177_v28 = vpop.eup %8176  ;;  %v4977_v49 = vadd.f32 %v4976_v3, %v11374_v20 }
 0x41f   :  { %v7658_v10 = vadd.f32 %v7657_v11, %v7385_v23  ;;  %8190 = vtanh.f32 %v5214_v21  ;;  %v5216_v35 = vadd.f32 %v5215_v6, %v4972_v31  ;;  %6072 = vmatprep.mubr.f32.mxu0 %v12810_v45  ;;  %v7386_v14 = vmul.f32 %v8177_v28, %v13482_v54  ;;  %v4978_v51 = vpop.f32.mrf.mxu0 }
 0x420   :  { %v8179_v59 = vpop.eup %8178  ;;  %v5220_v30 = vpop.f32.mrf.mxu1  ;;  %6346 = vmatmul.mubr.f32.gmra.mxu1 %v13484_v18  ;;  %v4979_v48 = vadd.f32 %v4978_v51, %v11379_v55  ;;  %v13491_v51 = vld [vmem:[#allocation149_spill] sm:$0xff] }
 0x421   :  { %v7393_v0 = vmul.f32 %v8179_v59, %v13485_v39  ;;  %8192 = vtanh.f32 %v5216_v35  ;;  %v5221_v38 = vadd.f32 %v5220_v30, %v4977_v49  ;;  %6351 = vmatprep.mubr.f32.mxu1 %v12810_v45  ;;  %v7688_v20 = vadd.f32 %v7687_v1, %v7386_v14  ;;  %v13489_v1 = vld [vmem:[#allocation48_spill] sm:$0xff]  ;;  %v13490_v14 = vld [vmem:[#allocation51_spill] sm:$0xff] }
 0x422   :  { %v4983_v58 = vpop.f32.mrf.mxu0  ;;  %6075 = vmatmul.mubr.f32.gmra.mxu0 %v13486_v2  ;;  %v5222_v42 = vpop.f32.mrf.mxu1 }
 0x423   :  { %v8181_v53 = vpop.eup %8180  ;;  %v7659_v41 = vadd.f32 %v7658_v10, %v7393_v0  ;;  %v4984_v11 = vadd.f32 %v4983_v58, %v11384_v9  ;;  %8194 = vtanh.f32 %v5221_v38  ;;  %v5223_v46 = vadd.f32 %v5222_v42, %v4979_v48  ;;  %6080 = vmatprep.mubr.f32.mxu0 %v12810_v45 }
 0x424   :  { %v8183_v27 = vpop.eup %8182  ;;  %v7394_v55 = vmul.f32 %v8181_v53, %v13485_v39  ;;  %v4985_v50 = vpop.f32.mrf.mxu0  ;;  %6355 = vmatmul.mubr.f32.gmra.mxu1 %v13487_v29  ;;  %v13584_v39 = vld [vmem:[#allocation139_spill] sm:$0xff] }
 0x425   :  { %v5227_v63 = vpop.f32.mrf.mxu1  ;;  %v7401_v12 = vmul.f32 %v8183_v27, %v13488_v24  ;;  %v4986_v23 = vadd.f32 %v4985_v50, %v11389_v13  ;;  %8196 = vtanh.f32 %v5223_v46  ;;  %6360 = vmatprep.mubr.f32.mxu1 %v12810_v45  ;;  %v13493_v27 = vld [vmem:[#allocation57_spill] sm:$0xff]  ;;  %v13494_v50 = vld [vmem:[#allocation150_spill] sm:$0xff] }
 0x426   :  { %v5228_v31 = vadd.f32 %v5227_v63, %v4984_v11  ;;  %v7689_v9 = vadd.f32 %v7688_v20, %v7394_v55  ;;  %v4990_v21 = vpop.f32.mrf.mxu0  ;;  %6083 = vmatmul.mubr.f32.gmra.mxu0 %v13489_v1  ;;  %v8185_v47 = vpop.eup %8184  ;;  %v13492_v20 = vld [vmem:[#allocation53_spill] sm:$0xff] }
 0x427   :  { %v5229_v3 = vpop.f32.mrf.mxu1  ;;  %v7660_v6 = vadd.f32 %v7659_v41, %v7401_v12  ;;  %v4991_v28 = vadd.f32 %v4990_v21, %v11394_v61  ;;  %6088 = vmatprep.mubr.f32.mxu0 %v12810_v45  ;;  %v7402_v13 = vmul.f32 %v8185_v47, %v13488_v24 }
 0x428   :  { %8198 = vtanh.f32 %v5228_v31  ;;  %v5230_v10 = vadd.f32 %v5229_v3, %v4986_v23  ;;  %v8187_v49 = vpop.eup %8186  ;;  %v4992_v35 = vpop.f32.mrf.mxu0  ;;  %6364 = vmatmul.mubr.f32.gmra.mxu1 %v13490_v14  ;;  %v13495_v31 = vld [vmem:[#allocation58_spill] sm:$0xff] }
 0x429   :  { %v5234_v59 = vpop.f32.mrf.mxu1  ;;  %v7409_v30 = vmul.f32 %v8187_v49, %v13491_v51  ;;  %v4993_v18 = vadd.f32 %v4992_v35, %v11399_v43  ;;  %6369 = vmatprep.mubr.f32.mxu1 %v12810_v45  ;;  %v7690_v48 = vadd.f32 %v7689_v9, %v7402_v13  ;;  %v13497_v13 = vld [vmem:[#allocation151_spill] sm:$0xff] }
 0x42a   :  { %8200 = vtanh.f32 %v5230_v10  ;;  %v5235_v0 = vadd.f32 %v5234_v59, %v4991_v28  ;;  %v8189_v61 = vpop.eup %8188  ;;  %v4997_v38 = vpop.f32.mrf.mxu0  ;;  %6091 = vmatmul.mubr.f32.gmra.mxu0 %v13492_v20  ;;  %v13496_v10 = vld [vmem:[#allocation61_spill] sm:$0xff] }
 0x42b   :  { %v5236_v58 = vpop.f32.mrf.mxu1  ;;  %v7661_v2 = vadd.f32 %v7660_v6, %v7409_v30  ;;  %v7410_v42 = vmul.f32 %v8189_v61, %v13491_v51  ;;  %v4998_v53 = vadd.f32 %v4997_v38, %v11404_v37  ;;  %6096 = vmatprep.mubr.f32.mxu0 %v12810_v45  ;;  %v13582_v51 = vld [vmem:[#allocation136_spill] sm:$0xff] }
 0x42c   :  { %8202 = vtanh.f32 %v5235_v0  ;;  %v8191_v41 = vpop.eup %8190  ;;  %v4999_v43 = vpop.f32.mrf.mxu0  ;;  %v5237_v11 = vadd.f32 %v5236_v58, %v4993_v18  ;;  %6373 = vmatmul.mubr.f32.gmra.mxu1 %v13493_v27  ;;  %v13498_v18 = vld [vmem:[#allocation59_spill] sm:$0xff] }
 0x42d   :  { %v5241_v46 = vpop.f32.mrf.mxu1  ;;  %v7691_v55 = vadd.f32 %v7690_v48, %v7410_v42  ;;  %v7417_v63 = vmul.f32 %v8191_v41, %v13494_v50  ;;  %v5000_v29 = vadd.f32 %v4999_v43, %v11409_v33  ;;  %6378 = vmatprep.mubr.f32.mxu1 %v12810_v45  ;;  %v13499_v42 = vld [vmem:[#allocation65_spill] sm:$0xff]  ;;  %v13500_v41 = vld [vmem:[#allocation152_spill] sm:$0xff] }
 0x42e   :  { %v5242_v12 = vadd.f32 %v5241_v46, %v4998_v53  ;;  %v8193_v23 = vpop.eup %8192  ;;  %8204 = vtanh.f32 %v5237_v11  ;;  %v5004_v37 = vpop.f32.mrf.mxu0  ;;  %6099 = vmatmul.mubr.f32.gmra.mxu0 %v13495_v31 }
 0x42f   :  { %v5243_v9 = vpop.f32.mrf.mxu1  ;;  %v7662_v21 = vadd.f32 %v7661_v2, %v7417_v63  ;;  %v7418_v1 = vmul.f32 %v8193_v23, %v13494_v50  ;;  %v5005_v3 = vadd.f32 %v5004_v37, %v11414_v44  ;;  %6104 = vmatprep.mubr.f32.mxu0 %v12810_v45 }
 0x430   :  { %8206 = vtanh.f32 %v5242_v12  ;;  %v8195_v47 = vpop.eup %8194  ;;  %v5006_v6 = vpop.f32.mrf.mxu0  ;;  %v5244_v33 = vadd.f32 %v5243_v9, %v5000_v29  ;;  %6382 = vmatmul.mubr.f32.gmra.mxu1 %v13496_v10 }
 0x431   :  { %v5248_v28 = vpop.f32.mrf.mxu1  ;;  %v7692_v49 = vadd.f32 %v7691_v55, %v7418_v1  ;;  %v7425_v35 = vmul.f32 %v8195_v47, %v13497_v13  ;;  %v5007_v59 = vadd.f32 %v5006_v6, %v11419_v8  ;;  %6387 = vmatprep.mubr.f32.mxu1 %v12810_v45  ;;  %v13501_v55 = vld [vmem:[#allocation66_spill] sm:$0xff]  ;;  %v13504_v6 = vld [vmem:[#allocation17_spill] sm:$0xff] }
 0x432   :  { %v5249_v14 = vadd.f32 %v5248_v28, %v5005_v3  ;;  %v8197_v30 = vpop.eup %8196  ;;  %8208 = vtanh.f32 %v5244_v33  ;;  %v5011_v44 = vpop.f32.mrf.mxu0  ;;  %6107 = vmatmul.mubr.f32.gmra.mxu0 %v13498_v18  ;;  %v13503_v3 = vld [vmem:[#allocation122_spill] sm:$0xff] }
 0x433   :  { %v5250_v0 = vpop.f32.mrf.mxu1  ;;  %v7663_v61 = vadd.f32 %v7662_v21, %v7425_v35  ;;  %v7426_v48 = vmul.f32 %v8197_v30, %v13497_v13  ;;  %v5012_v38 = vadd.f32 %v5011_v44, %v11424_v5  ;;  %6112 = vmatprep.mubr.f32.mxu0 %v12810_v45  ;;  %v13502_v21 = vld [vmem:[#allocation69_spill] sm:$0xff]  ;;  %v13580_v13 = vld [vmem:[#allocation132_spill] sm:$0xff] }
 0x434   :  { %8210 = vtanh.f32 %v5249_v14  ;;  %v5013_v58 = vpop.f32.mrf.mxu0  ;;  %v5251_v8 = vadd.f32 %v5250_v0, %v5007_v59  ;;  %6391 = vmatmul.mubr.f32.gmra.mxu1 %v13499_v42  ;;  %v13506_v14 = vld [vmem:[#allocation20_spill] sm:$0xff] }
 0x435   :  { %v8199_v20 = vpop.eup %8198  ;;  %v5255_v2 = vpop.f32.mrf.mxu1  ;;  %v7693_v53 = vadd.f32 %v7692_v49, %v7426_v48  ;;  %v5014_v11 = vadd.f32 %v5013_v58, %v11429_v62  ;;  %6396 = vmatprep.mubr.f32.mxu1 %v12810_v45 }
 0x436   :  { %v7433_v43 = vmul.f32 %v8199_v20, %v13500_v41  ;;  %v5256_v46 = vadd.f32 %v5255_v2, %v5012_v38  ;;  %8212 = vtanh.f32 %v5251_v8  ;;  %v5018_v5 = vpop.f32.mrf.mxu0  ;;  %6115 = vmatmul.mubr.f32.gmra.mxu0 %v13501_v55  ;;  %v13507_v38 = vld [vmem:[#allocation71_spill] sm:$0xff]  ;;  %v13508_v20 = vld [vmem:[#allocation124_spill] sm:$0xff] }
 0x437   :  { %v8201_v27 = vpop.eup %8200  ;;  %v5257_v63 = vpop.f32.mrf.mxu1  ;;  %v5019_v23 = vadd.f32 %v5018_v5, %v11434_v34  ;;  %6120 = vmatprep.mubr.f32.mxu0 %v12810_v45  ;;  %v13505_v34 = vld [vmem:[#allocation67_spill] sm:$0xff] }
 0x438   :  { %v7664_v29 = vadd.f32 %v7663_v61, %v7433_v43  ;;  %v7434_v12 = vmul.f32 %v8201_v27, %v13500_v41  ;;  %8214 = vtanh.f32 %v5256_v46  ;;  %v5020_v31 = vpop.f32.mrf.mxu0  ;;  %v5258_v62 = vadd.f32 %v5257_v63, %v5014_v11  ;;  %6400 = vmatmul.mubr.f32.gmra.mxu1 %v13502_v21  ;;  %v13509_v8 = vld [vmem:[#allocation23_spill] sm:$0xff]  ;;  %v13510_v11 = vld [vmem:[#allocation73_spill] sm:$0xff] }
 0x439   :  { %v8203_v37 = vpop.eup %8202  ;;  %v5262_v9 = vpop.f32.mrf.mxu1  ;;  %v5021_v33 = vadd.f32 %v5020_v31, %v13504_v6  ;;  %6405 = vmatprep.mubr.f32.mxu1 %v12810_v45  ;;  %v13511_v55 = vld [vmem:[#allocation27_spill] sm:$0xff] }
 0x43a   :  { %v7694_v1 = vadd.f32 %v7693_v53, %v7434_v12  ;;  %v7441_v47 = vmul.f32 %v8203_v37, %v13503_v3  ;;  %v5263_v28 = vadd.f32 %v5262_v9, %v5019_v23  ;;  %8216 = vtanh.f32 %v5258_v62  ;;  %v5025_v10 = vpop.f32.mrf.mxu0  ;;  %6123 = vmatmul.mubr.f32.gmra.mxu0 %v13505_v34  ;;  %v13512_v62 = vld [vmem:[#allocation77_spill] sm:$0xff]  ;;  %v13513_v9 = vld [vmem:[#allocation126_spill] sm:$0xff] }
 0x43b   :  { %v5264_v49 = vpop.f32.mrf.mxu1  ;;  %v8205_v35 = vpop.eup %8204  ;;  %v5026_v30 = vadd.f32 %v5025_v10, %v13506_v14  ;;  %6128 = vmatprep.mubr.f32.mxu0 %v12810_v45  ;;  %v13515_v10 = vld [vmem:[#allocation78_spill] sm:$0xff] }
 0x43c   :  { %v7665_v59 = vadd.f32 %v7664_v29, %v7441_v47  ;;  %8218 = vtanh.f32 %v5263_v28  ;;  %v5265_v44 = vadd.f32 %v5264_v49, %v5021_v33  ;;  %v7442_v0 = vmul.f32 %v8205_v35, %v13503_v3  ;;  %v5027_v61 = vpop.f32.mrf.mxu0  ;;  %6409 = vmatmul.mubr.f32.gmra.mxu1 %v13507_v38  ;;  %v13518_v38 = vld [vmem:[#allocation127_spill] sm:$0xff]  ;;  %v13578_v3 = vld [vmem:[#allocation128_spill] sm:$0xff] }
 0x43d   :  { %v8207_v18 = vpop.eup %8206  ;;  %v5269_v48 = vpop.f32.mrf.mxu1  ;;  %v5028_v2 = vadd.f32 %v5027_v61, %v13509_v8  ;;  %6414 = vmatprep.mubr.f32.mxu1 %v12810_v45  ;;  %v13519_v8 = vld [vmem:[#allocation40_spill] sm:$0xff] }
 0x43e   :  { %v7449_v58 = vmul.f32 %v8207_v18, %v13508_v20  ;;  %8220 = vtanh.f32 %v5265_v44  ;;  %v5270_v42 = vadd.f32 %v5269_v48, %v5026_v30  ;;  %v7695_v53 = vadd.f32 %v7694_v1, %v7442_v0  ;;  %v5032_v43 = vpop.f32.mrf.mxu0  ;;  %6131 = vmatmul.mubr.f32.gmra.mxu0 %v13510_v11  ;;  %v13514_v1 = vld [vmem:[#allocation32_spill] sm:$0xff]  ;;  %v13517_v48 = vld [vmem:[#allocation81_spill] sm:$0xff]  ;;  %v13520_v11 = vld [vmem:[#allocation79_spill] sm:$0xff] }
 0x43f   :  { %v5271_v46 = vpop.f32.mrf.mxu1  ;;  %v8209_v27 = vpop.eup %8208  ;;  %v5033_v63 = vadd.f32 %v5032_v43, %v13511_v55  ;;  %6136 = vmatprep.mubr.f32.mxu0 %v12810_v45 }
 0x440   :  { %v7666_v5 = vadd.f32 %v7665_v59, %v7449_v58  ;;  %8222 = vtanh.f32 %v5270_v42  ;;  %v5272_v29 = vadd.f32 %v5271_v46, %v5028_v2  ;;  %v7450_v23 = vmul.f32 %v8209_v27, %v13508_v20  ;;  %v5034_v37 = vpop.f32.mrf.mxu0  ;;  %6418 = vmatmul.mubr.f32.gmra.mxu1 %v13512_v62  ;;  %v13516_v59 = vld [vmem:[#allocation36_spill] sm:$0xff]  ;;  %v13522_v62 = vld [vmem:[#allocation129_spill] sm:$0xff] }
 0x441   :  { %v8211_v12 = vpop.eup %8210  ;;  %v5276_v31 = vpop.f32.mrf.mxu1  ;;  %v5035_v47 = vadd.f32 %v5034_v37, %v13514_v1  ;;  %6423 = vmatprep.mubr.f32.mxu1 %v12810_v45 }
 0x442   :  { %v7457_v21 = vmul.f32 %v8211_v12, %v13513_v9  ;;  %8224 = vtanh.f32 %v5272_v29  ;;  %v5277_v6 = vadd.f32 %v5276_v31, %v5033_v63  ;;  %v7696_v33 = vadd.f32 %v7695_v53, %v7450_v23  ;;  %v5039_v28 = vpop.f32.mrf.mxu0  ;;  %6139 = vmatmul.mubr.f32.gmra.mxu0 %v13515_v10  ;;  %v13521_v31 = vld [vmem:[#allocation83_spill] sm:$0xff] }
 0x443   :  { %v5278_v34 = vpop.f32.mrf.mxu1  ;;  %v8213_v49 = vpop.eup %8212  ;;  %v5040_v14 = vadd.f32 %v5039_v28, %v13516_v59  ;;  %6144 = vmatprep.mubr.f32.mxu0 %v12810_v45  ;;  %v13523_v28 = vld [vmem:[#allocation85_spill] sm:$0xff] }
 0x444   :  { %v7667_v35 = vadd.f32 %v7666_v5, %v7457_v21  ;;  %8226 = vtanh.f32 %v5277_v6  ;;  %v5279_v30 = vadd.f32 %v5278_v34, %v5035_v47  ;;  %v7458_v18 = vmul.f32 %v8213_v49, %v13513_v9  ;;  %v5041_v0 = vpop.f32.mrf.mxu0  ;;  %6427 = vmatmul.mubr.f32.gmra.mxu1 %v13517_v48  ;;  %v13576_v9 = vld [vmem:[#allocation123_spill] sm:$0xff] }
 0x445   :  { %v8215_v44 = vpop.eup %8214  ;;  %v5283_v61 = vpop.f32.mrf.mxu1  ;;  %v5042_v2 = vadd.f32 %v5041_v0, %v13519_v8  ;;  %6432 = vmatprep.mubr.f32.mxu1 %v12810_v45  ;;  %v13525_v0 = vld [vmem:[#allocation130_spill] sm:$0xff] }
 0x446   :  { %v7465_v58 = vmul.f32 %v8215_v44, %v13518_v38  ;;  %8228 = vtanh.f32 %v5279_v30  ;;  %v5284_v42 = vadd.f32 %v5283_v61, %v5040_v14  ;;  %v7697_v53 = vadd.f32 %v7696_v33, %v7458_v18  ;;  %v5046_v43 = vpop.f32.mrf.mxu0  ;;  %6147 = vmatmul.mubr.f32.gmra.mxu0 %v13520_v11  ;;  %v13524_v44 = vld [vmem:[#allocation89_spill] sm:$0xff] }
 0x447   :  { %v5285_v46 = vpop.f32.mrf.mxu1  ;;  %v8217_v27 = vpop.eup %8216  ;;  %v5047_v55 = vadd.f32 %v5046_v43, %v11474_v16  ;;  %6152 = vmatprep.mubr.f32.mxu0 %v12810_v45 }
 0x448   :  { %v7668_v5 = vadd.f32 %v7667_v35, %v7465_v58  ;;  %8230 = vtanh.f32 %v5284_v42  ;;  %v5286_v63 = vadd.f32 %v5285_v46, %v5042_v2  ;;  %v7466_v12 = vmul.f32 %v8217_v27, %v13518_v38  ;;  %v5048_v23 = vpop.f32.mrf.mxu0  ;;  %6436 = vmatmul.mubr.f32.gmra.mxu1 %v13521_v31  ;;  %v13526_v2 = vld [vmem:[#allocation90_spill] sm:$0xff] }
 0x449   :  { %v8219_v29 = vpop.eup %8218  ;;  %v5290_v37 = vpop.f32.mrf.mxu1  ;;  %v5049_v1 = vadd.f32 %v5048_v23, %v11479_v56  ;;  %6441 = vmatprep.mubr.f32.mxu1 %v12810_v45 }
 0x44a   :  { %v7473_v21 = vmul.f32 %v8219_v29, %v13522_v62  ;;  %8232 = vtanh.f32 %v5286_v63  ;;  %v5291_v47 = vadd.f32 %v5290_v37, %v5047_v55  ;;  %v7698_v6 = vadd.f32 %v7697_v53, %v7466_v12  ;;  %v5053_v33 = vpop.f32.mrf.mxu0  ;;  %6155 = vmatmul.mubr.f32.gmra.mxu0 %v13523_v28  ;;  %v13527_v55 = vld [vmem:[#allocation93_spill] sm:$0xff]  ;;  %v13528_v29 = vld [vmem:[#allocation131_spill] sm:$0xff] }
 0x44b   :  { %v8221_v16 = vpop.eup %8220  ;;  %v5292_v10 = vpop.f32.mrf.mxu1  ;;  %v5054_v35 = vadd.f32 %v5053_v33, %v11484_v19  ;;  %6160 = vmatprep.mubr.f32.mxu0 %v12810_v45 }
 0x44c   :  { %v7669_v34 = vadd.f32 %v7668_v5, %v7473_v21  ;;  %v7474_v49 = vmul.f32 %v8221_v16, %v13522_v62  ;;  %8234 = vtanh.f32 %v5291_v47  ;;  %v5055_v56 = vpop.f32.mrf.mxu0  ;;  %v5293_v14 = vadd.f32 %v5292_v10, %v5049_v1  ;;  %6445 = vmatmul.mubr.f32.gmra.mxu1 %v13524_v44  ;;  %v13529_v21 = vld [vmem:[#allocation94_spill] sm:$0xff]  ;;  %v13532_v44 = vld [vmem:[#allocation95_spill] sm:$0xff] }
 0x44d   :  { %v8223_v59 = vpop.eup %8222  ;;  %v5297_v30 = vpop.f32.mrf.mxu1  ;;  %v5056_v48 = vadd.f32 %v5055_v56, %v11489_v60  ;;  %6450 = vmatprep.mubr.f32.mxu1 %v12810_v45 }
 0x44e   :  { %v7699_v18 = vadd.f32 %v7698_v6, %v7474_v49  ;;  %v7481_v61 = vmul.f32 %v8223_v59, %v13525_v0  ;;  %v5298_v58 = vadd.f32 %v5297_v30, %v5054_v35  ;;  %8236 = vtanh.f32 %v5293_v14  ;;  %v5060_v19 = vpop.f32.mrf.mxu0  ;;  %6163 = vmatmul.mubr.f32.gmra.mxu0 %v13526_v2  ;;  %v13531_v35 = vld [vmem:[#allocation133_spill] sm:$0xff] }
 0x44f   :  { %v8225_v8 = vpop.eup %8224  ;;  %v5299_v42 = vpop.f32.mrf.mxu1  ;;  %v5061_v11 = vadd.f32 %v5060_v19, %v11494_v32  ;;  %6168 = vmatprep.mubr.f32.mxu0 %v12810_v45 }
 0x450   :  { %v7670_v53 = vadd.f32 %v7669_v34, %v7481_v61  ;;  %v7482_v43 = vmul.f32 %v8225_v8, %v13525_v0  ;;  %8238 = vtanh.f32 %v5298_v58  ;;  %v5062_v27 = vpop.f32.mrf.mxu0  ;;  %v5300_v60 = vadd.f32 %v5299_v42, %v5056_v48  ;;  %6454 = vmatmul.mubr.f32.gmra.mxu1 %v13527_v55  ;;  %v13530_v34 = vld [vmem:[#allocation97_spill] sm:$0xff]  ;;  %v13536_v55 = vld [vmem:[#allocation100_spill] sm:$0xff] }
 0x451   :  { %v8227_v46 = vpop.eup %8226  ;;  %v5304_v5 = vpop.f32.mrf.mxu1  ;;  %v5063_v23 = vadd.f32 %v5062_v27, %v11499_v40  ;;  %6459 = vmatprep.mubr.f32.mxu1 %v12810_v45  ;;  %v13533_v58 = vld [vmem:[#allocation105_spill] sm:$0xff] }
 0x452   :  { %v7700_v63 = vadd.f32 %v7699_v18, %v7482_v43  ;;  %v7489_v12 = vmul.f32 %v8227_v46, %v13528_v29  ;;  %v5305_v37 = vadd.f32 %v5304_v5, %v5061_v11  ;;  %8240 = vtanh.f32 %v5300_v60  ;;  %v5067_v32 = vpop.f32.mrf.mxu0  ;;  %6171 = vmatmul.mubr.f32.gmra.mxu0 %v13529_v21  ;;  %v13535_v11 = vld [vmem:[#allocation134_spill] sm:$0xff] }
 0x453   :  { %v8229_v31 = vpop.eup %8228  ;;  %v5306_v1 = vpop.f32.mrf.mxu1  ;;  %v5068_v6 = vadd.f32 %v5067_v32, %v11504_v36  ;;  %6176 = vmatprep.mubr.f32.mxu0 %v12810_v45 }
 0x454   :  { %v7671_v47 = vadd.f32 %v7670_v53, %v7489_v12  ;;  %v7490_v16 = vmul.f32 %v8229_v31, %v13528_v29  ;;  %8242 = vtanh.f32 %v5305_v37  ;;  %v5069_v28 = vpop.f32.mrf.mxu0  ;;  %v5307_v40 = vadd.f32 %v5306_v1, %v5063_v23  ;;  %6463 = vmatmul.mubr.f32.gmra.mxu1 %v13530_v34  ;;  %v13534_v53 = vld [vmem:[#allocation99_spill] sm:$0xff]  ;;  %v13537_v37 = vld [vmem:[#allocation106_spill] sm:$0xff] }
 0x455   :  { %v8231_v33 = vpop.eup %8230  ;;  %v5311_v10 = vpop.f32.mrf.mxu1  ;;  %v5070_v56 = vadd.f32 %v5069_v28, %v11509_v57  ;;  %6468 = vmatprep.mubr.f32.mxu1 %v12810_v45 }
 0x456   :  { %v7701_v49 = vadd.f32 %v7700_v63, %v7490_v16  ;;  %v7497_v59 = vmul.f32 %v8231_v33, %v13531_v35  ;;  %v5312_v14 = vadd.f32 %v5311_v10, %v5068_v6  ;;  %8244 = vtanh.f32 %v5307_v40  ;;  %v5391_v36 = vpop.f32.mrf.mxu0  ;;  %6179 = vmatmul.mubr.f32.gmra.mxu0 %v13532_v44  ;;  %v13538_v6 = vld [vmem:[#allocation102_spill] sm:$0xff]  ;;  %v13539_v33 = vld [vmem:[#allocation135_spill] sm:$0xff] }
 0x457   :  { %v8233_v30 = vpop.eup %8232  ;;  %v5313_v18 = vpop.f32.mrf.mxu1  ;;  %v5392_v8 = vadd.f32 %v5391_v36, %v13533_v58  ;;  %6184 = vmatprep.mubr.f32.mxu0 %v12810_v45  ;;  %v13541_v36 = vld [vmem:[#allocation107_spill] sm:$0xff] }
 0x458   :  { %v7672_v61 = vadd.f32 %v7671_v47, %v7497_v59  ;;  %v7498_v48 = vmul.f32 %v8233_v30, %v13531_v35  ;;  %8246 = vtanh.f32 %v5312_v14  ;;  %v5314_v2 = vadd.f32 %v5313_v18, %v5070_v56  ;;  %v5393_v57 = vpop.f32.mrf.mxu0  ;;  %6472 = vmatmul.mubr.f32.gmra.mxu1 %v13534_v53  ;;  %v13540_v59 = vld [vmem:[#allocation6_spill] sm:$0xff] }
 0x459   :  { %v8235_v19 = vpop.eup %8234  ;;  %v5747_v42 = vpop.f32.mrf.mxu1  ;;  %v5394_v27 = vadd.f32 %v5393_v57, %v13533_v58  ;;  %6477 = vmatprep.mubr.f32.mxu1 %v12810_v45 }
 0x45a   :  { %v7702_v43 = vadd.f32 %v7701_v49, %v7498_v48  ;;  %v7505_v46 = vmul.f32 %v8235_v19, %v13535_v11  ;;  %v11716_v60 = vadd.f32 %v5747_v42, %v5392_v8  ;;  %8248 = vtanh.f32 %v5314_v2  ;;  %v5402_v5 = vpop.f32.mrf.mxu0  ;;  %6187 = vmatmul.mubr.f32.gmra.mxu0 %v13536_v55  ;;  %v13542_v19 = vld [vmem:[#allocation153_spill] sm:$0xff] }
 0x45b   :  { %v5749_v63 = vpop.f32.mrf.mxu1  ;;  %v8237_v12 = vpop.eup %8236  ;;  %v5403_v31 = vadd.f32 %v5402_v5, %v13537_v37  ;;  %6563 = vmatprep.mubr.f32.mxu0 %v12810_v45 }
 0x45c   :  { %v7673_v23 = vadd.f32 %v7672_v61, %v7505_v46  ;;  %v11721_v32 = vadd.f32 %v5749_v63, %v5394_v27  ;;  %v7506_v1 = vmul.f32 %v8237_v12, %v13535_v11  ;;  %v5404_v47 = vpop.f32.mrf.mxu0  ;;  %6481 = vmatmul.mubr.f32.gmra.mxu1 %v13538_v6  ;;  %v13543_v46 = vld [vmem:[#allocation7_spill] sm:$0xff]  ;;  %v13544_v63 = vld [vmem:[#allocation108_spill] sm:$0xff] }
 0x45d   :  { %v8239_v21 = vpop.eup %8238  ;;  %v5754_v16 = vpop.f32.mrf.mxu1  ;;  %v5405_v40 = vadd.f32 %v5404_v47, %v13537_v37  ;;  %6807 = vmatprep.mubr.f32.mxu1 %v12810_v45  ;;  %v13545_v47 = vld [vmem:[#allocation154_spill] sm:$0xff] }
 0x45e   :  { %v7513_v28 = vmul.f32 %v8239_v21, %v13539_v33  ;;  %v11728_v10 = vadd.f32 %v5754_v16, %v5403_v31  ;;  %v7703_v34 = vadd.f32 %v7702_v43, %v7506_v1  ;;  %v5413_v49 = vpop.f32.mrf.mxu0  ;;  %6565 = vmatmul.mubr.f32.vlgmr.msra.gmra.mxu0 %v13540_v59 }
 0x45f   :  { %v5756_v56 = vpop.f32.mrf.mxu1  ;;  %v8241_v14 = vpop.eup %8240  ;;  %v5414_v44 = vadd.f32 %v5413_v49, %v13541_v36  ;;  %6570 = vmatprep.mubr.f32.mxu0 %v12810_v45  ;;  %v13546_v49 = vld [vmem:[#allocation8_spill] sm:$0xff] }
 0x460   :  { %v7674_v30 = vadd.f32 %v7673_v23, %v7513_v28  ;;  %v11733_v18 = vadd.f32 %v5756_v56, %v5405_v40  ;;  %v7514_v48 = vmul.f32 %v8241_v14, %v13539_v33  ;;  %v5415_v58 = vpop.f32.mrf.mxu0  ;;  %6809 = vmatmul.mubr.f32.vlgmr.msra.gmra.mxu1 %v13540_v59 }
 0x461   :  { %v8243_v61 = vpop.eup %8242  ;;  %v5761_v8 = vpop.f32.mrf.mxu1  ;;  %v5416_v57 = vadd.f32 %v5415_v58, %v13541_v36  ;;  %6814 = vmatprep.mubr.f32.mxu1 %v12810_v45 }
 0x462   :  { %v7521_v2 = vmul.f32 %v8243_v61, %v13542_v19  ;;  %v11740_v42 = vadd.f32 %v5761_v8, %v5414_v44  ;;  %v7704_v53 = vadd.f32 %v7703_v34, %v7514_v48  ;;  %v5424_v43 = vpop.f32.mrf.mxu0  ;;  %6572 = vmatmul.mubr.f32.gmra.mxu0 %v13543_v46 }
 0x463   :  { %v5763_v27 = vpop.f32.mrf.mxu1  ;;  %v8245_v5 = vpop.eup %8244  ;;  %v5425_v12 = vadd.f32 %v5424_v43, %v13544_v63  ;;  %6577 = vmatprep.mubr.f32.mxu0 %v12810_v45 }
 0x464   :  { %v7675_v55 = vadd.f32 %v7674_v30, %v7521_v2  ;;  %v11745_v23 = vadd.f32 %v5763_v27, %v5416_v57  ;;  %v7522_v31 = vmul.f32 %v8245_v5, %v13542_v19  ;;  %v5426_v21 = vpop.f32.mrf.mxu0  ;;  %6816 = vmatmul.mubr.f32.gmra.mxu1 %v13543_v46  ;;  %v13547_v30 = vld [vmem:[#allocation110_spill] sm:$0xff]  ;;  %v13548_v46 = vld [vmem:[#allocation12_spill] sm:$0xff] }
 0x465   :  { %v8247_v37 = vpop.eup %8246  ;;  %v5768_v1 = vpop.f32.mrf.mxu1  ;;  %v5427_v6 = vadd.f32 %v5426_v21, %v13544_v63  ;;  %6821 = vmatprep.mubr.f32.mxu1 %v12810_v45  ;;  %v13564_v19 = vld [vmem:[#allocation120_spill] sm:$0xff] }
 0x466   :  { %v7529_v16 = vmul.f32 %v8247_v37, %v13545_v47  ;;  %v11752_v28 = vadd.f32 %v5768_v1, %v5425_v12  ;;  %v7705_v40 = vadd.f32 %v7704_v53, %v7522_v31  ;;  %v5435_v34 = vpop.f32.mrf.mxu0  ;;  %6579 = vmatmul.mubr.f32.gmra.mxu0 %v13546_v49 }
 0x467   :  { %v5770_v59 = vpop.f32.mrf.mxu1  ;;  %v8249_v56 = vpop.eup %8248  ;;  %v5436_v36 = vadd.f32 %v5435_v34, %v13547_v30  ;;  %6584 = vmatprep.mubr.f32.mxu0 %v12810_v45 }
 0x468   :  { %v7676_v14 = vadd.f32 %v7675_v55, %v7529_v16  ;;  %v11757_v44 = vadd.f32 %v5770_v59, %v5427_v6  ;;  %v7530_v61 = vmul.f32 %v8249_v56, %v13545_v47  ;;  %v5437_v48 = vpop.f32.mrf.mxu0  ;;  %6823 = vmatmul.mubr.f32.gmra.mxu1 %v13546_v49  ;;  %v13549_v55 = vld [vmem:[#allocation109_spill] sm:$0xff]  ;;  %v13550_v49 = vld [vmem:[#allocation18_spill] sm:$0xff] }
 0x469   :  { %v5775_v58 = vpop.f32.mrf.mxu1  ;;  %v5438_v2 = vadd.f32 %v5437_v48, %v13547_v30  ;;  %6828 = vmatprep.mubr.f32.mxu1 %v12810_v45 }
 0x46a   :  { %v7677_v8 = vrot.slane %v7676_v14, 4  ;;  %v11763_v57 = vadd.f32 %v5775_v58, %v5436_v36  ;;  %v7706_v53 = vadd.f32 %v7705_v40, %v7530_v61  ;;  %v5446_v43 = vpop.f32.mrf.mxu0  ;;  %6586 = vmatmul.mubr.f32.gmra.mxu0 %v13548_v46 }
 0x46b   :  { %v5777_v27 = vpop.f32.mrf.mxu1  ;;  %v5447_v63 = vadd.f32 %v5446_v43, %v13549_v55  ;;  %6591 = vmatprep.mubr.f32.mxu0 %v12810_v45 }
 0x46c   :  { %v7678_v5 = vadd.f32 %v7677_v8, %v7676_v14  ;;  %v11768_v12 = vadd.f32 %v5777_v27, %v5438_v2  ;;  %v7707_v37 = vrot.slane %v7706_v53, 4  ;;  %v5448_v31 = vpop.f32.mrf.mxu0  ;;  %6830 = vmatmul.mubr.f32.gmra.mxu1 %v13548_v46  ;;  %v13551_v14 = vld [vmem:[#allocation113_spill] sm:$0xff]  ;;  %v13552_v27 = vld [vmem:[#allocation22_spill] sm:$0xff] }
 0x46d   :  { %v5782_v21 = vpop.f32.mrf.mxu1  ;;  %v5449_v16 = vadd.f32 %v5448_v31, %v13549_v55  ;;  %6835 = vmatprep.mubr.f32.mxu1 %v12810_v45 }
 0x46e   :  { %v7679_v1 = vrot.slane %v7678_v5, 2  ;;  %v11773_v6 = vadd.f32 %v5782_v21, %v5447_v63  ;;  %v7708_v40 = vadd.f32 %v7707_v37, %v7706_v53  ;;  %v5457_v34 = vpop.f32.mrf.mxu0  ;;  %6593 = vmatmul.mubr.f32.gmra.mxu0 %v13550_v49  ;;  %v13553_v63 = vld [vmem:[#allocation111_spill] sm:$0xff] }
 0x46f   :  { %v5784_v59 = vpop.f32.mrf.mxu1  ;;  %v5458_v30 = vadd.f32 %v5457_v34, %v13551_v14  ;;  %6598 = vmatprep.mubr.f32.mxu0 %v12810_v45  ;;  %v13554_v34 = vld [vmem:[#allocation156_spill] sm:$0xff] }
 0x470   :  { %v7680_v56 = vadd.f32 %v7679_v1, %v7678_v5  ;;  %v11778_v36 = vadd.f32 %v5784_v59, %v5449_v16  ;;  %v7709_v61 = vrot.slane %v7708_v40, 2  ;;  %v5459_v48 = vpop.f32.mrf.mxu0  ;;  %6837 = vmatmul.mubr.f32.gmra.mxu1 %v13550_v49 }
 0x471   :  { %v5789_v58 = vpop.f32.mrf.mxu1  ;;  %v5460_v2 = vadd.f32 %v5459_v48, %v13551_v14  ;;  %6842 = vmatprep.mubr.f32.mxu1 %v12810_v45 }
 0x472   :  { %v7681_v8 = vrot.slane %v7680_v56, 1  ;;  %v11783_v53 = vadd.f32 %v5789_v58, %v5458_v30  ;;  %v7710_v43 = vadd.f32 %v7709_v61, %v7708_v40  ;;  %v5468_v46 = vpop.f32.mrf.mxu0  ;;  %6600 = vmatmul.mubr.f32.gmra.mxu0 %v13552_v27  ;;  %v13555_v30 = vld [vmem:[#allocation26_spill] sm:$0xff]  ;;  %v13556_v58 = vld [vmem:[#allocation116_spill] sm:$0xff] }
 0x473   :  { %v5791_v5 = vpop.f32.mrf.mxu1  ;;  %v5469_v37 = vadd.f32 %v5468_v46, %v13553_v63  ;;  %6605 = vmatprep.mubr.f32.mxu0 %v12810_v45 }
 0x474   :  { %v7682_v55 = vadd.f32 %v7681_v8, %v7680_v56  ;;  %v11788_v31 = vadd.f32 %v5791_v5, %v5460_v2  ;;  %v7711_v21 = vrot.slane %v7710_v43, 1  ;;  %v5470_v1 = vpop.f32.mrf.mxu0  ;;  %6844 = vmatmul.mubr.f32.gmra.mxu1 %v13552_v27 }
 0x475   :  { %v5796_v16 = vpop.f32.mrf.mxu1  ;;  %v5471_v40 = vadd.f32 %v5470_v1, %v13553_v63  ;;  %6849 = vmatprep.mubr.f32.mxu1 %v12810_v45  ;;  %v13557_v1 = vld [vmem:[#allocation30_spill] sm:$0xff] }
 0x476   :  { %v7787_v49 = vadd.f32 %v13554_v34, %v7682_v55  ;;  %v11794_v59 = vadd.f32 %v5796_v16, %v5469_v37  ;;  %v7712_v56 = vadd.f32 %v7711_v21, %v7710_v43  ;;  %v5479_v14 = vpop.f32.mrf.mxu0  ;;  %6607 = vmatmul.mubr.f32.gmra.mxu0 %v13555_v30 }
 0x477   :  { %v5798_v61 = vpop.f32.mrf.mxu1  ;;  %v5480_v8 = vadd.f32 %v5479_v14, %v13556_v58  ;;  %6612 = vmatprep.mubr.f32.mxu0 %v12810_v45 }
 0x478   :  { %v7795_v48 = vmul.f32 %v7787_v49, %v7787_v49  ;;  %v11799_v2 = vadd.f32 %v5798_v61, %v5471_v40  ;;  %v7788_v46 = vadd.f32 %v13554_v34, %v7712_v56  ;;  %v5481_v27 = vpop.f32.mrf.mxu0  ;;  %6851 = vmatmul.mubr.f32.gmra.mxu1 %v13555_v30  ;;  %v13558_v49 = vld [vmem:[#allocation112_spill] sm:$0xff]  ;;  %v13562_v34 = vld [vmem:[#allocation114_spill] sm:$0xff] }
 0x479   :  { %v5803_v5 = vpop.f32.mrf.mxu1  ;;  %v5482_v43 = vadd.f32 %v5481_v27, %v13556_v58  ;;  %6856 = vmatprep.mubr.f32.mxu1 %v12810_v45 }
 0x47a   :  { %v11804_v55 = vadd.f32 0.1, %v7795_v48  ;;  %v11807_v63 = vadd.f32 %v5803_v5, %v5480_v8  ;;  %v7796_v37 = vmul.f32 %v7788_v46, %v7788_v46  ;;  %v5490_v21 = vpop.f32.mrf.mxu0  ;;  %6614 = vmatmul.mubr.f32.gmra.mxu0 %v13557_v1  ;;  %v13559_v46 = vld [vmem:[#allocation31_spill] sm:$0xff]  ;;  %v13560_v5 = vld [vmem:[#allocation118_spill] sm:$0xff] }
 0x47b   :  { %v5805_v16 = vpop.f32.mrf.mxu1  ;;  %v5491_v40 = vadd.f32 %v5490_v21, %v13558_v49  ;;  %6619 = vmatprep.mubr.f32.mxu0 %v12810_v45 }
 0x47c   :  { %v11812_v56 = vadd.f32 %v5805_v16, %v5482_v43  ;;  %8250 = vrsqrt.f32 %v11804_v55  ;;  %v11816_v14 = vadd.f32 0.1, %v7796_v37  ;;  %v5492_v30 = vpop.f32.mrf.mxu0  ;;  %6858 = vmatmul.mubr.f32.gmra.mxu1 %v13557_v1  ;;  %vm7837_vm10 = vcmp.eq.f32.partialorder %v11804_v55, inf }
 0x47d   :  { %v5810_v61 = vpop.f32.mrf.mxu1  ;;  %v5493_v48 = vadd.f32 %v5492_v30, %v13558_v49  ;;  %6863 = vmatprep.mubr.f32.mxu1 %v12810_v45  ;;  %v13561_v30 = vld [vmem:[#allocation38_spill] sm:$0xff]  ;;  %vm7839_vm12 = vcmp.eq.f32.partialorder %v11804_v55, 0.0 }
 0x47e   :  { %v11820_v58 = vadd.f32 %v5810_v61, %v5491_v40  ;;  %v5501_v8 = vpop.f32.mrf.mxu0  ;;  %6621 = vmatmul.mubr.f32.gmra.mxu0 %v13559_v46  ;;  %8252 = vrsqrt.f32 %v11816_v14  ;;  %vm7844_vm11 = vcmp.eq.f32.partialorder %v11816_v14, inf  ;;  %vm7846_vm13 = vcmp.eq.f32.partialorder %v11816_v14, 0.0 }
 0x47f   :  { %v5812_v27 = vpop.f32.mrf.mxu1  ;;  %v5502_v43 = vadd.f32 %v5501_v8, %v13560_v5  ;;  %6626 = vmatprep.mubr.f32.mxu0 %v12810_v45 }
 0x480   :  { %v11826_v37 = vadd.f32 %v5812_v27, %v5493_v48  ;;  %v5503_v21 = vpop.f32.mrf.mxu0  ;;  %6865 = vmatmul.mubr.f32.gmra.mxu1 %v13559_v46 }
 0x481   :  { %v5817_v1 = vpop.f32.mrf.mxu1  ;;  %v5504_v16 = vadd.f32 %v5503_v21, %v13560_v5  ;;  %6870 = vmatprep.mubr.f32.mxu1 %v12810_v45  ;;  %v13563_v21 = vld [vmem:[#allocation39_spill] sm:$0xff] }
 0x482   :  { %v11831_v49 = vadd.f32 %v5817_v1, %v5502_v43  ;;  %v5512_v40 = vpop.f32.mrf.mxu0  ;;  %6628 = vmatmul.mubr.f32.gmra.mxu0 %v13561_v30 }
 0x483   :  { %v5819_v61 = vpop.f32.mrf.mxu1  ;;  %v5513_v8 = vadd.f32 %v5512_v40, %v13562_v34  ;;  %6633 = vmatprep.mubr.f32.mxu0 %v12810_v45 }
 0x484   :  { %v11836_v48 = vadd.f32 %v5819_v61, %v5504_v16  ;;  %v5514_v27 = vpop.f32.mrf.mxu0  ;;  %6872 = vmatmul.mubr.f32.gmra.mxu1 %v13561_v30 }
 0x485   :  { %v5824_v47 = vpop.f32.mrf.mxu1  ;;  %v5515_v46 = vadd.f32 %v5514_v27, %v13562_v34  ;;  %6877 = vmatprep.mubr.f32.mxu1 %v12810_v45  ;;  %v13565_v27 = vld [vmem:[#allocation44_spill] sm:$0xff] }
 0x486   :  { %v11841_v5 = vadd.f32 %v5824_v47, %v5513_v8  ;;  %v5523_v43 = vpop.f32.mrf.mxu0  ;;  %6635 = vmatmul.mubr.f32.gmra.mxu0 %v13563_v21 }
 0x487   :  { %v5826_v1 = vpop.f32.mrf.mxu1  ;;  %v5524_v40 = vadd.f32 %v5523_v43, %v13564_v19  ;;  %6640 = vmatprep.mubr.f32.mxu0 %v12810_v45 }
 0x488   :  { %v11846_v16 = vadd.f32 %v5826_v1, %v5515_v46  ;;  %v5525_v33 = vpop.f32.mrf.mxu0  ;;  %6879 = vmatmul.mubr.f32.gmra.mxu1 %v13563_v21  ;;  %v13566_v1 = vld [vmem:[#allocation115_spill] sm:$0xff]  ;;  %v7840_v21 = vand.u32 2147483648, %v11804_v55 }
 0x489   :  { %v8251_v61 = vpop.eup %8250  ;;  %v5831_v11 = vpop.f32.mrf.mxu1  ;;  %v5526_v47 = vadd.f32 %v5525_v33, %v13564_v19  ;;  %6884 = vmatprep.mubr.f32.mxu1 %v12810_v45 }
 0x48a   :  { %v11851_v34 = vadd.f32 %v5831_v11, %v5524_v40  ;;  %v7836_v30 = vmul.f32 %v8251_v61, %v11804_v55  ;;  %v5534_v8 = vpop.f32.mrf.mxu0  ;;  %6642 = vmatmul.mubr.f32.gmra.mxu0 %v13565_v27 }
 0x48b   :  { %v5833_v46 = vpop.f32.mrf.mxu1  ;;  %v8253_v43 = vpop.eup %8252  ;;  %v5535_v35 = vadd.f32 %v5534_v8, %v13566_v1  ;;  %6647 = vmatprep.mubr.f32.mxu0 %v12810_v45 }
 0x48c   :  { %v11857_v29 = vadd.f32 %v5833_v46, %v5526_v47  ;;  %v5536_v33 = vpop.f32.mrf.mxu0  ;;  %6886 = vmatmul.mubr.f32.gmra.mxu1 %v13565_v27  ;;  %v7838_v19 = vsel %vm7837_vm10, %v11804_v55, %v7836_v30  ;;  %v7843_v40 = vmul.f32 %v8253_v43, %v11816_v14  ;;  %v7847_v47 = vand.u32 2147483648, %v11816_v14  ;;  %v13567_v46 = vld [vmem:[#allocation50_spill] sm:$0xff]  ;;  %v13568_v43 = vld [vmem:[#allocation125_spill] sm:$0xff] }
 0x48d   :  { %v5838_v11 = vpop.f32.mrf.mxu1  ;;  %v5537_v61 = vadd.f32 %v5536_v33, %v13566_v1  ;;  %6891 = vmatprep.mubr.f32.mxu1 %v12810_v45  ;;  %v11879_v33 = vsel %vm7839_vm12, %v7840_v21, %v7838_v19  ;;  %v13572_v21 = vld [vmem:[#allocation119_spill] sm:$0xff] }
 0x48e   :  { %v11866_v0 = vadd.f32 %v5838_v11, %v5535_v35  ;;  %v5545_v8 = vpop.f32.mrf.mxu0  ;;  %6649 = vmatmul.mubr.f32.gmra.mxu0 %v13567_v46  ;;  %v7845_v30 = vsel %vm7844_vm11, %v11816_v14, %v7843_v40  ;;  %13569 = vst [vmem:[#allocation45_spill] sm:$0xff] %v11879_v33 }
 0x48f   :  { %v5840_v27 = vpop.f32.mrf.mxu1  ;;  %v5546_v1 = vadd.f32 %v5545_v8, %v13568_v43  ;;  %6654 = vmatprep.mubr.f32.mxu0 %v12810_v45  ;;  %v11881_v11 = vsel %vm7846_vm13, %v7847_v47, %v7845_v30  ;;  %v13571_v8 = vld [vmem:[#allocation54_spill] sm:$0xff] }
 0x490   :  { %v11876_v35 = vadd.f32 %v5840_v27, %v5537_v61  ;;  %13570 = vst [vmem:[#allocation49_spill] sm:$0xff] %v11881_v11  ;;  %v5547_v62 = vpop.f32.mrf.mxu0  ;;  %6893 = vmatmul.mubr.f32.gmra.mxu1 %v13567_v46  ;;  %v13574_v11 = vld [vmem:[#allocation121_spill] sm:$0xff] }
 0x491   :  { %v5845_v38 = vpop.f32.mrf.mxu1  ;;  %v5548_v40 = vadd.f32 %v5547_v62, %v13568_v43  ;;  %6898 = vmatprep.mubr.f32.mxu1 %v12810_v45 }
 0x492   :  { %v11887_v14 = vadd.f32 %v5845_v38, %v5546_v1  ;;  %v5556_v61 = vpop.f32.mrf.mxu0  ;;  %6656 = vmatmul.mubr.f32.gmra.mxu0 %v13571_v8  ;;  %v13573_v1 = vld [vmem:[#allocation55_spill] sm:$0xff] }
 0x493   :  { %v5847_v19 = vpop.f32.mrf.mxu1  ;;  %v5557_v47 = vadd.f32 %v5556_v61, %v13572_v21  ;;  %6661 = vmatprep.mubr.f32.mxu0 %v12810_v45 }
 0x494   :  { %v11892_v27 = vadd.f32 %v5847_v19, %v5548_v40  ;;  %v5558_v46 = vpop.f32.mrf.mxu0  ;;  %6900 = vmatmul.mubr.f32.gmra.mxu1 %v13571_v8 }
 0x495   :  { %v5852_v30 = vpop.f32.mrf.mxu1  ;;  %v5559_v62 = vadd.f32 %v5558_v46, %v13572_v21  ;;  %6905 = vmatprep.mubr.f32.mxu1 %v12810_v45  ;;  %v13575_v46 = vld [vmem:[#allocation62_spill] sm:$0xff] }
 0x496   :  { %v11897_v38 = vadd.f32 %v5852_v30, %v5557_v47  ;;  %v5567_v43 = vpop.f32.mrf.mxu0  ;;  %6663 = vmatmul.mubr.f32.gmra.mxu0 %v13573_v1 }
 0x497   :  { %v5854_v55 = vpop.f32.mrf.mxu1  ;;  %v5568_v61 = vadd.f32 %v5567_v43, %v13574_v11  ;;  %6668 = vmatprep.mubr.f32.mxu0 %v12810_v45 }
 0x498   :  { %v11902_v40 = vadd.f32 %v5854_v55, %v5559_v62  ;;  %v5569_v19 = vpop.f32.mrf.mxu0  ;;  %6907 = vmatmul.mubr.f32.gmra.mxu1 %v13573_v1 }
 0x499   :  { %v5859_v33 = vpop.f32.mrf.mxu1  ;;  %v5570_v8 = vadd.f32 %v5569_v19, %v13574_v11  ;;  %6912 = vmatprep.mubr.f32.mxu1 %v12810_v45 }
 0x49a   :  { %v11907_v21 = vadd.f32 %v5859_v33, %v5568_v61  ;;  %v5578_v47 = vpop.f32.mrf.mxu0  ;;  %6670 = vmatmul.mubr.f32.gmra.mxu0 %v13575_v46  ;;  %v13577_v61 = vld [vmem:[#allocation63_spill] sm:$0xff] }
 0x49b   :  { %v5861_v30 = vpop.f32.mrf.mxu1  ;;  %v5579_v43 = vadd.f32 %v5578_v47, %v13576_v9  ;;  %6675 = vmatprep.mubr.f32.mxu0 %v12810_v45 }
 0x49c   :  { %v11912_v55 = vadd.f32 %v5861_v30, %v5570_v8  ;;  %v5580_v62 = vpop.f32.mrf.mxu0  ;;  %6914 = vmatmul.mubr.f32.gmra.mxu1 %v13575_v46 }
 0x49d   :  { %v5866_v20 = vpop.f32.mrf.mxu1  ;;  %v5581_v11 = vadd.f32 %v5580_v62, %v13576_v9  ;;  %6919 = vmatprep.mubr.f32.mxu1 %v12810_v45 }
 0x49e   :  { %v11917_v33 = vadd.f32 %v5866_v20, %v5579_v43  ;;  %v5589_v1 = vpop.f32.mrf.mxu0  ;;  %6677 = vmatmul.mubr.f32.gmra.mxu0 %v13577_v61  ;;  %v13579_v43 = vld [vmem:[#allocation70_spill] sm:$0xff] }
 0x49f   :  { %v5868_v19 = vpop.f32.mrf.mxu1  ;;  %v5590_v47 = vadd.f32 %v5589_v1, %v13578_v3  ;;  %6682 = vmatprep.mubr.f32.mxu0 %v12810_v45 }
 0x4a0   :  { %v11922_v8 = vadd.f32 %v5868_v19, %v5581_v11  ;;  %v5591_v30 = vpop.f32.mrf.mxu0  ;;  %6921 = vmatmul.mubr.f32.gmra.mxu1 %v13577_v61 }
 0x4a1   :  { %v5873_v41 = vpop.f32.mrf.mxu1  ;;  %v5592_v9 = vadd.f32 %v5591_v30, %v13578_v3  ;;  %6926 = vmatprep.mubr.f32.mxu1 %v12810_v45 }
 0x4a2   :  { %v11927_v20 = vadd.f32 %v5873_v41, %v5590_v47  ;;  %v5600_v46 = vpop.f32.mrf.mxu0  ;;  %6684 = vmatmul.mubr.f32.gmra.mxu0 %v13579_v43  ;;  %v13581_v47 = vld [vmem:[#allocation74_spill] sm:$0xff] }
 0x4a3   :  { %v5875_v62 = vpop.f32.mrf.mxu1  ;;  %v5601_v1 = vadd.f32 %v5600_v46, %v13580_v13  ;;  %6689 = vmatprep.mubr.f32.mxu0 %v12810_v45 }
 0x4a4   :  { %v11932_v11 = vadd.f32 %v5875_v62, %v5592_v9  ;;  %v5602_v19 = vpop.f32.mrf.mxu0  ;;  %6928 = vmatmul.mubr.f32.gmra.mxu1 %v13579_v43 }
 0x4a5   :  { %v5880_v50 = vpop.f32.mrf.mxu1  ;;  %v5603_v3 = vadd.f32 %v5602_v19, %v13580_v13  ;;  %6933 = vmatprep.mubr.f32.mxu1 %v12810_v45 }
 0x4a6   :  { %v11937_v41 = vadd.f32 %v5880_v50, %v5601_v1  ;;  %v5611_v61 = vpop.f32.mrf.mxu0  ;;  %6691 = vmatmul.mubr.f32.gmra.mxu0 %v13581_v47  ;;  %v13583_v1 = vld [vmem:[#allocation75_spill] sm:$0xff] }
 0x4a7   :  { %v5882_v30 = vpop.f32.mrf.mxu1  ;;  %v5612_v46 = vadd.f32 %v5611_v61, %v13582_v51  ;;  %6696 = vmatprep.mubr.f32.mxu0 %v12810_v45 }
 0x4a8   :  { %v11942_v9 = vadd.f32 %v5882_v30, %v5603_v3  ;;  %v5613_v62 = vpop.f32.mrf.mxu0  ;;  %6935 = vmatmul.mubr.f32.gmra.mxu1 %v13581_v47 }
 0x4a9   :  { %v5887_v24 = vpop.f32.mrf.mxu1  ;;  %v5614_v13 = vadd.f32 %v5613_v62, %v13582_v51  ;;  %6940 = vmatprep.mubr.f32.mxu1 %v12810_v45 }
 0x4aa   :  { %v11947_v50 = vadd.f32 %v5887_v24, %v5612_v46  ;;  %v5622_v43 = vpop.f32.mrf.mxu0  ;;  %6698 = vmatmul.mubr.f32.gmra.mxu0 %v13583_v1  ;;  %v13585_v46 = vld [vmem:[#allocation82_spill] sm:$0xff] }
 0x4ab   :  { %v5889_v19 = vpop.f32.mrf.mxu1  ;;  %v5623_v61 = vadd.f32 %v5622_v43, %v13584_v39  ;;  %6703 = vmatprep.mubr.f32.mxu0 %v12810_v45 }
 0x4ac   :  { %v11952_v3 = vadd.f32 %v5889_v19, %v5614_v13  ;;  %v5624_v30 = vpop.f32.mrf.mxu0  ;;  %6942 = vmatmul.mubr.f32.gmra.mxu1 %v13583_v1 }
 0x4ad   :  { %v5894_v54 = vpop.f32.mrf.mxu1  ;;  %v5625_v51 = vadd.f32 %v5624_v30, %v13584_v39  ;;  %6947 = vmatprep.mubr.f32.mxu1 %v12810_v45 }
 0x4ae   :  { %v11957_v24 = vadd.f32 %v5894_v54, %v5623_v61  ;;  %v5633_v47 = vpop.f32.mrf.mxu0  ;;  %6705 = vmatmul.mubr.f32.gmra.mxu0 %v13585_v46  ;;  %v13587_v61 = vld [vmem:[#allocation86_spill] sm:$0xff] }
 0x4af   :  { %v5896_v62 = vpop.f32.mrf.mxu1  ;;  %v5634_v43 = vadd.f32 %v5633_v47, %v13586_v7  ;;  %6710 = vmatprep.mubr.f32.mxu0 %v12810_v45 }
 0x4b0   :  { %v11962_v13 = vadd.f32 %v5896_v62, %v5625_v51  ;;  %v5635_v19 = vpop.f32.mrf.mxu0  ;;  %6949 = vmatmul.mubr.f32.gmra.mxu1 %v13585_v46 }
 0x4b1   :  { %v5901_v26 = vpop.f32.mrf.mxu1  ;;  %v5636_v39 = vadd.f32 %v5635_v19, %v13586_v7  ;;  %6954 = vmatprep.mubr.f32.mxu1 %v12810_v45 }
 0x4b2   :  { %v11967_v54 = vadd.f32 %v5901_v26, %v5634_v43  ;;  %v5644_v1 = vpop.f32.mrf.mxu0  ;;  %6712 = vmatmul.mubr.f32.gmra.mxu0 %v13587_v61  ;;  %v13589_v43 = vld [vmem:[#allocation87_spill] sm:$0xff] }
 0x4b3   :  { %v5903_v30 = vpop.f32.mrf.mxu1  ;;  %v5645_v47 = vadd.f32 %v5644_v1, %v13588_v17  ;;  %6717 = vmatprep.mubr.f32.mxu0 %v12810_v45 }
 0x4b4   :  { %v11972_v51 = vadd.f32 %v5903_v30, %v5636_v39  ;;  %v5646_v62 = vpop.f32.mrf.mxu0  ;;  %6956 = vmatmul.mubr.f32.gmra.mxu1 %v13587_v61 }
 0x4b5   :  { %v5908_v52 = vpop.f32.mrf.mxu1  ;;  %v5647_v7 = vadd.f32 %v5646_v62, %v13588_v17  ;;  %6961 = vmatprep.mubr.f32.mxu1 %v12810_v45 }
 0x4b6   :  { %v11977_v26 = vadd.f32 %v5908_v52, %v5645_v47  ;;  %v5655_v46 = vpop.f32.mrf.mxu0  ;;  %6719 = vmatmul.mubr.f32.gmra.mxu0 %v13589_v43 }
 0x4b7   :  { %v5910_v19 = vpop.f32.mrf.mxu1  ;;  %v5656_v1 = vadd.f32 %v5655_v46, %v13590_v15  ;;  %6724 = vmatprep.mubr.f32.mxu0 %v12810_v45 }
 0x4b8   :  { %v11982_v39 = vadd.f32 %v5910_v19, %v5647_v7  ;;  %v5657_v30 = vpop.f32.mrf.mxu0  ;;  %6963 = vmatmul.mubr.f32.gmra.mxu1 %v13589_v43 }
 0x4b9   :  { %v5915_v4 = vpop.f32.mrf.mxu1  ;;  %v5658_v17 = vadd.f32 %v5657_v30, %v13590_v15  ;;  %6968 = vmatprep.mubr.f32.mxu1 %v12810_v45 }
 0x4ba   :  { %v11987_v52 = vadd.f32 %v5915_v4, %v5656_v1  ;;  %v5996_v61 = vpop.f32.mrf.mxu0  ;;  %6726 = vmatmul.mubr.f32.gmra.mxu0 %v13453_v22 }
 0x4bb   :  { %v5917_v47 = vpop.f32.mrf.mxu1  ;;  %v5997_v62 = vadd.f32 %v5996_v61, %v11716_v60  ;;  %6731 = vmatprep.mubr.f32.mxu0 %v12810_v45 }
 0x4bc   :  { %v11992_v7 = vadd.f32 %v5917_v47, %v5658_v17  ;;  %v5998_v46 = vpop.f32.mrf.mxu0  ;;  %6970 = vmatmul.mubr.f32.gmra.mxu1 %v13453_v22 }
 0x4bd   :  { %v6266_v19 = vpop.f32.mrf.mxu1  ;;  %v5999_v15 = vadd.f32 %v5998_v46, %v11721_v32  ;;  %6975 = vmatprep.mubr.f32.mxu1 %v12810_v45 }
 0x4be   :  { %v11997_v4 = vadd.f32 %v6266_v19, %v5997_v62  ;;  %v6004_v43 = vpop.f32.mrf.mxu0  ;;  %6733 = vmatmul.mubr.f32.gmra.mxu0 %v9008_v25 }
 0x4bf   :  { %v6268_v1 = vpop.f32.mrf.mxu1  ;;  %v6005_v60 = vadd.f32 %v6004_v43, %v11728_v10 }
 0x4c0   :  { %13591 = vst [vmem:[#allocation52_spill] sm:$0xff] %v11997_v4  ;;  %v12002_v30 = vadd.f32 %v6268_v1, %v5999_v15  ;;  %v6006_v17 = vpop.f32.mrf.mxu0  ;;  %6977 = vmatmul.mubr.f32.gmra.mxu1 %v9008_v25 }
 0x4c1   :  { %v6275_v61 = vpop.f32.mrf.mxu1  ;;  %v6007_v22 = vadd.f32 %v6006_v17, %v11733_v18 }
 0x4c2   :  { %13592 = vst [vmem:[#allocation166_spill] sm:$0xff] %v12002_v30  ;;  %v12006_v47 = vadd.f32 %v6275_v61, %v6005_v60  ;;  %v6012_v32 = vpop.f32.mrf.mxu0 }
 0x4c3   :  { %v6277_v62 = vpop.f32.mrf.mxu1  ;;  %v6013_v45 = vadd.f32 %v6012_v32, %v11740_v42 }
 0x4c4   :  { %v12009_v46 = vadd.f32 %v6277_v62, %v6007_v22  ;;  %v6014_v19 = vpop.f32.mrf.mxu0 }
 0x4c5   :  { %v6284_v4 = vpop.f32.mrf.mxu1  ;;  %v6015_v10 = vadd.f32 %v6014_v19, %v11745_v23 }
 0x4c6   :  { %v12012_v15 = vadd.f32 %v6284_v4, %v6013_v45  ;;  %v6020_v43 = vpop.f32.mrf.mxu0 }
 0x4c7   :  { %v6286_v1 = vpop.f32.mrf.mxu1  ;;  %v6021_v25 = vadd.f32 %v6020_v43, %v11752_v28 }
 0x4c8   :  { %v12015_v30 = vadd.f32 %v6286_v1, %v6015_v10  ;;  %v6022_v18 = vpop.f32.mrf.mxu0 }
 0x4c9   :  { %v6293_v60 = vpop.f32.mrf.mxu1  ;;  %v6023_v17 = vadd.f32 %v6022_v18, %v11757_v44 }
 0x4ca   :  { %v12018_v61 = vadd.f32 %v6293_v60, %v6021_v25  ;;  %v6028_v42 = vpop.f32.mrf.mxu0 }
 0x4cb   :  { %v6295_v22 = vpop.f32.mrf.mxu1  ;;  %v6029_v32 = vadd.f32 %v6028_v42, %v11763_v57 }
 0x4cc   :  { %v12021_v62 = vadd.f32 %v6295_v22, %v6023_v17  ;;  %v6030_v23 = vpop.f32.mrf.mxu0 }
 0x4cd   :  { %v6302_v4 = vpop.f32.mrf.mxu1  ;;  %v6031_v45 = vadd.f32 %v6030_v23, %v11768_v12 }
 0x4ce   :  { %v12024_v19 = vadd.f32 %v6302_v4, %v6029_v32  ;;  %v6036_v28 = vpop.f32.mrf.mxu0 }
 0x4cf   :  { %v6304_v10 = vpop.f32.mrf.mxu1  ;;  %v6037_v43 = vadd.f32 %v6036_v28, %v11773_v6 }
 0x4d0   :  { %v12027_v1 = vadd.f32 %v6304_v10, %v6031_v45  ;;  %v6038_v44 = vpop.f32.mrf.mxu0 }
 0x4d1   :  { %v6311_v25 = vpop.f32.mrf.mxu1  ;;  %v6039_v18 = vadd.f32 %v6038_v44, %v11778_v36 }
 0x4d2   :  { %v12030_v60 = vadd.f32 %v6311_v25, %v6037_v43  ;;  %v6044_v57 = vpop.f32.mrf.mxu0 }
 0x4d3   :  { %v6313_v17 = vpop.f32.mrf.mxu1  ;;  %v6045_v42 = vadd.f32 %v6044_v57, %v11783_v53 }
 0x4d4   :  { %v12033_v22 = vadd.f32 %v6313_v17, %v6039_v18  ;;  %v6046_v12 = vpop.f32.mrf.mxu0 }
 0x4d5   :  { %v6320_v32 = vpop.f32.mrf.mxu1  ;;  %v6047_v23 = vadd.f32 %v6046_v12, %v11788_v31 }
 0x4d6   :  { %v12036_v4 = vadd.f32 %v6320_v32, %v6045_v42  ;;  %v6052_v6 = vpop.f32.mrf.mxu0 }
 0x4d7   :  { %v6322_v45 = vpop.f32.mrf.mxu1  ;;  %v6053_v28 = vadd.f32 %v6052_v6, %v11794_v59 }
 0x4d8   :  { %v12039_v10 = vadd.f32 %v6322_v45, %v6047_v23  ;;  %v6054_v36 = vpop.f32.mrf.mxu0 }
 0x4d9   :  { %v6329_v43 = vpop.f32.mrf.mxu1  ;;  %v6055_v44 = vadd.f32 %v6054_v36, %v11799_v2 }
 0x4da   :  { %v12042_v25 = vadd.f32 %v6329_v43, %v6053_v28  ;;  %v6060_v53 = vpop.f32.mrf.mxu0 }
 0x4db   :  { %v6331_v18 = vpop.f32.mrf.mxu1  ;;  %v6061_v57 = vadd.f32 %v6060_v53, %v11807_v63 }
 0x4dc   :  { %v12045_v17 = vadd.f32 %v6331_v18, %v6055_v44  ;;  %v6062_v31 = vpop.f32.mrf.mxu0 }
 0x4dd   :  { %v6338_v42 = vpop.f32.mrf.mxu1  ;;  %v6063_v12 = vadd.f32 %v6062_v31, %v11812_v56 }
 0x4de   :  { %v12048_v32 = vadd.f32 %v6338_v42, %v6061_v57  ;;  %v6068_v59 = vpop.f32.mrf.mxu0 }
 0x4df   :  { %v6340_v23 = vpop.f32.mrf.mxu1  ;;  %v6069_v6 = vadd.f32 %v6068_v59, %v11820_v58 }
 0x4e0   :  { %v12051_v45 = vadd.f32 %v6340_v23, %v6063_v12  ;;  %v6070_v2 = vpop.f32.mrf.mxu0 }
 0x4e1   :  { %v6347_v28 = vpop.f32.mrf.mxu1  ;;  %v6071_v36 = vadd.f32 %v6070_v2, %v11826_v37 }
 0x4e2   :  { %v12054_v43 = vadd.f32 %v6347_v28, %v6069_v6  ;;  %v6076_v63 = vpop.f32.mrf.mxu0 }
 0x4e3   :  { %v6349_v44 = vpop.f32.mrf.mxu1  ;;  %v6077_v53 = vadd.f32 %v6076_v63, %v11831_v49 }
 0x4e4   :  { %v12057_v18 = vadd.f32 %v6349_v44, %v6071_v36  ;;  %v6078_v56 = vpop.f32.mrf.mxu0 }
 0x4e5   :  { %v6356_v57 = vpop.f32.mrf.mxu1  ;;  %v6079_v31 = vadd.f32 %v6078_v56, %v11836_v48 }
 0x4e6   :  { %v12060_v42 = vadd.f32 %v6356_v57, %v6077_v53  ;;  %v6084_v58 = vpop.f32.mrf.mxu0 }
 0x4e7   :  { %v6358_v12 = vpop.f32.mrf.mxu1  ;;  %v6085_v59 = vadd.f32 %v6084_v58, %v11841_v5 }
 0x4e8   :  { %v12063_v23 = vadd.f32 %v6358_v12, %v6079_v31  ;;  %v6086_v37 = vpop.f32.mrf.mxu0 }
 0x4e9   :  { %v6365_v6 = vpop.f32.mrf.mxu1  ;;  %v6087_v2 = vadd.f32 %v6086_v37, %v11846_v16 }
 0x4ea   :  { %v12066_v28 = vadd.f32 %v6365_v6, %v6085_v59  ;;  %v6092_v49 = vpop.f32.mrf.mxu0 }
 0x4eb   :  { %v6367_v36 = vpop.f32.mrf.mxu1  ;;  %v6093_v63 = vadd.f32 %v6092_v49, %v11851_v34 }
 0x4ec   :  { %v12069_v44 = vadd.f32 %v6367_v36, %v6087_v2  ;;  %v6094_v48 = vpop.f32.mrf.mxu0 }
 0x4ed   :  { %v6374_v53 = vpop.f32.mrf.mxu1  ;;  %v6095_v56 = vadd.f32 %v6094_v48, %v11857_v29 }
 0x4ee   :  { %v12072_v57 = vadd.f32 %v6374_v53, %v6093_v63  ;;  %v6100_v5 = vpop.f32.mrf.mxu0 }
 0x4ef   :  { %v6376_v31 = vpop.f32.mrf.mxu1  ;;  %v6101_v58 = vadd.f32 %v6100_v5, %v11866_v0 }
 0x4f0   :  { %v12075_v12 = vadd.f32 %v6376_v31, %v6095_v56  ;;  %v6102_v16 = vpop.f32.mrf.mxu0 }
 0x4f1   :  { %v6383_v59 = vpop.f32.mrf.mxu1  ;;  %v6103_v37 = vadd.f32 %v6102_v16, %v11876_v35 }
 0x4f2   :  { %v12078_v6 = vadd.f32 %v6383_v59, %v6101_v58  ;;  %v6108_v34 = vpop.f32.mrf.mxu0 }
 0x4f3   :  { %v6385_v2 = vpop.f32.mrf.mxu1  ;;  %v6109_v49 = vadd.f32 %v6108_v34, %v11887_v14 }
 0x4f4   :  { %v12081_v36 = vadd.f32 %v6385_v2, %v6103_v37  ;;  %v6110_v29 = vpop.f32.mrf.mxu0 }
 0x4f5   :  { %v6392_v63 = vpop.f32.mrf.mxu1  ;;  %v6111_v48 = vadd.f32 %v6110_v29, %v11892_v27 }
 0x4f6   :  { %v12084_v53 = vadd.f32 %v6392_v63, %v6109_v49  ;;  %v6116_v0 = vpop.f32.mrf.mxu0 }
 0x4f7   :  { %v6394_v56 = vpop.f32.mrf.mxu1  ;;  %v6117_v5 = vadd.f32 %v6116_v0, %v11897_v38 }
 0x4f8   :  { %v12087_v31 = vadd.f32 %v6394_v56, %v6111_v48  ;;  %v6118_v35 = vpop.f32.mrf.mxu0 }
 0x4f9   :  { %v6401_v58 = vpop.f32.mrf.mxu1  ;;  %v6119_v16 = vadd.f32 %v6118_v35, %v11902_v40 }
 0x4fa   :  { %v12090_v59 = vadd.f32 %v6401_v58, %v6117_v5  ;;  %v6124_v14 = vpop.f32.mrf.mxu0 }
 0x4fb   :  { %v6403_v37 = vpop.f32.mrf.mxu1  ;;  %v6125_v34 = vadd.f32 %v6124_v14, %v11907_v21 }
 0x4fc   :  { %v12093_v2 = vadd.f32 %v6403_v37, %v6119_v16  ;;  %v6126_v27 = vpop.f32.mrf.mxu0 }
 0x4fd   :  { %v6410_v49 = vpop.f32.mrf.mxu1  ;;  %v6127_v29 = vadd.f32 %v6126_v27, %v11912_v55 }
 0x4fe   :  { %v12096_v63 = vadd.f32 %v6410_v49, %v6125_v34  ;;  %v6132_v38 = vpop.f32.mrf.mxu0 }
 0x4ff   :  { %v6412_v48 = vpop.f32.mrf.mxu1  ;;  %v6133_v0 = vadd.f32 %v6132_v38, %v11917_v33 }
 0x500   :  { %v12099_v56 = vadd.f32 %v6412_v48, %v6127_v29  ;;  %v6134_v40 = vpop.f32.mrf.mxu0 }
 0x501   :  { %v6419_v5 = vpop.f32.mrf.mxu1  ;;  %v6135_v35 = vadd.f32 %v6134_v40, %v11922_v8 }
 0x502   :  { %v12102_v58 = vadd.f32 %v6419_v5, %v6133_v0  ;;  %v6140_v21 = vpop.f32.mrf.mxu0 }
 0x503   :  { %v6421_v16 = vpop.f32.mrf.mxu1  ;;  %v6141_v14 = vadd.f32 %v6140_v21, %v11927_v20 }
 0x504   :  { %v12105_v37 = vadd.f32 %v6421_v16, %v6135_v35  ;;  %v6142_v55 = vpop.f32.mrf.mxu0 }
 0x505   :  { %v6428_v34 = vpop.f32.mrf.mxu1  ;;  %v6143_v27 = vadd.f32 %v6142_v55, %v11932_v11 }
 0x506   :  { %v12108_v49 = vadd.f32 %v6428_v34, %v6141_v14  ;;  %v6148_v33 = vpop.f32.mrf.mxu0 }
 0x507   :  { %v6430_v29 = vpop.f32.mrf.mxu1  ;;  %v6149_v38 = vadd.f32 %v6148_v33, %v11937_v41 }
 0x508   :  { %v12111_v48 = vadd.f32 %v6430_v29, %v6143_v27  ;;  %v6150_v8 = vpop.f32.mrf.mxu0 }
 0x509   :  { %v6437_v0 = vpop.f32.mrf.mxu1  ;;  %v6151_v40 = vadd.f32 %v6150_v8, %v11942_v9 }
 0x50a   :  { %v12114_v5 = vadd.f32 %v6437_v0, %v6149_v38  ;;  %v6156_v20 = vpop.f32.mrf.mxu0 }
 0x50b   :  { %v6439_v35 = vpop.f32.mrf.mxu1  ;;  %v6157_v21 = vadd.f32 %v6156_v20, %v11947_v50 }
 0x50c   :  { %v12117_v16 = vadd.f32 %v6439_v35, %v6151_v40  ;;  %v6158_v11 = vpop.f32.mrf.mxu0 }
 0x50d   :  { %v6446_v14 = vpop.f32.mrf.mxu1  ;;  %v6159_v55 = vadd.f32 %v6158_v11, %v11952_v3 }
 0x50e   :  { %v12120_v34 = vadd.f32 %v6446_v14, %v6157_v21  ;;  %v6164_v41 = vpop.f32.mrf.mxu0 }
 0x50f   :  { %v6448_v27 = vpop.f32.mrf.mxu1  ;;  %v6165_v33 = vadd.f32 %v6164_v41, %v11957_v24 }
 0x510   :  { %v12123_v29 = vadd.f32 %v6448_v27, %v6159_v55  ;;  %v6166_v9 = vpop.f32.mrf.mxu0 }
 0x511   :  { %v6455_v38 = vpop.f32.mrf.mxu1  ;;  %v6167_v8 = vadd.f32 %v6166_v9, %v11962_v13 }
 0x512   :  { %v12126_v0 = vadd.f32 %v6455_v38, %v6165_v33  ;;  %v6172_v50 = vpop.f32.mrf.mxu0 }
 0x513   :  { %v6457_v40 = vpop.f32.mrf.mxu1  ;;  %v6173_v20 = vadd.f32 %v6172_v50, %v11967_v54 }
 0x514   :  { %v12129_v35 = vadd.f32 %v6457_v40, %v6167_v8  ;;  %v6174_v3 = vpop.f32.mrf.mxu0 }
 0x515   :  { %v6464_v21 = vpop.f32.mrf.mxu1  ;;  %v6175_v11 = vadd.f32 %v6174_v3, %v11972_v51 }
 0x516   :  { %v12132_v14 = vadd.f32 %v6464_v21, %v6173_v20  ;;  %v6180_v24 = vpop.f32.mrf.mxu0 }
 0x517   :  { %v6466_v55 = vpop.f32.mrf.mxu1  ;;  %v6181_v41 = vadd.f32 %v6180_v24, %v11977_v26  ;;  %v13596_v24 = vld [vmem:[#allocation52_spill] sm:$0xff] }
 0x518   :  { %v12135_v27 = vadd.f32 %v6466_v55, %v6175_v11  ;;  %v6182_v13 = vpop.f32.mrf.mxu0 }
 0x519   :  { %v6473_v33 = vpop.f32.mrf.mxu1  ;;  %v6183_v9 = vadd.f32 %v6182_v13, %v11982_v39  ;;  %v13597_v13 = vld [vmem:[#allocation166_spill] sm:$0xff] }
 0x51a   :  { %13593 = vst [vmem:[#allocation56_spill] sm:$0xff] %v12135_v27  ;;  %v12138_v38 = vadd.f32 %v6473_v33, %v6181_v41  ;;  %v6188_v54 = vpop.f32.mrf.mxu0 }
 0x51b   :  { %v6475_v8 = vpop.f32.mrf.mxu1  ;;  %v6189_v50 = vadd.f32 %v6188_v54, %v11987_v52 }
 0x51c   :  { %13594 = vst [vmem:[#allocation167_spill] sm:$0xff] %v12138_v38  ;;  %v12141_v40 = vadd.f32 %v6475_v8, %v6183_v9  ;;  %v6190_v51 = vpop.f32.mrf.mxu0 }
 0x51d   :  { %v6482_v20 = vpop.f32.mrf.mxu1  ;;  %v6191_v3 = vadd.f32 %v6190_v51, %v11992_v7 }
 0x51e   :  { %13595 = vst [vmem:[#allocation168_spill] sm:$0xff] %v12141_v40  ;;  %v12144_v21 = vadd.f32 %v6482_v20, %v6189_v50  ;;  %v6566_v26 = vpop.f32.mrf.mxu0 }
 0x51f   :  { %v6484_v11 = vpop.f32.mrf.mxu1  ;;  %v6567_v55 = vadd.f32 %v6566_v26, %v13596_v24 }
 0x520   :  { %v12147_v27 = vadd.f32 %v6484_v11, %v6191_v3  ;;  %v6568_v39 = vpop.f32.mrf.mxu0 }
 0x521   :  { %v6810_v41 = vpop.f32.mrf.mxu1  ;;  %v6569_v33 = vadd.f32 %v6568_v39, %v13597_v13 }
 0x522   :  { %v6811_v38 = vadd.f32 %v6810_v41, %v6567_v55  ;;  %v6573_v52 = vpop.f32.mrf.mxu0 }
 0x523   :  { %v6812_v9 = vpop.f32.mrf.mxu1  ;;  %v6574_v54 = vadd.f32 %v6573_v52, %v12006_v47 }
 0x524   :  { %v6813_v8 = vadd.f32 %v6812_v9, %v6569_v33  ;;  %v6575_v40 = vpop.f32.mrf.mxu0  ;;  %8254 = vtanh.f32 %v6811_v38 }
 0x525   :  { %v6817_v7 = vpop.f32.mrf.mxu1  ;;  %v6576_v50 = vadd.f32 %v6575_v40, %v12009_v46 }
 0x526   :  { %v6818_v51 = vadd.f32 %v6817_v7, %v6574_v54  ;;  %8256 = vtanh.f32 %v6813_v8  ;;  %v6580_v20 = vpop.f32.mrf.mxu0 }
 0x527   :  { %v6819_v3 = vpop.f32.mrf.mxu1  ;;  %v6581_v26 = vadd.f32 %v6580_v20, %v12012_v15 }
 0x528   :  { %8258 = vtanh.f32 %v6818_v51  ;;  %v6820_v11 = vadd.f32 %v6819_v3, %v6576_v50  ;;  %v6582_v24 = vpop.f32.mrf.mxu0 }
 0x529   :  { %v6824_v55 = vpop.f32.mrf.mxu1  ;;  %v6583_v39 = vadd.f32 %v6582_v24, %v12015_v30 }
 0x52a   :  { %8260 = vtanh.f32 %v6820_v11  ;;  %v6825_v47 = vadd.f32 %v6824_v55, %v6581_v26  ;;  %v6587_v41 = vpop.f32.mrf.mxu0 }
 0x52b   :  { %v6826_v13 = vpop.f32.mrf.mxu1  ;;  %v6588_v38 = vadd.f32 %v6587_v41, %v12018_v61 }
 0x52c   :  { %8262 = vtanh.f32 %v6825_v47  ;;  %v6827_v46 = vadd.f32 %v6826_v13, %v6583_v39  ;;  %v6589_v40 = vpop.f32.mrf.mxu0  ;;  %v13599_v13 = vld [vmem:[#allocation137_spill] sm:$0xff] }
 0x52d   :  { %v6831_v33 = vpop.f32.mrf.mxu1  ;;  %v6590_v52 = vadd.f32 %v6589_v40, %v12021_v62 }
 0x52e   :  { %8264 = vtanh.f32 %v6827_v46  ;;  %v6832_v15 = vadd.f32 %v6831_v33, %v6588_v38  ;;  %v6594_v9 = vpop.f32.mrf.mxu0 }
 0x52f   :  { %v6833_v54 = vpop.f32.mrf.mxu1  ;;  %v6595_v8 = vadd.f32 %v6594_v9, %v12024_v19  ;;  %v13598_v19 = vld [vmem:[#allocation117_spill] sm:$0xff] }
 0x530   :  { %8266 = vtanh.f32 %v6832_v15  ;;  %v6834_v30 = vadd.f32 %v6833_v54, %v6590_v52  ;;  %v6596_v7 = vpop.f32.mrf.mxu0 }
 0x531   :  { %v6838_v50 = vpop.f32.mrf.mxu1  ;;  %v6597_v51 = vadd.f32 %v6596_v7, %v12027_v1  ;;  %v8255_v20 = vpop.eup %8254 }
 0x532   :  { %8268 = vtanh.f32 %v6834_v30  ;;  %v6839_v61 = vadd.f32 %v6838_v50, %v6595_v8  ;;  %v6601_v3 = vpop.f32.mrf.mxu0  ;;  %v7339_v41 = vmul.f32 %v8255_v20, %v13598_v19 }
 0x533   :  { %v6840_v26 = vpop.f32.mrf.mxu1  ;;  %v8257_v11 = vpop.eup %8256  ;;  %v6602_v62 = vadd.f32 %v6601_v3, %v12030_v60 }
 0x534   :  { %8270 = vtanh.f32 %v6839_v61  ;;  %v6841_v24 = vadd.f32 %v6840_v26, %v6597_v51  ;;  %v6603_v39 = vpop.f32.mrf.mxu0  ;;  %v7340_v40 = vmul.f32 %v8257_v11, %v13598_v19  ;;  %v13600_v61 = vld [vmem:[#allocation138_spill] sm:$0xff] }
 0x535   :  { %v8259_v55 = vpop.eup %8258  ;;  %v6845_v47 = vpop.f32.mrf.mxu1  ;;  %v6604_v33 = vadd.f32 %v6603_v39, %v12033_v22 }
 0x536   :  { %v7347_v38 = vmul.f32 %v8259_v55, %v13599_v13  ;;  %8272 = vtanh.f32 %v6841_v24  ;;  %v6846_v46 = vadd.f32 %v6845_v47, %v6602_v62  ;;  %v6608_v52 = vpop.f32.mrf.mxu0 }
 0x537   :  { %v8261_v1 = vpop.eup %8260  ;;  %v6847_v15 = vpop.f32.mrf.mxu1  ;;  %v6609_v54 = vadd.f32 %v6608_v52, %v12036_v4 }
 0x538   :  { %v7713_v9 = vadd.f32 %v7347_v38, %v7339_v41  ;;  %v7348_v60 = vmul.f32 %v8261_v1, %v13599_v13  ;;  %8274 = vtanh.f32 %v6846_v46  ;;  %v6610_v30 = vpop.f32.mrf.mxu0  ;;  %v6848_v7 = vadd.f32 %v6847_v15, %v6604_v33  ;;  %v13601_v38 = vld [vmem:[#allocation140_spill] sm:$0xff] }
 0x539   :  { %v8263_v8 = vpop.eup %8262  ;;  %v6852_v50 = vpop.f32.mrf.mxu1  ;;  %v6611_v11 = vadd.f32 %v6610_v30, %v12039_v10 }
 0x53a   :  { %v7743_v51 = vadd.f32 %v7348_v60, %v7340_v40  ;;  %v7355_v20 = vmul.f32 %v8263_v8, %v13600_v61  ;;  %v6853_v3 = vadd.f32 %v6852_v50, %v6609_v54  ;;  %8276 = vtanh.f32 %v6848_v7  ;;  %v6615_v22 = vpop.f32.mrf.mxu0  ;;  %v13602_v50 = vld [vmem:[#allocation141_spill] sm:$0xff] }
 0x53b   :  { %v8265_v26 = vpop.eup %8264  ;;  %v6854_v62 = vpop.f32.mrf.mxu1  ;;  %v6616_v4 = vadd.f32 %v6615_v22, %v12042_v25 }
 0x53c   :  { %v7714_v24 = vadd.f32 %v7713_v9, %v7355_v20  ;;  %v7356_v55 = vmul.f32 %v8265_v26, %v13600_v61  ;;  %8278 = vtanh.f32 %v6853_v3  ;;  %v6617_v47 = vpop.f32.mrf.mxu0  ;;  %v6855_v19 = vadd.f32 %v6854_v62, %v6611_v11 }
 0x53d   :  { %v8267_v39 = vpop.eup %8266  ;;  %v6859_v41 = vpop.f32.mrf.mxu1  ;;  %v6618_v10 = vadd.f32 %v6617_v47, %v12045_v17  ;;  %v13603_v47 = vld [vmem:[#allocation142_spill] sm:$0xff] }
 0x53e   :  { %v7744_v13 = vadd.f32 %v7743_v51, %v7356_v55  ;;  %v7363_v46 = vmul.f32 %v8267_v39, %v13601_v38  ;;  %v6860_v1 = vadd.f32 %v6859_v41, %v6616_v4  ;;  %8280 = vtanh.f32 %v6855_v19  ;;  %v6622_v33 = vpop.f32.mrf.mxu0 }
 0x53f   :  { %v8269_v40 = vpop.eup %8268  ;;  %v6861_v52 = vpop.f32.mrf.mxu1  ;;  %v6623_v25 = vadd.f32 %v6622_v33, %v12048_v32 }
 0x540   :  { %v7715_v15 = vadd.f32 %v7714_v24, %v7363_v46  ;;  %v7364_v9 = vmul.f32 %v8269_v40, %v13601_v38  ;;  %8282 = vtanh.f32 %v6860_v1  ;;  %v6624_v54 = vpop.f32.mrf.mxu0  ;;  %v6862_v8 = vadd.f32 %v6861_v52, %v6618_v10 }
 0x541   :  { %v8271_v60 = vpop.eup %8270  ;;  %v6866_v30 = vpop.f32.mrf.mxu1  ;;  %v6625_v17 = vadd.f32 %v6624_v54, %v12051_v45 }
 0x542   :  { %v7745_v7 = vadd.f32 %v7744_v13, %v7364_v9  ;;  %v7371_v51 = vmul.f32 %v8271_v60, %v13602_v50  ;;  %v6867_v61 = vadd.f32 %v6866_v30, %v6623_v25  ;;  %8284 = vtanh.f32 %v6862_v8  ;;  %v6629_v3 = vpop.f32.mrf.mxu0  ;;  %v13604_v9 = vld [vmem:[#allocation144_spill] sm:$0xff] }
 0x543   :  { %v8273_v20 = vpop.eup %8272  ;;  %v6868_v26 = vpop.f32.mrf.mxu1  ;;  %v6630_v32 = vadd.f32 %v6629_v3, %v12054_v43 }
 0x544   :  { %v7716_v11 = vadd.f32 %v7715_v15, %v7371_v51  ;;  %v7372_v22 = vmul.f32 %v8273_v20, %v13602_v50  ;;  %8286 = vtanh.f32 %v6867_v61  ;;  %v6631_v24 = vpop.f32.mrf.mxu0  ;;  %v6869_v55 = vadd.f32 %v6868_v26, %v6625_v17  ;;  %v13605_v26 = vld [vmem:[#allocation146_spill] sm:$0xff] }
 0x545   :  { %v8275_v62 = vpop.eup %8274  ;;  %v6873_v4 = vpop.f32.mrf.mxu1  ;;  %v6632_v41 = vadd.f32 %v6631_v24, %v12057_v18 }
 0x546   :  { %v7746_v39 = vadd.f32 %v7745_v7, %v7372_v22  ;;  %v7379_v19 = vmul.f32 %v8275_v62, %v13603_v47  ;;  %v6874_v13 = vadd.f32 %v6873_v4, %v6630_v32  ;;  %8288 = vtanh.f32 %v6869_v55  ;;  %v6636_v45 = vpop.f32.mrf.mxu0 }
 0x547   :  { %v6875_v38 = vpop.f32.mrf.mxu1  ;;  %v8277_v46 = vpop.eup %8276  ;;  %v6637_v40 = vadd.f32 %v6636_v45, %v12060_v42  ;;  %v13606_v45 = vld [vmem:[#allocation147_spill] sm:$0xff] }
 0x548   :  { %v7717_v1 = vadd.f32 %v7716_v11, %v7379_v19  ;;  %8290 = vtanh.f32 %v6874_v13  ;;  %v6876_v43 = vadd.f32 %v6875_v38, %v6632_v41  ;;  %v7380_v33 = vmul.f32 %v8277_v46, %v13603_v47  ;;  %v6638_v52 = vpop.f32.mrf.mxu0 }
 0x549   :  { %v8279_v10 = vpop.eup %8278  ;;  %v6880_v15 = vpop.f32.mrf.mxu1  ;;  %v6639_v60 = vadd.f32 %v6638_v52, %v12063_v23 }
 0x54a   :  { %v7387_v25 = vmul.f32 %v8279_v10, %v13604_v9  ;;  %8292 = vtanh.f32 %v6876_v43  ;;  %v6881_v18 = vadd.f32 %v6880_v15, %v6637_v40  ;;  %v7747_v54 = vadd.f32 %v7746_v39, %v7380_v33  ;;  %v6643_v8 = vpop.f32.mrf.mxu0 }
 0x54b   :  { %v6882_v30 = vpop.f32.mrf.mxu1  ;;  %v8281_v7 = vpop.eup %8280  ;;  %v6644_v42 = vadd.f32 %v6643_v8, %v12066_v28 }
 0x54c   :  { %v7718_v50 = vadd.f32 %v7717_v1, %v7387_v25  ;;  %8294 = vtanh.f32 %v6881_v18  ;;  %v6883_v51 = vadd.f32 %v6882_v30, %v6639_v60  ;;  %v7388_v20 = vmul.f32 %v8281_v7, %v13604_v9  ;;  %v6645_v17 = vpop.f32.mrf.mxu0  ;;  %v13607_v18 = vld [vmem:[#allocation149_spill] sm:$0xff] }
 0x54d   :  { %v8283_v61 = vpop.eup %8282  ;;  %v6887_v3 = vpop.f32.mrf.mxu1  ;;  %v6646_v23 = vadd.f32 %v6645_v17, %v12069_v44 }
 0x54e   :  { %v7395_v11 = vmul.f32 %v8283_v61, %v13605_v26  ;;  %8296 = vtanh.f32 %v6883_v51  ;;  %v6888_v22 = vadd.f32 %v6887_v3, %v6644_v42  ;;  %v7748_v32 = vadd.f32 %v7747_v54, %v7388_v20  ;;  %v6650_v62 = vpop.f32.mrf.mxu0 }
 0x54f   :  { %v6889_v24 = vpop.f32.mrf.mxu1  ;;  %v8285_v55 = vpop.eup %8284  ;;  %v6651_v28 = vadd.f32 %v6650_v62, %v12072_v57 }
 0x550   :  { %v7719_v4 = vadd.f32 %v7718_v50, %v7395_v11  ;;  %8298 = vtanh.f32 %v6888_v22  ;;  %v6890_v39 = vadd.f32 %v6889_v24, %v6646_v23  ;;  %v7396_v19 = vmul.f32 %v8285_v55, %v13605_v26  ;;  %v6652_v41 = vpop.f32.mrf.mxu0  ;;  %v13608_v23 = vld [vmem:[#allocation150_spill] sm:$0xff] }
 0x551   :  { %v8287_v47 = vpop.eup %8286  ;;  %v6894_v13 = vpop.f32.mrf.mxu1  ;;  %v6653_v44 = vadd.f32 %v6652_v41, %v12075_v12 }
 0x552   :  { %v7403_v38 = vmul.f32 %v8287_v47, %v13606_v45  ;;  %8300 = vtanh.f32 %v6890_v39  ;;  %v6895_v46 = vadd.f32 %v6894_v13, %v6651_v28  ;;  %v7749_v1 = vadd.f32 %v7748_v32, %v7396_v19  ;;  %v6657_v40 = vpop.f32.mrf.mxu0 }
 0x553   :  { %v6896_v43 = vpop.f32.mrf.mxu1  ;;  %v8289_v10 = vpop.eup %8288  ;;  %v6658_v57 = vadd.f32 %v6657_v40, %v12078_v6 }
 0x554   :  { %v7720_v33 = vadd.f32 %v7719_v4, %v7403_v38  ;;  %8302 = vtanh.f32 %v6895_v46  ;;  %v6897_v52 = vadd.f32 %v6896_v43, %v6653_v44  ;;  %v7404_v9 = vmul.f32 %v8289_v10, %v13606_v45  ;;  %v6659_v25 = vpop.f32.mrf.mxu0  ;;  %v13609_v45 = vld [vmem:[#allocation151_spill] sm:$0xff] }
 0x555   :  { %v8291_v15 = vpop.eup %8290  ;;  %v6901_v60 = vpop.f32.mrf.mxu1  ;;  %v6660_v7 = vadd.f32 %v6659_v25, %v12081_v36  ;;  %v13610_v25 = vld [vmem:[#allocation152_spill] sm:$0xff] }
 0x556   :  { %v7411_v54 = vmul.f32 %v8291_v15, %v13607_v18  ;;  %8304 = vtanh.f32 %v6897_v52  ;;  %v6902_v12 = vadd.f32 %v6901_v60, %v6658_v57  ;;  %v7750_v30 = vadd.f32 %v7749_v1, %v7404_v9  ;;  %v6664_v50 = vpop.f32.mrf.mxu0 }
 0x557   :  { %v8293_v8 = vpop.eup %8292  ;;  %v6903_v42 = vpop.f32.mrf.mxu1  ;;  %v6665_v61 = vadd.f32 %v6664_v50, %v12084_v53 }
 0x558   :  { %v7721_v51 = vadd.f32 %v7720_v33, %v7411_v54  ;;  %v7412_v6 = vmul.f32 %v8293_v8, %v13607_v18  ;;  %8306 = vtanh.f32 %v6902_v12  ;;  %v6666_v17 = vpop.f32.mrf.mxu0  ;;  %v6904_v3 = vadd.f32 %v6903_v42, %v6660_v7 }
 0x559   :  { %v8295_v20 = vpop.eup %8294  ;;  %v6908_v26 = vpop.f32.mrf.mxu1  ;;  %v6667_v24 = vadd.f32 %v6666_v17, %v12087_v31 }
 0x55a   :  { %v7751_v11 = vadd.f32 %v7750_v30, %v7412_v6  ;;  %v7419_v22 = vmul.f32 %v8295_v20, %v13608_v23  ;;  %v6909_v32 = vadd.f32 %v6908_v26, %v6665_v61  ;;  %8308 = vtanh.f32 %v6904_v3  ;;  %v6671_v36 = vpop.f32.mrf.mxu0  ;;  %v13611_v20 = vld [vmem:[#allocation122_spill] sm:$0xff] }
 0x55b   :  { %v8297_v62 = vpop.eup %8296  ;;  %v6910_v55 = vpop.f32.mrf.mxu1  ;;  %v6672_v53 = vadd.f32 %v6671_v36, %v12090_v59 }
 0x55c   :  { %v7722_v4 = vadd.f32 %v7721_v51, %v7419_v22  ;;  %v7420_v28 = vmul.f32 %v8297_v62, %v13608_v23  ;;  %8310 = vtanh.f32 %v6909_v32  ;;  %v6673_v47 = vpop.f32.mrf.mxu0  ;;  %v6911_v19 = vadd.f32 %v6910_v55, %v6667_v24 }
 0x55d   :  { %v8299_v39 = vpop.eup %8298  ;;  %v6915_v41 = vpop.f32.mrf.mxu1  ;;  %v6674_v31 = vadd.f32 %v6673_v47, %v12093_v2 }
 0x55e   :  { %v7752_v13 = vadd.f32 %v7751_v11, %v7420_v28  ;;  %v7427_v38 = vmul.f32 %v8299_v39, %v13609_v45  ;;  %v6916_v44 = vadd.f32 %v6915_v41, %v6672_v53  ;;  %8312 = vtanh.f32 %v6911_v19  ;;  %v6678_v1 = vpop.f32.mrf.mxu0 }
 0x55f   :  { %v8301_v46 = vpop.eup %8300  ;;  %v6917_v40 = vpop.f32.mrf.mxu1  ;;  %v6679_v59 = vadd.f32 %v6678_v1, %v12096_v63  ;;  %v13613_v1 = vld [vmem:[#allocation126_spill] sm:$0xff] }
 0x560   :  { %v7723_v43 = vadd.f32 %v7722_v4, %v7427_v38  ;;  %v7428_v10 = vmul.f32 %v8301_v46, %v13609_v45  ;;  %8314 = vtanh.f32 %v6916_v44  ;;  %v6680_v57 = vpop.f32.mrf.mxu0  ;;  %v6918_v52 = vadd.f32 %v6917_v40, %v6674_v31  ;;  %v13612_v4 = vld [vmem:[#allocation124_spill] sm:$0xff] }
 0x561   :  { %v8303_v33 = vpop.eup %8302  ;;  %v6922_v15 = vpop.f32.mrf.mxu1  ;;  %v6681_v2 = vadd.f32 %v6680_v57, %v12099_v56 }
 0x562   :  { %v7753_v9 = vadd.f32 %v7752_v13, %v7428_v10  ;;  %v7435_v60 = vmul.f32 %v8303_v33, %v13610_v25  ;;  %v6923_v18 = vadd.f32 %v6922_v15, %v6679_v59  ;;  %8316 = vtanh.f32 %v6918_v52  ;;  %v6685_v12 = vpop.f32.mrf.mxu0 }
 0x563   :  { %v8305_v54 = vpop.eup %8304  ;;  %v6924_v8 = vpop.f32.mrf.mxu1  ;;  %v6686_v63 = vadd.f32 %v6685_v12, %v12102_v58 }
 0x564   :  { %v7724_v30 = vadd.f32 %v7723_v43, %v7435_v60  ;;  %v7436_v7 = vmul.f32 %v8305_v54, %v13610_v25  ;;  %8318 = vtanh.f32 %v6923_v18  ;;  %v6687_v42 = vpop.f32.mrf.mxu0  ;;  %v6925_v51 = vadd.f32 %v6924_v8, %v6681_v2  ;;  %v13614_v54 = vld [vmem:[#allocation127_spill] sm:$0xff] }
 0x565   :  { %v8307_v50 = vpop.eup %8306  ;;  %v6929_v6 = vpop.f32.mrf.mxu1  ;;  %v6688_v3 = vadd.f32 %v6687_v42, %v12105_v37 }
 0x566   :  { %v7754_v61 = vadd.f32 %v7753_v9, %v7436_v7  ;;  %v7443_v17 = vmul.f32 %v8307_v50, %v13611_v20  ;;  %v6930_v26 = vadd.f32 %v6929_v6, %v6686_v63  ;;  %8320 = vtanh.f32 %v6925_v51  ;;  %v6692_v56 = vpop.f32.mrf.mxu0 }
 0x567   :  { %v6931_v11 = vpop.f32.mrf.mxu1  ;;  %v8309_v23 = vpop.eup %8308  ;;  %v6693_v32 = vadd.f32 %v6692_v56, %v12108_v49 }
 0x568   :  { %v7725_v22 = vadd.f32 %v7724_v30, %v7443_v17  ;;  %8322 = vtanh.f32 %v6930_v26  ;;  %v6932_v58 = vadd.f32 %v6931_v11, %v6688_v3  ;;  %v7444_v24 = vmul.f32 %v8309_v23, %v13611_v20  ;;  %v6694_v36 = vpop.f32.mrf.mxu0  ;;  %v13615_v17 = vld [vmem:[#allocation129_spill] sm:$0xff] }
 0x569   :  { %v8311_v62 = vpop.eup %8310  ;;  %v6936_v55 = vpop.f32.mrf.mxu1  ;;  %v6695_v53 = vadd.f32 %v6694_v36, %v12111_v48 }
 0x56a   :  { %v7451_v28 = vmul.f32 %v8311_v62, %v13612_v4  ;;  %8324 = vtanh.f32 %v6932_v58  ;;  %v6937_v37 = vadd.f32 %v6936_v55, %v6693_v32  ;;  %v7755_v39 = vadd.f32 %v7754_v61, %v7444_v24  ;;  %v6699_v47 = vpop.f32.mrf.mxu0 }
 0x56b   :  { %v6938_v19 = vpop.f32.mrf.mxu1  ;;  %v8313_v41 = vpop.eup %8312  ;;  %v6700_v49 = vadd.f32 %v6699_v47, %v12114_v5  ;;  %v13617_v47 = vld [vmem:[#allocation56_spill] sm:$0xff] }
 0x56c   :  { %v7726_v13 = vadd.f32 %v7725_v22, %v7451_v28  ;;  %8326 = vtanh.f32 %v6937_v37  ;;  %v6939_v45 = vadd.f32 %v6938_v19, %v6695_v53  ;;  %v7452_v44 = vmul.f32 %v8313_v41, %v13612_v4  ;;  %v6701_v46 = vpop.f32.mrf.mxu0  ;;  %v13616_v28 = vld [vmem:[#allocation130_spill] sm:$0xff] }
 0x56d   :  { %v8315_v38 = vpop.eup %8314  ;;  %v6943_v31 = vpop.f32.mrf.mxu1  ;;  %v6702_v48 = vadd.f32 %v6701_v46, %v12117_v16 }
 0x56e   :  { %v7459_v40 = vmul.f32 %v8315_v38, %v13613_v1  ;;  %8328 = vtanh.f32 %v6939_v45  ;;  %v6944_v43 = vadd.f32 %v6943_v31, %v6700_v49  ;;  %v7756_v10 = vadd.f32 %v7755_v39, %v7452_v44  ;;  %v6706_v59 = vpop.f32.mrf.mxu0  ;;  %v13618_v45 = vld [vmem:[#allocation167_spill] sm:$0xff] }
 0x56f   :  { %v6945_v33 = vpop.f32.mrf.mxu1  ;;  %v8317_v57 = vpop.eup %8316  ;;  %v6707_v5 = vadd.f32 %v6706_v59, %v12120_v34  ;;  %v13620_v59 = vld [vmem:[#allocation168_spill] sm:$0xff] }
 0x570   :  { %v7727_v52 = vadd.f32 %v7726_v13, %v7459_v40  ;;  %8330 = vtanh.f32 %v6944_v43  ;;  %v6946_v15 = vadd.f32 %v6945_v33, %v6702_v48  ;;  %v7460_v25 = vmul.f32 %v8317_v57, %v13613_v1  ;;  %v6708_v60 = vpop.f32.mrf.mxu0  ;;  %v13619_v40 = vld [vmem:[#allocation131_spill] sm:$0xff] }
 0x571   :  { %v8319_v9 = vpop.eup %8318  ;;  %v6950_v18 = vpop.f32.mrf.mxu1  ;;  %v6709_v16 = vadd.f32 %v6708_v60, %v12123_v29 }
 0x572   :  { %v7467_v2 = vmul.f32 %v8319_v9, %v13614_v54  ;;  %8332 = vtanh.f32 %v6946_v15  ;;  %v6951_v12 = vadd.f32 %v6950_v18, %v6707_v5  ;;  %v7757_v8 = vadd.f32 %v7756_v10, %v7460_v25  ;;  %v6713_v30 = vpop.f32.mrf.mxu0 }
 0x573   :  { %v6952_v7 = vpop.f32.mrf.mxu1  ;;  %v8321_v63 = vpop.eup %8320  ;;  %v6714_v34 = vadd.f32 %v6713_v30, %v12126_v0 }
 0x574   :  { %v7728_v50 = vadd.f32 %v7727_v52, %v7467_v2  ;;  %8334 = vtanh.f32 %v6951_v12  ;;  %v6953_v42 = vadd.f32 %v6952_v7, %v6709_v16  ;;  %v7468_v6 = vmul.f32 %v8321_v63, %v13614_v54  ;;  %v6715_v61 = vpop.f32.mrf.mxu0  ;;  %v13621_v16 = vld [vmem:[#allocation133_spill] sm:$0xff] }
 0x575   :  { %v8323_v51 = vpop.eup %8322  ;;  %v6957_v20 = vpop.f32.mrf.mxu1  ;;  %v6716_v11 = vadd.f32 %v6715_v61, %v12129_v35 }
 0x576   :  { %v7475_v3 = vmul.f32 %v8323_v51, %v13615_v17  ;;  %8336 = vtanh.f32 %v6953_v42  ;;  %v6958_v29 = vadd.f32 %v6957_v20, %v6714_v34  ;;  %v7758_v56 = vadd.f32 %v7757_v8, %v7468_v6  ;;  %v6720_v23 = vpop.f32.mrf.mxu0  ;;  %v13622_v6 = vld [vmem:[#allocation134_spill] sm:$0xff] }
 0x577   :  { %v8325_v26 = vpop.eup %8324  ;;  %v6959_v22 = vpop.f32.mrf.mxu1  ;;  %v6721_v58 = vadd.f32 %v6720_v23, %v12132_v14 }
 0x578   :  { %v7729_v32 = vadd.f32 %v7728_v50, %v7475_v3  ;;  %v7476_v0 = vmul.f32 %v8325_v26, %v13615_v17  ;;  %8338 = vtanh.f32 %v6958_v29  ;;  %v6722_v24 = vpop.f32.mrf.mxu0  ;;  %v6960_v36 = vadd.f32 %v6959_v22, %v6716_v11 }
 0x579   :  { %v8327_v62 = vpop.eup %8326  ;;  %v6964_v55 = vpop.f32.mrf.mxu1  ;;  %v6723_v19 = vadd.f32 %v6722_v24, %v13617_v47 }
 0x57a   :  { %v7759_v4 = vadd.f32 %v7758_v56, %v7476_v0  ;;  %v7483_v53 = vmul.f32 %v8327_v62, %v13616_v28  ;;  %v6965_v37 = vadd.f32 %v6964_v55, %v6721_v58  ;;  %8340 = vtanh.f32 %v6960_v36  ;;  %v6727_v35 = vpop.f32.mrf.mxu0  ;;  %v13624_v0 = vld [vmem:[#allocation153_spill] sm:$0xff] }
 0x57b   :  { %v8329_v39 = vpop.eup %8328  ;;  %v6966_v41 = vpop.f32.mrf.mxu1  ;;  %v6728_v14 = vadd.f32 %v6727_v35, %v13618_v45 }
 0x57c   :  { %v7730_v13 = vadd.f32 %v7729_v32, %v7483_v53  ;;  %v7484_v49 = vmul.f32 %v8329_v39, %v13616_v28  ;;  %8342 = vtanh.f32 %v6965_v37  ;;  %v6729_v44 = vpop.f32.mrf.mxu0  ;;  %v6967_v46 = vadd.f32 %v6966_v41, %v6723_v19  ;;  %v13625_v28 = vld [vmem:[#allocation154_spill] sm:$0xff] }
 0x57d   :  { %v8331_v38 = vpop.eup %8330  ;;  %v6971_v31 = vpop.f32.mrf.mxu1  ;;  %v6730_v33 = vadd.f32 %v6729_v44, %v13620_v59 }
 0x57e   :  { %v7760_v1 = vadd.f32 %v7759_v4, %v7484_v49  ;;  %v7491_v48 = vmul.f32 %v8331_v38, %v13619_v40  ;;  %v6972_v43 = vadd.f32 %v6971_v31, %v6728_v14  ;;  %8344 = vtanh.f32 %v6967_v46  ;;  %v6734_v57 = vpop.f32.mrf.mxu0 }
 0x57f   :  { %v8333_v10 = vpop.eup %8332  ;;  %v6973_v52 = vpop.f32.mrf.mxu1  ;;  %v6735_v9 = vadd.f32 %v6734_v57, %v12144_v21 }
 0x580   :  { %v7731_v5 = vadd.f32 %v7730_v13, %v7491_v48  ;;  %v7492_v15 = vmul.f32 %v8333_v10, %v13619_v40  ;;  %8346 = vtanh.f32 %v6972_v43  ;;  %v6736_v60 = vpop.f32.mrf.mxu0  ;;  %v6974_v18 = vadd.f32 %v6973_v52, %v6730_v33  ;;  %v13626_v48 = vld [vmem:[#allocation156_spill] sm:$0xff] }
 0x581   :  { %v8335_v25 = vpop.eup %8334  ;;  %v6978_v54 = vpop.f32.mrf.mxu1  ;;  %v6737_v8 = vadd.f32 %v6736_v60, %v12147_v27  ;;  %v13623_v27 = vld [vmem:[#allocation135_spill] sm:$0xff] }
 0x582   :  { %v7761_v2 = vadd.f32 %v7760_v1, %v7492_v15  ;;  %v7499_v12 = vmul.f32 %v8335_v25, %v13621_v16  ;;  %v6979_v30 = vadd.f32 %v6978_v54, %v6735_v9  ;;  %8348 = vtanh.f32 %v6974_v18 }
 0x583   :  { %v8337_v7 = vpop.eup %8336  ;;  %v6980_v63 = vpop.f32.mrf.mxu1 }
 0x584   :  { %v7732_v50 = vadd.f32 %v7731_v5, %v7499_v12  ;;  %v7500_v34 = vmul.f32 %v8337_v7, %v13621_v16  ;;  %8350 = vtanh.f32 %v6979_v30  ;;  %v6981_v42 = vadd.f32 %v6980_v63, %v6737_v8  ;;  %v13627_v7 = vld [vmem:[#allocation170_spill] sm:$0xff]  ;;  %v13628_v63 = vld [vmem:[#allocation45_spill] sm:$0xff] }
 0x585   :  { %v8339_v21 = vpop.eup %8338 }
 0x586   :  { %v7762_v51 = vadd.f32 %v7761_v2, %v7500_v34  ;;  %v7507_v61 = vmul.f32 %v8339_v21, %v13622_v6  ;;  %8352 = vtanh.f32 %v6981_v42 }
 0x587   :  { %v8341_v20 = vpop.eup %8340 }
 0x588   :  { %v7733_v17 = vadd.f32 %v7732_v50, %v7507_v61  ;;  %v7508_v29 = vmul.f32 %v8341_v20, %v13622_v6  ;;  %v13629_v50 = vld [vmem:[#allocation49_spill] sm:$0xff]  ;;  %v13631_v6 = vld [vmem:[#allocation171_spill] sm:$0xff]  ;;  %v13632_v61 = vld [vmem:[#allocation172_spill] sm:$0xff] }
 0x589   :  { %v8343_v3 = vpop.eup %8342  ;;  %v13630_v34 = vcombine.low %v13628_v63, %v13629_v50  ;;  %v13633_v20 = vcombine.low %v13631_v6, %v13632_v61 }
 0x58a   :  { %v7515_v26 = vmul.f32 %v8343_v3, %v13623_v27  ;;  %v7763_v56 = vadd.f32 %v7762_v51, %v7508_v29 }
 0x58b   :  { %v8345_v11 = vpop.eup %8344  ;;  %v7895_v42 = vrot.slane %v13630_v34, %v13627_v7 }
 0x58c   :  { %v7734_v23 = vadd.f32 %v7733_v17, %v7515_v26  ;;  %v7516_v32 = vmul.f32 %v8345_v11, %v13623_v27  ;;  %v7911_v17 = vrot.slane %v13633_v20, %v13627_v7 }
 0x58d   :  { %v8347_v22 = vpop.eup %8346 }
 0x58e   :  { %v7523_v58 = vmul.f32 %v8347_v22, %v13624_v0  ;;  %v7764_v62 = vadd.f32 %v7763_v56, %v7516_v32 }
 0x58f   :  { %v8349_v24 = vpop.eup %8348 }
 0x590   :  { %v7735_v36 = vadd.f32 %v7734_v23, %v7523_v58  ;;  %v7524_v4 = vmul.f32 %v8349_v24, %v13624_v0 }
 0x591   :  { %v8351_v55 = vpop.eup %8350 }
 0x592   :  { %v7531_v53 = vmul.f32 %v8351_v55, %v13625_v28  ;;  %v7765_v39 = vadd.f32 %v7764_v62, %v7524_v4 }
 0x593   :  { %v8353_v37 = vpop.eup %8352 }
 0x594   :  { %v7736_v47 = vadd.f32 %v7735_v36, %v7531_v53  ;;  %v7532_v19 = vmul.f32 %v8353_v37, %v13625_v28 }
 0x596   :  { %v7737_v35 = vrot.slane %v7736_v47, 4  ;;  %v7766_v41 = vadd.f32 %v7765_v39, %v7532_v19 }
 0x598   :  { %v7738_v13 = vadd.f32 %v7737_v35, %v7736_v47  ;;  %v7767_v49 = vrot.slane %v7766_v41, 4 }
 0x59a   :  { %v7739_v45 = vrot.slane %v7738_v13, 2  ;;  %v7768_v14 = vadd.f32 %v7767_v49, %v7766_v41 }
 0x59c   :  { %v7740_v38 = vadd.f32 %v7739_v45, %v7738_v13  ;;  %v7769_v44 = vrot.slane %v7768_v14, 2 }
 0x59e   :  { %v7741_v46 = vrot.slane %v7740_v38, 1  ;;  %v7770_v31 = vadd.f32 %v7769_v44, %v7768_v14 }
 0x5a0   :  { %v7742_v1 = vadd.f32 %v7741_v46, %v7740_v38  ;;  %v7771_v40 = vrot.slane %v7770_v31, 1 }
 0x5a2   :  { %v7789_v43 = vadd.f32 %v13626_v48, %v7742_v1  ;;  %v7772_v10 = vadd.f32 %v7771_v40, %v7770_v31 }
 0x5a4   :  { %v7797_v59 = vmul.f32 %v7789_v43, %v7789_v43  ;;  %v7790_v33 = vadd.f32 %v13626_v48, %v7772_v10 }
 0x5a6   :  { %v7805_v57 = vadd.f32 0.1, %v7797_v59  ;;  %v7798_v52 = vmul.f32 %v7790_v33, %v7790_v33 }
 0x5a8   :  { %v7806_v5 = vadd.f32 0.1, %v7798_v52  ;;  %8354 = vrsqrt.f32 %v7805_v57  ;;  %vm7851_vm14 = vcmp.eq.f32.partialorder %v7805_v57, inf  ;;  %v7854_v54 = vand.u32 2147483648, %v7805_v57 }
 0x5a9   :  { %vm7853_vm0 = vcmp.eq.f32.partialorder %v7805_v57, 0.0 }
 0x5aa   :  { %8356 = vrsqrt.f32 %v7806_v5  ;;  %vm7858_vm15 = vcmp.eq.f32.partialorder %v7806_v5, inf  ;;  %v7861_v2 = vand.u32 2147483648, %v7806_v5  ;;  %vm7860_vm1 = vcmp.eq.f32.partialorder %v7806_v5, 0.0 }
 0x5b5   :  { %v8355_v15 = vpop.eup %8354 }
 0x5b6   :  { %v7850_v9 = vmul.f32 %v8355_v15, %v7805_v57 }
 0x5b7   :  { %v8357_v25 = vpop.eup %8356 }
 0x5b8   :  { %v7852_v60 = vsel %vm7851_vm14, %v7805_v57, %v7850_v9  ;;  %v7857_v18 = vmul.f32 %v8357_v25, %v7806_v5 }
 0x5b9   :  { %v7855_v12 = vsel %vm7853_vm0, %v7854_v54, %v7852_v60 }
 0x5ba   :  { %v7859_v16 = vsel %vm7858_vm15, %v7806_v5, %v7857_v18 }
 0x5bb   :  { %v7862_v8 = vsel %vm7860_vm1, %v7861_v2, %v7859_v16 }
 0x5bc   :  { %v7874_v30 = vcombine.low %v7855_v12, %v7862_v8 }
 0x5be   :  { %v7902_v21 = vrot.slane %v7874_v30, %v13627_v7 }
 0x5c0   :  { %v7904_v51 = vcombine.low %v7895_v42, %v7902_v21 }
 0x5c2   :  { %v7918_v3 = vrot.slane %v7904_v51, %v13627_v7 }
 0x5c4   :  { %v7919_v29 = vcombine.low %v7911_v17, %v7918_v3 }
 0x5c6   :  { %7921 = vst [vmem:[#allocation3] sm:$0xff] %v7919_v29 }
 0x5c7   :  { %8369 = shalt.err (!%p8366_p4)
}
 0x5c8   :  { %7931 = dma.vmem_to_hbm [thread:$0]  %s7929_s13, 128, %s12268_s5, [#allocation4]  }
 0x5c9   :  { %8378 = dma.done.wait [#allocation4], 128  }
 0x5ca   :  { %8379 = vsyncadd [#allocation4], 4294967168 }
 0x5cb   :  { %7935 = vsyncpa [#allocation4], 1 }

</bundles_post_ra>
